<compile_context>
chip_gen: v7x
topology: tpu7x:2x2x1
jax: 0.10.0
libtpu: 0.0.40
codegen_flags: <defaults>
</compile_context>

<pallas_src>
import numpy as np
import jax
import jax.numpy as jnp
from jax.experimental import pallas as pl
from jax.experimental.pallas import tpu as pltpu

# ----------------------------- model dimensions ----------------------------
H_IN, W_IN, C_IN, C_PAD = 32, 32, 3, 4      # input 32x32x3, channels padded to 4
C1, C2 = 32, 32
OH1, OW1 = 30, 30                            # conv1: 3x3 stride 1 valid
OH2, OW2 = 14, 14                            # conv2: 3x3 stride 2 valid
N_LIN, N_OUT, N_PAD = 125, 2, 128

ROW_KP  = W_IN * C_PAD                       # 128  lanes of an input row  (w, c)
ROW_N1P = 1024                               # conv1 row: 30*32=960 -> 1024 (lane pad)
ROW_N2P = 512                                # conv2 row: 14*32=448 -> 512  (lane pad)
K1 = 3 * ROW_KP                              # 384   fused conv1 K
K2 = 3 * ROW_N1P                             # 3072  fused conv2 K
K3 = OH2 * ROW_N2P                           # 7168  flattened linear K

# Parity reorder of the 32 input rows: even rows 0,2,...,30 then odd 1,3,...,31.
ROW_PERM = list(range(0, H_IN, 2)) + list(range(1, H_IN, 2))


# ------------------------------- the kernel --------------------------------
def _mynet_kernel(x_ref, w1_ref, b1_ref, w2_ref, b2_ref,
                  w3_ref, b3_ref, w4_ref, b4_ref, o_ref):
    f32, bf16 = jnp.float32, jnp.bfloat16
    bt = x_ref.shape[0]                       # images per grid step (static)

    w1 = w1_ref[...]                          # [384, 1024]  bf16
    w2 = w2_ref[...]                          # [3072, 512]  bf16
    b1 = b1_ref[...]                          # [1, 1024]    f32
    b2 = b2_ref[...]                          # [1, 512]     f32

    # Convs per image (Bt is small; intermediates per image bound live ranges).
    # TODO(synk): for Bt > ~4 stage h1/h2 in explicit VMEM scratch + fori_loop.
    h2_flat = []
    for b in range(bt):
        xe = x_ref[b, 0:16, :]                # input rows 0,2,...,30   [16, 128] bf16
        xo = x_ref[b, 16:32, :]               # input rows 1,3,...,31   [16, 128] bf16

        # ---- conv1 (3x3, stride 1): one fused-K matmul per output-row parity
        # even output row 2q needs input rows (2q, 2q+1, 2q+2) = (xe[q], xo[q], xe[q+1])
        lhs_e = jnp.concatenate([xe[0:15], xo[0:15], xe[1:16]], axis=-1)   # [15, 384]
        # odd  output row 2q+1 needs rows (2q+1, 2q+2, 2q+3) = (xo[q], xe[q+1], xo[q+1])
        lhs_o = jnp.concatenate([xo[0:14], xe[1:15], xo[1:15]], axis=-1)   # [14, 384]
        h1e = jnp.maximum(jnp.dot(lhs_e, w1, preferred_element_type=f32) + b1,
                          0.0).astype(bf16)   # conv1 rows 0,2,...,28   [15, 1024]
        h1o = jnp.maximum(jnp.dot(lhs_o, w1, preferred_element_type=f32) + b1,
                          0.0).astype(bf16)   # conv1 rows 1,3,...,27   [14, 1024]

        # ---- conv2 (3x3, stride 2): stride-2 row gather is free (parity split),
        #      dh accumulation fused along K -> one [14, 3072] x [3072, 512] matmul
        lhs2 = jnp.concatenate([h1e[0:14], h1o[0:14], h1e[1:15]], axis=-1)  # [14, 3072]
        h2 = jnp.maximum(jnp.dot(lhs2, w2, preferred_element_type=f32) + b2,
                         0.0).astype(bf16)    # [14, 512]

        # NCHW flatten order is folded into W3's rows; flatten = aligned lane concat.
        h2_flat.append(jnp.concatenate([h2[r:r + 1, :] for r in range(OH2)],
                                       axis=-1))                           # [1, 7168]

    h2_all = jnp.concatenate(h2_flat, axis=0) if bt > 1 else h2_flat[0]     # [Bt, 7168]

    # ---- batched dense layers: [Bt,7168]x[7168,128] and [Bt,128]x[128,128] ----
    h3 = jnp.maximum(jnp.dot(h2_all, w3_ref[...], preferred_element_type=f32)
                     + b3_ref[...], 0.0).astype(bf16)                       # [Bt, 128]
    y = jnp.dot(h3, w4_ref[...], preferred_element_type=f32) + b4_ref[...]  # [Bt, 128]
    o_ref[...] = y.reshape(o_ref.shape).astype(o_ref.dtype)


# ------------------------- parameter init / packing ------------------------
def init_params(key):
    ks = jax.random.split(key, 8)
    s = 0.05
    return {
        "conv1_w": s * jax.random.normal(ks[0], (C1, C_IN, 3, 3), jnp.float32),
        "conv1_b": s * jax.random.normal(ks[1], (C1,), jnp.float32),
        "conv2_w": s * jax.random.normal(ks[2], (C2, C1, 3, 3), jnp.float32),
        "conv2_b": s * jax.random.normal(ks[3], (C2,), jnp.float32),
        "lin_w":   s * jax.random.normal(ks[4], (N_LIN, C2 * OH2 * OW2), jnp.float32),
        "lin_b":   s * jax.random.normal(ks[5], (N_LIN,), jnp.float32),
        "out_w":   s * jax.random.normal(ks[6], (N_OUT, N_LIN), jnp.float32),
        "out_b":   s * jax.random.normal(ks[7], (N_OUT,), jnp.float32),
    }


def pack_params(params):
    """One-time repack: fused-K Toeplitz conv matrices + permuted/padded dense (bf16)."""
    w1 = np.asarray(params["conv1_w"], np.float32)    # [co, ci, kh, kw]
    w2 = np.asarray(params["conv2_w"], np.float32)
    w_lin = np.asarray(params["lin_w"], np.float32)   # [125, 6272]
    w_out = np.asarray(params["out_w"], np.float32)   # [2, 125]

    # conv1: W1[dh*128 + w*4 + ci, ow*32 + co] = w1[co, ci, dh, w-ow]
    W1 = np.zeros((K1, ROW_N1P), np.float32)
    for dh in range(3):
        for dw in range(3):
            blk = w1[:, :, dh, dw].T                  # [ci=3, co=32]
            for ow in range(OW1):
                r0 = dh * ROW_KP + (ow + dw) * C_PAD
                W1[r0:r0 + C_IN, ow * C1:(ow + 1) * C1] = blk

    # conv2: W2[dh*1024 + ow1*32 + ci, ow2*32 + co] = w2[co, ci, dh, ow1-2*ow2]
    W2 = np.zeros((K2, ROW_N2P), np.float32)
    for dh in range(3):
        for dw in range(3):
            blk = w2[:, :, dh, dw].T                  # [ci=32, co=32]
            for ow in range(OW2):
                r0 = dh * ROW_N1P + (2 * ow + dw) * C1
                W2[r0:r0 + C1, ow * C2:(ow + 1) * C2] = blk

    # linear: fold the PyTorch NCHW flatten (idx = c*196 + h*14 + w) into row order.
    # Kernel activation layout: flat index = h*512 + w*32 + c.
    W3 = np.zeros((K3, N_PAD), np.float32)
    lw = w_lin.reshape(N_LIN, C2, OH2, OW2)           # [n, c, h, w]
    t = np.transpose(lw, (2, 3, 1, 0))                # [h, w, c, n]
    for h in range(OH2):
        W3[h * ROW_N2P: h * ROW_N2P + OW2 * C2, :N_LIN] = t[h].reshape(OW2 * C2, N_LIN)

    W4 = np.zeros((N_PAD, N_PAD), np.float32)
    W4[:N_LIN, :N_OUT] = w_out.T

    b1 = np.zeros((1, ROW_N1P), np.float32)
    b1[0, :OW1 * C1] = np.tile(np.asarray(params["conv1_b"], np.float32), OW1)
    b2 = np.zeros((1, ROW_N2P), np.float32)
    b2[0, :OW2 * C2] = np.tile(np.asarray(params["conv2_b"], np.float32), OW2)
    b3 = np.zeros((1, N_PAD), np.float32); b3[0, :N_LIN] = np.asarray(params["lin_b"])
    b4 = np.zeros((1, N_PAD), np.float32); b4[0, :N_OUT] = np.asarray(params["out_b"])

    bf = jnp.bfloat16
    return {
        "w1": jnp.asarray(W1, bf), "b1": jnp.asarray(b1),
        "w2": jnp.asarray(W2, bf), "b2": jnp.asarray(b2),
        "w3": jnp.asarray(W3, bf), "b3": jnp.asarray(b3),
        "w4": jnp.asarray(W4, bf), "b4": jnp.asarray(b4),
    }


def _pick_block_batch(B):
    """Largest Bt in {8,4,2,1} dividing B while keeping >= 2 grid steps (v7x 2-TC)."""
    for bt in (8, 4, 2, 1):
        if B % bt == 0 and B // bt >= 2:
            return bt
    return 1


def _resident_spec(a):
    """Weights: constant index_map (never re-fetched), single-buffered in VMEM."""
    nd = a.ndim
    return pl.BlockSpec(a.shape, lambda i, _n=nd: (0,) * _n,
                        pipeline_mode=pl.Buffered(1))


# ------------------------------ fused forward ------------------------------
@jax.jit
def mynet_forward(packed, x_nchw):
    B = x_nchw.shape[0]
    bt = _pick_block_batch(B)

    # NCHW -> NHWC -> pad C 3->4 -> rows [B, 32, 128] -> parity-ordered rows, bf16.
    x = jnp.transpose(x_nchw, (0, 2, 3, 1))
    x = jnp.pad(x, ((0, 0), (0, 0), (0, 0), (0, C_PAD - C_IN)))
    x = x.reshape(B, H_IN, ROW_KP)[:, ROW_PERM, :].astype(jnp.bfloat16)

    flops = 2 * B * ((OH2 + 1 + OH2) * K1 * ROW_N1P     # conv1 (15 + 14 rows)
                     + OH2 * K2 * ROW_N2P                # conv2
                     + K3 * N_PAD + N_PAD * N_PAD)       # linear + out
    bytes_accessed = int(B * (H_IN * ROW_KP * 2 + N_PAD * 4)
                         + sum(int(np.prod(v.shape)) * v.dtype.itemsize
                               for v in packed.values()))

    out = pl.pallas_call(
        _mynet_kernel,
        out_shape=jax.ShapeDtypeStruct((B, 1, N_PAD), jnp.float32),
        grid=(B // bt,),
        in_specs=[
            pl.BlockSpec((bt, H_IN, ROW_KP), lambda i: (i, 0, 0)),
            _resident_spec(packed["w1"]), _resident_spec(packed["b1"]),
            _resident_spec(packed["w2"]), _resident_spec(packed["b2"]),
            _resident_spec(packed["w3"]), _resident_spec(packed["b3"]),
            _resident_spec(packed["w4"]), _resident_spec(packed["b4"]),
        ],
        out_specs=pl.BlockSpec((bt, 1, N_PAD), lambda i: (i, 0, 0)),
        compiler_params=pltpu.CompilerParams(
            dimension_semantics=("parallel",),
            vmem_limit_bytes=32 * 1024 * 1024),
        cost_estimate=pl.CostEstimate(flops=flops, transcendentals=0,
                                      bytes_accessed=bytes_accessed),
    )(x, packed["w1"], packed["b1"], packed["w2"], packed["b2"],
      packed["w3"], packed["b3"], packed["w4"], packed["b4"])
    return out[:, 0, :N_OUT]


# ------------------------ pure-JAX reference (f32) --------------------------
@jax.jit
def reference_forward(params, x_nchw):
    hp = jax.lax.Precision.HIGHEST
    x = x_nchw.astype(jnp.float32)
    h = jax.lax.conv_general_dilated(
        x, params["conv1_w"], (1, 1), "VALID",
        dimension_numbers=("NCHW", "OIHW", "NCHW"), precision=hp)
    h = jax.nn.relu(h + params["conv1_b"][None, :, None, None])
    h = jax.lax.conv_general_dilated(
        h, params["conv2_w"], (2, 2), "VALID",
        dimension_numbers=("NCHW", "OIHW", "NCHW"), precision=hp)
    h = jax.nn.relu(h + params["conv2_b"][None, :, None, None])
    h = h.reshape(h.shape[0], -1)
    h = jax.nn.relu(jnp.dot(h, params["lin_w"].T, precision=hp) + params["lin_b"])
    return jnp.dot(h, params["out_w"].T, precision=hp) + params["out_b"]


if __name__ == "__main__":
    key = jax.random.PRNGKey(0)
    pkey, xkey = jax.random.split(key)
    params = init_params(pkey)
    packed = pack_params(params)                      # one-time weight repack

    x = jax.random.normal(xkey, (2, C_IN, H_IN, W_IN), jnp.float32)  # NCHW, batch=2

    y = mynet_forward(packed, x)
    jax.block_until_ready(y)
    assert y.shape == (2, N_OUT), y.shape

    y_ref = reference_forward(params, x)
    np.testing.assert_allclose(np.asarray(y), np.asarray(y_ref),
                               atol=5e-2, rtol=5e-2)
    print("KERNEL_OK")
</pallas_src>

<mosaic_0001>
module attributes {stable_mosaic.version = 11 : i64} {
  func.func @_mynet_kernel(%arg0: i32, %arg1: memref<1x32x128xbf16, #tpu.memory_space<vmem>>, %arg2: memref<384x1024xbf16, #tpu.memory_space<vmem>>, %arg3: memref<1x1024xf32, #tpu.memory_space<vmem>>, %arg4: memref<3072x512xbf16, #tpu.memory_space<vmem>>, %arg5: memref<1x512xf32, #tpu.memory_space<vmem>>, %arg6: memref<7168x128xbf16, #tpu.memory_space<vmem>>, %arg7: memref<1x128xf32, #tpu.memory_space<vmem>>, %arg8: memref<128x128xbf16, #tpu.memory_space<vmem>>, %arg9: memref<1x128xf32, #tpu.memory_space<vmem>>, %arg10: memref<1x1x128xf32, #tpu.memory_space<vmem>>) attributes {dimension_semantics = [#tpu.dimension_semantics<parallel>], iteration_bounds = array<i64: 2>, scalar_prefetch = 0 : i64, scratch_operands = 0 : i64, tpu.core_type = #tpu.core_type<tc>, window_params = [{transform_indices = @transform_0, window_bounds = array<i64: 1, 32, 128>}, {pipeline_mode = #tpu.pipeline_mode<synchronous>, transform_indices = @transform_1, window_bounds = array<i64: 384, 1024>}, {pipeline_mode = #tpu.pipeline_mode<synchronous>, transform_indices = @transform_2, window_bounds = array<i64: 1, 1024>}, {pipeline_mode = #tpu.pipeline_mode<synchronous>, transform_indices = @transform_3, window_bounds = array<i64: 3072, 512>}, {pipeline_mode = #tpu.pipeline_mode<synchronous>, transform_indices = @transform_4, window_bounds = array<i64: 1, 512>}, {pipeline_mode = #tpu.pipeline_mode<synchronous>, transform_indices = @transform_5, window_bounds = array<i64: 7168, 128>}, {pipeline_mode = #tpu.pipeline_mode<synchronous>, transform_indices = @transform_6, window_bounds = array<i64: 1, 128>}, {pipeline_mode = #tpu.pipeline_mode<synchronous>, transform_indices = @transform_7, window_bounds = array<i64: 128, 128>}, {pipeline_mode = #tpu.pipeline_mode<synchronous>, transform_indices = @transform_8, window_bounds = array<i64: 1, 128>}, {transform_indices = @transform_9, window_bounds = array<i64: 1, 1, 128>}]} {
    %c0 = arith.constant 0 : index
    %c0_0 = arith.constant 0 : index
    %0 = vector.load %arg2[%c0, %c0_0] : memref<384x1024xbf16, #tpu.memory_space<vmem>>, vector<384x1024xbf16>
    %c0_1 = arith.constant 0 : index
    %c0_2 = arith.constant 0 : index
    %1 = vector.load %arg4[%c0_1, %c0_2] : memref<3072x512xbf16, #tpu.memory_space<vmem>>, vector<3072x512xbf16>
    %c0_3 = arith.constant 0 : index
    %c0_4 = arith.constant 0 : index
    %2 = vector.load %arg3[%c0_3, %c0_4] : memref<1x1024xf32, #tpu.memory_space<vmem>>, vector<1x1024xf32>
    %c0_5 = arith.constant 0 : index
    %c0_6 = arith.constant 0 : index
    %3 = vector.load %arg5[%c0_5, %c0_6] : memref<1x512xf32, #tpu.memory_space<vmem>>, vector<1x512xf32>
    %c0_7 = arith.constant 0 : index
    %c0_8 = arith.constant 0 : index
    %c0_9 = arith.constant 0 : index
    %4 = vector.load %arg1[%c0_7, %c0_8, %c0_9] : memref<1x32x128xbf16, #tpu.memory_space<vmem>>, vector<1x16x128xbf16>
    %5 = vector.shape_cast %4 : vector<1x16x128xbf16> to vector<16x128xbf16>
    %c0_10 = arith.constant 0 : index
    %c16 = arith.constant 16 : index
    %c0_11 = arith.constant 0 : index
    %6 = vector.load %arg1[%c0_10, %c16, %c0_11] : memref<1x32x128xbf16, #tpu.memory_space<vmem>>, vector<1x16x128xbf16>
    %7 = vector.shape_cast %6 : vector<1x16x128xbf16> to vector<16x128xbf16>
    %8 = vector.extract_strided_slice %5 {offsets = [0, 0], sizes = [15, 128], strides = [1, 1]} : vector<16x128xbf16> to vector<15x128xbf16>
    %9 = vector.extract_strided_slice %7 {offsets = [0, 0], sizes = [15, 128], strides = [1, 1]} : vector<16x128xbf16> to vector<15x128xbf16>
    %10 = vector.extract_strided_slice %5 {offsets = [1, 0], sizes = [15, 128], strides = [1, 1]} : vector<16x128xbf16> to vector<15x128xbf16>
    %11 = tpu.concatenate %8, %9, %10 in 1 : vector<15x128xbf16>, vector<15x128xbf16>, vector<15x128xbf16> -> vector<15x384xbf16>
    %12 = vector.extract_strided_slice %7 {offsets = [0, 0], sizes = [14, 128], strides = [1, 1]} : vector<16x128xbf16> to vector<14x128xbf16>
    %13 = vector.extract_strided_slice %5 {offsets = [1, 0], sizes = [14, 128], strides = [1, 1]} : vector<16x128xbf16> to vector<14x128xbf16>
    %14 = vector.extract_strided_slice %7 {offsets = [1, 0], sizes = [14, 128], strides = [1, 1]} : vector<16x128xbf16> to vector<14x128xbf16>
    %15 = tpu.concatenate %12, %13, %14 in 1 : vector<14x128xbf16>, vector<14x128xbf16>, vector<14x128xbf16> -> vector<14x384xbf16>
    %cst = arith.constant dense<0.000000e+00> : vector<15x1024xf32>
    %16 = tpu.matmul %11, %0, %cst {dimension_numbers = #tpu.dot_dimension_numbers<[1], [0], [0], [1], [0, 0, 1, 1], [], []>} : vector<15x384xbf16>, vector<384x1024xbf16>, vector<15x1024xf32> -> vector<15x1024xf32>
    %17 = vector.broadcast %2 : vector<1x1024xf32> to vector<15x1024xf32>
    %18 = arith.addf %16, %17 : vector<15x1024xf32>
    %cst_12 = arith.constant 0.000000e+00 : f32
    %19 = vector.broadcast %cst_12 : f32 to vector<15x1024xf32>
    %20 = arith.maximumf %18, %19 : vector<15x1024xf32>
    %21 = arith.truncf %20 : vector<15x1024xf32> to vector<15x1024xbf16>
    %cst_13 = arith.constant dense<0.000000e+00> : vector<14x1024xf32>
    %22 = tpu.matmul %15, %0, %cst_13 {dimension_numbers = #tpu.dot_dimension_numbers<[1], [0], [0], [1], [0, 0, 1, 1], [], []>} : vector<14x384xbf16>, vector<384x1024xbf16>, vector<14x1024xf32> -> vector<14x1024xf32>
    %23 = vector.broadcast %2 : vector<1x1024xf32> to vector<14x1024xf32>
    %24 = arith.addf %22, %23 : vector<14x1024xf32>
    %cst_14 = arith.constant 0.000000e+00 : f32
    %25 = vector.broadcast %cst_14 : f32 to vector<14x1024xf32>
    %26 = arith.maximumf %24, %25 : vector<14x1024xf32>
    %27 = arith.truncf %26 : vector<14x1024xf32> to vector<14x1024xbf16>
    %28 = vector.extract_strided_slice %21 {offsets = [0, 0], sizes = [14, 1024], strides = [1, 1]} : vector<15x1024xbf16> to vector<14x1024xbf16>
    %29 = vector.extract_strided_slice %21 {offsets = [1, 0], sizes = [14, 1024], strides = [1, 1]} : vector<15x1024xbf16> to vector<14x1024xbf16>
    %30 = tpu.concatenate %28, %27, %29 in 1 : vector<14x1024xbf16>, vector<14x1024xbf16>, vector<14x1024xbf16> -> vector<14x3072xbf16>
    %cst_15 = arith.constant dense<0.000000e+00> : vector<14x512xf32>
    %31 = tpu.matmul %30, %1, %cst_15 {dimension_numbers = #tpu.dot_dimension_numbers<[1], [0], [0], [1], [0, 0, 1, 1], [], []>} : vector<14x3072xbf16>, vector<3072x512xbf16>, vector<14x512xf32> -> vector<14x512xf32>
    %32 = vector.broadcast %3 : vector<1x512xf32> to vector<14x512xf32>
    %33 = arith.addf %31, %32 : vector<14x512xf32>
    %cst_16 = arith.constant 0.000000e+00 : f32
    %34 = vector.broadcast %cst_16 : f32 to vector<14x512xf32>
    %35 = arith.maximumf %33, %34 : vector<14x512xf32>
    %36 = arith.truncf %35 : vector<14x512xf32> to vector<14x512xbf16>
    %37 = vector.extract_strided_slice %36 {offsets = [0, 0], sizes = [1, 512], strides = [1, 1]} : vector<14x512xbf16> to vector<1x512xbf16>
    %38 = vector.extract_strided_slice %36 {offsets = [1, 0], sizes = [1, 512], strides = [1, 1]} : vector<14x512xbf16> to vector<1x512xbf16>
    %39 = vector.extract_strided_slice %36 {offsets = [2, 0], sizes = [1, 512], strides = [1, 1]} : vector<14x512xbf16> to vector<1x512xbf16>
    %40 = vector.extract_strided_slice %36 {offsets = [3, 0], sizes = [1, 512], strides = [1, 1]} : vector<14x512xbf16> to vector<1x512xbf16>
    %41 = vector.extract_strided_slice %36 {offsets = [4, 0], sizes = [1, 512], strides = [1, 1]} : vector<14x512xbf16> to vector<1x512xbf16>
    %42 = vector.extract_strided_slice %36 {offsets = [5, 0], sizes = [1, 512], strides = [1, 1]} : vector<14x512xbf16> to vector<1x512xbf16>
    %43 = vector.extract_strided_slice %36 {offsets = [6, 0], sizes = [1, 512], strides = [1, 1]} : vector<14x512xbf16> to vector<1x512xbf16>
    %44 = vector.extract_strided_slice %36 {offsets = [7, 0], sizes = [1, 512], strides = [1, 1]} : vector<14x512xbf16> to vector<1x512xbf16>
    %45 = vector.extract_strided_slice %36 {offsets = [8, 0], sizes = [1, 512], strides = [1, 1]} : vector<14x512xbf16> to vector<1x512xbf16>
    %46 = vector.extract_strided_slice %36 {offsets = [9, 0], sizes = [1, 512], strides = [1, 1]} : vector<14x512xbf16> to vector<1x512xbf16>
    %47 = vector.extract_strided_slice %36 {offsets = [10, 0], sizes = [1, 512], strides = [1, 1]} : vector<14x512xbf16> to vector<1x512xbf16>
    %48 = vector.extract_strided_slice %36 {offsets = [11, 0], sizes = [1, 512], strides = [1, 1]} : vector<14x512xbf16> to vector<1x512xbf16>
    %49 = vector.extract_strided_slice %36 {offsets = [12, 0], sizes = [1, 512], strides = [1, 1]} : vector<14x512xbf16> to vector<1x512xbf16>
    %50 = vector.extract_strided_slice %36 {offsets = [13, 0], sizes = [1, 512], strides = [1, 1]} : vector<14x512xbf16> to vector<1x512xbf16>
    %51 = tpu.concatenate %37, %38, %39, %40, %41, %42, %43, %44, %45, %46, %47, %48, %49, %50 in 1 : vector<1x512xbf16>, vector<1x512xbf16>, vector<1x512xbf16>, vector<1x512xbf16>, vector<1x512xbf16>, vector<1x512xbf16>, vector<1x512xbf16>, vector<1x512xbf16>, vector<1x512xbf16>, vector<1x512xbf16>, vector<1x512xbf16>, vector<1x512xbf16>, vector<1x512xbf16>, vector<1x512xbf16> -> vector<1x7168xbf16>
    %c0_17 = arith.constant 0 : index
    %c0_18 = arith.constant 0 : index
    %52 = vector.load %arg6[%c0_17, %c0_18] : memref<7168x128xbf16, #tpu.memory_space<vmem>>, vector<7168x128xbf16>
    %cst_19 = arith.constant dense<0.000000e+00> : vector<1x128xf32>
    %53 = tpu.matmul %51, %52, %cst_19 {dimension_numbers = #tpu.dot_dimension_numbers<[1], [0], [0], [1], [0, 0, 1, 1], [], []>} : vector<1x7168xbf16>, vector<7168x128xbf16>, vector<1x128xf32> -> vector<1x128xf32>
    %c0_20 = arith.constant 0 : index
    %c0_21 = arith.constant 0 : index
    %54 = vector.load %arg7[%c0_20, %c0_21] : memref<1x128xf32, #tpu.memory_space<vmem>>, vector<1x128xf32>
    %55 = arith.addf %53, %54 : vector<1x128xf32>
    %cst_22 = arith.constant 0.000000e+00 : f32
    %56 = vector.broadcast %cst_22 : f32 to vector<1x128xf32>
    %57 = arith.maximumf %55, %56 : vector<1x128xf32>
    %58 = arith.truncf %57 : vector<1x128xf32> to vector<1x128xbf16>
    %c0_23 = arith.constant 0 : index
    %c0_24 = arith.constant 0 : index
    %59 = vector.load %arg8[%c0_23, %c0_24] : memref<128x128xbf16, #tpu.memory_space<vmem>>, vector<128x128xbf16>
    %cst_25 = arith.constant dense<0.000000e+00> : vector<1x128xf32>
    %60 = tpu.matmul %58, %59, %cst_25 {dimension_numbers = #tpu.dot_dimension_numbers<[1], [0], [0], [1], [0, 0, 1, 1], [], []>} : vector<1x128xbf16>, vector<128x128xbf16>, vector<1x128xf32> -> vector<1x128xf32>
    %c0_26 = arith.constant 0 : index
    %c0_27 = arith.constant 0 : index
    %61 = vector.load %arg9[%c0_26, %c0_27] : memref<1x128xf32, #tpu.memory_space<vmem>>, vector<1x128xf32>
    %62 = arith.addf %60, %61 : vector<1x128xf32>
    %63 = vector.shape_cast %62 : vector<1x128xf32> to vector<1x1x128xf32>
    %c0_28 = arith.constant 0 : index
    %c0_29 = arith.constant 0 : index
    %c0_30 = arith.constant 0 : index
    %64 = vector.load %arg10[%c0_28, %c0_29, %c0_30] : memref<1x1x128xf32, #tpu.memory_space<vmem>>, vector<1x1x128xf32>
    tpu.vector_store %arg10[%c0_28, %c0_29, %c0_30], %63 {strides = array<i32>} : memref<1x1x128xf32, #tpu.memory_space<vmem>>, vector<1x1x128xf32>,
    return
  }
  func.func @transform_0(%arg0: i32) -> (i32, i32, i32) {
    %c0_i32 = arith.constant 0 : i32
    %c0_i32_0 = arith.constant 0 : i32
    %c0_i32_1 = arith.constant 0 : i32
    return %arg0, %c0_i32, %c0_i32_0 : i32, i32, i32
  }
  func.func @transform_1(%arg0: i32) -> (i32, i32) {
    %c0_i32 = arith.constant 0 : i32
    %c0_i32_0 = arith.constant 0 : i32
    %c0_i32_1 = arith.constant 0 : i32
    return %c0_i32, %c0_i32_0 : i32, i32
  }
  func.func @transform_2(%arg0: i32) -> (i32, i32) {
    %c0_i32 = arith.constant 0 : i32
    %c0_i32_0 = arith.constant 0 : i32
    %c0_i32_1 = arith.constant 0 : i32
    return %c0_i32, %c0_i32_0 : i32, i32
  }
  func.func @transform_3(%arg0: i32) -> (i32, i32) {
    %c0_i32 = arith.constant 0 : i32
    %c0_i32_0 = arith.constant 0 : i32
    %c0_i32_1 = arith.constant 0 : i32
    return %c0_i32, %c0_i32_0 : i32, i32
  }
  func.func @transform_4(%arg0: i32) -> (i32, i32) {
    %c0_i32 = arith.constant 0 : i32
    %c0_i32_0 = arith.constant 0 : i32
    %c0_i32_1 = arith.constant 0 : i32
    return %c0_i32, %c0_i32_0 : i32, i32
  }
  func.func @transform_5(%arg0: i32) -> (i32, i32) {
    %c0_i32 = arith.constant 0 : i32
    %c0_i32_0 = arith.constant 0 : i32
    %c0_i32_1 = arith.constant 0 : i32
    return %c0_i32, %c0_i32_0 : i32, i32
  }
  func.func @transform_6(%arg0: i32) -> (i32, i32) {
    %c0_i32 = arith.constant 0 : i32
    %c0_i32_0 = arith.constant 0 : i32
    %c0_i32_1 = arith.constant 0 : i32
    return %c0_i32, %c0_i32_0 : i32, i32
  }
  func.func @transform_7(%arg0: i32) -> (i32, i32) {
    %c0_i32 = arith.constant 0 : i32
    %c0_i32_0 = arith.constant 0 : i32
    %c0_i32_1 = arith.constant 0 : i32
    return %c0_i32, %c0_i32_0 : i32, i32
  }
  func.func @transform_8(%arg0: i32) -> (i32, i32) {
    %c0_i32 = arith.constant 0 : i32
    %c0_i32_0 = arith.constant 0 : i32
    %c0_i32_1 = arith.constant 0 : i32
    return %c0_i32, %c0_i32_0 : i32, i32
  }
  func.func @transform_9(%arg0: i32) -> (i32, i32, i32) {
    %c0_i32 = arith.constant 0 : i32
    %c0_i32_0 = arith.constant 0 : i32
    %c0_i32_1 = arith.constant 0 : i32
    return %arg0, %c0_i32, %c0_i32_0 : i32, i32, i32
  }
}

</mosaic_0001>

<bundles_post_ra>
// kernel: mynet_forward.1
= control target key start
LH: loop header
LB: loop body
LE: loop exit
PB: predicated region body
PF: predicated region fallthrough
CT: control target
= control target key end

     0   :  { %s18966_s0 = inlined_call_operand.vmem [shape: bf16[2,32,128], index: 0, kind: input, shape index: {}]   ;;  %s18967_s1 = inlined_call_operand.hbm [shape: bf16[384,1024], index: 1, kind: input, shape index: {}]   ;;  %s18968_s2 = inlined_call_operand.hbm [shape: f32[1,1024], index: 2, kind: input, shape index: {}]   ;;  %s18969_s3 = inlined_call_operand.hbm [shape: bf16[3072,512], index: 3, kind: input, shape index: {}]   ;;  %s18970_s4 = inlined_call_operand.hbm [shape: f32[1,512], index: 4, kind: input, shape index: {}]   ;;  %s18971_s5 = inlined_call_operand.hbm [shape: bf16[7168,128], index: 5, kind: input, shape index: {}]   ;;  %s18972_s6 = inlined_call_operand.hbm [shape: f32[1,128], index: 6, kind: input, shape index: {}]   ;;  %s18973_s7 = inlined_call_operand.hbm [shape: bf16[128,128], index: 7, kind: input, shape index: {}]   ;;  %s18974_s8 = inlined_call_operand.hbm [shape: f32[1,128], index: 8, kind: input, shape index: {}]   ;;  %s18975_s9 = inlined_call_operand.hbm [shape: f32[2,1,128], index: 9, kind: output, shape index: {}]  }
   0x1   :  { %19121 = sst [smem:[#allocation163_spill]] %s18968_s2 }
   0x2   :  { %19122 = sst [smem:[#allocation164_spill]] %s18970_s4 }
   0x3   :  { %14 = vsyncpa [#allocation3], 0 }
   0x4   :  { %15 = vsyncpa [#allocation6], 0 }
   0x5   :  { %16 = vsyncpa [#allocation9], 0 }
   0x6   :  { %17 = vsyncpa [#allocation12], 0 }
   0x7   :  { %18 = vsyncpa [#allocation15], 0 }
   0x8   :  { %19 = vsyncpa [#allocation4], 0 }
   0x9   :  { %21 = vsyncpa [#allocation4 + $0x1], 0  ;;  %s17582_s30 = smov 0   ;;  %s17584_s10 = smov 0  }
   0xa   :  { %s17586_s11 = smov 0   ;;  %s17588_s12 = smov 0  }
   0xb LB: > { %19123 = sst [smem:[#allocation23_spill]] %s17508_s11  ;;  %s17603_s13 = sadd.s32 4294967295, %s17512_s12   ;;  %s17512_s12 = sphi %s17588_s12, %s19421_s12   ;;  %s17508_s11 = sphi %s17586_s11, %s19423_s11   ;;  %s17504_s10 = sphi %s17584_s10, %s19425_s10   ;;  %s17500_s30 = sphi %s17582_s30, %s19424_s30  }
   0xc   : > { %s13216_s14 = sadd.s32 4294967294, %s17512_s12   ;;  %s17607_s15 = sadd.s32 1, %s17512_s12  }
   0xd   : > { %19124 = sst [smem:[#allocation24_spill]] %s17607_s15  ;;  %s228_s16 = sadd.s32 1, %s17508_s11 }
   0xe   : > { %s225_s17 = ssub.s32 %s17512_s12, %s17607_s15  ;;  %p238_p0 = scmp.ne.s32.totalorder %s17508_s11, %s17504_s10 }
   0xf   : > { %p226_p1 = scmp.eq.s32.totalorder %s225_s17, 0  ;;  %p239_p2 = scmp.eq.s32.totalorder %s17603_s13, 1 }
  0x10   : > { %p244_p3 = scmp.ne.s32.totalorder %s17504_s10, %s17500_s30  ;;  %p245_p4 = scmp.eq.s32.totalorder %s13216_s14, 1 }
  0x11   : > { %s17618_s18 = scalar_select %p226_p1, %s17508_s11, %s228_s16  }
  0x12   : > { %p17620_p5 = por %p239_p2, %p238_p0  ;;  %p17624_p6 = por %p245_p4, %p244_p3 }
  0x13   : > { %19125 = sst [smem:[#allocation25_spill]] %s17618_s18  ;;  %p13217_p7 = scmp.ge.s32.totalorder %s17512_s12, 1 }
  0x14   : > { %s19126_s19 = scalar_select %p17620_p5, 1, 0 }
  0x15   : > { %s19127_s20 = scalar_select %p17624_p6, 1, 0 }
  0x16   : > { %p252_p8 = scmp.lt.s32.totalorder %s17512_s12, 3  ;;  %p18976_p9 = scmp.eq.s32.totalorder %s17603_s13, 0 }
  0x17   : > { %s17514_s22 = smov [#allocation5]   ;;  %s17515_s24 = smov [#allocation8]  }
  0x18   : > { %p17631_p10 = pnand %p13217_p7, %p252_p8  ;;  %s278_s23 = sshll.u32 %s17514_s22, 4  ;;  %s279_s23 = int_to_ptr.vmem [resolvable:$true] %s278_s23 }
  0x19   : > { %s302_s25 = sshll.u32 %s17515_s24, 4  ;;  %s17516_s27 = smov [#allocation11]   ;;  %s17643_s25 = int_to_ptr.vmem [resolvable:$true] %s302_s25 }
  0x1a   : > { %s19128_s21 = scalar_select %p17631_p10, 1, 0 }
  0x1b   : > { %p15499_p11 = pneg %p17631_p10  ;;  %s326_s28 = sshll.u32 %s17516_s27, 4  ;;  %s17645_s28 = int_to_ptr.vmem [resolvable:$true] %s326_s28 }
  0x1c   : > { %s19130_s2 = sld [smem:[#allocation163_spill]] }
  0x1d   : > { %p17639_p12 = pnand %p18976_p9, %p15499_p11 }
  0x1f   : > { %p17655_p0 = pneg %p17639_p12 }
  0x22   : > { %s17206_s16 = scalar_lea.hbm %s19130_s2, 128 }
  0x23   : > { %p17207_p13 = scmp.ne.s32.totalorder %s19130_s2, %s17206_s16  ;;  %p17213_p3 = scmp.lt.u32.totalorder %s17206_s16, %s19130_s2 }
  0x25   : > { %p17209_p1 = pnand %p17655_p0, %p17207_p13 }
  0x27   : > { %p17210_p2 = pneg %p17209_p1 }
  0x29   : > { %p17215_p4 = pnand %p17213_p3, %p17210_p2 }
  0x2b   : > { %17218 = shalt.err (!%p17215_p4)
}
  0x2c   : > { %s17219_s29 = scalar_lea.vmem %s279_s23, 128  ;;  %p17227_p9 = scmp.lt.s32.totalorder %s279_s23, %s279_s23 }
  0x2d   : > { %p17220_p7 = scmp.ne.s32.totalorder %s279_s23, %s17219_s29  ;;  %p17228_p6 = scmp.lt.s32.totalorder %s17219_s29, %s17219_s29 }
  0x2f   : > { %p17222_p8 = pnand %p17220_p7, %p17655_p0  ;;  %p17229_p5 = por %p17228_p6, %p17227_p9 }
  0x31   : > { %p17223_p11 = pneg %p17222_p8 }
  0x33   : > { %p17230_p10 = pnand %p17229_p5, %p17223_p11 }
  0x35   : > { %17233 = shalt.err (!%p17230_p10)
}
  0x36   : > { %15505 = dma.hbm_to_vmem [thread:$0]  (!%p17639_p12), %s19130_s2, 128, %s279_s23, [#allocation6]  }
  0x37   : > { %s19132_s4 = sld [smem:[#allocation164_spill]] }
  0x3d   : > { %s17234_s22 = scalar_lea.hbm %s19132_s4, 64 }
  0x3e   : > { %p17235_p13 = scmp.ne.s32.totalorder %s19132_s4, %s17234_s22  ;;  %p17241_p5 = scmp.lt.u32.totalorder %s17234_s22, %s19132_s4 }
  0x40   : > { %p17237_p1 = pnand %p17235_p13, %p17655_p0 }
  0x42   : > { %p17238_p6 = pneg %p17237_p1 }
  0x44   : > { %p17243_p9 = pnand %p17241_p5, %p17238_p6 }
  0x46   : > { %17246 = shalt.err (!%p17243_p9)
}
  0x47   : > { %s17247_s23 = scalar_lea.vmem %s17643_s25, 64  ;;  %p17255_p4 = scmp.lt.s32.totalorder %s17643_s25, %s17643_s25 }
  0x48   : > { %p17248_p10 = scmp.ne.s32.totalorder %s17643_s25, %s17247_s23  ;;  %p17256_p7 = scmp.lt.s32.totalorder %s17247_s23, %s17247_s23 }
  0x4a   : > { %p17250_p2 = pnand %p17248_p10, %p17655_p0  ;;  %p17257_p8 = por %p17256_p7, %p17255_p4 }
  0x4c   : > { %p17251_p3 = pneg %p17250_p2 }
  0x4e   : > { %p17258_p11 = pnand %p17257_p8, %p17251_p3 }
  0x50   : > { %17261 = shalt.err (!%p17258_p11)
}
  0x51   : > { %15511 = dma.hbm_to_vmem [thread:$0]  (!%p17639_p12), %s19132_s4, 64, %s17643_s25, [#allocation9]  }
  0x52   : > { %s17262_s18 = scalar_lea.hbm %s18972_s6, 16 }
  0x53   : > { %p17263_p13 = scmp.ne.s32.totalorder %s18972_s6, %s17262_s18  ;;  %p17269_p5 = scmp.lt.u32.totalorder %s17262_s18, %s18972_s6 }
  0x55   : > { %p17265_p1 = pnand %p17263_p13, %p17655_p0 }
  0x57   : > { %p17266_p6 = pneg %p17265_p1 }
  0x59   : > { %p17271_p9 = pnand %p17269_p5, %p17266_p6 }
  0x5b   : > { %17274 = shalt.err (!%p17271_p9)
}
  0x5c   : > { %s17275_s25 = scalar_lea.vmem %s17645_s28, 16  ;;  %s17282_s23 = scalar_lea.vmem %s17645_s28, 32 }
  0x5d   : > { %p17276_p10 = scmp.ne.s32.totalorder %s17645_s28, %s17275_s25  ;;  %p17283_p4 = scmp.lt.s32.totalorder %s17645_s28, %s17645_s28 }
  0x5e   : > { %p17284_p7 = scmp.lt.s32.totalorder %s17282_s23, %s17275_s25 }
  0x5f   : > { %p17278_p2 = pnand %p17276_p10, %p17655_p0 }
  0x60   : > { %p17285_p8 = por %p17284_p7, %p17283_p4 }
  0x61   : > { %p17279_p3 = pneg %p17278_p2 }
  0x63   : > { %p17286_p11 = pnand %p17285_p8, %p17279_p3 }
  0x65   : > { %17289 = shalt.err (!%p17286_p11)
}
  0x66   : > { %15517 = dma.hbm_to_vmem [thread:$0]  (!%p17639_p12), %s18972_s6, 16, %s17645_s28, [#allocation12]  }
  0x67   : > { %s17517_s14 = smov [#allocation2]   ;;  %s17290_s22 = scalar_lea.hbm %s18967_s1, 24576 }
  0x68   : > { %s264_s17 = sshll.u32 %s17517_s14, 4  ;;  %p17291_p13 = scmp.ne.s32.totalorder %s18967_s1, %s17290_s22  ;;  %s265_s17 = int_to_ptr.vmem [resolvable:$true] %s264_s17 }
  0x69   : > { %p17297_p5 = scmp.lt.u32.totalorder %s17290_s22, %s18967_s1 }
  0x6a   : > { %p17293_p1 = pnand %p17291_p13, %p17655_p0 }
  0x6c   : > { %p17294_p6 = pneg %p17293_p1 }
  0x6e   : > { %p17299_p9 = pnand %p17297_p5, %p17294_p6 }
  0x70   : > { %17302 = shalt.err (!%p17299_p9)
}
  0x71   : > { %s17303_s28 = scalar_lea.vmem %s265_s17, 24576  ;;  %p17311_p4 = scmp.lt.s32.totalorder %s265_s17, %s265_s17 }
  0x72   : > { %p17304_p10 = scmp.ne.s32.totalorder %s265_s17, %s17303_s28  ;;  %p17312_p7 = scmp.lt.s32.totalorder %s17303_s28, %s17303_s28 }
  0x74   : > { %p17306_p2 = pnand %p17304_p10, %p17655_p0  ;;  %p17313_p8 = por %p17312_p7, %p17311_p4 }
  0x76   : > { %p17307_p3 = pneg %p17306_p2 }
  0x78   : > { %p17314_p11 = pnand %p17313_p8, %p17307_p3 }
  0x7a   : > { %17317 = shalt.err (!%p17314_p11)
}
  0x7b   : > { %s17518_s11 = smov 512   ;;  %s17519_s15 = smov 32  }
  0x7c   : > { %15502 = dma.hbm_to_vmem [thread:$0]  (!%p17639_p12), %s18967_s1, 24576, %s265_s17, [#allocation3], %s17518_s11, %s17518_s11, %s17519_s15  }
  0x7d   : > { %s17520_s16 = smov [#allocation7]   ;;  %s17318_s25 = scalar_lea.hbm %s18969_s3, 98304 }
  0x7e   : > { %s288_s22 = sshll.u32 %s17520_s16, 4  ;;  %p17319_p13 = scmp.ne.s32.totalorder %s18969_s3, %s17318_s25  ;;  %s289_s22 = int_to_ptr.vmem [resolvable:$true] %s288_s22 }
  0x7f   : > { %p17325_p5 = scmp.lt.u32.totalorder %s17318_s25, %s18969_s3 }
  0x80   : > { %p17321_p1 = pnand %p17319_p13, %p17655_p0 }
  0x82   : > { %p17322_p6 = pneg %p17321_p1 }
  0x84   : > { %p17327_p9 = pnand %p17325_p5, %p17322_p6 }
  0x86   : > { %17330 = shalt.err (!%p17327_p9)
}
  0x87   : > { %s17331_s17 = scalar_lea.vmem %s289_s22, 98304  ;;  %p17339_p4 = scmp.lt.s32.totalorder %s289_s22, %s289_s22 }
  0x88   : > { %p17332_p10 = scmp.ne.s32.totalorder %s289_s22, %s17331_s17  ;;  %p17340_p7 = scmp.lt.s32.totalorder %s17331_s17, %s17331_s17 }
  0x8a   : > { %p17334_p2 = pnand %p17332_p10, %p17655_p0  ;;  %p17341_p8 = por %p17340_p7, %p17339_p4 }
  0x8c   : > { %p17335_p3 = pneg %p17334_p2 }
  0x8e   : > { %p17342_p11 = pnand %p17341_p8, %p17335_p3 }
  0x90   : > { %17345 = shalt.err (!%p17342_p11)
}
  0x91   : > { %s17521_s11 = smov 256   ;;  %s17522_s15 = smov 16  }
  0x92   : > { %15508 = dma.hbm_to_vmem [thread:$0]  (!%p17639_p12), %s18969_s3, 98304, %s289_s22, [#allocation6], %s17521_s11, %s17521_s11, %s17522_s15  }
  0x93   : > { %s17523_s14 = smov [#allocation10]   ;;  %s17346_s29 = scalar_lea.hbm %s18971_s5, 57344 }
  0x94   : > { %s312_s18 = sshll.u32 %s17523_s14, 4  ;;  %p17347_p13 = scmp.ne.s32.totalorder %s18971_s5, %s17346_s29  ;;  %s313_s18 = int_to_ptr.vmem [resolvable:$true] %s312_s18 }
  0x95   : > { %p17353_p5 = scmp.lt.u32.totalorder %s17346_s29, %s18971_s5 }
  0x96   : > { %p17349_p1 = pnand %p17347_p13, %p17655_p0 }
  0x98   : > { %p17350_p6 = pneg %p17349_p1 }
  0x9a   : > { %p17355_p9 = pnand %p17353_p5, %p17350_p6 }
  0x9c   : > { %17358 = shalt.err (!%p17355_p9)
}
  0x9d   : > { %s17359_s22 = scalar_lea.vmem %s313_s18, 57344  ;;  %p17367_p4 = scmp.lt.s32.totalorder %s313_s18, %s313_s18 }
  0x9e   : > { %p17360_p10 = scmp.ne.s32.totalorder %s313_s18, %s17359_s22  ;;  %p17368_p7 = scmp.lt.s32.totalorder %s17359_s22, %s17359_s22 }
  0xa0   : > { %p17362_p2 = pnand %p17360_p10, %p17655_p0  ;;  %p17369_p8 = por %p17368_p7, %p17367_p4 }
  0xa2   : > { %p17363_p3 = pneg %p17362_p2 }
  0xa4   : > { %p17370_p11 = pnand %p17369_p8, %p17363_p3 }
  0xa6   : > { %17373 = shalt.err (!%p17370_p11)
}
  0xa7   : > { %s17524_s11 = smov 64   ;;  %s17525_s15 = smov 4  }
  0xa8   : > { %15514 = dma.hbm_to_vmem [thread:$0]  (!%p17639_p12), %s18971_s5, 57344, %s313_s18, [#allocation9], %s17524_s11, %s17524_s11, %s17525_s15  }
  0xa9   : > { %s17526_s14 = smov [#allocation13]   ;;  %s17527_s27 = smov [#allocation14]  }
  0xaa   : > { %s336_s16 = sshll.u32 %s17526_s14, 4  ;;  %s350_s29 = sshll.u32 %s17527_s27, 4  ;;  %s337_s16 = int_to_ptr.vmem [resolvable:$true] %s336_s16  ;;  %s17772_s29 = int_to_ptr.vmem [resolvable:$true] %s350_s29 }
  0xab   : > { %s17374_s28 = scalar_lea.hbm %s18973_s7, 1024 }
  0xac   : > { %p17375_p13 = scmp.ne.s32.totalorder %s18973_s7, %s17374_s28  ;;  %p17381_p5 = scmp.lt.u32.totalorder %s17374_s28, %s18973_s7 }
  0xae   : > { %p17377_p1 = pnand %p17375_p13, %p17655_p0 }
  0xb0   : > { %p17378_p6 = pneg %p17377_p1 }
  0xb2   : > { %p17383_p9 = pnand %p17381_p5, %p17378_p6 }
  0xb4   : > { %17386 = shalt.err (!%p17383_p9)
}
  0xb5   : > { %s17387_s4 = scalar_lea.vmem %s337_s16, 1024  ;;  %p17395_p4 = scmp.lt.s32.totalorder %s337_s16, %s337_s16 }
  0xb6   : > { %p17388_p10 = scmp.ne.s32.totalorder %s337_s16, %s17387_s4  ;;  %p17396_p7 = scmp.lt.s32.totalorder %s17387_s4, %s17387_s4 }
  0xb8   : > { %p17390_p2 = pnand %p17388_p10, %p17655_p0  ;;  %p17397_p8 = por %p17396_p7, %p17395_p4 }
  0xba   : > { %p17391_p3 = pneg %p17390_p2 }
  0xbc   : > { %p17398_p11 = pnand %p17397_p8, %p17391_p3 }
  0xbe   : > { %17401 = shalt.err (!%p17398_p11)
}
  0xbf   : > { %15520 = dma.hbm_to_vmem [thread:$0]  (!%p17639_p12), %s18973_s7, 1024, %s337_s16, [#allocation12], %s17524_s11, %s17524_s11, %s17525_s15  }
  0xc0   : > { %s17402_s28 = scalar_lea.hbm %s18974_s8, 16 }
  0xc1   : > { %p17403_p13 = scmp.ne.s32.totalorder %s18974_s8, %s17402_s28  ;;  %p17409_p5 = scmp.lt.u32.totalorder %s17402_s28, %s18974_s8 }
  0xc3   : > { %p17405_p1 = pnand %p17403_p13, %p17655_p0 }
  0xc5   : > { %p17406_p6 = pneg %p17405_p1 }
  0xc7   : > { %p17411_p9 = pnand %p17409_p5, %p17406_p6 }
  0xc9   : > { %17414 = shalt.err (!%p17411_p9)
}
  0xca   : > { %s17415_s11 = scalar_lea.vmem %s17772_s29, 16  ;;  %s17422_s15 = scalar_lea.vmem %s17772_s29, 32 }
  0xcb   : > { %p17416_p10 = scmp.ne.s32.totalorder %s17772_s29, %s17415_s11  ;;  %p17423_p4 = scmp.lt.s32.totalorder %s17772_s29, %s17772_s29 }
  0xcc   : > { %p17424_p7 = scmp.lt.s32.totalorder %s17422_s15, %s17415_s11 }
  0xcd   : > { %p17418_p2 = pnand %p17416_p10, %p17655_p0 }
  0xce   : > { %p17425_p8 = por %p17424_p7, %p17423_p4 }
  0xcf   : > { %p17419_p3 = pneg %p17418_p2 }
  0xd1   : > { %p17426_p11 = pnand %p17425_p8, %p17419_p3 }
  0xd3   : > { %17429 = shalt.err (!%p17426_p11)
}
  0xd4   : > { %15523 = dma.hbm_to_vmem [thread:$0]  (!%p17639_p12), %s18974_s8, 16, %s17772_s29, [#allocation15]  }
  0xd5   : > { %p19133_p13 = scmp.ne.s32.totalorder %s19128_s21, 0 }
  0xd7   : > { %371 = sbr.rel (%p19133_p13) target bundleno = 2482 (0x9b2), region = 56 }
  0xde   : > { %p19134_p0 = scmp.eq.s32.totalorder %s17603_s13, 0 }
  0xe0   : > { %17475 = dma.done.wait (%p19134_p0), [#allocation3], 24576   ;;  %p19135_p1 = pmov %p19134_p0 }
  0xe1   : > { %p19136_p6 = pmov %p19134_p0 }
  0xe2   : > { %17477 = vsyncadd (%p19135_p1), [#allocation3], 4294942720 }
  0xe3   : > { %17479 = dma.done.wait (%p19136_p6), [#allocation6], 98432   ;;  %p19137_p5 = pmov %p19134_p0 }
  0xe4   : > { %p19138_p9 = pmov %p19134_p0 }
  0xe5   : > { %17481 = vsyncadd (%p19137_p5), [#allocation6], 4294868864 }
  0xe6   : > { %17483 = dma.done.wait (%p19138_p9), [#allocation9], 57408   ;;  %p19139_p12 = pmov %p19134_p0 }
  0xe7   : > { %p19140_p10 = pmov %p19134_p0 }
  0xe8   : > { %17485 = vsyncadd (%p19139_p12), [#allocation9], 4294909888 }
  0xe9   : > { %17487 = dma.done.wait (%p19140_p10), [#allocation12], 1040   ;;  %p19141_p2 = pmov %p19134_p0 }
  0xea   : > { %p19142_p3 = pmov %p19134_p0 }
  0xeb   : > { %17489 = vsyncadd (%p19141_p2), [#allocation12], 4294966256 }
  0xec   : > { %17491 = dma.done.wait (%p19142_p3), [#allocation15], 16   ;;  %p19143_p4 = pmov %p19134_p0 }
  0xed   : > { %v440_v0 = vld [vmem:[#allocation2] sm:$0xff]  ;;  %v441_v2 = vld [vmem:[#allocation2 + $0x8] sm:$0xff]  ;;  %p434_p7 = scmp.lt.s32.totalorder %s17603_s13, 1  ;;  %vm17530_vm0 = vmmov 0   ;;  %s432_s27 = sand.u32 1, %s17504_s10  }
  0xee   : > { %17493 = vsyncadd (%p19143_p4), [#allocation15], 4294967280  ;;  %v444_v1 = vld [vmem:[#allocation2 + $0x20] sm:$0xff]  ;;  %v445_v4 = vld [vmem:[#allocation2 + $0x28] sm:$0xff]  ;;  %s14656_s25 = sshll.u32 %s17603_s13, 4  ;;  %s433_s23 = scalar_lea.vmem [#allocation16], %s432_s27 }
  0xef   : > { %v17838_v3 = vcombine.high %v440_v0, %v444_v1  ;;  %v17840_v5 = vcombine.low %v440_v0, %v444_v1  ;;  %v448_v6 = vld [vmem:[#allocation2 + $0x40] sm:$0xff]  ;;  %v17842_v8 = vcombine.high %v441_v2, %v445_v4  ;;  %v17844_v9 = vcombine.low %v441_v2, %v445_v4  ;;  %v449_v11 = vld [vmem:[#allocation2 + $0x48] sm:$0xff]  ;;  %s435_s21 = scalar_select %p434_p7, %s17603_s13, 1 }
  0xf0   : > { %v452_v7 = vld [vmem:[#allocation2 + $0x60] sm:$0xff]  ;;  %v453_v12 = vld [vmem:[#allocation2 + $0x68] sm:$0xff]  ;;  %s13082_s28 = sshll.u32 %s433_s23, 4  ;;  %s18924_s2 = scalar_lea.hbm %s18975_s9, %s14656_s25  ;;  %s18926_s28 = int_to_ptr.vmem [resolvable:$true] %s13082_s28 }
  0xf1   : > { %v17846_v10 = vcombine.high %v448_v6, %v452_v7  ;;  %v456_v13 = vld [vmem:[#allocation2 + $0x80] sm:$0xff]  ;;  %2435 = vmatprep.subr.bf16.mxu0 %v17838_v3  ;;  %v17849_v14 = vcombine.high %v449_v11, %v453_v12  ;;  %v457_v16 = vld [vmem:[#allocation2 + $0x88] sm:$0xff]  ;;  %2521 = vmatprep.subr.bf16.mxu1 %v17842_v8  ;;  %v17853_v18 = vcombine.low %v448_v6, %v452_v7  ;;  %s14659_s26 = sshll.u32 %s435_s21, 4  ;;  %s13070_s18 = scalar_lea.sflag [#allocation4], %s432_s27 }
  0xf2   : > { %v460_v15 = vld [vmem:[#allocation2 + $0xa0] sm:$0xff]  ;;  %v461_v17 = vld [vmem:[#allocation2 + $0xa8] sm:$0xff]  ;;  %2436 = vmatpush1.bf16.msra.mxu0 %v17840_v5  ;;  %2522 = vmatpush1.bf16.msra.mxu1 %v17844_v9  ;;  %v17857_v19 = vcombine.low %v449_v11, %v453_v12  ;;  %s17905_s14 = scalar_lea.vmem %s18966_s0, %s14659_s26  ;;  %s17430_s13 = scalar_lea.vmem %s18926_s28, 16 }
  0xf3   : > { %2437 = vmatprep.subr.bf16.mxu0 %v17846_v10  ;;  %v17859_v20 = vcombine.high %v456_v13, %v460_v15  ;;  %2523 = vmatprep.subr.bf16.mxu1 %v17849_v14  ;;  %v17862_v21 = vcombine.high %v457_v16, %v461_v17  ;;  %v464_v22 = vld [vmem:[#allocation2 + $0xc0] sm:$0xff]  ;;  %v465_v24 = vld [vmem:[#allocation2 + $0xc8] sm:$0xff]  ;;  %v17865_v26 = vcombine.low %v456_v13, %v460_v15  ;;  %p17431_p8 = scmp.ne.s32.totalorder %s18926_s28, %s17430_s13  ;;  %p19419_p11 = scmp.ne.s32.totalorder %s19126_s19, 0 }
  0xf4   : > { %v468_v23 = vld [vmem:[#allocation2 + $0xe0] sm:$0xff]  ;;  %v469_v25 = vld [vmem:[#allocation2 + $0xe8] sm:$0xff]  ;;  %v17870_v27 = vcombine.low %v457_v16, %v461_v17  ;;  %s17531_s11 = smov [#allocation16]  }
  0xf5   : > { %v17872_v28 = vcombine.high %v464_v22, %v468_v23  ;;  %v17875_v29 = vcombine.high %v465_v24, %v469_v25  ;;  %v472_v30 = vld [vmem:[#allocation2 + $0x100] sm:$0xff]  ;;  %v473_v32 = vld [vmem:[#allocation2 + $0x108] sm:$0xff]  ;;  %v17878_v34 = vcombine.low %v464_v22, %v468_v23  ;;  %v17883_v35 = vcombine.low %v465_v24, %v469_v25  ;;  %p17432_p13 = pnand %p17431_p8, %p19419_p11  ;;  %s17434_s15 = sshll.u32 %s17531_s11, 4  ;;  %s17435_s15 = int_to_ptr.vmem [resolvable:$false] %s17434_s15 }
  0xf6   : > { %2438 = vmatpush1.bf16.msra.mxu0 %v17853_v18  ;;  %2524 = vmatpush1.bf16.msra.mxu1 %v17857_v19  ;;  %v476_v31 = vld [vmem:[#allocation2 + $0x120] sm:$0xff]  ;;  %v477_v33 = vld [vmem:[#allocation2 + $0x128] sm:$0xff]  ;;  %s17436_s16 = scalar_lea.vmem %s17435_s15, 32  ;;  %p17437_p1 = scmp.lt.s32.totalorder %s18926_s28, %s17435_s15 }
  0xf7   : > { %2439 = vmatprep.subr.bf16.mxu0 %v17859_v20  ;;  %2525 = vmatprep.subr.bf16.mxu1 %v17862_v21  ;;  %v17885_v36 = vcombine.high %v472_v30, %v476_v31  ;;  %v17888_v37 = vcombine.high %v473_v32, %v477_v33  ;;  %v480_v38 = vld [vmem:[#allocation2 + $0x140] sm:$0xff]  ;;  %v481_v40 = vld [vmem:[#allocation2 + $0x148] sm:$0xff]  ;;  %v17891_v42 = vcombine.low %v472_v30, %v476_v31  ;;  %p17433_p0 = pneg %p17432_p13  ;;  %p17438_p6 = scmp.lt.s32.totalorder %s17436_s16, %s17430_s13 }
  0xf8   : > { %v484_v39 = vld [vmem:[#allocation2 + $0x160] sm:$0xff]  ;;  %v485_v41 = vld [vmem:[#allocation2 + $0x168] sm:$0xff]  ;;  %v17895_v43 = vcombine.low %v473_v32, %v477_v33 }
  0xf9   : > { %v17897_v44 = vcombine.high %v480_v38, %v484_v39  ;;  %v17900_v45 = vcombine.high %v481_v40, %v485_v41  ;;  %v488_v46 = vld [vmem:[#allocation2 + $0x180] sm:$0xff]  ;;  %v489_v48 = vld [vmem:[#allocation2 + $0x188] sm:$0xff]  ;;  %v17908_v50 = vcombine.low %v480_v38, %v484_v39  ;;  %v17912_v51 = vcombine.low %v481_v40, %v485_v41  ;;  %p17439_p5 = por %p17438_p6, %p17437_p1 }
  0xfa   : > { %2440 = vmatpush1.bf16.msra.mxu0 %v17865_v26  ;;  %2526 = vmatpush1.bf16.msra.mxu1 %v17870_v27  ;;  %v492_v47 = vld [vmem:[#allocation2 + $0x1a0] sm:$0xff]  ;;  %v493_v49 = vld [vmem:[#allocation2 + $0x1a8] sm:$0xff] }
  0xfb   : > { %2441 = vmatprep.subr.bf16.mxu0 %v17872_v28  ;;  %2527 = vmatprep.subr.bf16.mxu1 %v17875_v29  ;;  %v17914_v52 = vcombine.high %v488_v46, %v492_v47  ;;  %v17917_v53 = vcombine.high %v489_v48, %v493_v49  ;;  %v496_v54 = vld [vmem:[#allocation2 + $0x1c0] sm:$0xff]  ;;  %v17920_v56 = vld [vmem:[%s17905_s14 + $0x8] sm:$0xff]   ;;  %v17923_v59 = vcombine.low %v488_v46, %v492_v47  ;;  %p17440_p9 = pnand %p17439_p5, %p17433_p0 }
  0xfc   : > { %v500_v55 = vld [vmem:[#allocation2 + $0x1e0] sm:$0xff]  ;;  %v497_v57 = vld [vmem:[#allocation2 + $0x1c8] sm:$0xff]  ;;  %2467 = vmatprep.mubr.bf16.mxu0 %v17920_v56  ;;  %v17928_v60 = vcombine.low %v489_v48, %v493_v49  ;;  %2553 = vmatprep.mubr.bf16.mxu1 %v17920_v56 }
  0xfd   : > { %v501_v58 = vld [vmem:[#allocation2 + $0x1e8] sm:$0xff]  ;;  %v17930_v61 = vcombine.high %v496_v54, %v500_v55  ;;  %v504_v63 = vld [vmem:[#allocation2 + $0x200] sm:$0xff]  ;;  %v17937_v4 = vcombine.low %v496_v54, %v500_v55 }
  0xfe   : > { %2442 = vmatpush1.bf16.msra.mxu0 %v17878_v34  ;;  %2528 = vmatpush1.bf16.msra.mxu1 %v17883_v35  ;;  %v17933_v62 = vcombine.high %v497_v57, %v501_v58  ;;  %v508_v0 = vld [vmem:[#allocation2 + $0x220] sm:$0xff]  ;;  %v505_v1 = vld [vmem:[#allocation2 + $0x208] sm:$0xff]  ;;  %v17941_v6 = vcombine.low %v497_v57, %v501_v58 }
  0xff   : > { %2443 = vmatprep.subr.bf16.mxu0 %v17885_v36  ;;  %2529 = vmatprep.subr.bf16.mxu1 %v17888_v37  ;;  %v509_v2 = vld [vmem:[#allocation2 + $0x228] sm:$0xff]  ;;  %v17943_v7 = vcombine.high %v504_v63, %v508_v0  ;;  %v512_v12 = vld [vmem:[#allocation2 + $0x240] sm:$0xff]  ;;  %v17949_v17 = vcombine.low %v504_v63, %v508_v0 }
 0x100   : > { %v17946_v11 = vcombine.high %v505_v1, %v509_v2  ;;  %v516_v13 = vld [vmem:[#allocation2 + $0x260] sm:$0xff]  ;;  %v513_v15 = vld [vmem:[#allocation2 + $0x248] sm:$0xff]  ;;  %v17953_v22 = vcombine.low %v505_v1, %v509_v2 }
 0x101   : > { %v517_v16 = vld [vmem:[#allocation2 + $0x268] sm:$0xff]  ;;  %v17955_v23 = vcombine.high %v512_v12, %v516_v13  ;;  %v520_v25 = vld [vmem:[#allocation2 + $0x280] sm:$0xff]  ;;  %v17961_v33 = vcombine.low %v512_v12, %v516_v13 }
 0x102   : > { %2444 = vmatpush1.bf16.msra.mxu0 %v17891_v42  ;;  %2530 = vmatpush1.bf16.msra.mxu1 %v17895_v43  ;;  %v17958_v24 = vcombine.high %v513_v15, %v517_v16  ;;  %v524_v30 = vld [vmem:[#allocation2 + $0x2a0] sm:$0xff]  ;;  %v521_v31 = vld [vmem:[#allocation2 + $0x288] sm:$0xff]  ;;  %v17965_v38 = vcombine.low %v513_v15, %v517_v16 }
 0x103   : > { %2445 = vmatprep.subr.bf16.mxu0 %v17897_v44  ;;  %2531 = vmatprep.subr.bf16.mxu1 %v17900_v45  ;;  %v525_v32 = vld [vmem:[#allocation2 + $0x2a8] sm:$0xff]  ;;  %v17967_v39 = vcombine.high %v520_v25, %v524_v30  ;;  %v528_v41 = vld [vmem:[#allocation2 + $0x2c0] sm:$0xff]  ;;  %v17973_v49 = vcombine.low %v520_v25, %v524_v30 }
 0x104   : > { %v17970_v40 = vcombine.high %v521_v31, %v525_v32  ;;  %v532_v46 = vld [vmem:[#allocation2 + $0x2e0] sm:$0xff]  ;;  %v529_v47 = vld [vmem:[#allocation2 + $0x2c8] sm:$0xff]  ;;  %v17977_v54 = vcombine.low %v521_v31, %v525_v32 }
 0x105   : > { %19144 = vst [vmem:[#allocation26_spill] sm:$0xff] %v17967_v39  ;;  %v533_v48 = vld [vmem:[#allocation2 + $0x2e8] sm:$0xff]  ;;  %19146 = vst [vmem:[#allocation28_spill] sm:$0xff] %v17973_v49  ;;  %v17979_v55 = vcombine.high %v528_v41, %v532_v46  ;;  %v536_v58 = vld [vmem:[#allocation2 + $0x300] sm:$0xff]  ;;  %v17985_v2 = vcombine.low %v528_v41, %v532_v46 }
 0x106   : > { %2446 = vmatpush1.bf16.msra.mxu0 %v17908_v50  ;;  %2532 = vmatpush1.bf16.msra.mxu1 %v17912_v51  ;;  %19145 = vst [vmem:[#allocation27_spill] sm:$0xff] %v17970_v40  ;;  %19147 = vst [vmem:[#allocation29_spill] sm:$0xff] %v17977_v54  ;;  %v17982_v57 = vcombine.high %v529_v47, %v533_v48  ;;  %v540_v63 = vld [vmem:[#allocation2 + $0x320] sm:$0xff]  ;;  %v537_v0 = vld [vmem:[#allocation2 + $0x308] sm:$0xff]  ;;  %v17989_v12 = vcombine.low %v529_v47, %v533_v48 }
 0x107   : > { %2447 = vmatprep.subr.bf16.mxu0 %v17914_v52  ;;  %2533 = vmatprep.subr.bf16.mxu1 %v17917_v53  ;;  %19148 = vst [vmem:[#allocation30_spill] sm:$0xff] %v17979_v55  ;;  %v541_v1 = vld [vmem:[#allocation2 + $0x328] sm:$0xff]  ;;  %19150 = vst [vmem:[#allocation32_spill] sm:$0xff] %v17985_v2  ;;  %v17991_v13 = vcombine.high %v536_v58, %v540_v63  ;;  %v544_v16 = vld [vmem:[#allocation2 + $0x340] sm:$0xff]  ;;  %v17997_v32 = vcombine.low %v536_v58, %v540_v63 }
 0x108   : > { %19149 = vst [vmem:[#allocation31_spill] sm:$0xff] %v17982_v57  ;;  %19151 = vst [vmem:[#allocation33_spill] sm:$0xff] %v17989_v12  ;;  %v17994_v15 = vcombine.high %v537_v0, %v541_v1  ;;  %v548_v25 = vld [vmem:[#allocation2 + $0x360] sm:$0xff]  ;;  %v545_v30 = vld [vmem:[#allocation2 + $0x348] sm:$0xff]  ;;  %v18001_v41 = vcombine.low %v537_v0, %v541_v1 }
 0x109   : > { %19152 = vst [vmem:[#allocation34_spill] sm:$0xff] %v17991_v13  ;;  %v549_v31 = vld [vmem:[#allocation2 + $0x368] sm:$0xff]  ;;  %19154 = vst [vmem:[#allocation36_spill] sm:$0xff] %v17997_v32  ;;  %v18003_v46 = vcombine.high %v544_v16, %v548_v25  ;;  %v552_v48 = vld [vmem:[#allocation2 + $0x380] sm:$0xff]  ;;  %v18009_v58 = vcombine.low %v544_v16, %v548_v25 }
 0x10a   : > { %2448 = vmatpush1.bf16.msra.mxu0 %v17923_v59  ;;  %2534 = vmatpush1.bf16.msra.mxu1 %v17928_v60  ;;  %19153 = vst [vmem:[#allocation35_spill] sm:$0xff] %v17994_v15  ;;  %19155 = vst [vmem:[#allocation37_spill] sm:$0xff] %v18001_v41  ;;  %v18006_v47 = vcombine.high %v545_v30, %v549_v31  ;;  %v18013_v63 = vcombine.low %v545_v30, %v549_v31 }
 0x10b   : > { %2449 = vmatprep.subr.bf16.mxu0 %v17930_v61  ;;  %2535 = vmatprep.subr.bf16.mxu1 %v17933_v62  ;;  %19156 = vst [vmem:[#allocation38_spill] sm:$0xff] %v18003_v46  ;;  %19158 = vst [vmem:[#allocation40_spill] sm:$0xff] %v18009_v58 }
 0x10c   : > { %19157 = vst [vmem:[#allocation39_spill] sm:$0xff] %v18006_v47  ;;  %19159 = vst [vmem:[#allocation41_spill] sm:$0xff] %v18013_v63 }
 0x10e   : > { %2450 = vmatpush1.bf16.msra.mxu0 %v17937_v4  ;;  %2536 = vmatpush1.bf16.msra.mxu1 %v17941_v6 }
 0x10f   : > { %2451 = vmatprep.subr.bf16.mxu0 %v17943_v7  ;;  %2537 = vmatprep.subr.bf16.mxu1 %v17946_v11 }
 0x112   : > { %2452 = vmatpush1.bf16.msra.mxu0 %v17949_v17  ;;  %2538 = vmatpush1.bf16.msra.mxu1 %v17953_v22 }
 0x113   : > { %2453 = vmatprep.subr.bf16.mxu0 %v17955_v23  ;;  %2539 = vmatprep.subr.bf16.mxu1 %v17958_v24 }
 0x116   : > { %2454 = vmatpush1.bf16.msra.mxu0 %v17961_v33  ;;  %2540 = vmatpush1.bf16.msra.mxu1 %v17965_v38 }
 0x117   : > { %2455 = vmatprep.subr.bf16.mxu0 %v17967_v39  ;;  %2541 = vmatprep.subr.bf16.mxu1 %v17970_v40  ;;  %v454_v39 = vld [vmem:[#allocation2 + $0x70] sm:$0xff] }
 0x11a   : > { %2456 = vmatpush1.bf16.msra.mxu0 %v17973_v49  ;;  %2542 = vmatpush1.bf16.msra.mxu1 %v17977_v54  ;;  %v557_v54 = vld [vmem:[#allocation2 + $0x3a8] sm:$0xff] }
 0x11b   : > { %2457 = vmatprep.subr.bf16.mxu0 %v17979_v55  ;;  %2543 = vmatprep.subr.bf16.mxu1 %v17982_v57  ;;  %v556_v57 = vld [vmem:[#allocation2 + $0x3a0] sm:$0xff]  ;;  %v553_v55 = vld [vmem:[#allocation2 + $0x388] sm:$0xff] }
 0x11c   : > { %v18015_v0 = vcombine.high %v552_v48, %v556_v57  ;;  %v18018_v1 = vcombine.high %v553_v55, %v557_v54  ;;  %v18021_v16 = vcombine.low %v552_v48, %v556_v57  ;;  %v18025_v25 = vcombine.low %v553_v55, %v557_v54 }
 0x11e   : > { %2458 = vmatpush1.bf16.msra.mxu0 %v17985_v2  ;;  %2544 = vmatpush1.bf16.msra.mxu1 %v17989_v12  ;;  %19160 = vst [vmem:[#allocation42_spill] sm:$0xff] %v18015_v0  ;;  %19161 = vst [vmem:[#allocation43_spill] sm:$0xff] %v18018_v1  ;;  %v561_v12 = vld [vmem:[#allocation2 + $0x3c8] sm:$0xff] }
 0x11f   : > { %2459 = vmatprep.subr.bf16.mxu0 %v17991_v13  ;;  %2545 = vmatprep.subr.bf16.mxu1 %v17994_v15  ;;  %v560_v15 = vld [vmem:[#allocation2 + $0x3c0] sm:$0xff]  ;;  %v565_v2 = vld [vmem:[#allocation2 + $0x3e8] sm:$0xff]  ;;  %19162 = vst [vmem:[#allocation44_spill] sm:$0xff] %v18021_v16  ;;  %19163 = vst [vmem:[#allocation45_spill] sm:$0xff] %v18025_v25 }
 0x120   : > { %v564_v13 = vld [vmem:[#allocation2 + $0x3e0] sm:$0xff]  ;;  %v18030_v31 = vcombine.high %v561_v12, %v565_v2  ;;  %v18037_v54 = vcombine.low %v561_v12, %v565_v2 }
 0x121   : > { %v18027_v30 = vcombine.high %v560_v15, %v564_v13  ;;  %v18033_v57 = vcombine.low %v560_v15, %v564_v13  ;;  %v584_v15 = vld [vmem:[#allocation2 + $0x480] sm:$0xff] }
 0x122   : > { %2460 = vmatpush1.bf16.msra.mxu0 %v17997_v32  ;;  %2546 = vmatpush1.bf16.msra.mxu1 %v18001_v41  ;;  %19165 = vst [vmem:[#allocation47_spill] sm:$0xff] %v18030_v31  ;;  %v569_v41 = vld [vmem:[#allocation2 + $0x408] sm:$0xff]  ;;  %19167 = vst [vmem:[#allocation49_spill] sm:$0xff] %v18037_v54 }
 0x123   : > { %2461 = vmatprep.subr.bf16.mxu0 %v18003_v46  ;;  %2547 = vmatprep.subr.bf16.mxu1 %v18006_v47  ;;  %19164 = vst [vmem:[#allocation46_spill] sm:$0xff] %v18027_v30  ;;  %v568_v47 = vld [vmem:[#allocation2 + $0x400] sm:$0xff]  ;;  %v573_v32 = vld [vmem:[#allocation2 + $0x428] sm:$0xff]  ;;  %19166 = vst [vmem:[#allocation48_spill] sm:$0xff] %v18033_v57 }
 0x124   : > { %v572_v46 = vld [vmem:[#allocation2 + $0x420] sm:$0xff]  ;;  %v18042_v48 = vcombine.high %v569_v41, %v573_v32  ;;  %v18052_v2 = vcombine.low %v569_v41, %v573_v32 }
 0x125   : > { %v18039_v55 = vcombine.high %v568_v47, %v572_v46  ;;  %v18048_v13 = vcombine.low %v568_v47, %v572_v46  ;;  %v592_v47 = vld [vmem:[#allocation2 + $0x4c0] sm:$0xff] }
 0x126   : > { %2462 = vmatpush1.bf16.msra.mxu0 %v18009_v58  ;;  %2548 = vmatpush1.bf16.msra.mxu1 %v18013_v63  ;;  %19169 = vst [vmem:[#allocation51_spill] sm:$0xff] %v18042_v48  ;;  %v18045_v63 = vld [vmem:[%s17905_s14] sm:$0xff]   ;;  %v577_v58 = vld [vmem:[#allocation2 + $0x448] sm:$0xff]  ;;  %19171 = vst [vmem:[#allocation53_spill] sm:$0xff] %v18052_v2 }
 0x127   : > { %2463 = vmatprep.subr.bf16.mxu0 %v18015_v0  ;;  %2549 = vmatprep.subr.bf16.mxu1 %v18018_v1  ;;  %19168 = vst [vmem:[#allocation50_spill] sm:$0xff] %v18039_v55  ;;  %v576_v1 = vld [vmem:[#allocation2 + $0x440] sm:$0xff]  ;;  %19170 = vst [vmem:[#allocation52_spill] sm:$0xff] %v18048_v13 }
 0x128   : > { %v580_v0 = vld [vmem:[#allocation2 + $0x460] sm:$0xff] }
 0x129   : > { %v18054_v12 = vcombine.high %v576_v1, %v580_v0  ;;  %v18062_v46 = vcombine.low %v576_v1, %v580_v0  ;;  %v596_v32 = vld [vmem:[#allocation2 + $0x4e0] sm:$0xff] }
 0x12a   : > { %2464 = vmatpush1.bf16.msra.mxu0 %v18021_v16  ;;  %2550 = vmatpush1.bf16.msra.mxu1 %v18025_v25  ;;  %v581_v16 = vld [vmem:[#allocation2 + $0x468] sm:$0xff]  ;;  %v600_v1 = vld [vmem:[#allocation2 + $0x500] sm:$0xff] }
 0x12b   : > { %2465 = vmatprep.subr.bf16.mxu0 %v18027_v30  ;;  %2551 = vmatprep.subr.bf16.mxu1 %v18030_v31  ;;  %19172 = vst [vmem:[#allocation54_spill] sm:$0xff] %v18054_v12  ;;  %v588_v31 = vld [vmem:[#allocation2 + $0x4a0] sm:$0xff]  ;;  %v585_v30 = vld [vmem:[#allocation2 + $0x488] sm:$0xff]  ;;  %v18057_v49 = vcombine.high %v577_v58, %v581_v16  ;;  %19174 = vst [vmem:[#allocation56_spill] sm:$0xff] %v18062_v46  ;;  %v18066_v41 = vcombine.low %v577_v58, %v581_v16 }
 0x12c   : > { %v589_v25 = vld [vmem:[#allocation2 + $0x4a8] sm:$0xff]  ;;  %v18076_v0 = vcombine.low %v584_v15, %v588_v31  ;;  %v604_v58 = vld [vmem:[#allocation2 + $0x520] sm:$0xff] }
 0x12d   : > { %19173 = vst [vmem:[#allocation55_spill] sm:$0xff] %v18057_v49  ;;  %19175 = vst [vmem:[#allocation57_spill] sm:$0xff] %v18066_v41  ;;  %v18080_v16 = vcombine.low %v585_v30, %v589_v25 }
 0x12e   : > { %2466 = vmatpush1.bf16.msra.mxu0 %v18033_v57  ;;  %2552 = vmatpush1.bf16.msra.mxu1 %v18037_v54  ;;  %v597_v54 = vld [vmem:[#allocation2 + $0x4e8] sm:$0xff]  ;;  %v18071_v57 = vcombine.high %v585_v30, %v589_v25  ;;  %19178 = vst [vmem:[#allocation60_spill] sm:$0xff] %v18076_v0  ;;  %v18094_v30 = vcombine.high %v600_v1, %v604_v58 }
 0x12f   : > { %2478 = vmatprep.subr.bf16.mxu0 %v18039_v55  ;;  %2564 = vmatprep.subr.bf16.mxu1 %v18042_v48  ;;  %v18068_v55 = vcombine.high %v584_v15, %v588_v31  ;;  %v593_v48 = vld [vmem:[#allocation2 + $0x4c8] sm:$0xff]  ;;  %19179 = vst [vmem:[#allocation61_spill] sm:$0xff] %v18080_v16  ;;  %v18088_v31 = vcombine.low %v592_v47, %v596_v32  ;;  %v608_v15 = vld [vmem:[#allocation2 + $0x540] sm:$0xff] }
 0x130   : > { %19177 = vst [vmem:[#allocation59_spill] sm:$0xff] %v18071_v57  ;;  %v18085_v40 = vcombine.high %v593_v48, %v597_v54  ;;  %v18092_v25 = vcombine.low %v593_v48, %v597_v54  ;;  %19184 = vst [vmem:[#allocation66_spill] sm:$0xff] %v18094_v30 }
 0x131   : > { %2468 = vmatmul.mubr.bf16.vlgmr.msra.gmra.mrb[0].mxu0 %v18045_v63  ;;  %2554 = vmatmul.mubr.bf16.vlgmr.msra.gmra.mrb[0].mxu1 %v18045_v63  ;;  %19176 = vst [vmem:[#allocation58_spill] sm:$0xff] %v18068_v55  ;;  %19182 = vst [vmem:[#allocation64_spill] sm:$0xff] %v18088_v31 }
 0x132   : > { %2479 = vmatpush1.bf16.msra.mxu0 %v18048_v13  ;;  %2565 = vmatpush1.bf16.msra.mxu1 %v18052_v2  ;;  %v19011_v13 = vmov 0   ;;  %v605_v2 = vld [vmem:[#allocation2 + $0x528] sm:$0xff]  ;;  %19181 = vst [vmem:[#allocation63_spill] sm:$0xff] %v18085_v40  ;;  %19183 = vst [vmem:[#allocation65_spill] sm:$0xff] %v18092_v25 }
 0x133   : > { %2480 = vmatprep.subr.bf16.mxu0 %v18054_v12  ;;  %2566 = vmatprep.subr.bf16.mxu1 %v18057_v49  ;;  %v18082_v49 = vcombine.high %v592_v47, %v596_v32  ;;  %v601_v12 = vld [vmem:[#allocation2 + $0x508] sm:$0xff]  ;;  %v18100_v47 = vcombine.low %v600_v1, %v604_v58  ;;  %v616_v32 = vld [vmem:[#allocation2 + $0x580] sm:$0xff] }
 0x134   : > { %2510 = vmatprep.mubr.bf16.mxu0 %v19011_v13  ;;  %2596 = vmatprep.mubr.bf16.mxu1 %v19011_v13  ;;  %v612_v13 = vld [vmem:[#allocation2 + $0x560] sm:$0xff]  ;;  %v18104_v54 = vcombine.low %v601_v12, %v605_v2 }
 0x135   : > { %19180 = vst [vmem:[#allocation62_spill] sm:$0xff] %v18082_v49  ;;  %19186 = vst [vmem:[#allocation68_spill] sm:$0xff] %v18100_v47  ;;  %v18106_v48 = vcombine.high %v608_v15, %v612_v13  ;;  %v18112_v1 = vcombine.low %v608_v15, %v612_v13  ;;  %v624_v58 = vld [vmem:[#allocation2 + $0x5c0] sm:$0xff]  ;;  %v442_v15 = vld [vmem:[#allocation2 + $0x10] sm:$0xff] }
 0x136   : > { %2481 = vmatpush1.bf16.msra.mxu0 %v18062_v46  ;;  %2567 = vmatpush1.bf16.msra.mxu1 %v18066_v41  ;;  %v613_v41 = vld [vmem:[#allocation2 + $0x568] sm:$0xff]  ;;  %19187 = vst [vmem:[#allocation69_spill] sm:$0xff] %v18104_v54 }
 0x137   : > { %2482 = vmatprep.subr.bf16.mxu0 %v18068_v55  ;;  %2568 = vmatprep.subr.bf16.mxu1 %v18071_v57  ;;  %v609_v55 = vld [vmem:[#allocation2 + $0x548] sm:$0xff]  ;;  %v18097_v57 = vcombine.high %v601_v12, %v605_v2  ;;  %19188 = vst [vmem:[#allocation70_spill] sm:$0xff] %v18106_v48  ;;  %19190 = vst [vmem:[#allocation72_spill] sm:$0xff] %v18112_v1 }
 0x138   : > { %v18116_v2 = vcombine.low %v609_v55, %v613_v41 }
 0x139   : > { %19185 = vst [vmem:[#allocation67_spill] sm:$0xff] %v18097_v57 }
 0x13a   : > { %2483 = vmatpush1.bf16.msra.mxu0 %v18076_v0  ;;  %2569 = vmatpush1.bf16.msra.mxu1 %v18080_v16  ;;  %v620_v0 = vld [vmem:[#allocation2 + $0x5a0] sm:$0xff]  ;;  %v621_v16 = vld [vmem:[#allocation2 + $0x5a8] sm:$0xff]  ;;  %19191 = vst [vmem:[#allocation73_spill] sm:$0xff] %v18116_v2 }
 0x13b   : > { %2484 = vmatprep.subr.bf16.mxu0 %v18082_v49  ;;  %2570 = vmatprep.subr.bf16.mxu1 %v18085_v40  ;;  %v617_v49 = vld [vmem:[#allocation2 + $0x588] sm:$0xff]  ;;  %v18109_v40 = vcombine.high %v609_v55, %v613_v41  ;;  %v18118_v12 = vcombine.high %v616_v32, %v620_v0  ;;  %v18125_v13 = vcombine.low %v616_v32, %v620_v0 }
 0x13c   : > { %v18129_v55 = vcombine.low %v617_v49, %v621_v16 }
 0x13d   : > { %19189 = vst [vmem:[#allocation71_spill] sm:$0xff] %v18109_v40  ;;  %19192 = vst [vmem:[#allocation74_spill] sm:$0xff] %v18118_v12 }
 0x13e   : > { %2485 = vmatpush1.bf16.msra.mxu0 %v18088_v31  ;;  %2571 = vmatpush1.bf16.msra.mxu1 %v18092_v25  ;;  %v628_v31 = vld [vmem:[#allocation2 + $0x5e0] sm:$0xff]  ;;  %v629_v25 = vld [vmem:[#allocation2 + $0x5e8] sm:$0xff]  ;;  %19194 = vst [vmem:[#allocation76_spill] sm:$0xff] %v18129_v55 }
 0x13f   : > { %2486 = vmatprep.subr.bf16.mxu0 %v18094_v30  ;;  %2572 = vmatprep.subr.bf16.mxu1 %v18097_v57  ;;  %v625_v30 = vld [vmem:[#allocation2 + $0x5c8] sm:$0xff]  ;;  %v18121_v57 = vcombine.high %v617_v49, %v621_v16  ;;  %v18131_v41 = vcombine.high %v624_v58, %v628_v31  ;;  %v18138_v32 = vcombine.low %v624_v58, %v628_v31  ;;  %v458_v58 = vld [vmem:[#allocation2 + $0x90] sm:$0xff] }
 0x140   : > { %v18134_v46 = vcombine.high %v625_v30, %v629_v25  ;;  %v18142_v49 = vcombine.low %v625_v30, %v629_v25 }
 0x141   : > { %19193 = vst [vmem:[#allocation75_spill] sm:$0xff] %v18121_v57  ;;  %19195 = vst [vmem:[#allocation77_spill] sm:$0xff] %v18131_v41 }
 0x142   : > { %2487 = vmatpush1.bf16.msra.mxu0 %v18100_v47  ;;  %2573 = vmatpush1.bf16.msra.mxu1 %v18104_v54  ;;  %v1421_v47 = vshll.u32 %v18045_v63, 16  ;;  %v446_v54 = vld [vmem:[#allocation2 + $0x30] sm:$0xff]  ;;  %19196 = vst [vmem:[#allocation78_spill] sm:$0xff] %v18134_v46  ;;  %19197 = vst [vmem:[#allocation79_spill] sm:$0xff] %v18142_v49 }
 0x143   : > { %2488 = vmatprep.subr.bf16.mxu0 %v18106_v48  ;;  %2574 = vmatprep.subr.bf16.mxu1 %v18109_v40  ;;  %v443_v48 = vld [vmem:[#allocation2 + $0x18] sm:$0xff]  ;;  %v18144_v16 = vcombine.high %v442_v15, %v446_v54  ;;  %v18152_v31 = vcombine.low %v442_v15, %v446_v54  ;;  %v466_v15 = vld [vmem:[#allocation2 + $0xd0] sm:$0xff] }
 0x144   : > { %v447_v40 = vld [vmem:[#allocation2 + $0x38] sm:$0xff]  ;;  %v1423_v0 = vrot.slane %v1421_v47, 1 }
 0x145   : > { %19198 = vst [vmem:[#allocation80_spill] sm:$0xff] %v18144_v16  ;;  %19200 = vst [vmem:[#allocation82_spill] sm:$0xff] %v18152_v31  ;;  %v18156_v25 = vcombine.low %v443_v48, %v447_v40 }
 0x146   : > { %2489 = vmatpush1.bf16.msra.mxu0 %v18112_v1  ;;  %2575 = vmatpush1.bf16.msra.mxu1 %v18116_v2  ;;  %v1419_v1 = vshrl.u32 %v18045_v63, 16  ;;  %v450_v2 = vld [vmem:[#allocation2 + $0x50] sm:$0xff]  ;;  %v18147_v63 = vcombine.high %v443_v48, %v447_v40 }
 0x147   : > { %2490 = vmatprep.subr.bf16.mxu0 %v18118_v12  ;;  %2576 = vmatprep.subr.bf16.mxu1 %v18121_v57  ;;  %v451_v57 = vld [vmem:[#allocation2 + $0x58] sm:$0xff]  ;;  %19201 = vst [vmem:[#allocation83_spill] sm:$0xff] %v18156_v25  ;;  %v18158_v30 = vcombine.high %v450_v2, %v454_v39  ;;  %v18166_v54 = vcombine.low %v450_v2, %v454_v39  ;;  %v474_v2 = vld [vmem:[#allocation2 + $0x110] sm:$0xff] }
 0x148   : > { %v455_v12 = vld [vmem:[#allocation2 + $0x78] sm:$0xff]  ;;  %19199 = vst [vmem:[#allocation81_spill] sm:$0xff] %v18147_v63  ;;  %v18149_v47 = vor.u32 %v1423_v0, %v1419_v1  ;;  %v470_v0 = vld [vmem:[#allocation2 + $0xf0] sm:$0xff] }
 0x149   : > { %19202 = vst [vmem:[#allocation84_spill] sm:$0xff] %v18158_v30  ;;  %v18161_v1 = vcombine.high %v451_v57, %v455_v12  ;;  %19204 = vst [vmem:[#allocation86_spill] sm:$0xff] %v18166_v54  ;;  %v18170_v40 = vcombine.low %v451_v57, %v455_v12  ;;  %v18186_v12 = vcombine.high %v466_v15, %v470_v0 }
 0x14a   : > { %2491 = vmatpush1.bf16.msra.mxu0 %v18125_v13  ;;  %2577 = vmatpush1.bf16.msra.mxu1 %v18129_v55  ;;  %v462_v55 = vld [vmem:[#allocation2 + $0xb0] sm:$0xff] }
 0x14b   : > { %2492 = vmatprep.subr.bf16.mxu0 %v18131_v41  ;;  %2578 = vmatprep.subr.bf16.mxu1 %v18134_v46  ;;  %v459_v41 = vld [vmem:[#allocation2 + $0x98] sm:$0xff]  ;;  %19203 = vst [vmem:[#allocation85_spill] sm:$0xff] %v18161_v1  ;;  %19205 = vst [vmem:[#allocation87_spill] sm:$0xff] %v18170_v40  ;;  %v18172_v48 = vcombine.high %v458_v58, %v462_v55  ;;  %v18180_v39 = vcombine.low %v458_v58, %v462_v55  ;;  %v482_v55 = vld [vmem:[#allocation2 + $0x150] sm:$0xff] }
 0x14c   : > { %v463_v46 = vld [vmem:[#allocation2 + $0xb8] sm:$0xff]  ;;  %19210 = vst [vmem:[#allocation92_spill] sm:$0xff] %v18186_v12  ;;  %v486_v58 = vld [vmem:[#allocation2 + $0x170] sm:$0xff] }
 0x14d   : > { %19206 = vst [vmem:[#allocation88_spill] sm:$0xff] %v18172_v48  ;;  %19208 = vst [vmem:[#allocation90_spill] sm:$0xff] %v18180_v39  ;;  %v18184_v57 = vcombine.low %v459_v41, %v463_v46 }
 0x14e   : > { %2493 = vmatpush1.bf16.msra.mxu0 %v18138_v32  ;;  %2579 = vmatpush1.bf16.msra.mxu1 %v18142_v49  ;;  %v18175_v49 = vcombine.high %v459_v41, %v463_v46 }
 0x14f   : > { %2607 = vmatprep.subr.bf16.mxu0 %v18144_v16  ;;  %2693 = vmatprep.subr.bf16.mxu1 %v18147_v63  ;;  %v467_v63 = vld [vmem:[#allocation2 + $0xd8] sm:$0xff]  ;;  %19209 = vst [vmem:[#allocation91_spill] sm:$0xff] %v18184_v57 }
 0x150   : > { %v471_v16 = vld [vmem:[#allocation2 + $0xf8] sm:$0xff]  ;;  %19207 = vst [vmem:[#allocation89_spill] sm:$0xff] %v18175_v49 }
 0x151   : > { %2511 = vmatmul.mubr.bf16.vlgmr.msra.gmra.mrb[0].mxu0 %v18149_v47  ;;  %2597 = vmatmul.mubr.bf16.vlgmr.msra.gmra.mrb[0].mxu1 %v18149_v47  ;;  %v18196_v46 = vcombine.low %v467_v63, %v471_v16 }
 0x152   : > { %2608 = vmatpush1.bf16.msra.mxu0 %v18152_v31  ;;  %2694 = vmatpush1.bf16.msra.mxu1 %v18156_v25  ;;  %v479_v25 = vld [vmem:[#allocation2 + $0x138] sm:$0xff]  ;;  %v18189_v31 = vcombine.high %v467_v63, %v471_v16  ;;  %v18210_v63 = vcombine.high %v482_v55, %v486_v58 }
 0x153   : > { %2609 = vmatprep.subr.bf16.mxu0 %v18158_v30  ;;  %2695 = vmatprep.subr.bf16.mxu1 %v18161_v1  ;;  %v478_v30 = vld [vmem:[#allocation2 + $0x130] sm:$0xff]  ;;  %v475_v1 = vld [vmem:[#allocation2 + $0x118] sm:$0xff]  ;;  %19213 = vst [vmem:[#allocation95_spill] sm:$0xff] %v18196_v46 }
 0x154   : > { %2639 = vmatprep.mubr.bf16.mxu0 %v17920_v56  ;;  %2725 = vmatprep.mubr.bf16.mxu1 %v17920_v56  ;;  %19211 = vst [vmem:[#allocation93_spill] sm:$0xff] %v18189_v31  ;;  %v18192_v56 = vcombine.low %v466_v15, %v470_v0  ;;  %v18198_v41 = vcombine.high %v474_v2, %v478_v30  ;;  %v490_v0 = vld [vmem:[#allocation2 + $0x190] sm:$0xff]  ;;  %19218 = vst [vmem:[#allocation100_spill] sm:$0xff] %v18210_v63 }
 0x155   : > { %v18204_v15 = vcombine.low %v474_v2, %v478_v30  ;;  %v18208_v16 = vcombine.low %v475_v1, %v479_v25  ;;  %v18216_v30 = vcombine.low %v482_v55, %v486_v58  ;;  %v498_v2 = vld [vmem:[#allocation2 + $0x1d0] sm:$0xff] }
 0x156   : > { %2610 = vmatpush1.bf16.msra.mxu0 %v18166_v54  ;;  %2696 = vmatpush1.bf16.msra.mxu1 %v18170_v40  ;;  %19212 = vst [vmem:[#allocation94_spill] sm:$0xff] %v18192_v56  ;;  %19214 = vst [vmem:[#allocation96_spill] sm:$0xff] %v18198_v41  ;;  %v487_v40 = vld [vmem:[#allocation2 + $0x178] sm:$0xff]  ;;  %v506_v58 = vld [vmem:[#allocation2 + $0x210] sm:$0xff] }
 0x157   : > { %2611 = vmatprep.subr.bf16.mxu0 %v18172_v48  ;;  %2697 = vmatprep.subr.bf16.mxu1 %v18175_v49  ;;  %v483_v48 = vld [vmem:[#allocation2 + $0x158] sm:$0xff]  ;;  %v18201_v49 = vcombine.high %v475_v1, %v479_v25  ;;  %19216 = vst [vmem:[#allocation98_spill] sm:$0xff] %v18204_v15  ;;  %19217 = vst [vmem:[#allocation99_spill] sm:$0xff] %v18208_v16  ;;  %v17204_v54 = vld [vmem:[%s17905_s14] sm:$0xff]  }
 0x158   : > { %19220 = vst [vmem:[#allocation102_spill] sm:$0xff] %v18216_v30  ;;  %v18220_v25 = vcombine.low %v483_v48, %v487_v40 }
 0x159   : > { %19215 = vst [vmem:[#allocation97_spill] sm:$0xff] %v18201_v49 }
 0x15a   : > { %2612 = vmatpush1.bf16.msra.mxu0 %v18180_v39  ;;  %2698 = vmatpush1.bf16.msra.mxu1 %v18184_v57  ;;  %v494_v39 = vld [vmem:[#allocation2 + $0x1b0] sm:$0xff]  ;;  %v495_v57 = vld [vmem:[#allocation2 + $0x1b8] sm:$0xff]  ;;  %19221 = vst [vmem:[#allocation103_spill] sm:$0xff] %v18220_v25 }
 0x15b   : > { %2613 = vmatprep.subr.bf16.mxu0 %v18186_v12  ;;  %2699 = vmatprep.subr.bf16.mxu1 %v18189_v31  ;;  %v491_v12 = vld [vmem:[#allocation2 + $0x198] sm:$0xff]  ;;  %v18213_v31 = vcombine.high %v483_v48, %v487_v40  ;;  %v18222_v1 = vcombine.high %v490_v0, %v494_v39  ;;  %v18228_v55 = vcombine.low %v490_v0, %v494_v39  ;;  %v514_v0 = vld [vmem:[#allocation2 + $0x250] sm:$0xff] }
 0x15c   : > { %v18232_v40 = vcombine.low %v491_v12, %v495_v57 }
 0x15d   : > { %19219 = vst [vmem:[#allocation101_spill] sm:$0xff] %v18213_v31  ;;  %19222 = vst [vmem:[#allocation104_spill] sm:$0xff] %v18222_v1 }
 0x15e   : > { %2614 = vmatpush1.bf16.msra.mxu0 %v18192_v56  ;;  %2700 = vmatpush1.bf16.msra.mxu1 %v18196_v46  ;;  %v502_v56 = vld [vmem:[#allocation2 + $0x1f0] sm:$0xff]  ;;  %v503_v46 = vld [vmem:[#allocation2 + $0x1f8] sm:$0xff]  ;;  %19224 = vst [vmem:[#allocation106_spill] sm:$0xff] %v18228_v55  ;;  %19225 = vst [vmem:[#allocation107_spill] sm:$0xff] %v18232_v40 }
 0x15f   : > { %2615 = vmatprep.subr.bf16.mxu0 %v18198_v41  ;;  %2701 = vmatprep.subr.bf16.mxu1 %v18201_v49  ;;  %v499_v41 = vld [vmem:[#allocation2 + $0x1d8] sm:$0xff]  ;;  %v18225_v49 = vcombine.high %v491_v12, %v495_v57  ;;  %v18234_v48 = vcombine.high %v498_v2, %v502_v56  ;;  %v18240_v39 = vcombine.low %v498_v2, %v502_v56  ;;  %v522_v2 = vld [vmem:[#allocation2 + $0x290] sm:$0xff] }
 0x160   : > { %v18244_v57 = vcombine.low %v499_v41, %v503_v46 }
 0x161   : > { %19223 = vst [vmem:[#allocation105_spill] sm:$0xff] %v18225_v49  ;;  %19226 = vst [vmem:[#allocation108_spill] sm:$0xff] %v18234_v48 }
 0x162   : > { %2616 = vmatpush1.bf16.msra.mxu0 %v18204_v15  ;;  %2702 = vmatpush1.bf16.msra.mxu1 %v18208_v16  ;;  %v510_v15 = vld [vmem:[#allocation2 + $0x230] sm:$0xff]  ;;  %v511_v16 = vld [vmem:[#allocation2 + $0x238] sm:$0xff]  ;;  %19228 = vst [vmem:[#allocation110_spill] sm:$0xff] %v18240_v39  ;;  %19229 = vst [vmem:[#allocation111_spill] sm:$0xff] %v18244_v57 }
 0x163   : > { %2617 = vmatprep.subr.bf16.mxu0 %v18210_v63  ;;  %2703 = vmatprep.subr.bf16.mxu1 %v18213_v31  ;;  %v507_v63 = vld [vmem:[#allocation2 + $0x218] sm:$0xff]  ;;  %v18237_v31 = vcombine.high %v499_v41, %v503_v46  ;;  %v18246_v12 = vcombine.high %v506_v58, %v510_v15  ;;  %v18252_v56 = vcombine.low %v506_v58, %v510_v15  ;;  %v530_v58 = vld [vmem:[#allocation2 + $0x2d0] sm:$0xff] }
 0x164   : > { %v18256_v46 = vcombine.low %v507_v63, %v511_v16 }
 0x165   : > { %19227 = vst [vmem:[#allocation109_spill] sm:$0xff] %v18237_v31  ;;  %19230 = vst [vmem:[#allocation112_spill] sm:$0xff] %v18246_v12 }
 0x166   : > { %2618 = vmatpush1.bf16.msra.mxu0 %v18216_v30  ;;  %2704 = vmatpush1.bf16.msra.mxu1 %v18220_v25  ;;  %v518_v30 = vld [vmem:[#allocation2 + $0x270] sm:$0xff]  ;;  %v519_v25 = vld [vmem:[#allocation2 + $0x278] sm:$0xff]  ;;  %19232 = vst [vmem:[#allocation114_spill] sm:$0xff] %v18252_v56  ;;  %19233 = vst [vmem:[#allocation115_spill] sm:$0xff] %v18256_v46 }
 0x167   : > { %2619 = vmatprep.subr.bf16.mxu0 %v18222_v1  ;;  %2705 = vmatprep.subr.bf16.mxu1 %v18225_v49  ;;  %v515_v1 = vld [vmem:[#allocation2 + $0x258] sm:$0xff]  ;;  %v18249_v49 = vcombine.high %v507_v63, %v511_v16  ;;  %v18258_v41 = vcombine.high %v514_v0, %v518_v30  ;;  %v18264_v15 = vcombine.low %v514_v0, %v518_v30  ;;  %v538_v0 = vld [vmem:[#allocation2 + $0x310] sm:$0xff] }
 0x168   : > { %v18268_v16 = vcombine.low %v515_v1, %v519_v25 }
 0x169   : > { %19231 = vst [vmem:[#allocation113_spill] sm:$0xff] %v18249_v49  ;;  %19234 = vst [vmem:[#allocation116_spill] sm:$0xff] %v18258_v41 }
 0x16a   : > { %2620 = vmatpush1.bf16.msra.mxu0 %v18228_v55  ;;  %2706 = vmatpush1.bf16.msra.mxu1 %v18232_v40  ;;  %v526_v55 = vld [vmem:[#allocation2 + $0x2b0] sm:$0xff]  ;;  %v527_v40 = vld [vmem:[#allocation2 + $0x2b8] sm:$0xff]  ;;  %19236 = vst [vmem:[#allocation118_spill] sm:$0xff] %v18264_v15  ;;  %19237 = vst [vmem:[#allocation119_spill] sm:$0xff] %v18268_v16 }
 0x16b   : > { %2621 = vmatprep.subr.bf16.mxu0 %v18234_v48  ;;  %2707 = vmatprep.subr.bf16.mxu1 %v18237_v31  ;;  %v523_v48 = vld [vmem:[#allocation2 + $0x298] sm:$0xff]  ;;  %v18261_v31 = vcombine.high %v515_v1, %v519_v25  ;;  %v18270_v63 = vcombine.high %v522_v2, %v526_v55  ;;  %v18276_v30 = vcombine.low %v522_v2, %v526_v55  ;;  %v546_v2 = vld [vmem:[#allocation2 + $0x350] sm:$0xff] }
 0x16c   : > { %v18280_v25 = vcombine.low %v523_v48, %v527_v40 }
 0x16d   : > { %19235 = vst [vmem:[#allocation117_spill] sm:$0xff] %v18261_v31  ;;  %19238 = vst [vmem:[#allocation120_spill] sm:$0xff] %v18270_v63 }
 0x16e   : > { %2622 = vmatpush1.bf16.msra.mxu0 %v18240_v39  ;;  %2708 = vmatpush1.bf16.msra.mxu1 %v18244_v57  ;;  %v534_v39 = vld [vmem:[#allocation2 + $0x2f0] sm:$0xff]  ;;  %v535_v57 = vld [vmem:[#allocation2 + $0x2f8] sm:$0xff]  ;;  %19240 = vst [vmem:[#allocation122_spill] sm:$0xff] %v18276_v30  ;;  %19241 = vst [vmem:[#allocation123_spill] sm:$0xff] %v18280_v25 }
 0x16f   : > { %2623 = vmatprep.subr.bf16.mxu0 %v18246_v12  ;;  %2709 = vmatprep.subr.bf16.mxu1 %v18249_v49  ;;  %v531_v12 = vld [vmem:[#allocation2 + $0x2d8] sm:$0xff]  ;;  %v18273_v49 = vcombine.high %v523_v48, %v527_v40  ;;  %v18282_v1 = vcombine.high %v530_v58, %v534_v39  ;;  %v18288_v55 = vcombine.low %v530_v58, %v534_v39  ;;  %v554_v58 = vld [vmem:[#allocation2 + $0x390] sm:$0xff] }
 0x170   : > { %v18292_v40 = vcombine.low %v531_v12, %v535_v57 }
 0x171   : > { %19239 = vst [vmem:[#allocation121_spill] sm:$0xff] %v18273_v49  ;;  %19242 = vst [vmem:[#allocation124_spill] sm:$0xff] %v18282_v1 }
 0x172   : > { %2624 = vmatpush1.bf16.msra.mxu0 %v18252_v56  ;;  %2710 = vmatpush1.bf16.msra.mxu1 %v18256_v46  ;;  %v542_v56 = vld [vmem:[#allocation2 + $0x330] sm:$0xff]  ;;  %v543_v46 = vld [vmem:[#allocation2 + $0x338] sm:$0xff]  ;;  %19244 = vst [vmem:[#allocation126_spill] sm:$0xff] %v18288_v55  ;;  %19245 = vst [vmem:[#allocation127_spill] sm:$0xff] %v18292_v40 }
 0x173   : > { %2625 = vmatprep.subr.bf16.mxu0 %v18258_v41  ;;  %2711 = vmatprep.subr.bf16.mxu1 %v18261_v31  ;;  %v539_v41 = vld [vmem:[#allocation2 + $0x318] sm:$0xff]  ;;  %v18285_v31 = vcombine.high %v531_v12, %v535_v57  ;;  %v18294_v48 = vcombine.high %v538_v0, %v542_v56  ;;  %v18300_v39 = vcombine.low %v538_v0, %v542_v56  ;;  %v562_v0 = vld [vmem:[#allocation2 + $0x3d0] sm:$0xff] }
 0x174   : > { %v18304_v57 = vcombine.low %v539_v41, %v543_v46 }
 0x175   : > { %19243 = vst [vmem:[#allocation125_spill] sm:$0xff] %v18285_v31  ;;  %19246 = vst [vmem:[#allocation128_spill] sm:$0xff] %v18294_v48 }
 0x176   : > { %2626 = vmatpush1.bf16.msra.mxu0 %v18264_v15  ;;  %2712 = vmatpush1.bf16.msra.mxu1 %v18268_v16  ;;  %v550_v15 = vld [vmem:[#allocation2 + $0x370] sm:$0xff]  ;;  %v551_v16 = vld [vmem:[#allocation2 + $0x378] sm:$0xff]  ;;  %19248 = vst [vmem:[#allocation130_spill] sm:$0xff] %v18300_v39  ;;  %19249 = vst [vmem:[#allocation131_spill] sm:$0xff] %v18304_v57 }
 0x177   : > { %2627 = vmatprep.subr.bf16.mxu0 %v18270_v63  ;;  %2713 = vmatprep.subr.bf16.mxu1 %v18273_v49  ;;  %v547_v63 = vld [vmem:[#allocation2 + $0x358] sm:$0xff]  ;;  %v18297_v49 = vcombine.high %v539_v41, %v543_v46  ;;  %v18306_v12 = vcombine.high %v546_v2, %v550_v15  ;;  %v18312_v56 = vcombine.low %v546_v2, %v550_v15  ;;  %v570_v2 = vld [vmem:[#allocation2 + $0x410] sm:$0xff] }
 0x178   : > { %v18316_v46 = vcombine.low %v547_v63, %v551_v16 }
 0x179   : > { %19247 = vst [vmem:[#allocation129_spill] sm:$0xff] %v18297_v49  ;;  %19250 = vst [vmem:[#allocation132_spill] sm:$0xff] %v18306_v12 }
 0x17a   : > { %2628 = vmatpush1.bf16.msra.mxu0 %v18276_v30  ;;  %2714 = vmatpush1.bf16.msra.mxu1 %v18280_v25  ;;  %v558_v30 = vld [vmem:[#allocation2 + $0x3b0] sm:$0xff]  ;;  %v559_v25 = vld [vmem:[#allocation2 + $0x3b8] sm:$0xff]  ;;  %19252 = vst [vmem:[#allocation134_spill] sm:$0xff] %v18312_v56  ;;  %19253 = vst [vmem:[#allocation135_spill] sm:$0xff] %v18316_v46 }
 0x17b   : > { %2629 = vmatprep.subr.bf16.mxu0 %v18282_v1  ;;  %2715 = vmatprep.subr.bf16.mxu1 %v18285_v31  ;;  %v555_v1 = vld [vmem:[#allocation2 + $0x398] sm:$0xff]  ;;  %v18309_v31 = vcombine.high %v547_v63, %v551_v16  ;;  %v18318_v41 = vcombine.high %v554_v58, %v558_v30  ;;  %v18324_v15 = vcombine.low %v554_v58, %v558_v30  ;;  %v578_v58 = vld [vmem:[#allocation2 + $0x450] sm:$0xff] }
 0x17c   : > { %v18328_v16 = vcombine.low %v555_v1, %v559_v25 }
 0x17d   : > { %19251 = vst [vmem:[#allocation133_spill] sm:$0xff] %v18309_v31  ;;  %19254 = vst [vmem:[#allocation136_spill] sm:$0xff] %v18318_v41 }
 0x17e   : > { %2630 = vmatpush1.bf16.msra.mxu0 %v18288_v55  ;;  %2716 = vmatpush1.bf16.msra.mxu1 %v18292_v40  ;;  %v566_v55 = vld [vmem:[#allocation2 + $0x3f0] sm:$0xff]  ;;  %v567_v40 = vld [vmem:[#allocation2 + $0x3f8] sm:$0xff]  ;;  %19256 = vst [vmem:[#allocation138_spill] sm:$0xff] %v18324_v15  ;;  %19257 = vst [vmem:[#allocation139_spill] sm:$0xff] %v18328_v16 }
 0x17f   : > { %2631 = vmatprep.subr.bf16.mxu0 %v18294_v48  ;;  %2717 = vmatprep.subr.bf16.mxu1 %v18297_v49  ;;  %v563_v48 = vld [vmem:[#allocation2 + $0x3d8] sm:$0xff]  ;;  %v18321_v49 = vcombine.high %v555_v1, %v559_v25  ;;  %v18330_v63 = vcombine.high %v562_v0, %v566_v55  ;;  %v18336_v30 = vcombine.low %v562_v0, %v566_v55  ;;  %v586_v0 = vld [vmem:[#allocation2 + $0x490] sm:$0xff] }
 0x180   : > { %v18340_v25 = vcombine.low %v563_v48, %v567_v40 }
 0x181   : > { %19255 = vst [vmem:[#allocation137_spill] sm:$0xff] %v18321_v49  ;;  %19258 = vst [vmem:[#allocation140_spill] sm:$0xff] %v18330_v63 }
 0x182   : > { %2632 = vmatpush1.bf16.msra.mxu0 %v18300_v39  ;;  %2718 = vmatpush1.bf16.msra.mxu1 %v18304_v57  ;;  %v574_v39 = vld [vmem:[#allocation2 + $0x430] sm:$0xff]  ;;  %v575_v57 = vld [vmem:[#allocation2 + $0x438] sm:$0xff]  ;;  %19260 = vst [vmem:[#allocation142_spill] sm:$0xff] %v18336_v30  ;;  %19261 = vst [vmem:[#allocation143_spill] sm:$0xff] %v18340_v25 }
 0x183   : > { %2633 = vmatprep.subr.bf16.mxu0 %v18306_v12  ;;  %2719 = vmatprep.subr.bf16.mxu1 %v18309_v31  ;;  %v571_v12 = vld [vmem:[#allocation2 + $0x418] sm:$0xff]  ;;  %v18333_v31 = vcombine.high %v563_v48, %v567_v40  ;;  %v18342_v1 = vcombine.high %v570_v2, %v574_v39  ;;  %v18348_v55 = vcombine.low %v570_v2, %v574_v39  ;;  %v594_v2 = vld [vmem:[#allocation2 + $0x4d0] sm:$0xff] }
 0x184   : > { %v18352_v40 = vcombine.low %v571_v12, %v575_v57 }
 0x185   : > { %19259 = vst [vmem:[#allocation141_spill] sm:$0xff] %v18333_v31  ;;  %19262 = vst [vmem:[#allocation144_spill] sm:$0xff] %v18342_v1 }
 0x186   : > { %2634 = vmatpush1.bf16.msra.mxu0 %v18312_v56  ;;  %2720 = vmatpush1.bf16.msra.mxu1 %v18316_v46  ;;  %v582_v56 = vld [vmem:[#allocation2 + $0x470] sm:$0xff]  ;;  %v583_v46 = vld [vmem:[#allocation2 + $0x478] sm:$0xff]  ;;  %19264 = vst [vmem:[#allocation146_spill] sm:$0xff] %v18348_v55  ;;  %19265 = vst [vmem:[#allocation147_spill] sm:$0xff] %v18352_v40 }
 0x187   : > { %2635 = vmatprep.subr.bf16.mxu0 %v18318_v41  ;;  %2721 = vmatprep.subr.bf16.mxu1 %v18321_v49  ;;  %v579_v41 = vld [vmem:[#allocation2 + $0x458] sm:$0xff]  ;;  %v18345_v49 = vcombine.high %v571_v12, %v575_v57  ;;  %v18354_v48 = vcombine.high %v578_v58, %v582_v56  ;;  %v18361_v39 = vcombine.low %v578_v58, %v582_v56  ;;  %v602_v56 = vld [vmem:[#allocation2 + $0x510] sm:$0xff] }
 0x188   : > { %v18365_v57 = vcombine.low %v579_v41, %v583_v46  ;;  %v606_v58 = vld [vmem:[#allocation2 + $0x530] sm:$0xff] }
 0x189   : > { %19263 = vst [vmem:[#allocation145_spill] sm:$0xff] %v18345_v49  ;;  %19266 = vst [vmem:[#allocation148_spill] sm:$0xff] %v18354_v48 }
 0x18a   : > { %2636 = vmatpush1.bf16.msra.mxu0 %v18324_v15  ;;  %2722 = vmatpush1.bf16.msra.mxu1 %v18328_v16  ;;  %v590_v15 = vld [vmem:[#allocation2 + $0x4b0] sm:$0xff]  ;;  %v591_v16 = vld [vmem:[#allocation2 + $0x4b8] sm:$0xff]  ;;  %19268 = vst [vmem:[#allocation150_spill] sm:$0xff] %v18361_v39  ;;  %19269 = vst [vmem:[#allocation151_spill] sm:$0xff] %v18365_v57 }
 0x18b   : > { %2637 = vmatprep.subr.bf16.mxu0 %v18330_v63  ;;  %2723 = vmatprep.subr.bf16.mxu1 %v18333_v31  ;;  %v587_v63 = vld [vmem:[#allocation2 + $0x498] sm:$0xff]  ;;  %v18357_v31 = vcombine.high %v579_v41, %v583_v46  ;;  %v18367_v12 = vcombine.high %v586_v0, %v590_v15 }
 0x18c   : > { %v18379_v46 = vcombine.low %v587_v63, %v591_v16 }
 0x18d   : > { %19267 = vst [vmem:[#allocation149_spill] sm:$0xff] %v18357_v31  ;;  %19270 = vst [vmem:[#allocation152_spill] sm:$0xff] %v18367_v12 }
 0x18e   : > { %2638 = vmatpush1.bf16.msra.mxu0 %v18336_v30  ;;  %2724 = vmatpush1.bf16.msra.mxu1 %v18340_v25  ;;  %v598_v25 = vld [vmem:[#allocation2 + $0x4f0] sm:$0xff]  ;;  %v18370_v30 = vcombine.high %v587_v63, %v591_v16  ;;  %19274 = vst [vmem:[#allocation155_spill] sm:$0xff] %v18379_v46  ;;  %v18393_v63 = vcombine.high %v602_v56, %v606_v58 }
 0x18f   : > { %2650 = vmatprep.subr.bf16.mxu0 %v18342_v1  ;;  %2736 = vmatprep.subr.bf16.mxu1 %v18345_v49  ;;  %v595_v49 = vld [vmem:[#allocation2 + $0x4d8] sm:$0xff]  ;;  %v18381_v41 = vcombine.high %v594_v2, %v598_v25 }
 0x190   : > { %v599_v1 = vld [vmem:[#allocation2 + $0x4f8] sm:$0xff]  ;;  %19271 = vst [vmem:[#allocation153_spill] sm:$0xff] %v18370_v30  ;;  %19279 = vst [vmem:[#allocation160_spill] sm:$0xff] %v18393_v63 }
 0x191   : > { %2640 = vmatmul.mubr.bf16.vlgmr.msra.gmra.mrb[4].mxu0 %v17204_v54  ;;  %2726 = vmatmul.mubr.bf16.vlgmr.msra.gmra.mrb[4].mxu1 %v17204_v54  ;;  %v18375_v54 = vcombine.low %v586_v0, %v590_v15  ;;  %19275 = vst [vmem:[#allocation156_spill] sm:$0xff] %v18381_v41  ;;  %v18387_v15 = vcombine.low %v594_v2, %v598_v25  ;;  %v610_v0 = vld [vmem:[#allocation2 + $0x550] sm:$0xff] }
 0x192   : > { %2651 = vmatpush1.bf16.msra.mxu0 %v18348_v55  ;;  %2737 = vmatpush1.bf16.msra.mxu1 %v18352_v40  ;;  %v19272_v55 = vmov 0   ;;  %v18384_v40 = vcombine.high %v595_v49, %v599_v1  ;;  %v18391_v16 = vcombine.low %v595_v49, %v599_v1  ;;  %v18399_v25 = vcombine.low %v602_v56, %v606_v58  ;;  %v618_v2 = vld [vmem:[#allocation2 + $0x590] sm:$0xff] }
 0x193   : > { %2652 = vmatprep.subr.bf16.mxu0 %v18354_v48  ;;  %2738 = vmatprep.subr.bf16.mxu1 %v18357_v31  ;;  %19273 = vst [vmem:[#allocation154_spill] sm:$0xff] %v18375_v54  ;;  %v603_v31 = vld [vmem:[#allocation2 + $0x518] sm:$0xff]  ;;  %19277 = vst [vmem:[#allocation158_spill] sm:$0xff] %v18387_v15  ;;  %v626_v58 = vld [vmem:[#allocation2 + $0x5d0] sm:$0xff] }
 0x194   : > { %2682 = vmatprep.mubr.bf16.mxu0 %v19272_v55  ;;  %2768 = vmatprep.mubr.bf16.mxu1 %v19272_v55  ;;  %v607_v48 = vld [vmem:[#allocation2 + $0x538] sm:$0xff]  ;;  %19276 = vst [vmem:[#allocation157_spill] sm:$0xff] %v18384_v40  ;;  %19278 = vst [vmem:[#allocation159_spill] sm:$0xff] %v18391_v16 }
 0x195   : > { %v18403_v49 = vcombine.low %v603_v31, %v607_v48 }
 0x196   : > { %2653 = vmatpush1.bf16.msra.mxu0 %v18361_v39  ;;  %2739 = vmatpush1.bf16.msra.mxu1 %v18365_v57  ;;  %v614_v39 = vld [vmem:[#allocation2 + $0x570] sm:$0xff]  ;;  %v615_v57 = vld [vmem:[#allocation2 + $0x578] sm:$0xff] }
 0x197   : > { %2654 = vmatprep.subr.bf16.mxu0 %v18367_v12  ;;  %2740 = vmatprep.subr.bf16.mxu1 %v18370_v30  ;;  %v611_v12 = vld [vmem:[#allocation2 + $0x558] sm:$0xff]  ;;  %v18396_v30 = vcombine.high %v603_v31, %v607_v48  ;;  %v18405_v1 = vcombine.high %v610_v0, %v614_v39  ;;  %v18411_v56 = vcombine.low %v610_v0, %v614_v39 }
 0x198   : > { %v18415_v31 = vcombine.low %v611_v12, %v615_v57 }
 0x199   : > { %19280 = vst [vmem:[#allocation161_spill] sm:$0xff] %v18396_v30 }
 0x19a   : > { %2655 = vmatpush1.bf16.msra.mxu0 %v18375_v54  ;;  %2741 = vmatpush1.bf16.msra.mxu1 %v18379_v46  ;;  %v622_v54 = vld [vmem:[#allocation2 + $0x5b0] sm:$0xff]  ;;  %v623_v46 = vld [vmem:[#allocation2 + $0x5b8] sm:$0xff] }
 0x19b   : > { %2656 = vmatprep.subr.bf16.mxu0 %v18381_v41  ;;  %2742 = vmatprep.subr.bf16.mxu1 %v18384_v40  ;;  %v619_v41 = vld [vmem:[#allocation2 + $0x598] sm:$0xff]  ;;  %v18408_v40 = vcombine.high %v611_v12, %v615_v57  ;;  %v18417_v48 = vcombine.high %v618_v2, %v622_v54  ;;  %v18423_v39 = vcombine.low %v618_v2, %v622_v54 }
 0x19c   : > { %v18427_v0 = vcombine.low %v619_v41, %v623_v46  ;;  %v19326_v2 = vld [vmem:[#allocation70_spill] sm:$0xff] }
 0x19d   : > { %19281 = vst [vmem:[#allocation162_spill] sm:$0xff] %v18408_v40 }
 0x19e   : > { %2657 = vmatpush1.bf16.msra.mxu0 %v18387_v15  ;;  %2743 = vmatpush1.bf16.msra.mxu1 %v18391_v16  ;;  %v630_v15 = vld [vmem:[#allocation2 + $0x5f0] sm:$0xff]  ;;  %v631_v16 = vld [vmem:[#allocation2 + $0x5f8] sm:$0xff] }
 0x19f   : > { %2658 = vmatprep.subr.bf16.mxu0 %v18393_v63  ;;  %2744 = vmatprep.subr.bf16.mxu1 %v18396_v30  ;;  %v627_v63 = vld [vmem:[#allocation2 + $0x5d8] sm:$0xff]  ;;  %v18420_v30 = vcombine.high %v619_v41, %v623_v46  ;;  %v18429_v57 = vcombine.high %v626_v58, %v630_v15  ;;  %v19321_v46 = vld [vmem:[#allocation65_spill] sm:$0xff] }
 0x1a0   : > { %v18432_v12 = vcombine.high %v627_v63, %v631_v16  ;;  %v18439_v54 = vcombine.low %v627_v63, %v631_v16  ;;  %v19322_v41 = vld [vmem:[#allocation66_spill] sm:$0xff]  ;;  %v19324_v16 = vld [vmem:[#allocation68_spill] sm:$0xff]  ;;  %v19325_v63 = vld [vmem:[#allocation69_spill] sm:$0xff] }
 0x1a2   : > { %2659 = vmatpush1.bf16.msra.mxu0 %v18399_v25  ;;  %2745 = vmatpush1.bf16.msra.mxu1 %v18403_v49 }
 0x1a3   : > { %2660 = vmatprep.subr.bf16.mxu0 %v18405_v1  ;;  %2746 = vmatprep.subr.bf16.mxu1 %v18408_v40  ;;  %v18435_v40 = vcombine.low %v626_v58, %v630_v15  ;;  %v19323_v15 = vld [vmem:[#allocation67_spill] sm:$0xff] }
 0x1a4   : > { %v19327_v58 = vld [vmem:[#allocation71_spill] sm:$0xff] }
 0x1a6   : > { %2661 = vmatpush1.bf16.msra.mxu0 %v18411_v56  ;;  %2747 = vmatpush1.bf16.msra.mxu1 %v18415_v31 }
 0x1a7   : > { %2662 = vmatprep.subr.bf16.mxu0 %v18417_v48  ;;  %2748 = vmatprep.subr.bf16.mxu1 %v18420_v30 }
 0x1aa   : > { %2663 = vmatpush1.bf16.msra.mxu0 %v18423_v39  ;;  %2749 = vmatpush1.bf16.msra.mxu1 %v18427_v0 }
 0x1ab   : > { %2664 = vmatprep.subr.bf16.mxu0 %v18429_v57  ;;  %2750 = vmatprep.subr.bf16.mxu1 %v18432_v12 }
 0x1ae   : > { %2665 = vmatpush1.bf16.msra.mxu0 %v18435_v40  ;;  %2751 = vmatpush1.bf16.msra.mxu1 %v18439_v54 }
 0x1af   : > { %2803 = vmatprep.subr.bf16.mxu0 %v17838_v3  ;;  %2889 = vmatprep.subr.bf16.mxu1 %v17842_v8  ;;  %v19282_v3 = vld [vmem:[#allocation26_spill] sm:$0xff]  ;;  %v19284_v8 = vld [vmem:[#allocation28_spill] sm:$0xff] }
 0x1b1   : > { %2683 = vmatmul.mubr.bf16.vlgmr.msra.gmra.mrb[4].mxu0 %v18149_v47  ;;  %2769 = vmatmul.mubr.bf16.vlgmr.msra.gmra.mrb[4].mxu1 %v18149_v47 }
 0x1b2   : > { %2804 = vmatpush1.bf16.msra.mxu0 %v17840_v5  ;;  %2890 = vmatpush1.bf16.msra.mxu1 %v17844_v9  ;;  %v19283_v5 = vld [vmem:[#allocation27_spill] sm:$0xff]  ;;  %v19285_v9 = vld [vmem:[#allocation29_spill] sm:$0xff] }
 0x1b3   : > { %2805 = vmatprep.subr.bf16.mxu0 %v17846_v10  ;;  %2891 = vmatprep.subr.bf16.mxu1 %v17849_v14  ;;  %v19286_v10 = vld [vmem:[#allocation30_spill] sm:$0xff]  ;;  %v19287_v14 = vld [vmem:[#allocation31_spill] sm:$0xff] }
 0x1b4   : > { %2835 = vmatprep.mubr.bf16.mxu0 %v18149_v47  ;;  %2921 = vmatprep.mubr.bf16.mxu1 %v18149_v47 }
 0x1b6   : > { %2806 = vmatpush1.bf16.msra.mxu0 %v17853_v18  ;;  %2892 = vmatpush1.bf16.msra.mxu1 %v17857_v19  ;;  %v19288_v18 = vld [vmem:[#allocation32_spill] sm:$0xff]  ;;  %v19289_v19 = vld [vmem:[#allocation33_spill] sm:$0xff] }
 0x1b7   : > { %2807 = vmatprep.subr.bf16.mxu0 %v17859_v20  ;;  %2893 = vmatprep.subr.bf16.mxu1 %v17862_v21  ;;  %v19290_v20 = vld [vmem:[#allocation34_spill] sm:$0xff]  ;;  %v19291_v21 = vld [vmem:[#allocation35_spill] sm:$0xff] }
 0x1ba   : > { %2808 = vmatpush1.bf16.msra.mxu0 %v17865_v26  ;;  %2894 = vmatpush1.bf16.msra.mxu1 %v17870_v27  ;;  %v19292_v26 = vld [vmem:[#allocation36_spill] sm:$0xff]  ;;  %v19293_v27 = vld [vmem:[#allocation37_spill] sm:$0xff] }
 0x1bb   : > { %2809 = vmatprep.subr.bf16.mxu0 %v17872_v28  ;;  %2895 = vmatprep.subr.bf16.mxu1 %v17875_v29  ;;  %v19294_v28 = vld [vmem:[#allocation38_spill] sm:$0xff]  ;;  %v19295_v29 = vld [vmem:[#allocation39_spill] sm:$0xff] }
 0x1be   : > { %2810 = vmatpush1.bf16.msra.mxu0 %v17878_v34  ;;  %2896 = vmatpush1.bf16.msra.mxu1 %v17883_v35  ;;  %v19296_v34 = vld [vmem:[#allocation40_spill] sm:$0xff]  ;;  %v19297_v35 = vld [vmem:[#allocation41_spill] sm:$0xff] }
 0x1bf   : > { %2811 = vmatprep.subr.bf16.mxu0 %v17885_v36  ;;  %2897 = vmatprep.subr.bf16.mxu1 %v17888_v37  ;;  %v19298_v36 = vld [vmem:[#allocation42_spill] sm:$0xff]  ;;  %v19299_v37 = vld [vmem:[#allocation43_spill] sm:$0xff] }
 0x1c2   : > { %2812 = vmatpush1.bf16.msra.mxu0 %v17891_v42  ;;  %2898 = vmatpush1.bf16.msra.mxu1 %v17895_v43  ;;  %v19300_v42 = vld [vmem:[#allocation44_spill] sm:$0xff]  ;;  %v19301_v43 = vld [vmem:[#allocation45_spill] sm:$0xff] }
 0x1c3   : > { %2813 = vmatprep.subr.bf16.mxu0 %v17897_v44  ;;  %2899 = vmatprep.subr.bf16.mxu1 %v17900_v45  ;;  %v19302_v44 = vld [vmem:[#allocation46_spill] sm:$0xff]  ;;  %v19303_v45 = vld [vmem:[#allocation47_spill] sm:$0xff] }
 0x1c6   : > { %2814 = vmatpush1.bf16.msra.mxu0 %v17908_v50  ;;  %2900 = vmatpush1.bf16.msra.mxu1 %v17912_v51  ;;  %v19304_v50 = vld [vmem:[#allocation48_spill] sm:$0xff]  ;;  %v19305_v51 = vld [vmem:[#allocation49_spill] sm:$0xff] }
 0x1c7   : > { %2815 = vmatprep.subr.bf16.mxu0 %v17914_v52  ;;  %2901 = vmatprep.subr.bf16.mxu1 %v17917_v53  ;;  %v19306_v52 = vld [vmem:[#allocation50_spill] sm:$0xff]  ;;  %v19307_v53 = vld [vmem:[#allocation51_spill] sm:$0xff] }
 0x1ca   : > { %2816 = vmatpush1.bf16.msra.mxu0 %v17923_v59  ;;  %2902 = vmatpush1.bf16.msra.mxu1 %v17928_v60  ;;  %v18515_v59 = vld [vmem:[%s17905_s14 + $0x8] sm:$0xff]  }
 0x1cb   : > { %2817 = vmatprep.subr.bf16.mxu0 %v17930_v61  ;;  %2903 = vmatprep.subr.bf16.mxu1 %v17933_v62  ;;  %v19308_v60 = vld [vmem:[#allocation52_spill] sm:$0xff]  ;;  %v19309_v61 = vld [vmem:[#allocation53_spill] sm:$0xff]  ;;  %v19310_v62 = vld [vmem:[#allocation54_spill] sm:$0xff] }
 0x1ce   : > { %2818 = vmatpush1.bf16.msra.mxu0 %v17937_v4  ;;  %2904 = vmatpush1.bf16.msra.mxu1 %v17941_v6  ;;  %v19311_v4 = vld [vmem:[#allocation55_spill] sm:$0xff]  ;;  %v19312_v6 = vld [vmem:[#allocation56_spill] sm:$0xff] }
 0x1cf   : > { %2819 = vmatprep.subr.bf16.mxu0 %v17943_v7  ;;  %2905 = vmatprep.subr.bf16.mxu1 %v17946_v11  ;;  %v19313_v7 = vld [vmem:[#allocation57_spill] sm:$0xff]  ;;  %v19314_v11 = vld [vmem:[#allocation58_spill] sm:$0xff] }
 0x1d2   : > { %2820 = vmatpush1.bf16.msra.mxu0 %v17949_v17  ;;  %2906 = vmatpush1.bf16.msra.mxu1 %v17953_v22  ;;  %v19315_v17 = vld [vmem:[#allocation59_spill] sm:$0xff]  ;;  %v19316_v22 = vld [vmem:[#allocation60_spill] sm:$0xff] }
 0x1d3   : > { %2821 = vmatprep.subr.bf16.mxu0 %v17955_v23  ;;  %2907 = vmatprep.subr.bf16.mxu1 %v17958_v24  ;;  %v19317_v23 = vld [vmem:[#allocation61_spill] sm:$0xff]  ;;  %v19318_v24 = vld [vmem:[#allocation62_spill] sm:$0xff] }
 0x1d6   : > { %2822 = vmatpush1.bf16.msra.mxu0 %v17961_v33  ;;  %2908 = vmatpush1.bf16.msra.mxu1 %v17965_v38  ;;  %v19319_v33 = vld [vmem:[#allocation63_spill] sm:$0xff]  ;;  %v19320_v38 = vld [vmem:[#allocation64_spill] sm:$0xff] }
 0x1d7   : > { %2823 = vmatprep.subr.bf16.mxu0 %v19282_v3  ;;  %2909 = vmatprep.subr.bf16.mxu1 %v19283_v5  ;;  %v1429_v3 = vshll.u32 %v18515_v59, 16  ;;  %v19328_v5 = vld [vmem:[#allocation72_spill] sm:$0xff] }
 0x1da   : > { %2824 = vmatpush1.bf16.msra.mxu0 %v19284_v8  ;;  %2910 = vmatpush1.bf16.msra.mxu1 %v19285_v9  ;;  %v19329_v8 = vld [vmem:[#allocation73_spill] sm:$0xff]  ;;  %v19330_v9 = vld [vmem:[#allocation74_spill] sm:$0xff] }
 0x1db   : > { %2825 = vmatprep.subr.bf16.mxu0 %v19286_v10  ;;  %2911 = vmatprep.subr.bf16.mxu1 %v19287_v14  ;;  %v19331_v10 = vld [vmem:[#allocation75_spill] sm:$0xff]  ;;  %v1427_v14 = vshrl.u32 %v18515_v59, 16 }
 0x1de   : > { %2826 = vmatpush1.bf16.msra.mxu0 %v19288_v18  ;;  %2912 = vmatpush1.bf16.msra.mxu1 %v19289_v19  ;;  %v1431_v18 = vrot.slane %v1429_v3, 1  ;;  %v19332_v19 = vld [vmem:[#allocation76_spill] sm:$0xff] }
 0x1df   : > { %2827 = vmatprep.subr.bf16.mxu0 %v19290_v20  ;;  %2913 = vmatprep.subr.bf16.mxu1 %v19291_v21  ;;  %v19333_v20 = vld [vmem:[#allocation77_spill] sm:$0xff]  ;;  %v19334_v21 = vld [vmem:[#allocation78_spill] sm:$0xff] }
 0x1e2   : > { %2828 = vmatpush1.bf16.msra.mxu0 %v19292_v26  ;;  %2914 = vmatpush1.bf16.msra.mxu1 %v19293_v27  ;;  %v18551_v26 = vor.u32 %v1431_v18, %v1427_v14  ;;  %v19335_v27 = vld [vmem:[#allocation79_spill] sm:$0xff] }
 0x1e3   : > { %2829 = vmatprep.subr.bf16.mxu0 %v19294_v28  ;;  %2915 = vmatprep.subr.bf16.mxu1 %v19295_v29  ;;  %v19336_v28 = vld [vmem:[#allocation80_spill] sm:$0xff]  ;;  %v19337_v29 = vld [vmem:[#allocation81_spill] sm:$0xff] }
 0x1e6   : > { %2830 = vmatpush1.bf16.msra.mxu0 %v19296_v34  ;;  %2916 = vmatpush1.bf16.msra.mxu1 %v19297_v35  ;;  %v19339_v34 = vld [vmem:[#allocation83_spill] sm:$0xff]  ;;  %v19340_v35 = vld [vmem:[#allocation84_spill] sm:$0xff] }
 0x1e7   : > { %2831 = vmatprep.subr.bf16.mxu0 %v19298_v36  ;;  %2917 = vmatprep.subr.bf16.mxu1 %v19299_v37  ;;  %v19341_v36 = vld [vmem:[#allocation85_spill] sm:$0xff]  ;;  %v19342_v37 = vld [vmem:[#allocation86_spill] sm:$0xff] }
 0x1ea   : > { %2832 = vmatpush1.bf16.msra.mxu0 %v19300_v42  ;;  %2918 = vmatpush1.bf16.msra.mxu1 %v19301_v43  ;;  %v19343_v42 = vld [vmem:[#allocation87_spill] sm:$0xff]  ;;  %v19344_v43 = vld [vmem:[#allocation88_spill] sm:$0xff] }
 0x1eb   : > { %2833 = vmatprep.subr.bf16.mxu0 %v19302_v44  ;;  %2919 = vmatprep.subr.bf16.mxu1 %v19303_v45  ;;  %v19345_v44 = vld [vmem:[#allocation89_spill] sm:$0xff] }
 0x1ee   : > { %2834 = vmatpush1.bf16.msra.mxu0 %v19304_v50  ;;  %2920 = vmatpush1.bf16.msra.mxu1 %v19305_v51  ;;  %v19346_v50 = vld [vmem:[#allocation90_spill] sm:$0xff]  ;;  %v19347_v51 = vld [vmem:[#allocation91_spill] sm:$0xff] }
 0x1ef   : > { %2846 = vmatprep.subr.bf16.mxu0 %v19306_v52  ;;  %2932 = vmatprep.subr.bf16.mxu1 %v19307_v53  ;;  %v19348_v52 = vld [vmem:[#allocation92_spill] sm:$0xff]  ;;  %v19349_v53 = vld [vmem:[#allocation93_spill] sm:$0xff] }
 0x1f1   : > { %2836 = vmatmul.mubr.bf16.vlgmr.msra.gmra.mrb[8].mxu0 %v18515_v59  ;;  %2922 = vmatmul.mubr.bf16.vlgmr.msra.gmra.mrb[8].mxu1 %v18515_v59 }
 0x1f2   : > { %2847 = vmatpush1.bf16.msra.mxu0 %v19308_v60  ;;  %2933 = vmatpush1.bf16.msra.mxu1 %v19309_v61  ;;  %v18575_v60 = vld [vmem:[#allocation5] sm:$0xff]  ;;  %v19350_v61 = vld [vmem:[#allocation94_spill] sm:$0xff] }
 0x1f3   : > { %2848 = vmatprep.subr.bf16.mxu0 %v19310_v62  ;;  %2934 = vmatprep.subr.bf16.mxu1 %v19311_v4 }
 0x1f4   : > { %2878 = vmatprep.mubr.bf16.mxu0 %v19272_v55  ;;  %2964 = vmatprep.mubr.bf16.mxu1 %v19272_v55 }
 0x1f6   : > { %2849 = vmatpush1.bf16.msra.mxu0 %v19312_v6  ;;  %2935 = vmatpush1.bf16.msra.mxu1 %v19313_v7  ;;  %v19351_v6 = vld [vmem:[#allocation95_spill] sm:$0xff]  ;;  %v19352_v7 = vld [vmem:[#allocation96_spill] sm:$0xff] }
 0x1f7   : > { %2850 = vmatprep.subr.bf16.mxu0 %v19314_v11  ;;  %2936 = vmatprep.subr.bf16.mxu1 %v19315_v17  ;;  %v19353_v17 = vld [vmem:[#allocation97_spill] sm:$0xff] }
 0x1fa   : > { %2851 = vmatpush1.bf16.msra.mxu0 %v19316_v22  ;;  %2937 = vmatpush1.bf16.msra.mxu1 %v19317_v23  ;;  %v19354_v23 = vld [vmem:[#allocation98_spill] sm:$0xff] }
 0x1fb   : > { %2852 = vmatprep.subr.bf16.mxu0 %v19318_v24  ;;  %2938 = vmatprep.subr.bf16.mxu1 %v19319_v33 }
 0x1fe   : > { %2853 = vmatpush1.bf16.msra.mxu0 %v19320_v38  ;;  %2939 = vmatpush1.bf16.msra.mxu1 %v19321_v46  ;;  %v19355_v38 = vld [vmem:[#allocation99_spill] sm:$0xff] }
 0x1ff   : > { %2854 = vmatprep.subr.bf16.mxu0 %v19322_v41  ;;  %2940 = vmatprep.subr.bf16.mxu1 %v19323_v15  ;;  %v19356_v41 = vld [vmem:[#allocation100_spill] sm:$0xff] }
 0x202   : > { %2855 = vmatpush1.bf16.msra.mxu0 %v19324_v16  ;;  %2941 = vmatpush1.bf16.msra.mxu1 %v19325_v63  ;;  %v19357_v16 = vld [vmem:[#allocation101_spill] sm:$0xff] }
 0x203   : > { %2856 = vmatprep.subr.bf16.mxu0 %v19326_v2  ;;  %2942 = vmatprep.subr.bf16.mxu1 %v19327_v58 }
 0x206   : > { %2857 = vmatpush1.bf16.msra.mxu0 %v19328_v5  ;;  %2943 = vmatpush1.bf16.msra.mxu1 %v19329_v8 }
 0x207   : > { %2858 = vmatprep.subr.bf16.mxu0 %v19330_v9  ;;  %2944 = vmatprep.subr.bf16.mxu1 %v19331_v10  ;;  %v19358_v10 = vld [vmem:[#allocation102_spill] sm:$0xff] }
 0x20a   : > { %2859 = vmatpush1.bf16.msra.mxu0 %v18125_v13  ;;  %2945 = vmatpush1.bf16.msra.mxu1 %v19332_v19  ;;  %v19338_v13 = vld [vmem:[#allocation82_spill] sm:$0xff] }
 0x20b   : > { %2860 = vmatprep.subr.bf16.mxu0 %v19333_v20  ;;  %2946 = vmatprep.subr.bf16.mxu1 %v19334_v21  ;;  %v19359_v20 = vld [vmem:[#allocation103_spill] sm:$0xff] }
 0x20e   : > { %2861 = vmatpush1.bf16.msra.mxu0 %v18138_v32  ;;  %2947 = vmatpush1.bf16.msra.mxu1 %v19335_v27  ;;  %v1435_v32 = vlaneseq  ;;  %v19360_v27 = vld [vmem:[#allocation104_spill] sm:$0xff] }
 0x20f   : > { %2975 = vmatprep.subr.bf16.mxu0 %v19336_v28  ;;  %3061 = vmatprep.subr.bf16.mxu1 %v19337_v29 }
 0x210   : > { %v18569_v45 = vshrl.u32 %v1435_v32, 7 }
 0x211   : > { %2879 = vmatmul.mubr.bf16.vlgmr.msra.gmra.mrb[8].mxu0 %v18551_v26  ;;  %2965 = vmatmul.mubr.bf16.vlgmr.msra.gmra.mrb[8].mxu1 %v18551_v26 }
 0x212   : > { %2976 = vmatpush1.bf16.msra.mxu0 %v19338_v13  ;;  %3062 = vmatpush1.bf16.msra.mxu1 %v19339_v34  ;;  %v1445_v62 = vsub.s32 2, %v18569_v45  ;;  %v1441_v4 = vsub.s32 1, %v18569_v45  ;;  %v1449_v11 = vsub.s32 3, %v18569_v45  ;;  %v19361_v34 = vld [vmem:[#allocation105_spill] sm:$0xff] }
 0x213   : > { %2977 = vmatprep.subr.bf16.mxu0 %v19340_v35  ;;  %3063 = vmatprep.subr.bf16.mxu1 %v19341_v36 }
 0x214   : > { %3007 = vmatprep.mubr.bf16.mxu0 %v18149_v47  ;;  %3093 = vmatprep.mubr.bf16.mxu1 %v18149_v47  ;;  %v1437_v47 = vsub.s32 0, %v18569_v45  ;;  %v18594_v24 = vrot.slane %v18575_v60, %v1445_v62  ;;  %v18599_v33 = vrot.slane %v18575_v60, %v1441_v4  ;;  %v18605_v46 = vrot.slane %v18575_v60, %v1449_v11 }
 0x216   : > { %2978 = vmatpush1.bf16.msra.mxu0 %v19342_v37  ;;  %3064 = vmatpush1.bf16.msra.mxu1 %v19343_v42  ;;  %v18588_v22 = vrot.slane %v18575_v60, %v1437_v47 }
 0x217   : > { %2979 = vmatprep.subr.bf16.mxu0 %v19344_v43  ;;  %3065 = vmatprep.subr.bf16.mxu1 %v19345_v44 }
 0x21a   : > { %2980 = vmatpush1.bf16.msra.mxu0 %v19346_v50  ;;  %3066 = vmatpush1.bf16.msra.mxu1 %v19347_v51  ;;  %v19362_v50 = vld [vmem:[#allocation106_spill] sm:$0xff] }
 0x21b   : > { %2981 = vmatprep.subr.bf16.mxu0 %v19348_v52  ;;  %3067 = vmatprep.subr.bf16.mxu1 %v19349_v53 }
 0x21e   : > { %2982 = vmatpush1.bf16.msra.mxu0 %v19350_v61  ;;  %3068 = vmatpush1.bf16.msra.mxu1 %v19351_v6  ;;  %v19363_v61 = vld [vmem:[#allocation107_spill] sm:$0xff]  ;;  %v19364_v6 = vld [vmem:[#allocation108_spill] sm:$0xff] }
 0x21f   : > { %2983 = vmatprep.subr.bf16.mxu0 %v19352_v7  ;;  %3069 = vmatprep.subr.bf16.mxu1 %v19353_v17 }
 0x222   : > { %2984 = vmatpush1.bf16.msra.mxu0 %v19354_v23  ;;  %3070 = vmatpush1.bf16.msra.mxu1 %v19355_v38  ;;  %v19365_v23 = vld [vmem:[#allocation109_spill] sm:$0xff] }
 0x223   : > { %2985 = vmatprep.subr.bf16.mxu0 %v19356_v41  ;;  %3071 = vmatprep.subr.bf16.mxu1 %v19357_v16  ;;  %v19366_v41 = vld [vmem:[#allocation110_spill] sm:$0xff]  ;;  %v19368_v16 = vld [vmem:[#allocation112_spill] sm:$0xff] }
 0x224   : > { %v2512_v15 = vpop.f32.mrb[0].mxu0  ;;  %v2598_v2 = vpop.f32.mrb[0].mxu1 }
 0x225   : > { %v15305_v63 = vadd.f32 %v2512_v15, %v18588_v22  ;;  %v2514_v58 = vpop.f32.mrb[1].mxu0  ;;  %v15309_v3 = vadd.f32 %v2598_v2, %v18594_v24  ;;  %v2600_v8 = vpop.f32.mrb[1].mxu1  ;;  %v19367_v15 = vld [vmem:[#allocation111_spill] sm:$0xff]  ;;  %v19370_v2 = vld [vmem:[#allocation114_spill] sm:$0xff] }
 0x226   : > { %v15306_v5 = vadd.f32 %v2514_v58, %v18599_v33  ;;  %v2516_v9 = vpop.f32.mrb[2].mxu0  ;;  %2986 = vmatpush1.bf16.msra.mxu0 %v19358_v10  ;;  %v15310_v14 = vadd.f32 %v2600_v8, %v18605_v46  ;;  %v2602_v19 = vpop.f32.mrb[2].mxu1  ;;  %3072 = vmatpush1.bf16.msra.mxu1 %v19359_v20  ;;  %v19371_v58 = vld [vmem:[#allocation115_spill] sm:$0xff]  ;;  %v19374_v8 = vld [vmem:[#allocation118_spill] sm:$0xff]  ;;  %v19376_v10 = vld [vmem:[#allocation120_spill] sm:$0xff] }
 0x227   : > { %v15307_v18 = vadd.f32 %v2516_v9, %v18588_v22  ;;  %v2518_v21 = vpop.f32.mrb[3].mxu0  ;;  %2987 = vmatprep.subr.bf16.mxu0 %v19360_v27  ;;  %v15311_v28 = vadd.f32 %v2602_v19, %v18594_v24  ;;  %v2604_v13 = vpop.f32.mrb[3].mxu1  ;;  %3073 = vmatprep.subr.bf16.mxu1 %v19361_v34  ;;  %v2779_v35 = vmax.f32 %v15305_v63, 0.0  ;;  %v2781_v36 = vmax.f32 %v15309_v3, 0.0  ;;  %v19369_v63 = vld [vmem:[#allocation113_spill] sm:$0xff]  ;;  %v19372_v3 = vld [vmem:[#allocation116_spill] sm:$0xff] }
 0x228   : > { %v15308_v29 = vadd.f32 %v2518_v21, %v18599_v33  ;;  %v15312_v37 = vadd.f32 %v2604_v13, %v18605_v46  ;;  %v2780_v42 = vmax.f32 %v15306_v5, 0.0  ;;  %v2782_v51 = vmax.f32 %v15310_v14, 0.0  ;;  %v19373_v5 = vld [vmem:[#allocation117_spill] sm:$0xff]  ;;  %v19375_v9 = vld [vmem:[#allocation119_spill] sm:$0xff]  ;;  %v19380_v20 = vld [vmem:[#allocation124_spill] sm:$0xff] }
 0x229   : > { %v2787_v32 = vmax.f32 %v15307_v18, 0.0  ;;  %v2789_v43 = vmax.f32 %v15311_v28, 0.0  ;;  %v19377_v14 = vld [vmem:[#allocation121_spill] sm:$0xff]  ;;  %v19378_v18 = vld [vmem:[#allocation122_spill] sm:$0xff]  ;;  %v19379_v19 = vld [vmem:[#allocation123_spill] sm:$0xff] }
 0x22a   : > { %v2788_v44 = vmax.f32 %v15308_v29, 0.0  ;;  %2988 = vmatpush1.bf16.msra.mxu0 %v19362_v50  ;;  %v2790_v53 = vmax.f32 %v15312_v37, 0.0  ;;  %3074 = vmatpush1.bf16.msra.mxu1 %v19363_v61  ;;  %v19381_v21 = vld [vmem:[#allocation125_spill] sm:$0xff]  ;;  %v19382_v27 = vld [vmem:[#allocation126_spill] sm:$0xff]  ;;  %v19383_v28 = vld [vmem:[#allocation127_spill] sm:$0xff] }
 0x22b   : > { %v18622_v52 = vpack.c.bf16 %v2787_v32, %v2779_v35  ;;  %2989 = vmatprep.subr.bf16.mxu0 %v19364_v6  ;;  %v18626_v7 = vpack.c.bf16 %v2789_v43, %v2781_v36  ;;  %3075 = vmatprep.subr.bf16.mxu1 %v19365_v23  ;;  %v19384_v29 = vld [vmem:[#allocation128_spill] sm:$0xff]  ;;  %v19385_v13 = vld [vmem:[#allocation129_spill] sm:$0xff]  ;;  %v19386_v34 = vld [vmem:[#allocation130_spill] sm:$0xff] }
 0x22c   : > { %v18628_v17 = vpack.c.bf16 %v2788_v44, %v2780_v42  ;;  %v18631_v38 = vpack.c.bf16 %v2790_v53, %v2782_v51  ;;  %v19387_v35 = vld [vmem:[#allocation131_spill] sm:$0xff]  ;;  %v19388_v36 = vld [vmem:[#allocation132_spill] sm:$0xff]  ;;  %v19389_v32 = vld [vmem:[#allocation133_spill] sm:$0xff] }
 0x22d   : > { %v19390_v37 = vld [vmem:[#allocation134_spill] sm:$0xff]  ;;  %v19391_v42 = vld [vmem:[#allocation135_spill] sm:$0xff]  ;;  %v19392_v43 = vld [vmem:[#allocation136_spill] sm:$0xff] }
 0x22e   : > { %2990 = vmatpush1.bf16.msra.mxu0 %v19366_v41  ;;  %3076 = vmatpush1.bf16.msra.mxu1 %v19367_v15  ;;  %v19393_v44 = vld [vmem:[#allocation137_spill] sm:$0xff]  ;;  %v19394_v50 = vld [vmem:[#allocation138_spill] sm:$0xff]  ;;  %v19395_v51 = vld [vmem:[#allocation139_spill] sm:$0xff] }
 0x22f   : > { %2991 = vmatprep.subr.bf16.mxu0 %v19368_v16  ;;  %3077 = vmatprep.subr.bf16.mxu1 %v19369_v63  ;;  %v19396_v53 = vld [vmem:[#allocation140_spill] sm:$0xff]  ;;  %v19397_v61 = vld [vmem:[#allocation141_spill] sm:$0xff]  ;;  %v19398_v6 = vld [vmem:[#allocation142_spill] sm:$0xff] }
 0x230   : > { %v19399_v23 = vld [vmem:[#allocation143_spill] sm:$0xff]  ;;  %v19400_v41 = vld [vmem:[#allocation144_spill] sm:$0xff]  ;;  %v19401_v15 = vld [vmem:[#allocation145_spill] sm:$0xff] }
 0x231   : > { %v19402_v16 = vld [vmem:[#allocation146_spill] sm:$0xff]  ;;  %v19403_v63 = vld [vmem:[#allocation147_spill] sm:$0xff] }
 0x232   : > { %2992 = vmatpush1.bf16.msra.mxu0 %v19370_v2  ;;  %3078 = vmatpush1.bf16.msra.mxu1 %v19371_v58  ;;  %v19404_v2 = vld [vmem:[#allocation148_spill] sm:$0xff]  ;;  %v19405_v58 = vld [vmem:[#allocation149_spill] sm:$0xff] }
 0x233   : > { %2993 = vmatprep.subr.bf16.mxu0 %v19372_v3  ;;  %3079 = vmatprep.subr.bf16.mxu1 %v19373_v5  ;;  %v19406_v3 = vld [vmem:[#allocation150_spill] sm:$0xff]  ;;  %v19407_v5 = vld [vmem:[#allocation151_spill] sm:$0xff] }
 0x236   : > { %2994 = vmatpush1.bf16.msra.mxu0 %v19374_v8  ;;  %3080 = vmatpush1.bf16.msra.mxu1 %v19375_v9  ;;  %v19408_v8 = vld [vmem:[#allocation152_spill] sm:$0xff]  ;;  %v19409_v9 = vld [vmem:[#allocation153_spill] sm:$0xff] }
 0x237   : > { %2995 = vmatprep.subr.bf16.mxu0 %v19376_v10  ;;  %3081 = vmatprep.subr.bf16.mxu1 %v19377_v14  ;;  %v19410_v10 = vld [vmem:[#allocation154_spill] sm:$0xff]  ;;  %v19412_v14 = vld [vmem:[#allocation156_spill] sm:$0xff] }
 0x23a   : > { %2996 = vmatpush1.bf16.msra.mxu0 %v19378_v18  ;;  %3082 = vmatpush1.bf16.msra.mxu1 %v19379_v19  ;;  %v19413_v18 = vld [vmem:[#allocation157_spill] sm:$0xff]  ;;  %v19414_v19 = vld [vmem:[#allocation158_spill] sm:$0xff] }
 0x23b   : > { %2997 = vmatprep.subr.bf16.mxu0 %v19380_v20  ;;  %3083 = vmatprep.subr.bf16.mxu1 %v19381_v21  ;;  %v19415_v20 = vld [vmem:[#allocation159_spill] sm:$0xff]  ;;  %v19417_v21 = vld [vmem:[#allocation161_spill] sm:$0xff] }
 0x23e   : > { %2998 = vmatpush1.bf16.msra.mxu0 %v19382_v27  ;;  %3084 = vmatpush1.bf16.msra.mxu1 %v19383_v28  ;;  %v19418_v27 = vld [vmem:[#allocation162_spill] sm:$0xff]  ;;  %v15598_v28 = vld [vmem:[#allocation7 + $0x4] ss:$16 sps:$4 sm:$0xff]  }
 0x23f   : > { %2999 = vmatprep.subr.bf16.mxu0 %v19384_v29  ;;  %3085 = vmatprep.subr.bf16.mxu1 %v19385_v13  ;;  %v15601_v29 = vld [vmem:[#allocation7 + $0xc] ss:$16 sps:$4 sm:$0xff]   ;;  %v15622_v13 = vld [vmem:[#allocation7 + $0x84] ss:$16 sps:$4 sm:$0xff]  }
 0x242   : > { %3000 = vmatpush1.bf16.msra.mxu0 %v19386_v34  ;;  %3086 = vmatpush1.bf16.msra.mxu1 %v19387_v35  ;;  %v15625_v34 = vld [vmem:[#allocation7 + $0x8c] ss:$16 sps:$4 sm:$0xff]   ;;  %v1453_v35 = vsub.s32 4, %v18569_v45 }
 0x243   : > { %3001 = vmatprep.subr.bf16.mxu0 %v19388_v36  ;;  %3087 = vmatprep.subr.bf16.mxu1 %v19389_v32  ;;  %v15620_v36 = vld [vmem:[#allocation7 + $0x80] ss:$16 sps:$4 sm:$0xff]   ;;  %v1461_v32 = vsub.s32 6, %v18569_v45 }
 0x246   : > { %3002 = vmatpush1.bf16.msra.mxu0 %v19390_v37  ;;  %3088 = vmatpush1.bf16.msra.mxu1 %v19391_v42  ;;  %v1457_v37 = vsub.s32 5, %v18569_v45  ;;  %v15623_v42 = vld [vmem:[#allocation7 + $0x88] ss:$16 sps:$4 sm:$0xff]  }
 0x247   : > { %3003 = vmatprep.subr.bf16.mxu0 %v19392_v43  ;;  %3089 = vmatprep.subr.bf16.mxu1 %v19393_v44  ;;  %v1465_v43 = vsub.s32 7, %v18569_v45  ;;  %v15628_v44 = vld [vmem:[#allocation7 + $0xa4] ss:$16 sps:$4 sm:$0xff]  }
 0x24a   : > { %3004 = vmatpush1.bf16.msra.mxu0 %v19394_v50  ;;  %3090 = vmatpush1.bf16.msra.mxu1 %v19395_v51  ;;  %v15631_v50 = vld [vmem:[#allocation7 + $0xac] ss:$16 sps:$4 sm:$0xff]   ;;  %v15626_v51 = vld [vmem:[#allocation7 + $0xa0] ss:$16 sps:$4 sm:$0xff]  }
 0x24b   : > { %3005 = vmatprep.subr.bf16.mxu0 %v19396_v53  ;;  %3091 = vmatprep.subr.bf16.mxu1 %v19397_v61  ;;  %v18712_v53 = vrot.slane %v18575_v60, %v1453_v35  ;;  %v18715_v61 = vrot.slane %v18575_v60, %v1461_v32  ;;  %v15647_v32 = vld [vmem:[#allocation7 + $0x108] ss:$16 sps:$4 sm:$0xff]  }
 0x24e   : > { %3006 = vmatpush1.bf16.msra.mxu0 %v19398_v6  ;;  %3092 = vmatpush1.bf16.msra.mxu1 %v19399_v23  ;;  %v18718_v6 = vrot.slane %v18575_v60, %v1457_v37  ;;  %v18721_v23 = vrot.slane %v18575_v60, %v1465_v43  ;;  %v15652_v37 = vld [vmem:[#allocation7 + $0x124] ss:$16 sps:$4 sm:$0xff]   ;;  %v15650_v43 = vld [vmem:[#allocation7 + $0x120] ss:$16 sps:$4 sm:$0xff]  }
 0x24f   : > { %3018 = vmatprep.subr.bf16.mxu0 %v19400_v41  ;;  %3104 = vmatprep.subr.bf16.mxu1 %v19401_v15  ;;  %v15629_v41 = vld [vmem:[#allocation7 + $0xa8] ss:$16 sps:$4 sm:$0xff]   ;;  %v15634_v15 = vld [vmem:[#allocation7 + $0xc4] ss:$16 sps:$4 sm:$0xff]  }
 0x251   : > { %3008 = vmatmul.mubr.bf16.vlgmr.msra.gmra.mrb[12].mxu0 %v18515_v59  ;;  %3094 = vmatmul.mubr.bf16.vlgmr.msra.gmra.mrb[12].mxu1 %v18515_v59  ;;  %v19411_v59 = vld [vmem:[#allocation155_spill] sm:$0xff] }
 0x252   : > { %3019 = vmatpush1.bf16.msra.mxu0 %v19402_v16  ;;  %3105 = vmatpush1.bf16.msra.mxu1 %v19403_v63  ;;  %v15637_v16 = vld [vmem:[#allocation7 + $0xcc] ss:$16 sps:$4 sm:$0xff]  }
 0x253   : > { %3020 = vmatprep.subr.bf16.mxu0 %v19404_v2  ;;  %3106 = vmatprep.subr.bf16.mxu1 %v19405_v58  ;;  %v15632_v2 = vld [vmem:[#allocation7 + $0xc0] ss:$16 sps:$4 sm:$0xff]  }
 0x254   : > { %3050 = vmatprep.mubr.bf16.mxu0 %v19272_v55  ;;  %3136 = vmatprep.mubr.bf16.mxu1 %v19272_v55  ;;  %v19416_v55 = vld [vmem:[#allocation160_spill] sm:$0xff] }
 0x256   : > { %3021 = vmatpush1.bf16.msra.mxu0 %v19406_v3  ;;  %3107 = vmatpush1.bf16.msra.mxu1 %v19407_v5 }
 0x257   : > { %3022 = vmatprep.subr.bf16.mxu0 %v19408_v8  ;;  %3108 = vmatprep.subr.bf16.mxu1 %v19409_v9 }
 0x25a   : > { %3023 = vmatpush1.bf16.msra.mxu0 %v19410_v10  ;;  %3109 = vmatpush1.bf16.msra.mxu1 %v19411_v59 }
 0x25b   : > { %3024 = vmatprep.subr.bf16.mxu0 %v19412_v14  ;;  %3110 = vmatprep.subr.bf16.mxu1 %v19413_v18 }
 0x25e   : > { %3025 = vmatpush1.bf16.msra.mxu0 %v19414_v19  ;;  %3111 = vmatpush1.bf16.msra.mxu1 %v19415_v20  ;;  %v15635_v20 = vld [vmem:[#allocation7 + $0xc8] ss:$16 sps:$4 sm:$0xff]  }
 0x25f   : > { %3026 = vmatprep.subr.bf16.mxu0 %v19416_v55  ;;  %3112 = vmatprep.subr.bf16.mxu1 %v19417_v21  ;;  %v15640_v55 = vld [vmem:[#allocation7 + $0xe4] ss:$16 sps:$4 sm:$0xff]  }
 0x262   : > { %3027 = vmatpush1.bf16.msra.mxu0 %v18399_v25  ;;  %3113 = vmatpush1.bf16.msra.mxu1 %v18403_v49  ;;  %v15596_v25 = vld [vmem:[#allocation7] ss:$16 sps:$4 sm:$0xff]   ;;  %v15599_v49 = vld [vmem:[#allocation7 + $0x8] ss:$16 sps:$4 sm:$0xff]  }
 0x263   : > { %3028 = vmatprep.subr.bf16.mxu0 %v18405_v1  ;;  %3114 = vmatprep.subr.bf16.mxu1 %v19418_v27  ;;  %v15604_v1 = vld [vmem:[#allocation7 + $0x24] ss:$16 sps:$4 sm:$0xff]  }
 0x266   : > { %3029 = vmatpush1.bf16.msra.mxu0 %v18411_v56  ;;  %3115 = vmatpush1.bf16.msra.mxu1 %v18415_v31  ;;  %v15605_v56 = vld [vmem:[#allocation7 + $0x28] ss:$16 sps:$4 sm:$0xff]   ;;  %v15607_v31 = vld [vmem:[#allocation7 + $0x2c] ss:$16 sps:$4 sm:$0xff]  }
 0x267   : > { %3030 = vmatprep.subr.bf16.mxu0 %v18417_v48  ;;  %3116 = vmatprep.subr.bf16.mxu1 %v18420_v30  ;;  %v15602_v30 = vld [vmem:[#allocation7 + $0x20] ss:$16 sps:$4 sm:$0xff]   ;;  %v15610_v48 = vld [vmem:[#allocation7 + $0x44] ss:$16 sps:$4 sm:$0xff]  }
 0x26a   : > { %3031 = vmatpush1.bf16.msra.mxu0 %v18423_v39  ;;  %3117 = vmatpush1.bf16.msra.mxu1 %v18427_v0  ;;  %v15608_v39 = vld [vmem:[#allocation7 + $0x40] ss:$16 sps:$4 sm:$0xff]   ;;  %v15611_v0 = vld [vmem:[#allocation7 + $0x48] ss:$16 sps:$4 sm:$0xff]  }
 0x26b   : > { %3032 = vmatprep.subr.bf16.mxu0 %v18429_v57  ;;  %3118 = vmatprep.subr.bf16.mxu1 %v18432_v12  ;;  %v15616_v57 = vld [vmem:[#allocation7 + $0x64] ss:$16 sps:$4 sm:$0xff]   ;;  %v15614_v12 = vld [vmem:[#allocation7 + $0x60] ss:$16 sps:$4 sm:$0xff]  }
 0x26e   : > { %3033 = vmatpush1.bf16.msra.mxu0 %v18435_v40  ;;  %3119 = vmatpush1.bf16.msra.mxu1 %v18439_v54  ;;  %v15613_v40 = vld [vmem:[#allocation7 + $0x4c] ss:$16 sps:$4 sm:$0xff]  }
 0x26f   : > { %7096 = vmatprep.subr.bf16.mxu0 %v15598_v28  ;;  %7612 = vmatprep.subr.bf16.mxu1 %v15601_v29  ;;  %v15619_v54 = vld [vmem:[#allocation7 + $0x6c] ss:$16 sps:$4 sm:$0xff]  }
 0x271   : > { %3051 = vmatmul.mubr.bf16.vlgmr.msra.gmra.mrb[12].mxu0 %v18551_v26  ;;  %3137 = vmatmul.mubr.bf16.vlgmr.msra.gmra.mrb[12].mxu1 %v18551_v26  ;;  %v15617_v26 = vld [vmem:[#allocation7 + $0x68] ss:$16 sps:$4 sm:$0xff]  }
 0x272   : > { %7097 = vmatpush1.bf16.msra.mxu0 %v15596_v25  ;;  %7128 = vmatprep.mubr.bf16.mxu0 %v18628_v17  ;;  %v15643_v25 = vld [vmem:[#allocation7 + $0xec] ss:$16 sps:$4 sm:$0xff]  }
 0x273   : > { %7613 = vmatpush1.bf16.msra.mxu1 %v15599_v49  ;;  %7644 = vmatprep.mubr.bf16.mxu1 %v18628_v17 }
 0x274   : > { %7098 = vmatprep.subr.bf16.mxu0 %v15604_v1  ;;  %7614 = vmatprep.subr.bf16.mxu1 %v15607_v31  ;;  %v15638_v31 = vld [vmem:[#allocation7 + $0xe0] ss:$16 sps:$4 sm:$0xff]  }
 0x276   : > { %7099 = vmatpush1.bf16.msra.mxu0 %v15602_v30 }
 0x277   : > { %7615 = vmatpush1.bf16.msra.mxu1 %v15605_v56  ;;  %7100 = vmatprep.subr.bf16.mxu0 %v15610_v48 }
 0x278   : > { %7616 = vmatprep.subr.bf16.mxu1 %v15613_v40 }
 0x27a   : > { %7101 = vmatpush1.bf16.msra.mxu0 %v15608_v39 }
 0x27b   : > { %7617 = vmatpush1.bf16.msra.mxu1 %v15611_v0  ;;  %7102 = vmatprep.subr.bf16.mxu0 %v15616_v57 }
 0x27c   : > { %7618 = vmatprep.subr.bf16.mxu1 %v15619_v54  ;;  %v15646_v54 = vld [vmem:[#allocation7 + $0x104] ss:$16 sps:$4 sm:$0xff]  }
 0x27e   : > { %7103 = vmatpush1.bf16.msra.mxu0 %v15614_v12  ;;  %v15641_v12 = vld [vmem:[#allocation7 + $0xe8] ss:$16 sps:$4 sm:$0xff]  }
 0x27f   : > { %7619 = vmatpush1.bf16.msra.mxu1 %v15617_v26  ;;  %7104 = vmatprep.subr.bf16.mxu0 %v15622_v13 }
 0x280   : > { %7620 = vmatprep.subr.bf16.mxu1 %v15625_v34  ;;  %v15649_v34 = vld [vmem:[#allocation7 + $0x10c] ss:$16 sps:$4 sm:$0xff]  }
 0x282   : > { %7105 = vmatpush1.bf16.msra.mxu0 %v15620_v36  ;;  %v15644_v36 = vld [vmem:[#allocation7 + $0x100] ss:$16 sps:$4 sm:$0xff]  }
 0x283   : > { %7621 = vmatpush1.bf16.msra.mxu1 %v15623_v42  ;;  %7106 = vmatprep.subr.bf16.mxu0 %v15628_v44  ;;  %v15655_v42 = vld [vmem:[#allocation7 + $0x12c] ss:$16 sps:$4 sm:$0xff]   ;;  %v15653_v44 = vld [vmem:[#allocation7 + $0x128] ss:$16 sps:$4 sm:$0xff]  }
 0x284   : > { %v2684_v63 = vpop.f32.mrb[4].mxu0  ;;  %7622 = vmatprep.subr.bf16.mxu1 %v15631_v50  ;;  %v2770_v3 = vpop.f32.mrb[4].mxu1  ;;  %v15658_v50 = vld [vmem:[#allocation7 + $0x144] ss:$16 sps:$4 sm:$0xff]  }
 0x285   : > { %v15313_v58 = vadd.f32 %v2684_v63, %v18712_v53  ;;  %v2686_v5 = vpop.f32.mrb[5].mxu0  ;;  %v15317_v8 = vadd.f32 %v2770_v3, %v18715_v61  ;;  %v2772_v10 = vpop.f32.mrb[5].mxu1  ;;  %v15662_v63 = vld [vmem:[#allocation7 + $0x160] ss:$16 sps:$4 sm:$0xff]   ;;  %v15670_v3 = vld [vmem:[#allocation7 + $0x184] ss:$16 sps:$4 sm:$0xff]  }
 0x286   : > { %v15314_v9 = vadd.f32 %v2686_v5, %v18718_v6  ;;  %v2688_v59 = vpop.f32.mrb[6].mxu0  ;;  %7107 = vmatpush1.bf16.msra.mxu0 %v15626_v51  ;;  %v15318_v60 = vadd.f32 %v2772_v10, %v18721_v23  ;;  %v2774_v18 = vpop.f32.mrb[6].mxu1  ;;  %v15656_v51 = vld [vmem:[#allocation7 + $0x140] ss:$16 sps:$4 sm:$0xff]   ;;  %v15676_v10 = vld [vmem:[#allocation7 + $0x1a4] ss:$16 sps:$4 sm:$0xff]  }
 0x287   : > { %v15315_v14 = vadd.f32 %v2688_v59, %v18712_v53  ;;  %7623 = vmatpush1.bf16.msra.mxu1 %v15629_v41  ;;  %v2690_v19 = vpop.f32.mrb[7].mxu0  ;;  %7108 = vmatprep.subr.bf16.mxu0 %v15634_v15  ;;  %v2783_v21 = vmax.f32 %v15313_v58, 0.0  ;;  %v15319_v27 = vadd.f32 %v2774_v18, %v18715_v61  ;;  %v2776_v29 = vpop.f32.mrb[7].mxu1  ;;  %v2785_v49 = vmax.f32 %v15317_v8, 0.0  ;;  %v15661_v41 = vld [vmem:[#allocation7 + $0x14c] ss:$16 sps:$4 sm:$0xff]  }
 0x288   : > { %v15316_v28 = vadd.f32 %v2690_v19, %v18718_v6  ;;  %7624 = vmatprep.subr.bf16.mxu1 %v15637_v16  ;;  %v2784_v1 = vmax.f32 %v15314_v9, 0.0  ;;  %v15320_v56 = vadd.f32 %v2776_v29, %v18721_v23  ;;  %v2786_v39 = vmax.f32 %v15318_v60, 0.0  ;;  %v15659_v15 = vld [vmem:[#allocation7 + $0x148] ss:$16 sps:$4 sm:$0xff]   ;;  %v15664_v16 = vld [vmem:[#allocation7 + $0x164] ss:$16 sps:$4 sm:$0xff]  }
 0x289   : > { %v2791_v30 = vmax.f32 %v15315_v14, 0.0  ;;  %v2793_v48 = vmax.f32 %v15319_v27, 0.0  ;;  %v15665_v58 = vld [vmem:[#allocation7 + $0x168] ss:$16 sps:$4 sm:$0xff]   ;;  %v15668_v5 = vld [vmem:[#allocation7 + $0x180] ss:$16 sps:$4 sm:$0xff]  }
 0x28a   : > { %v2792_v40 = vmax.f32 %v15316_v28, 0.0  ;;  %7109 = vmatpush1.bf16.msra.mxu0 %v15632_v2  ;;  %v2794_v57 = vmax.f32 %v15320_v56, 0.0  ;;  %v15667_v2 = vld [vmem:[#allocation7 + $0x16c] ss:$16 sps:$4 sm:$0xff]   ;;  %v15671_v9 = vld [vmem:[#allocation7 + $0x188] ss:$16 sps:$4 sm:$0xff]  }
 0x28b   : > { %v18731_v0 = vpack.c.bf16 %v2791_v30, %v2783_v21  ;;  %7625 = vmatpush1.bf16.msra.mxu1 %v15635_v20  ;;  %7110 = vmatprep.subr.bf16.mxu0 %v15640_v55  ;;  %v18733_v26 = vpack.c.bf16 %v2793_v48, %v2785_v49  ;;  %v15673_v8 = vld [vmem:[#allocation7 + $0x18c] ss:$16 sps:$4 sm:$0xff]   ;;  %v15674_v59 = vld [vmem:[#allocation7 + $0x1a0] ss:$16 sps:$4 sm:$0xff]   ;;  %v15677_v14 = vld [vmem:[#allocation7 + $0x1a8] ss:$16 sps:$4 sm:$0xff]  }
 0x28c   : > { %v18735_v13 = vpack.c.bf16 %v2792_v40, %v2784_v1  ;;  %7626 = vmatprep.subr.bf16.mxu1 %v15643_v25  ;;  %v18737_v35 = vpack.c.bf16 %v2794_v57, %v2786_v39  ;;  %v15679_v60 = vld [vmem:[#allocation7 + $0x1ac] ss:$16 sps:$4 sm:$0xff]   ;;  %v15682_v18 = vld [vmem:[#allocation7 + $0x1c4] ss:$16 sps:$4 sm:$0xff]   ;;  %v15680_v19 = vld [vmem:[#allocation7 + $0x1c0] ss:$16 sps:$4 sm:$0xff]  }
 0x28d   : > { %v15685_v20 = vld [vmem:[#allocation7 + $0x1cc] ss:$16 sps:$4 sm:$0xff]   ;;  %v15683_v55 = vld [vmem:[#allocation7 + $0x1c8] ss:$16 sps:$4 sm:$0xff]   ;;  %v15688_v21 = vld [vmem:[#allocation7 + $0x1e4] ss:$16 sps:$4 sm:$0xff]  }
 0x28e   : > { %7111 = vmatpush1.bf16.msra.mxu0 %v15638_v31  ;;  %v15686_v27 = vld [vmem:[#allocation7 + $0x1e0] ss:$16 sps:$4 sm:$0xff]   ;;  %v15691_v28 = vld [vmem:[#allocation7 + $0x1ec] ss:$16 sps:$4 sm:$0xff]   ;;  %v15689_v29 = vld [vmem:[#allocation7 + $0x1e8] ss:$16 sps:$4 sm:$0xff]  }
 0x28f   : > { %7627 = vmatpush1.bf16.msra.mxu1 %v15641_v12  ;;  %7112 = vmatprep.subr.bf16.mxu0 %v15646_v54  ;;  %v15694_v25 = vld [vmem:[#allocation7 + $0x204] ss:$16 sps:$4 sm:$0xff]   ;;  %v15692_v49 = vld [vmem:[#allocation7 + $0x200] ss:$16 sps:$4 sm:$0xff]   ;;  %v15697_v1 = vld [vmem:[#allocation7 + $0x20c] ss:$16 sps:$4 sm:$0xff]  }
 0x290   : > { %7628 = vmatprep.subr.bf16.mxu1 %v15649_v34  ;;  %v15695_v30 = vld [vmem:[#allocation7 + $0x208] ss:$16 sps:$4 sm:$0xff]   ;;  %v15700_v56 = vld [vmem:[#allocation7 + $0x224] ss:$16 sps:$4 sm:$0xff]   ;;  %v15698_v31 = vld [vmem:[#allocation7 + $0x220] ss:$16 sps:$4 sm:$0xff]  }
 0x291   : > { %v15701_v48 = vld [vmem:[#allocation7 + $0x228] ss:$16 sps:$4 sm:$0xff]   ;;  %v15703_v40 = vld [vmem:[#allocation7 + $0x22c] ss:$16 sps:$4 sm:$0xff]   ;;  %v15706_v39 = vld [vmem:[#allocation7 + $0x244] ss:$16 sps:$4 sm:$0xff]  }
 0x292   : > { %7113 = vmatpush1.bf16.msra.mxu0 %v15644_v36  ;;  %v15709_v57 = vld [vmem:[#allocation7 + $0x24c] ss:$16 sps:$4 sm:$0xff]   ;;  %v15704_v12 = vld [vmem:[#allocation7 + $0x240] ss:$16 sps:$4 sm:$0xff]   ;;  %v15707_v54 = vld [vmem:[#allocation7 + $0x248] ss:$16 sps:$4 sm:$0xff]  }
 0x293   : > { %7629 = vmatpush1.bf16.msra.mxu1 %v15647_v32  ;;  %7114 = vmatprep.subr.bf16.mxu0 %v15652_v37  ;;  %v15712_v34 = vld [vmem:[#allocation7 + $0x264] ss:$16 sps:$4 sm:$0xff]   ;;  %v15710_v36 = vld [vmem:[#allocation7 + $0x260] ss:$16 sps:$4 sm:$0xff]   ;;  %v15715_v32 = vld [vmem:[#allocation7 + $0x26c] ss:$16 sps:$4 sm:$0xff]  }
 0x294   : > { %7630 = vmatprep.subr.bf16.mxu1 %v15655_v42  ;;  %v15713_v37 = vld [vmem:[#allocation7 + $0x268] ss:$16 sps:$4 sm:$0xff]   ;;  %v15718_v42 = vld [vmem:[#allocation7 + $0x284] ss:$16 sps:$4 sm:$0xff]  }
 0x296   : > { %7115 = vmatpush1.bf16.msra.mxu0 %v15650_v43  ;;  %v15716_v43 = vld [vmem:[#allocation7 + $0x280] ss:$16 sps:$4 sm:$0xff]  }
 0x297   : > { %7631 = vmatpush1.bf16.msra.mxu1 %v15653_v44  ;;  %7116 = vmatprep.subr.bf16.mxu0 %v15658_v50  ;;  %v15721_v44 = vld [vmem:[#allocation7 + $0x28c] ss:$16 sps:$4 sm:$0xff]   ;;  %v15719_v50 = vld [vmem:[#allocation7 + $0x288] ss:$16 sps:$4 sm:$0xff]  }
 0x298   : > { %7632 = vmatprep.subr.bf16.mxu1 %v15661_v41  ;;  %v15722_v41 = vld [vmem:[#allocation7 + $0x2a0] ss:$16 sps:$4 sm:$0xff]  }
 0x29a   : > { %7117 = vmatpush1.bf16.msra.mxu0 %v15656_v51  ;;  %v15724_v51 = vld [vmem:[#allocation7 + $0x2a4] ss:$16 sps:$4 sm:$0xff]  }
 0x29b   : > { %7633 = vmatpush1.bf16.msra.mxu1 %v15659_v15  ;;  %7118 = vmatprep.subr.bf16.mxu0 %v15664_v16  ;;  %v15727_v15 = vld [vmem:[#allocation7 + $0x2ac] ss:$16 sps:$4 sm:$0xff]   ;;  %v15725_v16 = vld [vmem:[#allocation7 + $0x2a8] ss:$16 sps:$4 sm:$0xff]  }
 0x29c   : > { %7634 = vmatprep.subr.bf16.mxu1 %v15667_v2  ;;  %v15733_v2 = vld [vmem:[#allocation7 + $0x2cc] ss:$16 sps:$4 sm:$0xff]  }
 0x29e   : > { %7119 = vmatpush1.bf16.msra.mxu0 %v15662_v63  ;;  %v15730_v63 = vld [vmem:[#allocation7 + $0x2c4] ss:$16 sps:$4 sm:$0xff]  }
 0x29f   : > { %7635 = vmatpush1.bf16.msra.mxu1 %v15665_v58  ;;  %7120 = vmatprep.subr.bf16.mxu0 %v15670_v3  ;;  %v15728_v58 = vld [vmem:[#allocation7 + $0x2c0] ss:$16 sps:$4 sm:$0xff]   ;;  %v15731_v3 = vld [vmem:[#allocation7 + $0x2c8] ss:$16 sps:$4 sm:$0xff]  }
 0x2a0   : > { %7636 = vmatprep.subr.bf16.mxu1 %v15673_v8  ;;  %v15739_v8 = vld [vmem:[#allocation7 + $0x2ec] ss:$16 sps:$4 sm:$0xff]  }
 0x2a2   : > { %7121 = vmatpush1.bf16.msra.mxu0 %v15668_v5  ;;  %v15736_v5 = vld [vmem:[#allocation7 + $0x2e4] ss:$16 sps:$4 sm:$0xff]  }
 0x2a3   : > { %7637 = vmatpush1.bf16.msra.mxu1 %v15671_v9  ;;  %7122 = vmatprep.subr.bf16.mxu0 %v15676_v10  ;;  %v15734_v9 = vld [vmem:[#allocation7 + $0x2e0] ss:$16 sps:$4 sm:$0xff]   ;;  %v15737_v10 = vld [vmem:[#allocation7 + $0x2e8] ss:$16 sps:$4 sm:$0xff]  }
 0x2a4   : > { %7638 = vmatprep.subr.bf16.mxu1 %v15679_v60  ;;  %v15745_v60 = vld [vmem:[#allocation7 + $0x30c] ss:$16 sps:$4 sm:$0xff]  }
 0x2a6   : > { %7123 = vmatpush1.bf16.msra.mxu0 %v15674_v59  ;;  %v15742_v59 = vld [vmem:[#allocation7 + $0x304] ss:$16 sps:$4 sm:$0xff]  }
 0x2a7   : > { %7639 = vmatpush1.bf16.msra.mxu1 %v15677_v14  ;;  %7124 = vmatprep.subr.bf16.mxu0 %v15682_v18  ;;  %v15740_v14 = vld [vmem:[#allocation7 + $0x300] ss:$16 sps:$4 sm:$0xff]   ;;  %v15743_v18 = vld [vmem:[#allocation7 + $0x308] ss:$16 sps:$4 sm:$0xff]  }
 0x2a8   : > { %7640 = vmatprep.subr.bf16.mxu1 %v15685_v20  ;;  %v15746_v20 = vld [vmem:[#allocation7 + $0x320] ss:$16 sps:$4 sm:$0xff]  }
 0x2aa   : > { %7125 = vmatpush1.bf16.msra.mxu0 %v15680_v19  ;;  %v15748_v19 = vld [vmem:[#allocation7 + $0x324] ss:$16 sps:$4 sm:$0xff]  }
 0x2ab   : > { %7641 = vmatpush1.bf16.msra.mxu1 %v15683_v55  ;;  %7126 = vmatprep.subr.bf16.mxu0 %v15688_v21  ;;  %v15751_v55 = vld [vmem:[#allocation7 + $0x32c] ss:$16 sps:$4 sm:$0xff]   ;;  %v15749_v21 = vld [vmem:[#allocation7 + $0x328] ss:$16 sps:$4 sm:$0xff]  }
 0x2ac   : > { %7642 = vmatprep.subr.bf16.mxu1 %v15691_v28  ;;  %v15752_v28 = vld [vmem:[#allocation7 + $0x340] ss:$16 sps:$4 sm:$0xff]  }
 0x2ae   : > { %7127 = vmatpush1.bf16.msra.mxu0 %v15686_v27  ;;  %v15754_v27 = vld [vmem:[#allocation7 + $0x344] ss:$16 sps:$4 sm:$0xff]  }
 0x2af   : > { %7643 = vmatpush1.bf16.msra.mxu1 %v15689_v29  ;;  %7139 = vmatprep.subr.bf16.mxu0 %v15694_v25  ;;  %v15757_v29 = vld [vmem:[#allocation7 + $0x34c] ss:$16 sps:$4 sm:$0xff]   ;;  %v15755_v25 = vld [vmem:[#allocation7 + $0x348] ss:$16 sps:$4 sm:$0xff]  }
 0x2b0   : > { %7655 = vmatprep.subr.bf16.mxu1 %v15697_v1  ;;  %v15758_v1 = vld [vmem:[#allocation7 + $0x360] ss:$16 sps:$4 sm:$0xff]  }
 0x2b1   : > { %7129 = vmatmul.mubr.bf16.vlgmr.msra.gmra.mrb[16].mxu0 %v18622_v52 }
 0x2b2   : > { %7645 = vmatmul.mubr.bf16.vlgmr.msra.gmra.mrb[16].mxu1 %v18622_v52  ;;  %7140 = vmatpush1.bf16.msra.mxu0 %v15692_v49  ;;  %v15760_v49 = vld [vmem:[#allocation7 + $0x364] ss:$16 sps:$4 sm:$0xff]  }
 0x2b3   : > { %7171 = vmatprep.mubr.bf16.mxu0 %v18631_v38  ;;  %7656 = vmatpush1.bf16.msra.mxu1 %v15695_v30  ;;  %v15763_v30 = vld [vmem:[#allocation7 + $0x36c] ss:$16 sps:$4 sm:$0xff]  }
 0x2b4   : > { %7687 = vmatprep.mubr.bf16.mxu1 %v18631_v38  ;;  %7141 = vmatprep.subr.bf16.mxu0 %v15700_v56  ;;  %v15761_v56 = vld [vmem:[#allocation7 + $0x368] ss:$16 sps:$4 sm:$0xff]  }
 0x2b5   : > { %7657 = vmatprep.subr.bf16.mxu1 %v15703_v40  ;;  %v15769_v40 = vld [vmem:[#allocation7 + $0x38c] ss:$16 sps:$4 sm:$0xff]  }
 0x2b6   : > { %7142 = vmatpush1.bf16.msra.mxu0 %v15698_v31  ;;  %v15766_v31 = vld [vmem:[#allocation7 + $0x384] ss:$16 sps:$4 sm:$0xff]  }
 0x2b7   : > { %7658 = vmatpush1.bf16.msra.mxu1 %v15701_v48  ;;  %7143 = vmatprep.subr.bf16.mxu0 %v15706_v39  ;;  %v15764_v48 = vld [vmem:[#allocation7 + $0x380] ss:$16 sps:$4 sm:$0xff]   ;;  %v15767_v39 = vld [vmem:[#allocation7 + $0x388] ss:$16 sps:$4 sm:$0xff]  }
 0x2b8   : > { %7659 = vmatprep.subr.bf16.mxu1 %v15709_v57  ;;  %v15772_v57 = vld [vmem:[#allocation7 + $0x3a4] ss:$16 sps:$4 sm:$0xff]  }
 0x2ba   : > { %7144 = vmatpush1.bf16.msra.mxu0 %v15704_v12  ;;  %v15775_v12 = vld [vmem:[#allocation7 + $0x3ac] ss:$16 sps:$4 sm:$0xff]  }
 0x2bb   : > { %7660 = vmatpush1.bf16.msra.mxu1 %v15707_v54  ;;  %7145 = vmatprep.subr.bf16.mxu0 %v15712_v34  ;;  %v15770_v54 = vld [vmem:[#allocation7 + $0x3a0] ss:$16 sps:$4 sm:$0xff]   ;;  %v15773_v34 = vld [vmem:[#allocation7 + $0x3a8] ss:$16 sps:$4 sm:$0xff]  }
 0x2bc   : > { %7661 = vmatprep.subr.bf16.mxu1 %v15715_v32  ;;  %v15781_v32 = vld [vmem:[#allocation7 + $0x3cc] ss:$16 sps:$4 sm:$0xff]  }
 0x2be   : > { %7146 = vmatpush1.bf16.msra.mxu0 %v15710_v36  ;;  %v15778_v36 = vld [vmem:[#allocation7 + $0x3c4] ss:$16 sps:$4 sm:$0xff]  }
 0x2bf   : > { %7662 = vmatpush1.bf16.msra.mxu1 %v15713_v37  ;;  %7147 = vmatprep.subr.bf16.mxu0 %v15718_v42  ;;  %v15776_v42 = vld [vmem:[#allocation7 + $0x3c0] ss:$16 sps:$4 sm:$0xff]  }
 0x2c0   : > { %7663 = vmatprep.subr.bf16.mxu1 %v15721_v44 }
 0x2c2   : > { %7148 = vmatpush1.bf16.msra.mxu0 %v15716_v43 }
 0x2c3   : > { %7664 = vmatpush1.bf16.msra.mxu1 %v15719_v50  ;;  %7149 = vmatprep.subr.bf16.mxu0 %v15724_v51 }
 0x2c4   : > { %7665 = vmatprep.subr.bf16.mxu1 %v15727_v15 }
 0x2c6   : > { %7150 = vmatpush1.bf16.msra.mxu0 %v15722_v41 }
 0x2c7   : > { %7666 = vmatpush1.bf16.msra.mxu1 %v15725_v16  ;;  %7151 = vmatprep.subr.bf16.mxu0 %v15730_v63 }
 0x2c8   : > { %7667 = vmatprep.subr.bf16.mxu1 %v15733_v2 }
 0x2ca   : > { %7152 = vmatpush1.bf16.msra.mxu0 %v15728_v58 }
 0x2cb   : > { %7668 = vmatpush1.bf16.msra.mxu1 %v15731_v3  ;;  %7153 = vmatprep.subr.bf16.mxu0 %v15736_v5  ;;  %v15779_v5 = vld [vmem:[#allocation7 + $0x3c8] ss:$16 sps:$4 sm:$0xff]  }
 0x2cc   : > { %7669 = vmatprep.subr.bf16.mxu1 %v15739_v8  ;;  %v15784_v8 = vld [vmem:[#allocation7 + $0x3e4] ss:$16 sps:$4 sm:$0xff]  }
 0x2ce   : > { %7154 = vmatpush1.bf16.msra.mxu0 %v15734_v9 }
 0x2cf   : > { %7670 = vmatpush1.bf16.msra.mxu1 %v15737_v10  ;;  %7155 = vmatprep.subr.bf16.mxu0 %v15742_v59 }
 0x2d0   : > { %7671 = vmatprep.subr.bf16.mxu1 %v15745_v60 }
 0x2d2   : > { %7156 = vmatpush1.bf16.msra.mxu0 %v15740_v14  ;;  %v15787_v14 = vld [vmem:[#allocation7 + $0x3ec] ss:$16 sps:$4 sm:$0xff]  }
 0x2d3   : > { %7672 = vmatpush1.bf16.msra.mxu1 %v15743_v18  ;;  %7157 = vmatprep.subr.bf16.mxu0 %v15748_v19 }
 0x2d4   : > { %7673 = vmatprep.subr.bf16.mxu1 %v15751_v55 }
 0x2d6   : > { %7158 = vmatpush1.bf16.msra.mxu0 %v15746_v20 }
 0x2d7   : > { %7674 = vmatpush1.bf16.msra.mxu1 %v15749_v21  ;;  %7159 = vmatprep.subr.bf16.mxu0 %v15754_v27 }
 0x2d8   : > { %7675 = vmatprep.subr.bf16.mxu1 %v15757_v29 }
 0x2da   : > { %7160 = vmatpush1.bf16.msra.mxu0 %v15752_v28 }
 0x2db   : > { %7676 = vmatpush1.bf16.msra.mxu1 %v15755_v25  ;;  %7161 = vmatprep.subr.bf16.mxu0 %v15760_v49 }
 0x2dc   : > { %7677 = vmatprep.subr.bf16.mxu1 %v15763_v30  ;;  %v15788_v30 = vld [vmem:[#allocation7 + $0x400] ss:$16 sps:$4 sm:$0xff]  }
 0x2de   : > { %7162 = vmatpush1.bf16.msra.mxu0 %v15758_v1 }
 0x2df   : > { %7678 = vmatpush1.bf16.msra.mxu1 %v15761_v56  ;;  %7163 = vmatprep.subr.bf16.mxu0 %v15766_v31  ;;  %v15793_v56 = vld [vmem:[#allocation7 + $0x40c] ss:$16 sps:$4 sm:$0xff]   ;;  %v15791_v31 = vld [vmem:[#allocation7 + $0x408] ss:$16 sps:$4 sm:$0xff]  }
 0x2e0   : > { %7679 = vmatprep.subr.bf16.mxu1 %v15769_v40  ;;  %v15794_v40 = vld [vmem:[#allocation7 + $0x420] ss:$16 sps:$4 sm:$0xff]  }
 0x2e2   : > { %7164 = vmatpush1.bf16.msra.mxu0 %v15764_v48  ;;  %v15796_v48 = vld [vmem:[#allocation7 + $0x424] ss:$16 sps:$4 sm:$0xff]  }
 0x2e3   : > { %7680 = vmatpush1.bf16.msra.mxu1 %v15767_v39  ;;  %7165 = vmatprep.subr.bf16.mxu0 %v15772_v57  ;;  %v15797_v39 = vld [vmem:[#allocation7 + $0x428] ss:$16 sps:$4 sm:$0xff]   ;;  %v15799_v57 = vld [vmem:[#allocation7 + $0x42c] ss:$16 sps:$4 sm:$0xff]  }
 0x2e4   : > { %v2880_v37 = vpop.f32.mrb[8].mxu0  ;;  %7681 = vmatprep.subr.bf16.mxu1 %v15775_v12  ;;  %v2966_v44 = vpop.f32.mrb[8].mxu1  ;;  %v15802_v12 = vld [vmem:[#allocation7 + $0x444] ss:$16 sps:$4 sm:$0xff]  }
 0x2e5   : > { %v15321_v43 = vadd.f32 %v2880_v37, %v18588_v22  ;;  %v2882_v50 = vpop.f32.mrb[9].mxu0  ;;  %v15325_v51 = vadd.f32 %v2966_v44, %v18594_v24  ;;  %v2968_v15 = vpop.f32.mrb[9].mxu1  ;;  %v15806_v37 = vld [vmem:[#allocation7 + $0x460] ss:$16 sps:$4 sm:$0xff]   ;;  %v15814_v44 = vld [vmem:[#allocation7 + $0x484] ss:$16 sps:$4 sm:$0xff]  }
 0x2e6   : > { %v15322_v41 = vadd.f32 %v2882_v50, %v18599_v33  ;;  %v2884_v16 = vpop.f32.mrb[10].mxu0  ;;  %7166 = vmatpush1.bf16.msra.mxu0 %v15770_v54  ;;  %v15326_v63 = vadd.f32 %v2968_v15, %v18605_v46  ;;  %v2970_v58 = vpop.f32.mrb[10].mxu1  ;;  %v15805_v54 = vld [vmem:[#allocation7 + $0x44c] ss:$16 sps:$4 sm:$0xff]   ;;  %v15812_v50 = vld [vmem:[#allocation7 + $0x480] ss:$16 sps:$4 sm:$0xff]  }
 0x2e7   : > { %v15323_v2 = vadd.f32 %v2884_v16, %v18588_v22  ;;  %7682 = vmatpush1.bf16.msra.mxu1 %v15773_v34  ;;  %v2886_v3 = vpop.f32.mrb[11].mxu0  ;;  %7167 = vmatprep.subr.bf16.mxu0 %v15778_v36  ;;  %v3147_v9 = vmax.f32 %v15321_v43, 0.0  ;;  %v15327_v10 = vadd.f32 %v2970_v58, %v18594_v24  ;;  %v2972_v60 = vpop.f32.mrb[11].mxu1  ;;  %v3149_v18 = vmax.f32 %v15325_v51, 0.0  ;;  %v15782_v22 = vld [vmem:[#allocation7 + $0x3e0] ss:$16 sps:$4 sm:$0xff]  }
 0x2e8   : > { %v15324_v59 = vadd.f32 %v2886_v3, %v18599_v33  ;;  %7683 = vmatprep.subr.bf16.mxu1 %v15781_v32  ;;  %v3148_v19 = vmax.f32 %v15322_v41, 0.0  ;;  %v15328_v55 = vadd.f32 %v2972_v60, %v18605_v46  ;;  %v3150_v28 = vmax.f32 %v15326_v63, 0.0  ;;  %v15785_v24 = vld [vmem:[#allocation7 + $0x3e8] ss:$16 sps:$4 sm:$0xff]   ;;  %v15790_v33 = vld [vmem:[#allocation7 + $0x404] ss:$16 sps:$4 sm:$0xff]  }
 0x2e9   : > { %v3155_v20 = vmax.f32 %v15323_v2, 0.0  ;;  %v3157_v21 = vmax.f32 %v15327_v10, 0.0  ;;  %v15800_v34 = vld [vmem:[#allocation7 + $0x440] ss:$16 sps:$4 sm:$0xff]   ;;  %v15803_v36 = vld [vmem:[#allocation7 + $0x448] ss:$16 sps:$4 sm:$0xff]  }
 0x2ea   : > { %v3156_v27 = vmax.f32 %v15324_v59, 0.0  ;;  %7168 = vmatpush1.bf16.msra.mxu0 %v15776_v42  ;;  %v3158_v25 = vmax.f32 %v15328_v55, 0.0  ;;  %v15808_v32 = vld [vmem:[#allocation7 + $0x464] ss:$16 sps:$4 sm:$0xff]   ;;  %v15811_v42 = vld [vmem:[#allocation7 + $0x46c] ss:$16 sps:$4 sm:$0xff]  }
 0x2eb   : > { %v18751_v29 = vpack.c.bf16 %v3155_v20, %v3147_v9  ;;  %7684 = vmatpush1.bf16.msra.mxu1 %v15779_v5  ;;  %7169 = vmatprep.subr.bf16.mxu0 %v15784_v8  ;;  %v18753_v49 = vpack.c.bf16 %v3157_v21, %v3149_v18  ;;  %v15809_v43 = vld [vmem:[#allocation7 + $0x468] ss:$16 sps:$4 sm:$0xff]   ;;  %v15817_v51 = vld [vmem:[#allocation7 + $0x48c] ss:$16 sps:$4 sm:$0xff]   ;;  %v15820_v15 = vld [vmem:[#allocation7 + $0x4a4] ss:$16 sps:$4 sm:$0xff]  }
 0x2ec   : > { %v18755_v1 = vpack.c.bf16 %v3156_v27, %v3148_v19  ;;  %7685 = vmatprep.subr.bf16.mxu1 %v15787_v14  ;;  %v18757_v46 = vpack.c.bf16 %v3158_v25, %v3150_v28  ;;  %v15815_v41 = vld [vmem:[#allocation7 + $0x488] ss:$16 sps:$4 sm:$0xff]   ;;  %v15818_v16 = vld [vmem:[#allocation7 + $0x4a0] ss:$16 sps:$4 sm:$0xff]   ;;  %v15823_v63 = vld [vmem:[#allocation7 + $0x4ac] ss:$16 sps:$4 sm:$0xff]  }
 0x2ed   : > { %v15821_v2 = vld [vmem:[#allocation7 + $0x4a8] ss:$16 sps:$4 sm:$0xff]   ;;  %v15826_v58 = vld [vmem:[#allocation7 + $0x4c4] ss:$16 sps:$4 sm:$0xff]   ;;  %v15824_v3 = vld [vmem:[#allocation7 + $0x4c0] ss:$16 sps:$4 sm:$0xff]  }
 0x2ee   : > { %7170 = vmatpush1.bf16.msra.mxu0 %v15782_v22  ;;  %v15829_v5 = vld [vmem:[#allocation7 + $0x4cc] ss:$16 sps:$4 sm:$0xff]   ;;  %v15827_v8 = vld [vmem:[#allocation7 + $0x4c8] ss:$16 sps:$4 sm:$0xff]   ;;  %v15832_v9 = vld [vmem:[#allocation7 + $0x4e4] ss:$16 sps:$4 sm:$0xff]  }
 0x2ef   : > { %7686 = vmatpush1.bf16.msra.mxu1 %v15785_v24  ;;  %7182 = vmatprep.subr.bf16.mxu0 %v15790_v33  ;;  %v15830_v10 = vld [vmem:[#allocation7 + $0x4e0] ss:$16 sps:$4 sm:$0xff]   ;;  %v15835_v59 = vld [vmem:[#allocation7 + $0x4ec] ss:$16 sps:$4 sm:$0xff]   ;;  %v15833_v60 = vld [vmem:[#allocation7 + $0x4e8] ss:$16 sps:$4 sm:$0xff]  }
 0x2f0   : > { %7698 = vmatprep.subr.bf16.mxu1 %v15793_v56  ;;  %v15838_v14 = vld [vmem:[#allocation7 + $0x504] ss:$16 sps:$4 sm:$0xff]   ;;  %v15836_v18 = vld [vmem:[#allocation7 + $0x500] ss:$16 sps:$4 sm:$0xff]   ;;  %v15841_v19 = vld [vmem:[#allocation7 + $0x50c] ss:$16 sps:$4 sm:$0xff]  }
 0x2f1   : > { %7172 = vmatmul.mubr.bf16.vlgmr.msra.gmra.mrb[16].mxu0 %v18626_v7  ;;  %v15839_v20 = vld [vmem:[#allocation7 + $0x508] ss:$16 sps:$4 sm:$0xff]   ;;  %v15844_v55 = vld [vmem:[#allocation7 + $0x524] ss:$16 sps:$4 sm:$0xff]   ;;  %v15842_v22 = vld [vmem:[#allocation7 + $0x520] ss:$16 sps:$4 sm:$0xff]  }
 0x2f2   : > { %7688 = vmatmul.mubr.bf16.vlgmr.msra.gmra.mrb[16].mxu1 %v18626_v7  ;;  %7183 = vmatpush1.bf16.msra.mxu0 %v15788_v30  ;;  %v15847_v21 = vld [vmem:[#allocation7 + $0x52c] ss:$16 sps:$4 sm:$0xff]   ;;  %v15845_v27 = vld [vmem:[#allocation7 + $0x528] ss:$16 sps:$4 sm:$0xff]   ;;  %v15850_v28 = vld [vmem:[#allocation7 + $0x544] ss:$16 sps:$4 sm:$0xff]  }
 0x2f3   : > { %7214 = vmatprep.mubr.bf16.mxu0 %v18735_v13  ;;  %7699 = vmatpush1.bf16.msra.mxu1 %v15791_v31  ;;  %v15848_v25 = vld [vmem:[#allocation7 + $0x540] ss:$16 sps:$4 sm:$0xff]   ;;  %v15853_v24 = vld [vmem:[#allocation7 + $0x54c] ss:$16 sps:$4 sm:$0xff]   ;;  %v15851_v33 = vld [vmem:[#allocation7 + $0x548] ss:$16 sps:$4 sm:$0xff]  }
 0x2f4   : > { %7730 = vmatprep.mubr.bf16.mxu1 %v18735_v13  ;;  %7184 = vmatprep.subr.bf16.mxu0 %v15796_v48  ;;  %v15856_v30 = vld [vmem:[#allocation7 + $0x564] ss:$16 sps:$4 sm:$0xff]   ;;  %v15854_v56 = vld [vmem:[#allocation7 + $0x560] ss:$16 sps:$4 sm:$0xff]   ;;  %v15859_v31 = vld [vmem:[#allocation7 + $0x56c] ss:$16 sps:$4 sm:$0xff]  }
 0x2f5   : > { %7700 = vmatprep.subr.bf16.mxu1 %v15799_v57  ;;  %v15857_v48 = vld [vmem:[#allocation7 + $0x568] ss:$16 sps:$4 sm:$0xff]   ;;  %v15865_v57 = vld [vmem:[#allocation7 + $0x58c] ss:$16 sps:$4 sm:$0xff]  }
 0x2f6   : > { %7185 = vmatpush1.bf16.msra.mxu0 %v15794_v40  ;;  %v15862_v40 = vld [vmem:[#allocation7 + $0x584] ss:$16 sps:$4 sm:$0xff]  }
 0x2f7   : > { %7701 = vmatpush1.bf16.msra.mxu1 %v15797_v39  ;;  %7186 = vmatprep.subr.bf16.mxu0 %v15802_v12  ;;  %v15860_v39 = vld [vmem:[#allocation7 + $0x580] ss:$16 sps:$4 sm:$0xff]   ;;  %v15863_v12 = vld [vmem:[#allocation7 + $0x588] ss:$16 sps:$4 sm:$0xff]  }
 0x2f8   : > { %7702 = vmatprep.subr.bf16.mxu1 %v15805_v54  ;;  %v15868_v54 = vld [vmem:[#allocation7 + $0x5a4] ss:$16 sps:$4 sm:$0xff]  }
 0x2fa   : > { %7187 = vmatpush1.bf16.msra.mxu0 %v15800_v34  ;;  %v15866_v34 = vld [vmem:[#allocation7 + $0x5a0] ss:$16 sps:$4 sm:$0xff]  }
 0x2fb   : > { %7703 = vmatpush1.bf16.msra.mxu1 %v15803_v36  ;;  %7188 = vmatprep.subr.bf16.mxu0 %v15808_v32  ;;  %v15871_v36 = vld [vmem:[#allocation7 + $0x5ac] ss:$16 sps:$4 sm:$0xff]   ;;  %v15869_v32 = vld [vmem:[#allocation7 + $0x5a8] ss:$16 sps:$4 sm:$0xff]  }
 0x2fc   : > { %7704 = vmatprep.subr.bf16.mxu1 %v15811_v42  ;;  %v15872_v42 = vld [vmem:[#allocation7 + $0x5c0] ss:$16 sps:$4 sm:$0xff]  }
 0x2fe   : > { %7189 = vmatpush1.bf16.msra.mxu0 %v15806_v37  ;;  %v15874_v37 = vld [vmem:[#allocation7 + $0x5c4] ss:$16 sps:$4 sm:$0xff]  }
 0x2ff   : > { %7705 = vmatpush1.bf16.msra.mxu1 %v15809_v43  ;;  %7190 = vmatprep.subr.bf16.mxu0 %v15814_v44  ;;  %v15877_v43 = vld [vmem:[#allocation7 + $0x5cc] ss:$16 sps:$4 sm:$0xff]   ;;  %v15875_v44 = vld [vmem:[#allocation7 + $0x5c8] ss:$16 sps:$4 sm:$0xff]  }
 0x300   : > { %7706 = vmatprep.subr.bf16.mxu1 %v15817_v51  ;;  %v15878_v51 = vld [vmem:[#allocation7 + $0x5e0] ss:$16 sps:$4 sm:$0xff]  }
 0x302   : > { %7191 = vmatpush1.bf16.msra.mxu0 %v15812_v50  ;;  %v15880_v50 = vld [vmem:[#allocation7 + $0x5e4] ss:$16 sps:$4 sm:$0xff]  }
 0x303   : > { %7707 = vmatpush1.bf16.msra.mxu1 %v15815_v41  ;;  %7192 = vmatprep.subr.bf16.mxu0 %v15820_v15  ;;  %v15883_v41 = vld [vmem:[#allocation7 + $0x5ec] ss:$16 sps:$4 sm:$0xff]   ;;  %v15881_v15 = vld [vmem:[#allocation7 + $0x5e8] ss:$16 sps:$4 sm:$0xff]  }
 0x304   : > { %7708 = vmatprep.subr.bf16.mxu1 %v15823_v63  ;;  %v15884_v63 = vld [vmem:[#allocation7 + $0x600] ss:$16 sps:$4 sm:$0xff]  }
 0x306   : > { %7193 = vmatpush1.bf16.msra.mxu0 %v15818_v16  ;;  %v15886_v16 = vld [vmem:[#allocation7 + $0x604] ss:$16 sps:$4 sm:$0xff]  }
 0x307   : > { %7709 = vmatpush1.bf16.msra.mxu1 %v15821_v2  ;;  %7194 = vmatprep.subr.bf16.mxu0 %v15826_v58  ;;  %v15889_v2 = vld [vmem:[#allocation7 + $0x60c] ss:$16 sps:$4 sm:$0xff]   ;;  %v15887_v58 = vld [vmem:[#allocation7 + $0x608] ss:$16 sps:$4 sm:$0xff]  }
 0x308   : > { %7710 = vmatprep.subr.bf16.mxu1 %v15829_v5  ;;  %v15890_v5 = vld [vmem:[#allocation7 + $0x620] ss:$16 sps:$4 sm:$0xff]  }
 0x30a   : > { %7195 = vmatpush1.bf16.msra.mxu0 %v15824_v3  ;;  %v15892_v3 = vld [vmem:[#allocation7 + $0x624] ss:$16 sps:$4 sm:$0xff]  }
 0x30b   : > { %7711 = vmatpush1.bf16.msra.mxu1 %v15827_v8  ;;  %7196 = vmatprep.subr.bf16.mxu0 %v15832_v9  ;;  %v15893_v8 = vld [vmem:[#allocation7 + $0x628] ss:$16 sps:$4 sm:$0xff]   ;;  %v15895_v9 = vld [vmem:[#allocation7 + $0x62c] ss:$16 sps:$4 sm:$0xff]  }
 0x30c   : > { %7712 = vmatprep.subr.bf16.mxu1 %v15835_v59  ;;  %v15901_v59 = vld [vmem:[#allocation7 + $0x64c] ss:$16 sps:$4 sm:$0xff]  }
 0x30e   : > { %7197 = vmatpush1.bf16.msra.mxu0 %v15830_v10  ;;  %v15898_v10 = vld [vmem:[#allocation7 + $0x644] ss:$16 sps:$4 sm:$0xff]  }
 0x30f   : > { %7713 = vmatpush1.bf16.msra.mxu1 %v15833_v60  ;;  %7198 = vmatprep.subr.bf16.mxu0 %v15838_v14  ;;  %v15896_v60 = vld [vmem:[#allocation7 + $0x640] ss:$16 sps:$4 sm:$0xff]   ;;  %v15899_v14 = vld [vmem:[#allocation7 + $0x648] ss:$16 sps:$4 sm:$0xff]  }
 0x310   : > { %7714 = vmatprep.subr.bf16.mxu1 %v15841_v19  ;;  %v15902_v19 = vld [vmem:[#allocation7 + $0x660] ss:$16 sps:$4 sm:$0xff]  }
 0x312   : > { %7199 = vmatpush1.bf16.msra.mxu0 %v15836_v18  ;;  %v15904_v18 = vld [vmem:[#allocation7 + $0x664] ss:$16 sps:$4 sm:$0xff]  }
 0x313   : > { %7715 = vmatpush1.bf16.msra.mxu1 %v15839_v20  ;;  %7200 = vmatprep.subr.bf16.mxu0 %v15844_v55  ;;  %v15907_v20 = vld [vmem:[#allocation7 + $0x66c] ss:$16 sps:$4 sm:$0xff]   ;;  %v15905_v55 = vld [vmem:[#allocation7 + $0x668] ss:$16 sps:$4 sm:$0xff]  }
 0x314   : > { %7716 = vmatprep.subr.bf16.mxu1 %v15847_v21  ;;  %v15908_v21 = vld [vmem:[#allocation7 + $0x680] ss:$16 sps:$4 sm:$0xff]  }
 0x316   : > { %7201 = vmatpush1.bf16.msra.mxu0 %v15842_v22  ;;  %v15910_v22 = vld [vmem:[#allocation7 + $0x684] ss:$16 sps:$4 sm:$0xff]  }
 0x317   : > { %7717 = vmatpush1.bf16.msra.mxu1 %v15845_v27  ;;  %7202 = vmatprep.subr.bf16.mxu0 %v15850_v28  ;;  %v15913_v27 = vld [vmem:[#allocation7 + $0x68c] ss:$16 sps:$4 sm:$0xff]   ;;  %v15911_v28 = vld [vmem:[#allocation7 + $0x688] ss:$16 sps:$4 sm:$0xff]  }
 0x318   : > { %7718 = vmatprep.subr.bf16.mxu1 %v15853_v24  ;;  %v15919_v24 = vld [vmem:[#allocation7 + $0x6ac] ss:$16 sps:$4 sm:$0xff]  }
 0x31a   : > { %7203 = vmatpush1.bf16.msra.mxu0 %v15848_v25  ;;  %v15916_v25 = vld [vmem:[#allocation7 + $0x6a4] ss:$16 sps:$4 sm:$0xff]  }
 0x31b   : > { %7719 = vmatpush1.bf16.msra.mxu1 %v15851_v33  ;;  %7204 = vmatprep.subr.bf16.mxu0 %v15856_v30  ;;  %v15914_v33 = vld [vmem:[#allocation7 + $0x6a0] ss:$16 sps:$4 sm:$0xff]   ;;  %v15917_v30 = vld [vmem:[#allocation7 + $0x6a8] ss:$16 sps:$4 sm:$0xff]  }
 0x31c   : > { %7720 = vmatprep.subr.bf16.mxu1 %v15859_v31  ;;  %v15925_v31 = vld [vmem:[#allocation7 + $0x6cc] ss:$16 sps:$4 sm:$0xff]  }
 0x31e   : > { %7205 = vmatpush1.bf16.msra.mxu0 %v15854_v56  ;;  %v15922_v56 = vld [vmem:[#allocation7 + $0x6c4] ss:$16 sps:$4 sm:$0xff]  }
 0x31f   : > { %7721 = vmatpush1.bf16.msra.mxu1 %v15857_v48  ;;  %7206 = vmatprep.subr.bf16.mxu0 %v15862_v40  ;;  %v15920_v40 = vld [vmem:[#allocation7 + $0x6c0] ss:$16 sps:$4 sm:$0xff]  }
 0x320   : > { %7722 = vmatprep.subr.bf16.mxu1 %v15865_v57 }
 0x322   : > { %7207 = vmatpush1.bf16.msra.mxu0 %v15860_v39 }
 0x323   : > { %7723 = vmatpush1.bf16.msra.mxu1 %v15863_v12  ;;  %7208 = vmatprep.subr.bf16.mxu0 %v15868_v54 }
 0x324   : > { %7724 = vmatprep.subr.bf16.mxu1 %v15871_v36 }
 0x326   : > { %7209 = vmatpush1.bf16.msra.mxu0 %v15866_v34 }
 0x327   : > { %7725 = vmatpush1.bf16.msra.mxu1 %v15869_v32  ;;  %7210 = vmatprep.subr.bf16.mxu0 %v15874_v37 }
 0x328   : > { %7726 = vmatprep.subr.bf16.mxu1 %v15877_v43 }
 0x32a   : > { %7211 = vmatpush1.bf16.msra.mxu0 %v15872_v42 }
 0x32b   : > { %7727 = vmatpush1.bf16.msra.mxu1 %v15875_v44  ;;  %7212 = vmatprep.subr.bf16.mxu0 %v15880_v50  ;;  %v15923_v50 = vld [vmem:[#allocation7 + $0x6c8] ss:$16 sps:$4 sm:$0xff]  }
 0x32c   : > { %7728 = vmatprep.subr.bf16.mxu1 %v15883_v41 }
 0x32e   : > { %7213 = vmatpush1.bf16.msra.mxu0 %v15878_v51  ;;  %v15928_v51 = vld [vmem:[#allocation7 + $0x6e4] ss:$16 sps:$4 sm:$0xff]  }
 0x32f   : > { %7729 = vmatpush1.bf16.msra.mxu1 %v15881_v15  ;;  %7225 = vmatprep.subr.bf16.mxu0 %v15886_v16 }
 0x330   : > { %7741 = vmatprep.subr.bf16.mxu1 %v15889_v2  ;;  %v15931_v2 = vld [vmem:[#allocation7 + $0x6ec] ss:$16 sps:$4 sm:$0xff]  }
 0x331   : > { %7215 = vmatmul.mubr.bf16.vlgmr.msra.gmra.mrb[16].mxu0 %v18731_v0 }
 0x332   : > { %7731 = vmatmul.mubr.bf16.vlgmr.msra.gmra.mrb[16].mxu1 %v18731_v0  ;;  %7226 = vmatpush1.bf16.msra.mxu0 %v15884_v63 }
 0x333   : > { %7257 = vmatprep.mubr.bf16.mxu0 %v18737_v35  ;;  %7742 = vmatpush1.bf16.msra.mxu1 %v15887_v58 }
 0x334   : > { %7773 = vmatprep.mubr.bf16.mxu1 %v18737_v35  ;;  %7227 = vmatprep.subr.bf16.mxu0 %v15892_v3 }
 0x335   : > { %7743 = vmatprep.subr.bf16.mxu1 %v15895_v9 }
 0x336   : > { %7228 = vmatpush1.bf16.msra.mxu0 %v15890_v5 }
 0x337   : > { %7744 = vmatpush1.bf16.msra.mxu1 %v15893_v8  ;;  %7229 = vmatprep.subr.bf16.mxu0 %v15898_v10 }
 0x338   : > { %7745 = vmatprep.subr.bf16.mxu1 %v15901_v59 }
 0x33a   : > { %7230 = vmatpush1.bf16.msra.mxu0 %v15896_v60 }
 0x33b   : > { %7746 = vmatpush1.bf16.msra.mxu1 %v15899_v14  ;;  %7231 = vmatprep.subr.bf16.mxu0 %v15904_v18 }
 0x33c   : > { %7747 = vmatprep.subr.bf16.mxu1 %v15907_v20  ;;  %v15932_v20 = vld [vmem:[#allocation7 + $0x700] ss:$16 sps:$4 sm:$0xff]  }
 0x33e   : > { %7232 = vmatpush1.bf16.msra.mxu0 %v15902_v19 }
 0x33f   : > { %7748 = vmatpush1.bf16.msra.mxu1 %v15905_v55  ;;  %7233 = vmatprep.subr.bf16.mxu0 %v15910_v22  ;;  %v15937_v55 = vld [vmem:[#allocation7 + $0x70c] ss:$16 sps:$4 sm:$0xff]   ;;  %v15935_v22 = vld [vmem:[#allocation7 + $0x708] ss:$16 sps:$4 sm:$0xff]  }
 0x340   : > { %7749 = vmatprep.subr.bf16.mxu1 %v15913_v27  ;;  %v15938_v27 = vld [vmem:[#allocation7 + $0x720] ss:$16 sps:$4 sm:$0xff]  }
 0x342   : > { %7234 = vmatpush1.bf16.msra.mxu0 %v15908_v21  ;;  %v15940_v21 = vld [vmem:[#allocation7 + $0x724] ss:$16 sps:$4 sm:$0xff]  }
 0x343   : > { %7750 = vmatpush1.bf16.msra.mxu1 %v15911_v28  ;;  %7235 = vmatprep.subr.bf16.mxu0 %v15916_v25  ;;  %v15943_v28 = vld [vmem:[#allocation7 + $0x72c] ss:$16 sps:$4 sm:$0xff]   ;;  %v15941_v25 = vld [vmem:[#allocation7 + $0x728] ss:$16 sps:$4 sm:$0xff]  }
 0x344   : > { %v3052_v48 = vpop.f32.mrb[12].mxu0  ;;  %7751 = vmatprep.subr.bf16.mxu1 %v15919_v24  ;;  %v3138_v57 = vpop.f32.mrb[12].mxu1  ;;  %v15946_v24 = vld [vmem:[#allocation7 + $0x744] ss:$16 sps:$4 sm:$0xff]  }
 0x345   : > { %v15329_v39 = vadd.f32 %v3052_v48, %v18712_v53  ;;  %v3054_v12 = vpop.f32.mrb[13].mxu0  ;;  %v15333_v54 = vadd.f32 %v3138_v57, %v18715_v61  ;;  %v3140_v36 = vpop.f32.mrb[13].mxu1  ;;  %v15950_v48 = vld [vmem:[#allocation7 + $0x760] ss:$16 sps:$4 sm:$0xff]   ;;  %v15958_v57 = vld [vmem:[#allocation7 + $0x784] ss:$16 sps:$4 sm:$0xff]  }
 0x346   : > { %v15330_v34 = vadd.f32 %v3054_v12, %v18718_v6  ;;  %v3056_v32 = vpop.f32.mrb[14].mxu0  ;;  %7236 = vmatpush1.bf16.msra.mxu0 %v15914_v33  ;;  %v15334_v37 = vadd.f32 %v3140_v36, %v18721_v23  ;;  %v3142_v43 = vpop.f32.mrb[14].mxu1  ;;  %v15944_v33 = vld [vmem:[#allocation7 + $0x740] ss:$16 sps:$4 sm:$0xff]   ;;  %v15964_v36 = vld [vmem:[#allocation7 + $0x7a4] ss:$16 sps:$4 sm:$0xff]  }
 0x347   : > { %v15331_v42 = vadd.f32 %v3056_v32, %v18712_v53  ;;  %7752 = vmatpush1.bf16.msra.mxu1 %v15917_v30  ;;  %v3058_v44 = vpop.f32.mrb[15].mxu0  ;;  %7237 = vmatprep.subr.bf16.mxu0 %v15922_v56  ;;  %v3151_v41 = vmax.f32 %v15329_v39, 0.0  ;;  %v15335_v15 = vadd.f32 %v3142_v43, %v18715_v61  ;;  %v3144_v63 = vpop.f32.mrb[15].mxu1  ;;  %v3153_v58 = vmax.f32 %v15333_v54, 0.0  ;;  %v15926_v53 = vld [vmem:[#allocation7 + $0x6e0] ss:$16 sps:$4 sm:$0xff]  }
 0x348   : > { %v15332_v16 = vadd.f32 %v3058_v44, %v18718_v6  ;;  %7753 = vmatprep.subr.bf16.mxu1 %v15925_v31  ;;  %v3152_v3 = vmax.f32 %v15330_v34, 0.0  ;;  %v15336_v8 = vadd.f32 %v3144_v63, %v18721_v23  ;;  %v3154_v59 = vmax.f32 %v15334_v37, 0.0  ;;  %v15929_v61 = vld [vmem:[#allocation7 + $0x6e8] ss:$16 sps:$4 sm:$0xff]   ;;  %v15934_v6 = vld [vmem:[#allocation7 + $0x704] ss:$16 sps:$4 sm:$0xff]  }
 0x349   : > { %v3159_v5 = vmax.f32 %v15331_v42, 0.0  ;;  %v3161_v9 = vmax.f32 %v15335_v15, 0.0  ;;  %v15949_v30 = vld [vmem:[#allocation7 + $0x74c] ss:$16 sps:$4 sm:$0xff]   ;;  %v15947_v56 = vld [vmem:[#allocation7 + $0x748] ss:$16 sps:$4 sm:$0xff]  }
 0x34a   : > { %v3160_v10 = vmax.f32 %v15332_v16, 0.0  ;;  %7238 = vmatpush1.bf16.msra.mxu0 %v15920_v40  ;;  %v3162_v14 = vmax.f32 %v15336_v8, 0.0  ;;  %v15952_v31 = vld [vmem:[#allocation7 + $0x764] ss:$16 sps:$4 sm:$0xff]   ;;  %v15955_v40 = vld [vmem:[#allocation7 + $0x76c] ss:$16 sps:$4 sm:$0xff]  }
 0x34b   : > { %v18775_v60 = vpack.c.bf16 %v3159_v5, %v3151_v41  ;;  %7754 = vmatpush1.bf16.msra.mxu1 %v15923_v50  ;;  %7239 = vmatprep.subr.bf16.mxu0 %v15928_v51  ;;  %v18777_v18 = vpack.c.bf16 %v3161_v9, %v3153_v58  ;;  %v15953_v39 = vld [vmem:[#allocation7 + $0x768] ss:$16 sps:$4 sm:$0xff]   ;;  %v15956_v12 = vld [vmem:[#allocation7 + $0x780] ss:$16 sps:$4 sm:$0xff]   ;;  %v15961_v54 = vld [vmem:[#allocation7 + $0x78c] ss:$16 sps:$4 sm:$0xff]  }
 0x34c   : > { %v18779_v19 = vpack.c.bf16 %v3160_v10, %v3152_v3  ;;  %7755 = vmatprep.subr.bf16.mxu1 %v15931_v2  ;;  %v18781_v23 = vpack.c.bf16 %v3162_v14, %v3154_v59  ;;  %v15959_v34 = vld [vmem:[#allocation7 + $0x788] ss:$16 sps:$4 sm:$0xff]   ;;  %v15962_v32 = vld [vmem:[#allocation7 + $0x7a0] ss:$16 sps:$4 sm:$0xff]   ;;  %v15967_v37 = vld [vmem:[#allocation7 + $0x7ac] ss:$16 sps:$4 sm:$0xff]  }
 0x34d   : > { %v15965_v42 = vld [vmem:[#allocation7 + $0x7a8] ss:$16 sps:$4 sm:$0xff]   ;;  %v15970_v43 = vld [vmem:[#allocation7 + $0x7c4] ss:$16 sps:$4 sm:$0xff]   ;;  %v15968_v44 = vld [vmem:[#allocation7 + $0x7c0] ss:$16 sps:$4 sm:$0xff]  }
 0x34e   : > { %7240 = vmatpush1.bf16.msra.mxu0 %v15926_v53  ;;  %v15973_v50 = vld [vmem:[#allocation7 + $0x7cc] ss:$16 sps:$4 sm:$0xff]   ;;  %v15971_v51 = vld [vmem:[#allocation7 + $0x7c8] ss:$16 sps:$4 sm:$0xff]   ;;  %v15976_v41 = vld [vmem:[#allocation7 + $0x7e4] ss:$16 sps:$4 sm:$0xff]  }
 0x34f   : > { %7756 = vmatpush1.bf16.msra.mxu1 %v15929_v61  ;;  %7241 = vmatprep.subr.bf16.mxu0 %v15934_v6  ;;  %v15974_v15 = vld [vmem:[#allocation7 + $0x7e0] ss:$16 sps:$4 sm:$0xff]   ;;  %v15979_v16 = vld [vmem:[#allocation7 + $0x7ec] ss:$16 sps:$4 sm:$0xff]   ;;  %v15977_v63 = vld [vmem:[#allocation7 + $0x7e8] ss:$16 sps:$4 sm:$0xff]  }
 0x350   : > { %7757 = vmatprep.subr.bf16.mxu1 %v15937_v55  ;;  %v15982_v2 = vld [vmem:[#allocation7 + $0x804] ss:$16 sps:$4 sm:$0xff]   ;;  %v15980_v58 = vld [vmem:[#allocation7 + $0x800] ss:$16 sps:$4 sm:$0xff]   ;;  %v15985_v3 = vld [vmem:[#allocation7 + $0x80c] ss:$16 sps:$4 sm:$0xff]  }
 0x351   : > { %v15983_v5 = vld [vmem:[#allocation7 + $0x808] ss:$16 sps:$4 sm:$0xff]   ;;  %v15988_v8 = vld [vmem:[#allocation7 + $0x824] ss:$16 sps:$4 sm:$0xff]   ;;  %v15986_v53 = vld [vmem:[#allocation7 + $0x820] ss:$16 sps:$4 sm:$0xff]  }
 0x352   : > { %7242 = vmatpush1.bf16.msra.mxu0 %v15932_v20  ;;  %v15989_v9 = vld [vmem:[#allocation7 + $0x828] ss:$16 sps:$4 sm:$0xff]   ;;  %v15991_v10 = vld [vmem:[#allocation7 + $0x82c] ss:$16 sps:$4 sm:$0xff]   ;;  %v15994_v59 = vld [vmem:[#allocation7 + $0x844] ss:$16 sps:$4 sm:$0xff]  }
 0x353   : > { %7758 = vmatpush1.bf16.msra.mxu1 %v15935_v22  ;;  %7243 = vmatprep.subr.bf16.mxu0 %v15940_v21  ;;  %v15997_v14 = vld [vmem:[#allocation7 + $0x84c] ss:$16 sps:$4 sm:$0xff]   ;;  %v15992_v61 = vld [vmem:[#allocation7 + $0x840] ss:$16 sps:$4 sm:$0xff]   ;;  %v15995_v6 = vld [vmem:[#allocation7 + $0x848] ss:$16 sps:$4 sm:$0xff]  }
 0x354   : > { %7759 = vmatprep.subr.bf16.mxu1 %v15943_v28  ;;  %v16000_v20 = vld [vmem:[#allocation7 + $0x864] ss:$16 sps:$4 sm:$0xff]   ;;  %v15998_v55 = vld [vmem:[#allocation7 + $0x860] ss:$16 sps:$4 sm:$0xff]   ;;  %v16003_v22 = vld [vmem:[#allocation7 + $0x86c] ss:$16 sps:$4 sm:$0xff]  }
 0x355   : > { %v16001_v21 = vld [vmem:[#allocation7 + $0x868] ss:$16 sps:$4 sm:$0xff]   ;;  %v16004_v28 = vld [vmem:[#allocation7 + $0x880] ss:$16 sps:$4 sm:$0xff]  }
 0x356   : > { %7244 = vmatpush1.bf16.msra.mxu0 %v15938_v27  ;;  %v16006_v27 = vld [vmem:[#allocation7 + $0x884] ss:$16 sps:$4 sm:$0xff]  }
 0x357   : > { %7760 = vmatpush1.bf16.msra.mxu1 %v15941_v25  ;;  %7245 = vmatprep.subr.bf16.mxu0 %v15946_v24  ;;  %v16007_v25 = vld [vmem:[#allocation7 + $0x888] ss:$16 sps:$4 sm:$0xff]   ;;  %v16012_v24 = vld [vmem:[#allocation7 + $0x8a4] ss:$16 sps:$4 sm:$0xff]  }
 0x358   : > { %7761 = vmatprep.subr.bf16.mxu1 %v15949_v30  ;;  %v16015_v30 = vld [vmem:[#allocation7 + $0x8ac] ss:$16 sps:$4 sm:$0xff]  }
 0x35a   : > { %7246 = vmatpush1.bf16.msra.mxu0 %v15944_v33  ;;  %v16010_v33 = vld [vmem:[#allocation7 + $0x8a0] ss:$16 sps:$4 sm:$0xff]  }
 0x35b   : > { %7762 = vmatpush1.bf16.msra.mxu1 %v15947_v56  ;;  %7247 = vmatprep.subr.bf16.mxu0 %v15952_v31  ;;  %v16013_v56 = vld [vmem:[#allocation7 + $0x8a8] ss:$16 sps:$4 sm:$0xff]   ;;  %v16018_v31 = vld [vmem:[#allocation7 + $0x8c4] ss:$16 sps:$4 sm:$0xff]  }
 0x35c   : > { %7763 = vmatprep.subr.bf16.mxu1 %v15955_v40  ;;  %v16021_v40 = vld [vmem:[#allocation7 + $0x8cc] ss:$16 sps:$4 sm:$0xff]  }
 0x35e   : > { %7248 = vmatpush1.bf16.msra.mxu0 %v15950_v48  ;;  %v16016_v48 = vld [vmem:[#allocation7 + $0x8c0] ss:$16 sps:$4 sm:$0xff]  }
 0x35f   : > { %7764 = vmatpush1.bf16.msra.mxu1 %v15953_v39  ;;  %7249 = vmatprep.subr.bf16.mxu0 %v15958_v57  ;;  %v16019_v39 = vld [vmem:[#allocation7 + $0x8c8] ss:$16 sps:$4 sm:$0xff]   ;;  %v16024_v57 = vld [vmem:[#allocation7 + $0x8e4] ss:$16 sps:$4 sm:$0xff]  }
 0x360   : > { %7765 = vmatprep.subr.bf16.mxu1 %v15961_v54  ;;  %v16027_v54 = vld [vmem:[#allocation7 + $0x8ec] ss:$16 sps:$4 sm:$0xff]  }
 0x362   : > { %7250 = vmatpush1.bf16.msra.mxu0 %v15956_v12  ;;  %v16022_v12 = vld [vmem:[#allocation7 + $0x8e0] ss:$16 sps:$4 sm:$0xff]  }
 0x363   : > { %7766 = vmatpush1.bf16.msra.mxu1 %v15959_v34  ;;  %7251 = vmatprep.subr.bf16.mxu0 %v15964_v36  ;;  %v16025_v34 = vld [vmem:[#allocation7 + $0x8e8] ss:$16 sps:$4 sm:$0xff]   ;;  %v16030_v36 = vld [vmem:[#allocation7 + $0x904] ss:$16 sps:$4 sm:$0xff]  }
 0x364   : > { %7767 = vmatprep.subr.bf16.mxu1 %v15967_v37  ;;  %v16033_v37 = vld [vmem:[#allocation7 + $0x90c] ss:$16 sps:$4 sm:$0xff]  }
 0x366   : > { %7252 = vmatpush1.bf16.msra.mxu0 %v15962_v32  ;;  %v16028_v32 = vld [vmem:[#allocation7 + $0x900] ss:$16 sps:$4 sm:$0xff]  }
 0x367   : > { %7768 = vmatpush1.bf16.msra.mxu1 %v15965_v42  ;;  %7253 = vmatprep.subr.bf16.mxu0 %v15970_v43  ;;  %v16031_v42 = vld [vmem:[#allocation7 + $0x908] ss:$16 sps:$4 sm:$0xff]   ;;  %v16036_v43 = vld [vmem:[#allocation7 + $0x924] ss:$16 sps:$4 sm:$0xff]  }
 0x368   : > { %7769 = vmatprep.subr.bf16.mxu1 %v15973_v50  ;;  %v16039_v50 = vld [vmem:[#allocation7 + $0x92c] ss:$16 sps:$4 sm:$0xff]  }
 0x36a   : > { %7254 = vmatpush1.bf16.msra.mxu0 %v15968_v44  ;;  %v16034_v44 = vld [vmem:[#allocation7 + $0x920] ss:$16 sps:$4 sm:$0xff]  }
 0x36b   : > { %7770 = vmatpush1.bf16.msra.mxu1 %v15971_v51  ;;  %7255 = vmatprep.subr.bf16.mxu0 %v15976_v41  ;;  %v16037_v51 = vld [vmem:[#allocation7 + $0x928] ss:$16 sps:$4 sm:$0xff]   ;;  %v16042_v41 = vld [vmem:[#allocation7 + $0x944] ss:$16 sps:$4 sm:$0xff]  }
 0x36c   : > { %7771 = vmatprep.subr.bf16.mxu1 %v15979_v16  ;;  %v16045_v16 = vld [vmem:[#allocation7 + $0x94c] ss:$16 sps:$4 sm:$0xff]  }
 0x36e   : > { %7256 = vmatpush1.bf16.msra.mxu0 %v15974_v15  ;;  %v16040_v15 = vld [vmem:[#allocation7 + $0x940] ss:$16 sps:$4 sm:$0xff]  }
 0x36f   : > { %7772 = vmatpush1.bf16.msra.mxu1 %v15977_v63  ;;  %7268 = vmatprep.subr.bf16.mxu0 %v15982_v2  ;;  %v16043_v63 = vld [vmem:[#allocation7 + $0x948] ss:$16 sps:$4 sm:$0xff]   ;;  %v16048_v2 = vld [vmem:[#allocation7 + $0x964] ss:$16 sps:$4 sm:$0xff]  }
 0x370   : > { %7784 = vmatprep.subr.bf16.mxu1 %v15985_v3  ;;  %v16051_v3 = vld [vmem:[#allocation7 + $0x96c] ss:$16 sps:$4 sm:$0xff]  }
 0x371   : > { %7258 = vmatmul.mubr.bf16.vlgmr.msra.gmra.mrb[16].mxu0 %v18733_v26 }
 0x372   : > { %7774 = vmatmul.mubr.bf16.vlgmr.msra.gmra.mrb[16].mxu1 %v18733_v26  ;;  %7269 = vmatpush1.bf16.msra.mxu0 %v15980_v58  ;;  %v16046_v58 = vld [vmem:[#allocation7 + $0x960] ss:$16 sps:$4 sm:$0xff]  }
 0x373   : > { %7300 = vmatprep.mubr.bf16.mxu0 %v18755_v1  ;;  %7785 = vmatpush1.bf16.msra.mxu1 %v15983_v5  ;;  %v16049_v5 = vld [vmem:[#allocation7 + $0x968] ss:$16 sps:$4 sm:$0xff]  }
 0x374   : > { %7816 = vmatprep.mubr.bf16.mxu1 %v18755_v1  ;;  %7270 = vmatprep.subr.bf16.mxu0 %v15988_v8  ;;  %v16009_v1 = vld [vmem:[#allocation7 + $0x88c] ss:$16 sps:$4 sm:$0xff]   ;;  %v16054_v8 = vld [vmem:[#allocation7 + $0x984] ss:$16 sps:$4 sm:$0xff]  }
 0x375   : > { %7786 = vmatprep.subr.bf16.mxu1 %v15991_v10  ;;  %v16055_v10 = vld [vmem:[#allocation7 + $0x988] ss:$16 sps:$4 sm:$0xff]  }
 0x376   : > { %7271 = vmatpush1.bf16.msra.mxu0 %v15986_v53  ;;  %v16052_v53 = vld [vmem:[#allocation7 + $0x980] ss:$16 sps:$4 sm:$0xff]  }
 0x377   : > { %7787 = vmatpush1.bf16.msra.mxu1 %v15989_v9  ;;  %7272 = vmatprep.subr.bf16.mxu0 %v15994_v59  ;;  %v16057_v9 = vld [vmem:[#allocation7 + $0x98c] ss:$16 sps:$4 sm:$0xff]   ;;  %v16060_v59 = vld [vmem:[#allocation7 + $0x9a4] ss:$16 sps:$4 sm:$0xff]  }
 0x378   : > { %7788 = vmatprep.subr.bf16.mxu1 %v15997_v14  ;;  %v16058_v14 = vld [vmem:[#allocation7 + $0x9a0] ss:$16 sps:$4 sm:$0xff]  }
 0x37a   : > { %7273 = vmatpush1.bf16.msra.mxu0 %v15992_v61  ;;  %v16063_v61 = vld [vmem:[#allocation7 + $0x9ac] ss:$16 sps:$4 sm:$0xff]  }
 0x37b   : > { %7789 = vmatpush1.bf16.msra.mxu1 %v15995_v6  ;;  %7274 = vmatprep.subr.bf16.mxu0 %v16000_v20  ;;  %v16061_v6 = vld [vmem:[#allocation7 + $0x9a8] ss:$16 sps:$4 sm:$0xff]   ;;  %v16066_v20 = vld [vmem:[#allocation7 + $0x9c4] ss:$16 sps:$4 sm:$0xff]  }
 0x37c   : > { %7790 = vmatprep.subr.bf16.mxu1 %v16003_v22  ;;  %v16069_v22 = vld [vmem:[#allocation7 + $0x9cc] ss:$16 sps:$4 sm:$0xff]  }
 0x37e   : > { %7275 = vmatpush1.bf16.msra.mxu0 %v15998_v55  ;;  %v16064_v55 = vld [vmem:[#allocation7 + $0x9c0] ss:$16 sps:$4 sm:$0xff]  }
 0x37f   : > { %7791 = vmatpush1.bf16.msra.mxu1 %v16001_v21  ;;  %7276 = vmatprep.subr.bf16.mxu0 %v16006_v27  ;;  %v16067_v21 = vld [vmem:[#allocation7 + $0x9c8] ss:$16 sps:$4 sm:$0xff]   ;;  %v16072_v27 = vld [vmem:[#allocation7 + $0x9e4] ss:$16 sps:$4 sm:$0xff]  }
 0x380   : > { %7792 = vmatprep.subr.bf16.mxu1 %v16009_v1  ;;  %v16075_v1 = vld [vmem:[#allocation7 + $0x9ec] ss:$16 sps:$4 sm:$0xff]  }
 0x382   : > { %7277 = vmatpush1.bf16.msra.mxu0 %v16004_v28  ;;  %v16070_v28 = vld [vmem:[#allocation7 + $0x9e0] ss:$16 sps:$4 sm:$0xff]  }
 0x383   : > { %7793 = vmatpush1.bf16.msra.mxu1 %v16007_v25  ;;  %7278 = vmatprep.subr.bf16.mxu0 %v16012_v24  ;;  %v16073_v25 = vld [vmem:[#allocation7 + $0x9e8] ss:$16 sps:$4 sm:$0xff]   ;;  %v16078_v24 = vld [vmem:[#allocation7 + $0xa04] ss:$16 sps:$4 sm:$0xff]  }
 0x384   : > { %7794 = vmatprep.subr.bf16.mxu1 %v16015_v30  ;;  %v16081_v30 = vld [vmem:[#allocation7 + $0xa0c] ss:$16 sps:$4 sm:$0xff]  }
 0x386   : > { %7279 = vmatpush1.bf16.msra.mxu0 %v16010_v33  ;;  %v16076_v33 = vld [vmem:[#allocation7 + $0xa00] ss:$16 sps:$4 sm:$0xff]  }
 0x387   : > { %7795 = vmatpush1.bf16.msra.mxu1 %v16013_v56  ;;  %7280 = vmatprep.subr.bf16.mxu0 %v16018_v31  ;;  %v16079_v56 = vld [vmem:[#allocation7 + $0xa08] ss:$16 sps:$4 sm:$0xff]   ;;  %v16084_v31 = vld [vmem:[#allocation7 + $0xa24] ss:$16 sps:$4 sm:$0xff]  }
 0x388   : > { %7796 = vmatprep.subr.bf16.mxu1 %v16021_v40  ;;  %v16085_v40 = vld [vmem:[#allocation7 + $0xa28] ss:$16 sps:$4 sm:$0xff]  }
 0x38a   : > { %7281 = vmatpush1.bf16.msra.mxu0 %v16016_v48  ;;  %v16082_v48 = vld [vmem:[#allocation7 + $0xa20] ss:$16 sps:$4 sm:$0xff]  }
 0x38b   : > { %7797 = vmatpush1.bf16.msra.mxu1 %v16019_v39  ;;  %7282 = vmatprep.subr.bf16.mxu0 %v16024_v57  ;;  %v16087_v39 = vld [vmem:[#allocation7 + $0xa2c] ss:$16 sps:$4 sm:$0xff]   ;;  %v16090_v57 = vld [vmem:[#allocation7 + $0xa44] ss:$16 sps:$4 sm:$0xff]  }
 0x38c   : > { %7798 = vmatprep.subr.bf16.mxu1 %v16027_v54  ;;  %v16088_v54 = vld [vmem:[#allocation7 + $0xa40] ss:$16 sps:$4 sm:$0xff]  }
 0x38e   : > { %7283 = vmatpush1.bf16.msra.mxu0 %v16022_v12  ;;  %v16093_v12 = vld [vmem:[#allocation7 + $0xa4c] ss:$16 sps:$4 sm:$0xff]  }
 0x38f   : > { %7799 = vmatpush1.bf16.msra.mxu1 %v16025_v34  ;;  %7284 = vmatprep.subr.bf16.mxu0 %v16030_v36  ;;  %v16091_v34 = vld [vmem:[#allocation7 + $0xa48] ss:$16 sps:$4 sm:$0xff]   ;;  %v16096_v36 = vld [vmem:[#allocation7 + $0xa64] ss:$16 sps:$4 sm:$0xff]  }
 0x390   : > { %7800 = vmatprep.subr.bf16.mxu1 %v16033_v37  ;;  %v16099_v37 = vld [vmem:[#allocation7 + $0xa6c] ss:$16 sps:$4 sm:$0xff]  }
 0x392   : > { %7285 = vmatpush1.bf16.msra.mxu0 %v16028_v32  ;;  %v16094_v32 = vld [vmem:[#allocation7 + $0xa60] ss:$16 sps:$4 sm:$0xff]  }
 0x393   : > { %7801 = vmatpush1.bf16.msra.mxu1 %v16031_v42  ;;  %7286 = vmatprep.subr.bf16.mxu0 %v16036_v43  ;;  %v16102_v42 = vld [vmem:[#allocation7 + $0xa84] ss:$16 sps:$4 sm:$0xff]   ;;  %v16100_v43 = vld [vmem:[#allocation7 + $0xa80] ss:$16 sps:$4 sm:$0xff]  }
 0x394   : > { %7802 = vmatprep.subr.bf16.mxu1 %v16039_v50  ;;  %v16108_v50 = vld [vmem:[#allocation7 + $0xaa4] ss:$16 sps:$4 sm:$0xff]  }
 0x396   : > { %7287 = vmatpush1.bf16.msra.mxu0 %v16034_v44  ;;  %v16103_v44 = vld [vmem:[#allocation7 + $0xa88] ss:$16 sps:$4 sm:$0xff]  }
 0x397   : > { %7803 = vmatpush1.bf16.msra.mxu1 %v16037_v51  ;;  %7288 = vmatprep.subr.bf16.mxu0 %v16042_v41  ;;  %v16106_v51 = vld [vmem:[#allocation7 + $0xaa0] ss:$16 sps:$4 sm:$0xff]   ;;  %v16111_v41 = vld [vmem:[#allocation7 + $0xaac] ss:$16 sps:$4 sm:$0xff]  }
 0x398   : > { %7804 = vmatprep.subr.bf16.mxu1 %v16045_v16  ;;  %v16114_v16 = vld [vmem:[#allocation7 + $0xac4] ss:$16 sps:$4 sm:$0xff]  }
 0x39a   : > { %7289 = vmatpush1.bf16.msra.mxu0 %v16040_v15  ;;  %v16109_v15 = vld [vmem:[#allocation7 + $0xaa8] ss:$16 sps:$4 sm:$0xff]  }
 0x39b   : > { %7805 = vmatpush1.bf16.msra.mxu1 %v16043_v63  ;;  %7290 = vmatprep.subr.bf16.mxu0 %v16048_v2  ;;  %v16112_v63 = vld [vmem:[#allocation7 + $0xac0] ss:$16 sps:$4 sm:$0xff]   ;;  %v16117_v2 = vld [vmem:[#allocation7 + $0xacc] ss:$16 sps:$4 sm:$0xff]  }
 0x39c   : > { %7806 = vmatprep.subr.bf16.mxu1 %v16051_v3  ;;  %v16120_v3 = vld [vmem:[#allocation7 + $0xae4] ss:$16 sps:$4 sm:$0xff]  }
 0x39e   : > { %7291 = vmatpush1.bf16.msra.mxu0 %v16046_v58  ;;  %v16115_v58 = vld [vmem:[#allocation7 + $0xac8] ss:$16 sps:$4 sm:$0xff]  }
 0x39f   : > { %7807 = vmatpush1.bf16.msra.mxu1 %v16049_v5  ;;  %7292 = vmatprep.subr.bf16.mxu0 %v16054_v8  ;;  %v16118_v5 = vld [vmem:[#allocation7 + $0xae0] ss:$16 sps:$4 sm:$0xff]   ;;  %v16123_v8 = vld [vmem:[#allocation7 + $0xaec] ss:$16 sps:$4 sm:$0xff]  }
 0x3a0   : > { %7808 = vmatprep.subr.bf16.mxu1 %v16057_v9  ;;  %v16126_v9 = vld [vmem:[#allocation7 + $0xb04] ss:$16 sps:$4 sm:$0xff]  }
 0x3a2   : > { %7293 = vmatpush1.bf16.msra.mxu0 %v16052_v53  ;;  %v16121_v53 = vld [vmem:[#allocation7 + $0xae8] ss:$16 sps:$4 sm:$0xff]  }
 0x3a3   : > { %7809 = vmatpush1.bf16.msra.mxu1 %v16055_v10  ;;  %7294 = vmatprep.subr.bf16.mxu0 %v16060_v59  ;;  %v16124_v10 = vld [vmem:[#allocation7 + $0xb00] ss:$16 sps:$4 sm:$0xff]   ;;  %v16129_v59 = vld [vmem:[#allocation7 + $0xb0c] ss:$16 sps:$4 sm:$0xff]  }
 0x3a4   : > { %7810 = vmatprep.subr.bf16.mxu1 %v16063_v61  ;;  %v16132_v61 = vld [vmem:[#allocation7 + $0xb24] ss:$16 sps:$4 sm:$0xff]  }
 0x3a6   : > { %7295 = vmatpush1.bf16.msra.mxu0 %v16058_v14  ;;  %v16127_v14 = vld [vmem:[#allocation7 + $0xb08] ss:$16 sps:$4 sm:$0xff]  }
 0x3a7   : > { %7811 = vmatpush1.bf16.msra.mxu1 %v16061_v6  ;;  %7296 = vmatprep.subr.bf16.mxu0 %v16066_v20  ;;  %v16130_v6 = vld [vmem:[#allocation7 + $0xb20] ss:$16 sps:$4 sm:$0xff]   ;;  %v16135_v20 = vld [vmem:[#allocation7 + $0xb2c] ss:$16 sps:$4 sm:$0xff]  }
 0x3a8   : > { %7812 = vmatprep.subr.bf16.mxu1 %v16069_v22  ;;  %v16138_v22 = vld [vmem:[#allocation7 + $0xb44] ss:$16 sps:$4 sm:$0xff]  }
 0x3aa   : > { %7297 = vmatpush1.bf16.msra.mxu0 %v16064_v55  ;;  %v16133_v55 = vld [vmem:[#allocation7 + $0xb28] ss:$16 sps:$4 sm:$0xff]  }
 0x3ab   : > { %7813 = vmatpush1.bf16.msra.mxu1 %v16067_v21  ;;  %7298 = vmatprep.subr.bf16.mxu0 %v16072_v27  ;;  %v16136_v21 = vld [vmem:[#allocation7 + $0xb40] ss:$16 sps:$4 sm:$0xff]   ;;  %v16141_v27 = vld [vmem:[#allocation7 + $0xb4c] ss:$16 sps:$4 sm:$0xff]  }
 0x3ac   : > { %7814 = vmatprep.subr.bf16.mxu1 %v16075_v1  ;;  %v16144_v1 = vld [vmem:[#allocation7 + $0xb64] ss:$16 sps:$4 sm:$0xff]  }
 0x3ae   : > { %7299 = vmatpush1.bf16.msra.mxu0 %v16070_v28  ;;  %v16139_v28 = vld [vmem:[#allocation7 + $0xb48] ss:$16 sps:$4 sm:$0xff]  }
 0x3af   : > { %7815 = vmatpush1.bf16.msra.mxu1 %v16073_v25  ;;  %7311 = vmatprep.subr.bf16.mxu0 %v16078_v24  ;;  %v16142_v25 = vld [vmem:[#allocation7 + $0xb60] ss:$16 sps:$4 sm:$0xff]   ;;  %v16147_v24 = vld [vmem:[#allocation7 + $0xb6c] ss:$16 sps:$4 sm:$0xff]  }
 0x3b0   : > { %7827 = vmatprep.subr.bf16.mxu1 %v16081_v30  ;;  %v16150_v30 = vld [vmem:[#allocation7 + $0xb84] ss:$16 sps:$4 sm:$0xff]  }
 0x3b1   : > { %7301 = vmatmul.mubr.bf16.vlgmr.msra.gmra.mrb[16].mxu0 %v18751_v29 }
 0x3b2   : > { %7817 = vmatmul.mubr.bf16.vlgmr.msra.gmra.mrb[16].mxu1 %v18751_v29  ;;  %7312 = vmatpush1.bf16.msra.mxu0 %v16076_v33  ;;  %v16097_v29 = vld [vmem:[#allocation7 + $0xa68] ss:$16 sps:$4 sm:$0xff]  }
 0x3b3   : > { %7343 = vmatprep.mubr.bf16.mxu0 %v18757_v46  ;;  %7828 = vmatpush1.bf16.msra.mxu1 %v16079_v56  ;;  %v16145_v33 = vld [vmem:[#allocation7 + $0xb68] ss:$16 sps:$4 sm:$0xff]   ;;  %v16148_v56 = vld [vmem:[#allocation7 + $0xb80] ss:$16 sps:$4 sm:$0xff]  }
 0x3b4   : > { %7859 = vmatprep.mubr.bf16.mxu1 %v18757_v46  ;;  %7313 = vmatprep.subr.bf16.mxu0 %v16084_v31  ;;  %v16105_v46 = vld [vmem:[#allocation7 + $0xa8c] ss:$16 sps:$4 sm:$0xff]  }
 0x3b5   : > { %7829 = vmatprep.subr.bf16.mxu1 %v16087_v39  ;;  %v16153_v31 = vld [vmem:[#allocation7 + $0xb8c] ss:$16 sps:$4 sm:$0xff]   ;;  %v16154_v39 = vld [vmem:[#allocation7 + $0xba0] ss:$16 sps:$4 sm:$0xff]  }
 0x3b6   : > { %7314 = vmatpush1.bf16.msra.mxu0 %v16082_v48  ;;  %v16151_v48 = vld [vmem:[#allocation7 + $0xb88] ss:$16 sps:$4 sm:$0xff]  }
 0x3b7   : > { %7830 = vmatpush1.bf16.msra.mxu1 %v16085_v40  ;;  %7315 = vmatprep.subr.bf16.mxu0 %v16090_v57  ;;  %v16156_v40 = vld [vmem:[#allocation7 + $0xba4] ss:$16 sps:$4 sm:$0xff]   ;;  %v16159_v57 = vld [vmem:[#allocation7 + $0xbac] ss:$16 sps:$4 sm:$0xff]  }
 0x3b8   : > { %7831 = vmatprep.subr.bf16.mxu1 %v16093_v12  ;;  %v16157_v12 = vld [vmem:[#allocation7 + $0xba8] ss:$16 sps:$4 sm:$0xff]  }
 0x3ba   : > { %7316 = vmatpush1.bf16.msra.mxu0 %v16088_v54  ;;  %v16162_v54 = vld [vmem:[#allocation7 + $0xbc4] ss:$16 sps:$4 sm:$0xff]  }
 0x3bb   : > { %7832 = vmatpush1.bf16.msra.mxu1 %v16091_v34  ;;  %7317 = vmatprep.subr.bf16.mxu0 %v16096_v36  ;;  %v16160_v34 = vld [vmem:[#allocation7 + $0xbc0] ss:$16 sps:$4 sm:$0xff]   ;;  %v16165_v36 = vld [vmem:[#allocation7 + $0xbcc] ss:$16 sps:$4 sm:$0xff]  }
 0x3bc   : > { %7833 = vmatprep.subr.bf16.mxu1 %v16099_v37  ;;  %v16168_v37 = vld [vmem:[#allocation7 + $0xbe4] ss:$16 sps:$4 sm:$0xff]  }
 0x3be   : > { %7318 = vmatpush1.bf16.msra.mxu0 %v16094_v32  ;;  %v16163_v32 = vld [vmem:[#allocation7 + $0xbc8] ss:$16 sps:$4 sm:$0xff]  }
 0x3bf   : > { %7834 = vmatpush1.bf16.msra.mxu1 %v16097_v29  ;;  %7319 = vmatprep.subr.bf16.mxu0 %v16102_v42  ;;  %v16166_v29 = vld [vmem:[#allocation7 + $0xbe0] ss:$16 sps:$4 sm:$0xff]   ;;  %v16171_v42 = vld [vmem:[#allocation7 + $0xbec] ss:$16 sps:$4 sm:$0xff]  }
 0x3c0   : > { %7835 = vmatprep.subr.bf16.mxu1 %v16105_v46  ;;  %v16174_v46 = vld [vmem:[#allocation7 + $0xc04] ss:$16 sps:$4 sm:$0xff]  }
 0x3c2   : > { %7320 = vmatpush1.bf16.msra.mxu0 %v16100_v43  ;;  %v16169_v43 = vld [vmem:[#allocation7 + $0xbe8] ss:$16 sps:$4 sm:$0xff]  }
 0x3c3   : > { %7836 = vmatpush1.bf16.msra.mxu1 %v16103_v44  ;;  %7321 = vmatprep.subr.bf16.mxu0 %v16108_v50  ;;  %v16172_v44 = vld [vmem:[#allocation7 + $0xc00] ss:$16 sps:$4 sm:$0xff]   ;;  %v16177_v50 = vld [vmem:[#allocation7 + $0xc0c] ss:$16 sps:$4 sm:$0xff]  }
 0x3c4   : > { %7837 = vmatprep.subr.bf16.mxu1 %v16111_v41  ;;  %v16180_v41 = vld [vmem:[#allocation7 + $0xc24] ss:$16 sps:$4 sm:$0xff]  }
 0x3c6   : > { %7322 = vmatpush1.bf16.msra.mxu0 %v16106_v51  ;;  %v16175_v51 = vld [vmem:[#allocation7 + $0xc08] ss:$16 sps:$4 sm:$0xff]  }
 0x3c7   : > { %7838 = vmatpush1.bf16.msra.mxu1 %v16109_v15  ;;  %7323 = vmatprep.subr.bf16.mxu0 %v16114_v16  ;;  %v16178_v15 = vld [vmem:[#allocation7 + $0xc20] ss:$16 sps:$4 sm:$0xff]   ;;  %v16181_v16 = vld [vmem:[#allocation7 + $0xc28] ss:$16 sps:$4 sm:$0xff]  }
 0x3c8   : > { %7839 = vmatprep.subr.bf16.mxu1 %v16117_v2  ;;  %v16186_v2 = vld [vmem:[#allocation7 + $0xc44] ss:$16 sps:$4 sm:$0xff]  }
 0x3ca   : > { %7324 = vmatpush1.bf16.msra.mxu0 %v16112_v63  ;;  %v16183_v63 = vld [vmem:[#allocation7 + $0xc2c] ss:$16 sps:$4 sm:$0xff]  }
 0x3cb   : > { %7840 = vmatpush1.bf16.msra.mxu1 %v16115_v58  ;;  %7325 = vmatprep.subr.bf16.mxu0 %v16120_v3  ;;  %v16189_v58 = vld [vmem:[#allocation7 + $0xc4c] ss:$16 sps:$4 sm:$0xff]   ;;  %v16184_v3 = vld [vmem:[#allocation7 + $0xc40] ss:$16 sps:$4 sm:$0xff]  }
 0x3cc   : > { %7841 = vmatprep.subr.bf16.mxu1 %v16123_v8  ;;  %v16192_v8 = vld [vmem:[#allocation7 + $0xc64] ss:$16 sps:$4 sm:$0xff]  }
 0x3ce   : > { %7326 = vmatpush1.bf16.msra.mxu0 %v16118_v5  ;;  %v16187_v5 = vld [vmem:[#allocation7 + $0xc48] ss:$16 sps:$4 sm:$0xff]  }
 0x3cf   : > { %7842 = vmatpush1.bf16.msra.mxu1 %v16121_v53  ;;  %7327 = vmatprep.subr.bf16.mxu0 %v16126_v9  ;;  %v16190_v53 = vld [vmem:[#allocation7 + $0xc60] ss:$16 sps:$4 sm:$0xff]   ;;  %v16195_v9 = vld [vmem:[#allocation7 + $0xc6c] ss:$16 sps:$4 sm:$0xff]  }
 0x3d0   : > { %7843 = vmatprep.subr.bf16.mxu1 %v16129_v59  ;;  %v16196_v59 = vld [vmem:[#allocation7 + $0xc80] ss:$16 sps:$4 sm:$0xff]  }
 0x3d2   : > { %7328 = vmatpush1.bf16.msra.mxu0 %v16124_v10  ;;  %v16198_v10 = vld [vmem:[#allocation7 + $0xc84] ss:$16 sps:$4 sm:$0xff]  }
 0x3d3   : > { %7844 = vmatpush1.bf16.msra.mxu1 %v16127_v14  ;;  %7329 = vmatprep.subr.bf16.mxu0 %v16132_v61  ;;  %v16199_v14 = vld [vmem:[#allocation7 + $0xc88] ss:$16 sps:$4 sm:$0xff]   ;;  %v16204_v61 = vld [vmem:[#allocation7 + $0xca4] ss:$16 sps:$4 sm:$0xff]  }
 0x3d4   : > { %7845 = vmatprep.subr.bf16.mxu1 %v16135_v20  ;;  %v16207_v20 = vld [vmem:[#allocation7 + $0xcac] ss:$16 sps:$4 sm:$0xff]  }
 0x3d6   : > { %7330 = vmatpush1.bf16.msra.mxu0 %v16130_v6  ;;  %v16202_v6 = vld [vmem:[#allocation7 + $0xca0] ss:$16 sps:$4 sm:$0xff]  }
 0x3d7   : > { %7846 = vmatpush1.bf16.msra.mxu1 %v16133_v55  ;;  %7331 = vmatprep.subr.bf16.mxu0 %v16138_v22  ;;  %v16205_v55 = vld [vmem:[#allocation7 + $0xca8] ss:$16 sps:$4 sm:$0xff]   ;;  %v16210_v22 = vld [vmem:[#allocation7 + $0xcc4] ss:$16 sps:$4 sm:$0xff]  }
 0x3d8   : > { %7847 = vmatprep.subr.bf16.mxu1 %v16141_v27  ;;  %v16213_v27 = vld [vmem:[#allocation7 + $0xccc] ss:$16 sps:$4 sm:$0xff]  }
 0x3da   : > { %7332 = vmatpush1.bf16.msra.mxu0 %v16136_v21  ;;  %v16208_v21 = vld [vmem:[#allocation7 + $0xcc0] ss:$16 sps:$4 sm:$0xff]  }
 0x3db   : > { %7848 = vmatpush1.bf16.msra.mxu1 %v16139_v28  ;;  %7333 = vmatprep.subr.bf16.mxu0 %v16144_v1  ;;  %v16211_v28 = vld [vmem:[#allocation7 + $0xcc8] ss:$16 sps:$4 sm:$0xff]   ;;  %v16216_v1 = vld [vmem:[#allocation7 + $0xce4] ss:$16 sps:$4 sm:$0xff]  }
 0x3dc   : > { %7849 = vmatprep.subr.bf16.mxu1 %v16147_v24  ;;  %v16219_v24 = vld [vmem:[#allocation7 + $0xcec] ss:$16 sps:$4 sm:$0xff]  }
 0x3de   : > { %7334 = vmatpush1.bf16.msra.mxu0 %v16142_v25  ;;  %v16214_v25 = vld [vmem:[#allocation7 + $0xce0] ss:$16 sps:$4 sm:$0xff]  }
 0x3df   : > { %7850 = vmatpush1.bf16.msra.mxu1 %v16145_v33  ;;  %7335 = vmatprep.subr.bf16.mxu0 %v16150_v30  ;;  %v16217_v33 = vld [vmem:[#allocation7 + $0xce8] ss:$16 sps:$4 sm:$0xff]   ;;  %v16222_v30 = vld [vmem:[#allocation7 + $0xd04] ss:$16 sps:$4 sm:$0xff]  }
 0x3e0   : > { %7851 = vmatprep.subr.bf16.mxu1 %v16153_v31  ;;  %v16225_v31 = vld [vmem:[#allocation7 + $0xd0c] ss:$16 sps:$4 sm:$0xff]  }
 0x3e2   : > { %7336 = vmatpush1.bf16.msra.mxu0 %v16148_v56  ;;  %v16220_v56 = vld [vmem:[#allocation7 + $0xd00] ss:$16 sps:$4 sm:$0xff]  }
 0x3e3   : > { %7852 = vmatpush1.bf16.msra.mxu1 %v16151_v48  ;;  %7337 = vmatprep.subr.bf16.mxu0 %v16156_v40  ;;  %v16223_v48 = vld [vmem:[#allocation7 + $0xd08] ss:$16 sps:$4 sm:$0xff]   ;;  %v16228_v40 = vld [vmem:[#allocation7 + $0xd24] ss:$16 sps:$4 sm:$0xff]  }
 0x3e4   : > { %7853 = vmatprep.subr.bf16.mxu1 %v16159_v57  ;;  %v16231_v57 = vld [vmem:[#allocation7 + $0xd2c] ss:$16 sps:$4 sm:$0xff]  }
 0x3e6   : > { %7338 = vmatpush1.bf16.msra.mxu0 %v16154_v39  ;;  %v16226_v39 = vld [vmem:[#allocation7 + $0xd20] ss:$16 sps:$4 sm:$0xff]  }
 0x3e7   : > { %7854 = vmatpush1.bf16.msra.mxu1 %v16157_v12  ;;  %7339 = vmatprep.subr.bf16.mxu0 %v16162_v54  ;;  %v16229_v12 = vld [vmem:[#allocation7 + $0xd28] ss:$16 sps:$4 sm:$0xff]   ;;  %v16234_v54 = vld [vmem:[#allocation7 + $0xd44] ss:$16 sps:$4 sm:$0xff]  }
 0x3e8   : > { %7855 = vmatprep.subr.bf16.mxu1 %v16165_v36  ;;  %v16237_v36 = vld [vmem:[#allocation7 + $0xd4c] ss:$16 sps:$4 sm:$0xff]  }
 0x3ea   : > { %7340 = vmatpush1.bf16.msra.mxu0 %v16160_v34  ;;  %v16232_v34 = vld [vmem:[#allocation7 + $0xd40] ss:$16 sps:$4 sm:$0xff]  }
 0x3eb   : > { %7856 = vmatpush1.bf16.msra.mxu1 %v16163_v32  ;;  %7341 = vmatprep.subr.bf16.mxu0 %v16168_v37  ;;  %v16235_v32 = vld [vmem:[#allocation7 + $0xd48] ss:$16 sps:$4 sm:$0xff]   ;;  %v16240_v37 = vld [vmem:[#allocation7 + $0xd64] ss:$16 sps:$4 sm:$0xff]  }
 0x3ec   : > { %7857 = vmatprep.subr.bf16.mxu1 %v16171_v42  ;;  %v16243_v42 = vld [vmem:[#allocation7 + $0xd6c] ss:$16 sps:$4 sm:$0xff]  }
 0x3ee   : > { %7342 = vmatpush1.bf16.msra.mxu0 %v16166_v29  ;;  %v16238_v29 = vld [vmem:[#allocation7 + $0xd60] ss:$16 sps:$4 sm:$0xff]  }
 0x3ef   : > { %7858 = vmatpush1.bf16.msra.mxu1 %v16169_v43  ;;  %7354 = vmatprep.subr.bf16.mxu0 %v16174_v46  ;;  %v16241_v43 = vld [vmem:[#allocation7 + $0xd68] ss:$16 sps:$4 sm:$0xff]   ;;  %v16246_v46 = vld [vmem:[#allocation7 + $0xd84] ss:$16 sps:$4 sm:$0xff]  }
 0x3f0   : > { %7870 = vmatprep.subr.bf16.mxu1 %v16177_v50  ;;  %v16249_v50 = vld [vmem:[#allocation7 + $0xd8c] ss:$16 sps:$4 sm:$0xff]  }
 0x3f1   : > { %7344 = vmatmul.mubr.bf16.vlgmr.msra.gmra.mrb[16].mxu0 %v18753_v49 }
 0x3f2   : > { %7860 = vmatmul.mubr.bf16.vlgmr.msra.gmra.mrb[16].mxu1 %v18753_v49  ;;  %7355 = vmatpush1.bf16.msra.mxu0 %v16172_v44  ;;  %v16193_v49 = vld [vmem:[#allocation7 + $0xc68] ss:$16 sps:$4 sm:$0xff]   ;;  %v16244_v44 = vld [vmem:[#allocation7 + $0xd80] ss:$16 sps:$4 sm:$0xff]  }
 0x3f3   : > { %7386 = vmatprep.mubr.bf16.mxu0 %v18779_v19  ;;  %7871 = vmatpush1.bf16.msra.mxu1 %v16175_v51  ;;  %v16247_v51 = vld [vmem:[#allocation7 + $0xd88] ss:$16 sps:$4 sm:$0xff]  }
 0x3f4   : > { %7902 = vmatprep.mubr.bf16.mxu1 %v18779_v19  ;;  %7356 = vmatprep.subr.bf16.mxu0 %v16180_v41  ;;  %v16201_v19 = vld [vmem:[#allocation7 + $0xc8c] ss:$16 sps:$4 sm:$0xff]   ;;  %v16252_v41 = vld [vmem:[#allocation7 + $0xda4] ss:$16 sps:$4 sm:$0xff]  }
 0x3f5   : > { %7872 = vmatprep.subr.bf16.mxu1 %v16183_v63  ;;  %v16253_v63 = vld [vmem:[#allocation7 + $0xda8] ss:$16 sps:$4 sm:$0xff]  }
 0x3f6   : > { %7357 = vmatpush1.bf16.msra.mxu0 %v16178_v15  ;;  %v16250_v15 = vld [vmem:[#allocation7 + $0xda0] ss:$16 sps:$4 sm:$0xff]  }
 0x3f7   : > { %7873 = vmatpush1.bf16.msra.mxu1 %v16181_v16  ;;  %7358 = vmatprep.subr.bf16.mxu0 %v16186_v2  ;;  %v16255_v16 = vld [vmem:[#allocation7 + $0xdac] ss:$16 sps:$4 sm:$0xff]   ;;  %v16258_v2 = vld [vmem:[#allocation7 + $0xdc4] ss:$16 sps:$4 sm:$0xff]  }
 0x3f8   : > { %7874 = vmatprep.subr.bf16.mxu1 %v16189_v58  ;;  %v16256_v58 = vld [vmem:[#allocation7 + $0xdc0] ss:$16 sps:$4 sm:$0xff]  }
 0x3fa   : > { %7359 = vmatpush1.bf16.msra.mxu0 %v16184_v3  ;;  %v16261_v3 = vld [vmem:[#allocation7 + $0xdcc] ss:$16 sps:$4 sm:$0xff]  }
 0x3fb   : > { %7875 = vmatpush1.bf16.msra.mxu1 %v16187_v5  ;;  %7360 = vmatprep.subr.bf16.mxu0 %v16192_v8  ;;  %v16259_v5 = vld [vmem:[#allocation7 + $0xdc8] ss:$16 sps:$4 sm:$0xff]   ;;  %v16264_v8 = vld [vmem:[#allocation7 + $0xde4] ss:$16 sps:$4 sm:$0xff]  }
 0x3fc   : > { %7876 = vmatprep.subr.bf16.mxu1 %v16195_v9  ;;  %v16267_v9 = vld [vmem:[#allocation7 + $0xdec] ss:$16 sps:$4 sm:$0xff]  }
 0x3fe   : > { %7361 = vmatpush1.bf16.msra.mxu0 %v16190_v53  ;;  %v16262_v53 = vld [vmem:[#allocation7 + $0xde0] ss:$16 sps:$4 sm:$0xff]  }
 0x3ff   : > { %7877 = vmatpush1.bf16.msra.mxu1 %v16193_v49  ;;  %7362 = vmatprep.subr.bf16.mxu0 %v16198_v10  ;;  %v16265_v49 = vld [vmem:[#allocation7 + $0xde8] ss:$16 sps:$4 sm:$0xff]   ;;  %v16270_v10 = vld [vmem:[#allocation7 + $0xe04] ss:$16 sps:$4 sm:$0xff]  }
 0x400   : > { %7878 = vmatprep.subr.bf16.mxu1 %v16201_v19  ;;  %v16268_v19 = vld [vmem:[#allocation7 + $0xe00] ss:$16 sps:$4 sm:$0xff]  }
 0x402   : > { %7363 = vmatpush1.bf16.msra.mxu0 %v16196_v59  ;;  %v16273_v59 = vld [vmem:[#allocation7 + $0xe0c] ss:$16 sps:$4 sm:$0xff]  }
 0x403   : > { %7879 = vmatpush1.bf16.msra.mxu1 %v16199_v14  ;;  %7364 = vmatprep.subr.bf16.mxu0 %v16204_v61  ;;  %v16271_v14 = vld [vmem:[#allocation7 + $0xe08] ss:$16 sps:$4 sm:$0xff]   ;;  %v16276_v61 = vld [vmem:[#allocation7 + $0xe24] ss:$16 sps:$4 sm:$0xff]  }
 0x404   : > { %7880 = vmatprep.subr.bf16.mxu1 %v16207_v20  ;;  %v16274_v20 = vld [vmem:[#allocation7 + $0xe20] ss:$16 sps:$4 sm:$0xff]  }
 0x406   : > { %7365 = vmatpush1.bf16.msra.mxu0 %v16202_v6  ;;  %v16279_v6 = vld [vmem:[#allocation7 + $0xe2c] ss:$16 sps:$4 sm:$0xff]  }
 0x407   : > { %7881 = vmatpush1.bf16.msra.mxu1 %v16205_v55  ;;  %7366 = vmatprep.subr.bf16.mxu0 %v16210_v22  ;;  %v16277_v55 = vld [vmem:[#allocation7 + $0xe28] ss:$16 sps:$4 sm:$0xff]   ;;  %v16282_v22 = vld [vmem:[#allocation7 + $0xe44] ss:$16 sps:$4 sm:$0xff]  }
 0x408   : > { %7882 = vmatprep.subr.bf16.mxu1 %v16213_v27  ;;  %v16280_v27 = vld [vmem:[#allocation7 + $0xe40] ss:$16 sps:$4 sm:$0xff]  }
 0x40a   : > { %7367 = vmatpush1.bf16.msra.mxu0 %v16208_v21  ;;  %v16285_v21 = vld [vmem:[#allocation7 + $0xe4c] ss:$16 sps:$4 sm:$0xff]  }
 0x40b   : > { %7883 = vmatpush1.bf16.msra.mxu1 %v16211_v28  ;;  %7368 = vmatprep.subr.bf16.mxu0 %v16216_v1  ;;  %v16283_v28 = vld [vmem:[#allocation7 + $0xe48] ss:$16 sps:$4 sm:$0xff]   ;;  %v16288_v1 = vld [vmem:[#allocation7 + $0xe64] ss:$16 sps:$4 sm:$0xff]  }
 0x40c   : > { %7884 = vmatprep.subr.bf16.mxu1 %v16219_v24  ;;  %v16289_v24 = vld [vmem:[#allocation7 + $0xe68] ss:$16 sps:$4 sm:$0xff]  }
 0x40e   : > { %7369 = vmatpush1.bf16.msra.mxu0 %v16214_v25  ;;  %v16286_v25 = vld [vmem:[#allocation7 + $0xe60] ss:$16 sps:$4 sm:$0xff]  }
 0x40f   : > { %7885 = vmatpush1.bf16.msra.mxu1 %v16217_v33  ;;  %7370 = vmatprep.subr.bf16.mxu0 %v16222_v30  ;;  %v16294_v33 = vld [vmem:[#allocation7 + $0xe84] ss:$16 sps:$4 sm:$0xff]   ;;  %v16297_v30 = vld [vmem:[#allocation7 + $0xe8c] ss:$16 sps:$4 sm:$0xff]  }
 0x410   : > { %7886 = vmatprep.subr.bf16.mxu1 %v16225_v31  ;;  %v16300_v31 = vld [vmem:[#allocation7 + $0xea4] ss:$16 sps:$4 sm:$0xff]  }
 0x412   : > { %7371 = vmatpush1.bf16.msra.mxu0 %v16220_v56  ;;  %v16295_v56 = vld [vmem:[#allocation7 + $0xe88] ss:$16 sps:$4 sm:$0xff]  }
 0x413   : > { %7887 = vmatpush1.bf16.msra.mxu1 %v16223_v48  ;;  %7372 = vmatprep.subr.bf16.mxu0 %v16228_v40  ;;  %v16303_v48 = vld [vmem:[#allocation7 + $0xeac] ss:$16 sps:$4 sm:$0xff]   ;;  %v16298_v40 = vld [vmem:[#allocation7 + $0xea0] ss:$16 sps:$4 sm:$0xff]  }
 0x414   : > { %7888 = vmatprep.subr.bf16.mxu1 %v16231_v57  ;;  %v16306_v57 = vld [vmem:[#allocation7 + $0xec4] ss:$16 sps:$4 sm:$0xff]  }
 0x416   : > { %7373 = vmatpush1.bf16.msra.mxu0 %v16226_v39  ;;  %v16301_v39 = vld [vmem:[#allocation7 + $0xea8] ss:$16 sps:$4 sm:$0xff]  }
 0x417   : > { %7889 = vmatpush1.bf16.msra.mxu1 %v16229_v12  ;;  %7374 = vmatprep.subr.bf16.mxu0 %v16234_v54  ;;  %v16309_v12 = vld [vmem:[#allocation7 + $0xecc] ss:$16 sps:$4 sm:$0xff]   ;;  %v16304_v54 = vld [vmem:[#allocation7 + $0xec0] ss:$16 sps:$4 sm:$0xff]  }
 0x418   : > { %7890 = vmatprep.subr.bf16.mxu1 %v16237_v36  ;;  %v16312_v36 = vld [vmem:[#allocation7 + $0xee4] ss:$16 sps:$4 sm:$0xff]  }
 0x41a   : > { %7375 = vmatpush1.bf16.msra.mxu0 %v16232_v34  ;;  %v16307_v34 = vld [vmem:[#allocation7 + $0xec8] ss:$16 sps:$4 sm:$0xff]  }
 0x41b   : > { %7891 = vmatpush1.bf16.msra.mxu1 %v16235_v32  ;;  %7376 = vmatprep.subr.bf16.mxu0 %v16240_v37  ;;  %v16315_v32 = vld [vmem:[#allocation7 + $0xeec] ss:$16 sps:$4 sm:$0xff]   ;;  %v16310_v37 = vld [vmem:[#allocation7 + $0xee0] ss:$16 sps:$4 sm:$0xff]  }
 0x41c   : > { %7892 = vmatprep.subr.bf16.mxu1 %v16243_v42  ;;  %v16318_v42 = vld [vmem:[#allocation7 + $0xf04] ss:$16 sps:$4 sm:$0xff]  }
 0x41e   : > { %7377 = vmatpush1.bf16.msra.mxu0 %v16238_v29  ;;  %v16313_v29 = vld [vmem:[#allocation7 + $0xee8] ss:$16 sps:$4 sm:$0xff]  }
 0x41f   : > { %7893 = vmatpush1.bf16.msra.mxu1 %v16241_v43  ;;  %7378 = vmatprep.subr.bf16.mxu0 %v16246_v46  ;;  %v16321_v43 = vld [vmem:[#allocation7 + $0xf0c] ss:$16 sps:$4 sm:$0xff]   ;;  %v16316_v46 = vld [vmem:[#allocation7 + $0xf00] ss:$16 sps:$4 sm:$0xff]  }
 0x420   : > { %7894 = vmatprep.subr.bf16.mxu1 %v16249_v50  ;;  %v16324_v50 = vld [vmem:[#allocation7 + $0xf24] ss:$16 sps:$4 sm:$0xff]  }
 0x422   : > { %7379 = vmatpush1.bf16.msra.mxu0 %v16244_v44  ;;  %v16319_v44 = vld [vmem:[#allocation7 + $0xf08] ss:$16 sps:$4 sm:$0xff]  }
 0x423   : > { %7895 = vmatpush1.bf16.msra.mxu1 %v16247_v51  ;;  %7380 = vmatprep.subr.bf16.mxu0 %v16252_v41  ;;  %v16327_v51 = vld [vmem:[#allocation7 + $0xf2c] ss:$16 sps:$4 sm:$0xff]   ;;  %v16322_v41 = vld [vmem:[#allocation7 + $0xf20] ss:$16 sps:$4 sm:$0xff]  }
 0x424   : > { %7896 = vmatprep.subr.bf16.mxu1 %v16255_v16  ;;  %v16330_v16 = vld [vmem:[#allocation7 + $0xf44] ss:$16 sps:$4 sm:$0xff]  }
 0x426   : > { %7381 = vmatpush1.bf16.msra.mxu0 %v16250_v15  ;;  %v16325_v15 = vld [vmem:[#allocation7 + $0xf28] ss:$16 sps:$4 sm:$0xff]  }
 0x427   : > { %7897 = vmatpush1.bf16.msra.mxu1 %v16253_v63  ;;  %7382 = vmatprep.subr.bf16.mxu0 %v16258_v2  ;;  %v16333_v63 = vld [vmem:[#allocation7 + $0xf4c] ss:$16 sps:$4 sm:$0xff]   ;;  %v16328_v2 = vld [vmem:[#allocation7 + $0xf40] ss:$16 sps:$4 sm:$0xff]  }
 0x428   : > { %7898 = vmatprep.subr.bf16.mxu1 %v16261_v3  ;;  %v16336_v3 = vld [vmem:[#allocation7 + $0xf64] ss:$16 sps:$4 sm:$0xff]  }
 0x42a   : > { %7383 = vmatpush1.bf16.msra.mxu0 %v16256_v58  ;;  %v16331_v58 = vld [vmem:[#allocation7 + $0xf48] ss:$16 sps:$4 sm:$0xff]  }
 0x42b   : > { %7899 = vmatpush1.bf16.msra.mxu1 %v16259_v5  ;;  %7384 = vmatprep.subr.bf16.mxu0 %v16264_v8  ;;  %v16339_v5 = vld [vmem:[#allocation7 + $0xf6c] ss:$16 sps:$4 sm:$0xff]   ;;  %v16334_v8 = vld [vmem:[#allocation7 + $0xf60] ss:$16 sps:$4 sm:$0xff]  }
 0x42c   : > { %7900 = vmatprep.subr.bf16.mxu1 %v16267_v9  ;;  %v16342_v9 = vld [vmem:[#allocation7 + $0xf84] ss:$16 sps:$4 sm:$0xff]  }
 0x42e   : > { %7385 = vmatpush1.bf16.msra.mxu0 %v16262_v53  ;;  %v16337_v53 = vld [vmem:[#allocation7 + $0xf68] ss:$16 sps:$4 sm:$0xff]  }
 0x42f   : > { %7901 = vmatpush1.bf16.msra.mxu1 %v16265_v49  ;;  %7397 = vmatprep.subr.bf16.mxu0 %v16270_v10  ;;  %v16345_v49 = vld [vmem:[#allocation7 + $0xf8c] ss:$16 sps:$4 sm:$0xff]   ;;  %v16340_v10 = vld [vmem:[#allocation7 + $0xf80] ss:$16 sps:$4 sm:$0xff]  }
 0x430   : > { %7913 = vmatprep.subr.bf16.mxu1 %v16273_v59  ;;  %v16343_v59 = vld [vmem:[#allocation7 + $0xf88] ss:$16 sps:$4 sm:$0xff]  }
 0x431   : > { %7387 = vmatmul.mubr.bf16.vlgmr.msra.gmra.mrb[16].mxu0 %v18775_v60 }
 0x432   : > { %7903 = vmatmul.mubr.bf16.vlgmr.msra.gmra.mrb[16].mxu1 %v18775_v60  ;;  %7398 = vmatpush1.bf16.msra.mxu0 %v16268_v19  ;;  %v16291_v60 = vld [vmem:[#allocation7 + $0xe6c] ss:$16 sps:$4 sm:$0xff]   ;;  %v16348_v19 = vld [vmem:[#allocation7 + $0xfa4] ss:$16 sps:$4 sm:$0xff]  }
 0x433   : > { %7429 = vmatprep.mubr.bf16.mxu0 %v18781_v23  ;;  %7914 = vmatpush1.bf16.msra.mxu1 %v16271_v14  ;;  %v16351_v14 = vld [vmem:[#allocation7 + $0xfac] ss:$16 sps:$4 sm:$0xff]  }
 0x434   : > { %7945 = vmatprep.mubr.bf16.mxu1 %v18781_v23  ;;  %7399 = vmatprep.subr.bf16.mxu0 %v16276_v61  ;;  %v16292_v23 = vld [vmem:[#allocation7 + $0xe80] ss:$16 sps:$4 sm:$0xff]  }
 0x435   : > { %7915 = vmatprep.subr.bf16.mxu1 %v16279_v6  ;;  %v16346_v61 = vld [vmem:[#allocation7 + $0xfa0] ss:$16 sps:$4 sm:$0xff]   ;;  %v16349_v6 = vld [vmem:[#allocation7 + $0xfa8] ss:$16 sps:$4 sm:$0xff]  }
 0x436   : > { %7400 = vmatpush1.bf16.msra.mxu0 %v16274_v20  ;;  %v16354_v20 = vld [vmem:[#allocation7 + $0xfc4] ss:$16 sps:$4 sm:$0xff]  }
 0x437   : > { %7916 = vmatpush1.bf16.msra.mxu1 %v16277_v55  ;;  %7401 = vmatprep.subr.bf16.mxu0 %v16282_v22  ;;  %v16357_v55 = vld [vmem:[#allocation7 + $0xfcc] ss:$16 sps:$4 sm:$0xff]   ;;  %v16352_v22 = vld [vmem:[#allocation7 + $0xfc0] ss:$16 sps:$4 sm:$0xff]  }
 0x438   : > { %7917 = vmatprep.subr.bf16.mxu1 %v16285_v21  ;;  %v16355_v21 = vld [vmem:[#allocation7 + $0xfc8] ss:$16 sps:$4 sm:$0xff]  }
 0x43a   : > { %7402 = vmatpush1.bf16.msra.mxu0 %v16280_v27  ;;  %v16360_v27 = vld [vmem:[#allocation7 + $0xfe4] ss:$16 sps:$4 sm:$0xff]  }
 0x43b   : > { %7918 = vmatpush1.bf16.msra.mxu1 %v16283_v28  ;;  %7403 = vmatprep.subr.bf16.mxu0 %v16288_v1  ;;  %v16363_v28 = vld [vmem:[#allocation7 + $0xfec] ss:$16 sps:$4 sm:$0xff]   ;;  %v3181_v1 = vshll.u32 %v18628_v17, 16 }
 0x43c   : > { %7919 = vmatprep.subr.bf16.mxu1 %v16291_v60  ;;  %v16358_v60 = vld [vmem:[#allocation7 + $0xfe0] ss:$16 sps:$4 sm:$0xff]  }
 0x43e   : > { %7404 = vmatpush1.bf16.msra.mxu0 %v16286_v25  ;;  %v16361_v25 = vld [vmem:[#allocation7 + $0xfe8] ss:$16 sps:$4 sm:$0xff]  }
 0x43f   : > { %7920 = vmatpush1.bf16.msra.mxu1 %v16289_v24  ;;  %7405 = vmatprep.subr.bf16.mxu0 %v16294_v33  ;;  %v16366_v24 = vld [vmem:[#allocation7 + $0x1004] ss:$16 sps:$4 sm:$0xff]   ;;  %v16369_v33 = vld [vmem:[#allocation7 + $0x100c] ss:$16 sps:$4 sm:$0xff]  }
 0x440   : > { %7921 = vmatprep.subr.bf16.mxu1 %v16297_v30  ;;  %v3183_v30 = vrot.slane %v3181_v1, 1  ;;  %v16430_v1 = vld [vmem:[#allocation7 + $0x1160] ss:$16 sps:$4 sm:$0xff]  }
 0x442   : > { %7406 = vmatpush1.bf16.msra.mxu0 %v16292_v23  ;;  %v16364_v23 = vld [vmem:[#allocation7 + $0x1000] ss:$16 sps:$4 sm:$0xff]  }
 0x443   : > { %7922 = vmatpush1.bf16.msra.mxu1 %v16295_v56  ;;  %7407 = vmatprep.subr.bf16.mxu0 %v16300_v31  ;;  %v16367_v56 = vld [vmem:[#allocation7 + $0x1008] ss:$16 sps:$4 sm:$0xff]   ;;  %v3179_v31 = vshrl.u32 %v18628_v17, 16  ;;  %v16376_v17 = vld [vmem:[#allocation7 + $0x1040] ss:$16 sps:$4 sm:$0xff]  }
 0x444   : > { %7923 = vmatprep.subr.bf16.mxu1 %v16303_v48  ;;  %v16372_v48 = vld [vmem:[#allocation7 + $0x1024] ss:$16 sps:$4 sm:$0xff]  }
 0x446   : > { %7408 = vmatpush1.bf16.msra.mxu0 %v16298_v40  ;;  %v3184_v40 = vor.u32 %v3183_v30, %v3179_v31  ;;  %v16439_v30 = vld [vmem:[#allocation7 + $0x1188] ss:$16 sps:$4 sm:$0xff]   ;;  %v16442_v31 = vld [vmem:[#allocation7 + $0x11a0] ss:$16 sps:$4 sm:$0xff]  }
 0x447   : > { %7924 = vmatpush1.bf16.msra.mxu1 %v16301_v39  ;;  %7409 = vmatprep.subr.bf16.mxu0 %v16306_v57  ;;  %v16375_v39 = vld [vmem:[#allocation7 + $0x102c] ss:$16 sps:$4 sm:$0xff]   ;;  %v16370_v57 = vld [vmem:[#allocation7 + $0x1020] ss:$16 sps:$4 sm:$0xff]  }
 0x448   : > { %7925 = vmatprep.subr.bf16.mxu1 %v16309_v12  ;;  %v16373_v12 = vld [vmem:[#allocation7 + $0x1028] ss:$16 sps:$4 sm:$0xff]  }
 0x44a   : > { %7410 = vmatpush1.bf16.msra.mxu0 %v16304_v54  ;;  %v16378_v54 = vld [vmem:[#allocation7 + $0x1044] ss:$16 sps:$4 sm:$0xff]  }
 0x44b   : > { %7926 = vmatpush1.bf16.msra.mxu1 %v16307_v34  ;;  %7411 = vmatprep.subr.bf16.mxu0 %v16312_v36  ;;  %v16381_v34 = vld [vmem:[#allocation7 + $0x104c] ss:$16 sps:$4 sm:$0xff]   ;;  %v16379_v36 = vld [vmem:[#allocation7 + $0x1048] ss:$16 sps:$4 sm:$0xff]  }
 0x44c   : > { %7927 = vmatprep.subr.bf16.mxu1 %v16315_v32  ;;  %v16384_v32 = vld [vmem:[#allocation7 + $0x1064] ss:$16 sps:$4 sm:$0xff]  }
 0x44e   : > { %7412 = vmatpush1.bf16.msra.mxu0 %v16310_v37  ;;  %v16387_v37 = vld [vmem:[#allocation7 + $0x106c] ss:$16 sps:$4 sm:$0xff]  }
 0x44f   : > { %7928 = vmatpush1.bf16.msra.mxu1 %v16313_v29  ;;  %7413 = vmatprep.subr.bf16.mxu0 %v16318_v42  ;;  %v16385_v29 = vld [vmem:[#allocation7 + $0x1068] ss:$16 sps:$4 sm:$0xff]   ;;  %v16390_v42 = vld [vmem:[#allocation7 + $0x1084] ss:$16 sps:$4 sm:$0xff]  }
 0x450   : > { %7929 = vmatprep.subr.bf16.mxu1 %v16321_v43  ;;  %v16393_v43 = vld [vmem:[#allocation7 + $0x108c] ss:$16 sps:$4 sm:$0xff]  }
 0x452   : > { %7414 = vmatpush1.bf16.msra.mxu0 %v16316_v46  ;;  %v16388_v46 = vld [vmem:[#allocation7 + $0x1080] ss:$16 sps:$4 sm:$0xff]  }
 0x453   : > { %7930 = vmatpush1.bf16.msra.mxu1 %v16319_v44  ;;  %7415 = vmatprep.subr.bf16.mxu0 %v16324_v50  ;;  %v16391_v44 = vld [vmem:[#allocation7 + $0x1088] ss:$16 sps:$4 sm:$0xff]   ;;  %v16396_v50 = vld [vmem:[#allocation7 + $0x10a4] ss:$16 sps:$4 sm:$0xff]  }
 0x454   : > { %7931 = vmatprep.subr.bf16.mxu1 %v16327_v51  ;;  %v16399_v51 = vld [vmem:[#allocation7 + $0x10ac] ss:$16 sps:$4 sm:$0xff]  }
 0x456   : > { %7416 = vmatpush1.bf16.msra.mxu0 %v16322_v41  ;;  %v16394_v41 = vld [vmem:[#allocation7 + $0x10a0] ss:$16 sps:$4 sm:$0xff]  }
 0x457   : > { %7932 = vmatpush1.bf16.msra.mxu1 %v16325_v15  ;;  %7417 = vmatprep.subr.bf16.mxu0 %v16330_v16  ;;  %v16397_v15 = vld [vmem:[#allocation7 + $0x10a8] ss:$16 sps:$4 sm:$0xff]   ;;  %v16402_v16 = vld [vmem:[#allocation7 + $0x10c4] ss:$16 sps:$4 sm:$0xff]  }
 0x458   : > { %7933 = vmatprep.subr.bf16.mxu1 %v16333_v63  ;;  %v16405_v63 = vld [vmem:[#allocation7 + $0x10cc] ss:$16 sps:$4 sm:$0xff]  }
 0x45a   : > { %7418 = vmatpush1.bf16.msra.mxu0 %v16328_v2  ;;  %v16400_v2 = vld [vmem:[#allocation7 + $0x10c0] ss:$16 sps:$4 sm:$0xff]  }
 0x45b   : > { %7934 = vmatpush1.bf16.msra.mxu1 %v16331_v58  ;;  %7419 = vmatprep.subr.bf16.mxu0 %v16336_v3  ;;  %v16403_v58 = vld [vmem:[#allocation7 + $0x10c8] ss:$16 sps:$4 sm:$0xff]   ;;  %v16408_v3 = vld [vmem:[#allocation7 + $0x10e4] ss:$16 sps:$4 sm:$0xff]  }
 0x45c   : > { %7935 = vmatprep.subr.bf16.mxu1 %v16339_v5  ;;  %v16411_v5 = vld [vmem:[#allocation7 + $0x10ec] ss:$16 sps:$4 sm:$0xff]  }
 0x45e   : > { %7420 = vmatpush1.bf16.msra.mxu0 %v16334_v8  ;;  %v16406_v8 = vld [vmem:[#allocation7 + $0x10e0] ss:$16 sps:$4 sm:$0xff]  }
 0x45f   : > { %7936 = vmatpush1.bf16.msra.mxu1 %v16337_v53  ;;  %7421 = vmatprep.subr.bf16.mxu0 %v16342_v9  ;;  %v16409_v53 = vld [vmem:[#allocation7 + $0x10e8] ss:$16 sps:$4 sm:$0xff]   ;;  %v16414_v9 = vld [vmem:[#allocation7 + $0x1104] ss:$16 sps:$4 sm:$0xff]  }
 0x460   : > { %7937 = vmatprep.subr.bf16.mxu1 %v16345_v49  ;;  %v16417_v49 = vld [vmem:[#allocation7 + $0x110c] ss:$16 sps:$4 sm:$0xff]  }
 0x462   : > { %7422 = vmatpush1.bf16.msra.mxu0 %v16340_v10  ;;  %v16412_v10 = vld [vmem:[#allocation7 + $0x1100] ss:$16 sps:$4 sm:$0xff]  }
 0x463   : > { %7938 = vmatpush1.bf16.msra.mxu1 %v16343_v59  ;;  %7423 = vmatprep.subr.bf16.mxu0 %v16348_v19  ;;  %v16415_v59 = vld [vmem:[#allocation7 + $0x1108] ss:$16 sps:$4 sm:$0xff]   ;;  %v16420_v19 = vld [vmem:[#allocation7 + $0x1124] ss:$16 sps:$4 sm:$0xff]  }
 0x464   : > { %7939 = vmatprep.subr.bf16.mxu1 %v16351_v14  ;;  %v16423_v14 = vld [vmem:[#allocation7 + $0x112c] ss:$16 sps:$4 sm:$0xff]  }
 0x466   : > { %7424 = vmatpush1.bf16.msra.mxu0 %v16346_v61  ;;  %v16418_v61 = vld [vmem:[#allocation7 + $0x1120] ss:$16 sps:$4 sm:$0xff]  }
 0x467   : > { %7940 = vmatpush1.bf16.msra.mxu1 %v16349_v6  ;;  %7425 = vmatprep.subr.bf16.mxu0 %v16354_v20  ;;  %v16421_v6 = vld [vmem:[#allocation7 + $0x1128] ss:$16 sps:$4 sm:$0xff]   ;;  %v16426_v20 = vld [vmem:[#allocation7 + $0x1144] ss:$16 sps:$4 sm:$0xff]  }
 0x468   : > { %7941 = vmatprep.subr.bf16.mxu1 %v16357_v55  ;;  %v16429_v55 = vld [vmem:[#allocation7 + $0x114c] ss:$16 sps:$4 sm:$0xff]  }
 0x46a   : > { %7426 = vmatpush1.bf16.msra.mxu0 %v16352_v22  ;;  %v16424_v22 = vld [vmem:[#allocation7 + $0x1140] ss:$16 sps:$4 sm:$0xff]  }
 0x46b   : > { %7942 = vmatpush1.bf16.msra.mxu1 %v16355_v21  ;;  %7427 = vmatprep.subr.bf16.mxu0 %v16360_v27  ;;  %v16427_v21 = vld [vmem:[#allocation7 + $0x1148] ss:$16 sps:$4 sm:$0xff]   ;;  %v16432_v27 = vld [vmem:[#allocation7 + $0x1164] ss:$16 sps:$4 sm:$0xff]  }
 0x46c   : > { %7943 = vmatprep.subr.bf16.mxu1 %v16363_v28  ;;  %v16435_v28 = vld [vmem:[#allocation7 + $0x116c] ss:$16 sps:$4 sm:$0xff]  }
 0x46e   : > { %7428 = vmatpush1.bf16.msra.mxu0 %v16358_v60  ;;  %v16433_v60 = vld [vmem:[#allocation7 + $0x1168] ss:$16 sps:$4 sm:$0xff]  }
 0x46f   : > { %7944 = vmatpush1.bf16.msra.mxu1 %v16361_v25  ;;  %7440 = vmatprep.subr.bf16.mxu0 %v16366_v24  ;;  %v16438_v25 = vld [vmem:[#allocation7 + $0x1184] ss:$16 sps:$4 sm:$0xff]   ;;  %v16441_v24 = vld [vmem:[#allocation7 + $0x118c] ss:$16 sps:$4 sm:$0xff]  }
 0x470   : > { %7956 = vmatprep.subr.bf16.mxu1 %v16369_v33  ;;  %v16436_v33 = vld [vmem:[#allocation7 + $0x1180] ss:$16 sps:$4 sm:$0xff]  }
 0x471   : > { %7430 = vmatmul.mubr.bf16.vlgmr.msra.gmra.mrb[16].mxu0 %v18777_v18 }
 0x472   : > { %7946 = vmatmul.mubr.bf16.vlgmr.msra.gmra.mrb[16].mxu1 %v18777_v18  ;;  %7441 = vmatpush1.bf16.msra.mxu0 %v16364_v23  ;;  %v16382_v18 = vld [vmem:[#allocation7 + $0x1060] ss:$16 sps:$4 sm:$0xff]   ;;  %v16444_v23 = vld [vmem:[#allocation7 + $0x11a4] ss:$16 sps:$4 sm:$0xff]  }
 0x473   : > { %7472 = vmatprep.mubr.bf16.mxu0 %v3184_v40  ;;  %7957 = vmatpush1.bf16.msra.mxu1 %v16367_v56  ;;  %v16447_v56 = vld [vmem:[#allocation7 + $0x11ac] ss:$16 sps:$4 sm:$0xff]  }
 0x474   : > { %7988 = vmatprep.mubr.bf16.mxu1 %v3184_v40  ;;  %7442 = vmatprep.subr.bf16.mxu0 %v16372_v48  ;;  %v16445_v48 = vld [vmem:[#allocation7 + $0x11a8] ss:$16 sps:$4 sm:$0xff]   ;;  %v16450_v40 = vld [vmem:[#allocation7 + $0x11c4] ss:$16 sps:$4 sm:$0xff]  }
 0x475   : > { %7958 = vmatprep.subr.bf16.mxu1 %v16375_v39  ;;  %v16453_v39 = vld [vmem:[#allocation7 + $0x11cc] ss:$16 sps:$4 sm:$0xff]  }
 0x476   : > { %7443 = vmatpush1.bf16.msra.mxu0 %v16370_v57  ;;  %v16448_v57 = vld [vmem:[#allocation7 + $0x11c0] ss:$16 sps:$4 sm:$0xff]  }
 0x477   : > { %7959 = vmatpush1.bf16.msra.mxu1 %v16373_v12  ;;  %7444 = vmatprep.subr.bf16.mxu0 %v16378_v54  ;;  %v16451_v12 = vld [vmem:[#allocation7 + $0x11c8] ss:$16 sps:$4 sm:$0xff]   ;;  %v16456_v54 = vld [vmem:[#allocation7 + $0x11e4] ss:$16 sps:$4 sm:$0xff]  }
 0x478   : > { %7960 = vmatprep.subr.bf16.mxu1 %v16381_v34  ;;  %v3174_v34 = vshll.u32 %v18622_v52, 16 }
 0x47a   : > { %7445 = vmatpush1.bf16.msra.mxu0 %v16376_v17  ;;  %v16459_v17 = vld [vmem:[#allocation7 + $0x11ec] ss:$16 sps:$4 sm:$0xff]  }
 0x47b   : > { %7961 = vmatpush1.bf16.msra.mxu1 %v16379_v36  ;;  %7446 = vmatprep.subr.bf16.mxu0 %v16384_v32  ;;  %v3195_v36 = vshll.u32 %v18631_v38, 16  ;;  %v16454_v32 = vld [vmem:[#allocation7 + $0x11e0] ss:$16 sps:$4 sm:$0xff]  }
 0x47c   : > { %7962 = vmatprep.subr.bf16.mxu1 %v16387_v37  ;;  %v16457_v37 = vld [vmem:[#allocation7 + $0x11e8] ss:$16 sps:$4 sm:$0xff]  }
 0x47e   : > { %7447 = vmatpush1.bf16.msra.mxu0 %v16382_v18  ;;  %v3176_v18 = vrot.slane %v3174_v34, 1  ;;  %v16523_v34 = vld [vmem:[#allocation7 + $0x1348] ss:$16 sps:$4 sm:$0xff]  }
 0x47f   : > { %7963 = vmatpush1.bf16.msra.mxu1 %v16385_v29  ;;  %7448 = vmatprep.subr.bf16.mxu0 %v16390_v42  ;;  %v16462_v29 = vld [vmem:[#allocation7 + $0x1204] ss:$16 sps:$4 sm:$0xff]   ;;  %v16465_v42 = vld [vmem:[#allocation7 + $0x120c] ss:$16 sps:$4 sm:$0xff]  }
 0x480   : > { %7964 = vmatprep.subr.bf16.mxu1 %v16393_v43  ;;  %v3172_v43 = vshrl.u32 %v18622_v52, 16  ;;  %v16469_v52 = vld [vmem:[#allocation7 + $0x1228] ss:$16 sps:$4 sm:$0xff]  }
 0x482   : > { %7449 = vmatpush1.bf16.msra.mxu0 %v16388_v46  ;;  %v3197_v46 = vrot.slane %v3195_v36, 1  ;;  %v16531_v36 = vld [vmem:[#allocation7 + $0x136c] ss:$16 sps:$4 sm:$0xff]  }
 0x483   : > { %7965 = vmatpush1.bf16.msra.mxu1 %v16391_v44  ;;  %7450 = vmatprep.subr.bf16.mxu0 %v16396_v50  ;;  %v16460_v44 = vld [vmem:[#allocation7 + $0x1200] ss:$16 sps:$4 sm:$0xff]   ;;  %v3177_v50 = vor.u32 %v3176_v18, %v3172_v43  ;;  %v16534_v18 = vld [vmem:[#allocation7 + $0x1384] ss:$16 sps:$4 sm:$0xff]   ;;  %v16535_v43 = vld [vmem:[#allocation7 + $0x1388] ss:$16 sps:$4 sm:$0xff]  }
 0x484   : > { %7966 = vmatprep.subr.bf16.mxu1 %v16399_v51  ;;  %v16463_v51 = vld [vmem:[#allocation7 + $0x1208] ss:$16 sps:$4 sm:$0xff]  }
 0x486   : > { %7451 = vmatpush1.bf16.msra.mxu0 %v16394_v41  ;;  %v3193_v41 = vshrl.u32 %v18631_v38, 16  ;;  %v16475_v38 = vld [vmem:[#allocation7 + $0x1248] ss:$16 sps:$4 sm:$0xff]  }
 0x487   : > { %7967 = vmatpush1.bf16.msra.mxu1 %v16397_v15  ;;  %7452 = vmatprep.subr.bf16.mxu0 %v16402_v16  ;;  %v16468_v15 = vld [vmem:[#allocation7 + $0x1224] ss:$16 sps:$4 sm:$0xff]  }
 0x488   : > { %7968 = vmatprep.subr.bf16.mxu1 %v16405_v63  ;;  %v3198_v16 = vor.u32 %v3197_v46, %v3193_v41  ;;  %v16471_v63 = vld [vmem:[#allocation7 + $0x122c] ss:$16 sps:$4 sm:$0xff]   ;;  %v16540_v46 = vld [vmem:[#allocation7 + $0x13a4] ss:$16 sps:$4 sm:$0xff]  }
 0x489   : > { %v16546_v41 = vld [vmem:[#allocation7 + $0x13c4] ss:$16 sps:$4 sm:$0xff]  }
 0x48a   : > { %7453 = vmatpush1.bf16.msra.mxu0 %v16400_v2  ;;  %v16466_v2 = vld [vmem:[#allocation7 + $0x1220] ss:$16 sps:$4 sm:$0xff]  }
 0x48b   : > { %7969 = vmatpush1.bf16.msra.mxu1 %v16403_v58  ;;  %7454 = vmatprep.subr.bf16.mxu0 %v16408_v3  ;;  %v16474_v58 = vld [vmem:[#allocation7 + $0x1244] ss:$16 sps:$4 sm:$0xff]   ;;  %v16477_v3 = vld [vmem:[#allocation7 + $0x124c] ss:$16 sps:$4 sm:$0xff]  }
 0x48c   : > { %7970 = vmatprep.subr.bf16.mxu1 %v16411_v5  ;;  %v16472_v5 = vld [vmem:[#allocation7 + $0x1240] ss:$16 sps:$4 sm:$0xff]  }
 0x48e   : > { %7455 = vmatpush1.bf16.msra.mxu0 %v16406_v8  ;;  %v16480_v8 = vld [vmem:[#allocation7 + $0x1264] ss:$16 sps:$4 sm:$0xff]  }
 0x48f   : > { %7971 = vmatpush1.bf16.msra.mxu1 %v16409_v53  ;;  %7456 = vmatprep.subr.bf16.mxu0 %v16414_v9  ;;  %v16483_v53 = vld [vmem:[#allocation7 + $0x126c] ss:$16 sps:$4 sm:$0xff]   ;;  %v16478_v9 = vld [vmem:[#allocation7 + $0x1260] ss:$16 sps:$4 sm:$0xff]  }
 0x490   : > { %7972 = vmatprep.subr.bf16.mxu1 %v16417_v49  ;;  %v16481_v49 = vld [vmem:[#allocation7 + $0x1268] ss:$16 sps:$4 sm:$0xff]  }
 0x492   : > { %7457 = vmatpush1.bf16.msra.mxu0 %v16412_v10  ;;  %v16486_v10 = vld [vmem:[#allocation7 + $0x1284] ss:$16 sps:$4 sm:$0xff]  }
 0x493   : > { %7973 = vmatpush1.bf16.msra.mxu1 %v16415_v59  ;;  %7458 = vmatprep.subr.bf16.mxu0 %v16420_v19  ;;  %v16489_v59 = vld [vmem:[#allocation7 + $0x128c] ss:$16 sps:$4 sm:$0xff]   ;;  %v16484_v19 = vld [vmem:[#allocation7 + $0x1280] ss:$16 sps:$4 sm:$0xff]  }
 0x494   : > { %7974 = vmatprep.subr.bf16.mxu1 %v16423_v14  ;;  %v16487_v14 = vld [vmem:[#allocation7 + $0x1288] ss:$16 sps:$4 sm:$0xff]  }
 0x496   : > { %7459 = vmatpush1.bf16.msra.mxu0 %v16418_v61  ;;  %v16492_v61 = vld [vmem:[#allocation7 + $0x12a4] ss:$16 sps:$4 sm:$0xff]  }
 0x497   : > { %7975 = vmatpush1.bf16.msra.mxu1 %v16421_v6  ;;  %7460 = vmatprep.subr.bf16.mxu0 %v16426_v20  ;;  %v16495_v6 = vld [vmem:[#allocation7 + $0x12ac] ss:$16 sps:$4 sm:$0xff]   ;;  %v16490_v20 = vld [vmem:[#allocation7 + $0x12a0] ss:$16 sps:$4 sm:$0xff]  }
 0x498   : > { %7976 = vmatprep.subr.bf16.mxu1 %v16429_v55  ;;  %v16493_v55 = vld [vmem:[#allocation7 + $0x12a8] ss:$16 sps:$4 sm:$0xff]  }
 0x49a   : > { %7461 = vmatpush1.bf16.msra.mxu0 %v16424_v22  ;;  %v16498_v22 = vld [vmem:[#allocation7 + $0x12c4] ss:$16 sps:$4 sm:$0xff]  }
 0x49b   : > { %7977 = vmatpush1.bf16.msra.mxu1 %v16427_v21  ;;  %7462 = vmatprep.subr.bf16.mxu0 %v16432_v27  ;;  %v16501_v21 = vld [vmem:[#allocation7 + $0x12cc] ss:$16 sps:$4 sm:$0xff]   ;;  %v16496_v27 = vld [vmem:[#allocation7 + $0x12c0] ss:$16 sps:$4 sm:$0xff]  }
 0x49c   : > { %7978 = vmatprep.subr.bf16.mxu1 %v16435_v28  ;;  %v16499_v28 = vld [vmem:[#allocation7 + $0x12c8] ss:$16 sps:$4 sm:$0xff]  }
 0x49e   : > { %7463 = vmatpush1.bf16.msra.mxu0 %v16430_v1  ;;  %v16504_v1 = vld [vmem:[#allocation7 + $0x12e4] ss:$16 sps:$4 sm:$0xff]  }
 0x49f   : > { %7979 = vmatpush1.bf16.msra.mxu1 %v16433_v60  ;;  %7464 = vmatprep.subr.bf16.mxu0 %v16438_v25  ;;  %v16507_v60 = vld [vmem:[#allocation7 + $0x12ec] ss:$16 sps:$4 sm:$0xff]   ;;  %v16502_v25 = vld [vmem:[#allocation7 + $0x12e0] ss:$16 sps:$4 sm:$0xff]  }
 0x4a0   : > { %7980 = vmatprep.subr.bf16.mxu1 %v16441_v24  ;;  %v16505_v24 = vld [vmem:[#allocation7 + $0x12e8] ss:$16 sps:$4 sm:$0xff]  }
 0x4a2   : > { %7465 = vmatpush1.bf16.msra.mxu0 %v16436_v33  ;;  %v16510_v33 = vld [vmem:[#allocation7 + $0x1304] ss:$16 sps:$4 sm:$0xff]  }
 0x4a3   : > { %7981 = vmatpush1.bf16.msra.mxu1 %v16439_v30  ;;  %7466 = vmatprep.subr.bf16.mxu0 %v16444_v23  ;;  %v16513_v30 = vld [vmem:[#allocation7 + $0x130c] ss:$16 sps:$4 sm:$0xff]   ;;  %v16508_v23 = vld [vmem:[#allocation7 + $0x1300] ss:$16 sps:$4 sm:$0xff]  }
 0x4a4   : > { %7982 = vmatprep.subr.bf16.mxu1 %v16447_v56  ;;  %v16511_v56 = vld [vmem:[#allocation7 + $0x1308] ss:$16 sps:$4 sm:$0xff]  }
 0x4a6   : > { %7467 = vmatpush1.bf16.msra.mxu0 %v16442_v31  ;;  %v16516_v31 = vld [vmem:[#allocation7 + $0x1324] ss:$16 sps:$4 sm:$0xff]  }
 0x4a7   : > { %7983 = vmatpush1.bf16.msra.mxu1 %v16445_v48  ;;  %7468 = vmatprep.subr.bf16.mxu0 %v16450_v40  ;;  %v16519_v48 = vld [vmem:[#allocation7 + $0x132c] ss:$16 sps:$4 sm:$0xff]   ;;  %v16514_v40 = vld [vmem:[#allocation7 + $0x1320] ss:$16 sps:$4 sm:$0xff]  }
 0x4a8   : > { %7984 = vmatprep.subr.bf16.mxu1 %v16453_v39  ;;  %v16517_v39 = vld [vmem:[#allocation7 + $0x1328] ss:$16 sps:$4 sm:$0xff]  }
 0x4aa   : > { %7469 = vmatpush1.bf16.msra.mxu0 %v16448_v57  ;;  %v16522_v57 = vld [vmem:[#allocation7 + $0x1344] ss:$16 sps:$4 sm:$0xff]  }
 0x4ab   : > { %7985 = vmatpush1.bf16.msra.mxu1 %v16451_v12  ;;  %7470 = vmatprep.subr.bf16.mxu0 %v16456_v54  ;;  %v16525_v12 = vld [vmem:[#allocation7 + $0x134c] ss:$16 sps:$4 sm:$0xff]   ;;  %v16520_v54 = vld [vmem:[#allocation7 + $0x1340] ss:$16 sps:$4 sm:$0xff]  }
 0x4ac   : > { %7986 = vmatprep.subr.bf16.mxu1 %v16459_v17  ;;  %v16528_v17 = vld [vmem:[#allocation7 + $0x1364] ss:$16 sps:$4 sm:$0xff]  }
 0x4ae   : > { %7471 = vmatpush1.bf16.msra.mxu0 %v16454_v32  ;;  %v16526_v32 = vld [vmem:[#allocation7 + $0x1360] ss:$16 sps:$4 sm:$0xff]  }
 0x4af   : > { %7987 = vmatpush1.bf16.msra.mxu1 %v16457_v37  ;;  %7483 = vmatprep.subr.bf16.mxu0 %v16462_v29  ;;  %v16529_v37 = vld [vmem:[#allocation7 + $0x1368] ss:$16 sps:$4 sm:$0xff]   ;;  %v16537_v29 = vld [vmem:[#allocation7 + $0x138c] ss:$16 sps:$4 sm:$0xff]  }
 0x4b0   : > { %7999 = vmatprep.subr.bf16.mxu1 %v16465_v42  ;;  %v16532_v42 = vld [vmem:[#allocation7 + $0x1380] ss:$16 sps:$4 sm:$0xff]  }
 0x4b1   : > { %7473 = vmatmul.mubr.bf16.vlgmr.msra.gmra.mrb[16].mxu0 %v3177_v50 }
 0x4b2   : > { %7989 = vmatmul.mubr.bf16.vlgmr.msra.gmra.mrb[16].mxu1 %v3177_v50  ;;  %7484 = vmatpush1.bf16.msra.mxu0 %v16460_v44  ;;  %v16543_v44 = vld [vmem:[#allocation7 + $0x13ac] ss:$16 sps:$4 sm:$0xff]   ;;  %v16538_v50 = vld [vmem:[#allocation7 + $0x13a0] ss:$16 sps:$4 sm:$0xff]  }
 0x4b3   : > { %7515 = vmatprep.mubr.bf16.mxu0 %v3198_v16  ;;  %8000 = vmatpush1.bf16.msra.mxu1 %v16463_v51  ;;  %v16541_v51 = vld [vmem:[#allocation7 + $0x13a8] ss:$16 sps:$4 sm:$0xff]  }
 0x4b4   : > { %8031 = vmatprep.mubr.bf16.mxu1 %v3198_v16  ;;  %7485 = vmatprep.subr.bf16.mxu0 %v16468_v15  ;;  %v16549_v15 = vld [vmem:[#allocation7 + $0x13cc] ss:$16 sps:$4 sm:$0xff]   ;;  %v16544_v16 = vld [vmem:[#allocation7 + $0x13c0] ss:$16 sps:$4 sm:$0xff]  }
 0x4b5   : > { %8001 = vmatprep.subr.bf16.mxu1 %v16471_v63  ;;  %v16547_v63 = vld [vmem:[#allocation7 + $0x13c8] ss:$16 sps:$4 sm:$0xff]  }
 0x4b6   : > { %7486 = vmatpush1.bf16.msra.mxu0 %v16466_v2  ;;  %v16552_v2 = vld [vmem:[#allocation7 + $0x13e4] ss:$16 sps:$4 sm:$0xff]  }
 0x4b7   : > { %8002 = vmatpush1.bf16.msra.mxu1 %v16469_v52  ;;  %7487 = vmatprep.subr.bf16.mxu0 %v16474_v58  ;;  %v3188_v52 = vshll.u32 %v18626_v7, 16  ;;  %v16555_v58 = vld [vmem:[#allocation7 + $0x13ec] ss:$16 sps:$4 sm:$0xff]  }
 0x4b8   : > { %8003 = vmatprep.subr.bf16.mxu1 %v16477_v3  ;;  %v3209_v3 = vshll.u32 %v18735_v13, 16 }
 0x4ba   : > { %7488 = vmatpush1.bf16.msra.mxu0 %v16472_v5  ;;  %v16550_v5 = vld [vmem:[#allocation7 + $0x13e0] ss:$16 sps:$4 sm:$0xff]  }
 0x4bb   : > { %8004 = vmatpush1.bf16.msra.mxu1 %v16475_v38  ;;  %7489 = vmatprep.subr.bf16.mxu0 %v16480_v8  ;;  %v16553_v38 = vld [vmem:[#allocation7 + $0x13e8] ss:$16 sps:$4 sm:$0xff]   ;;  %v3190_v8 = vrot.slane %v3188_v52, 1  ;;  %v16627_v52 = vld [vmem:[#allocation7 + $0x156c] ss:$16 sps:$4 sm:$0xff]  }
 0x4bc   : > { %8005 = vmatprep.subr.bf16.mxu1 %v16483_v53  ;;  %v16558_v53 = vld [vmem:[#allocation7 + $0x1404] ss:$16 sps:$4 sm:$0xff]  }
 0x4be   : > { %7490 = vmatpush1.bf16.msra.mxu0 %v16478_v9  ;;  %v16561_v9 = vld [vmem:[#allocation7 + $0x140c] ss:$16 sps:$4 sm:$0xff]  }
 0x4bf   : > { %8006 = vmatpush1.bf16.msra.mxu1 %v16481_v49  ;;  %7491 = vmatprep.subr.bf16.mxu0 %v16486_v10  ;;  %v3186_v49 = vshrl.u32 %v18626_v7, 16  ;;  %v3211_v10 = vrot.slane %v3209_v3, 1  ;;  %v16565_v7 = vld [vmem:[#allocation7 + $0x1428] ss:$16 sps:$4 sm:$0xff]  }
 0x4c0   : > { %8007 = vmatprep.subr.bf16.mxu1 %v16489_v59  ;;  %v16556_v59 = vld [vmem:[#allocation7 + $0x1400] ss:$16 sps:$4 sm:$0xff]   ;;  %v16625_v3 = vld [vmem:[#allocation7 + $0x1568] ss:$16 sps:$4 sm:$0xff]  }
 0x4c2   : > { %7492 = vmatpush1.bf16.msra.mxu0 %v16484_v19  ;;  %v3191_v19 = vor.u32 %v3190_v8, %v3186_v49  ;;  %v16628_v8 = vld [vmem:[#allocation7 + $0x1580] ss:$16 sps:$4 sm:$0xff]   ;;  %v16639_v49 = vld [vmem:[#allocation7 + $0x15ac] ss:$16 sps:$4 sm:$0xff]  }
 0x4c3   : > { %8008 = vmatpush1.bf16.msra.mxu1 %v16487_v14  ;;  %7493 = vmatprep.subr.bf16.mxu0 %v16492_v61  ;;  %v16559_v14 = vld [vmem:[#allocation7 + $0x1408] ss:$16 sps:$4 sm:$0xff]   ;;  %v3207_v61 = vshrl.u32 %v18735_v13, 16 }
 0x4c4   : > { %8009 = vmatprep.subr.bf16.mxu1 %v16495_v6  ;;  %v16564_v6 = vld [vmem:[#allocation7 + $0x1424] ss:$16 sps:$4 sm:$0xff]   ;;  %v16571_v13 = vld [vmem:[#allocation7 + $0x1448] ss:$16 sps:$4 sm:$0xff]  }
 0x4c6   : > { %7494 = vmatpush1.bf16.msra.mxu0 %v16490_v20  ;;  %v3212_v20 = vor.u32 %v3211_v10, %v3207_v61  ;;  %v16634_v10 = vld [vmem:[#allocation7 + $0x15a0] ss:$16 sps:$4 sm:$0xff]  }
 0x4c7   : > { %8010 = vmatpush1.bf16.msra.mxu1 %v16493_v55  ;;  %7495 = vmatprep.subr.bf16.mxu0 %v16498_v22  ;;  %v16567_v55 = vld [vmem:[#allocation7 + $0x142c] ss:$16 sps:$4 sm:$0xff]   ;;  %v16562_v22 = vld [vmem:[#allocation7 + $0x1420] ss:$16 sps:$4 sm:$0xff]  }
 0x4c8   : > { %8011 = vmatprep.subr.bf16.mxu1 %v16501_v21  ;;  %v16570_v21 = vld [vmem:[#allocation7 + $0x1444] ss:$16 sps:$4 sm:$0xff]   ;;  %v16640_v61 = vld [vmem:[#allocation7 + $0x15c0] ss:$16 sps:$4 sm:$0xff]  }
 0x4ca   : > { %7496 = vmatpush1.bf16.msra.mxu0 %v16496_v27  ;;  %v16573_v27 = vld [vmem:[#allocation7 + $0x144c] ss:$16 sps:$4 sm:$0xff]  }
 0x4cb   : > { %8012 = vmatpush1.bf16.msra.mxu1 %v16499_v28  ;;  %7497 = vmatprep.subr.bf16.mxu0 %v16504_v1  ;;  %v16568_v28 = vld [vmem:[#allocation7 + $0x1440] ss:$16 sps:$4 sm:$0xff]   ;;  %v16576_v1 = vld [vmem:[#allocation7 + $0x1464] ss:$16 sps:$4 sm:$0xff]  }
 0x4cc   : > { %8013 = vmatprep.subr.bf16.mxu1 %v16507_v60  ;;  %v16579_v60 = vld [vmem:[#allocation7 + $0x146c] ss:$16 sps:$4 sm:$0xff]  }
 0x4ce   : > { %7498 = vmatpush1.bf16.msra.mxu0 %v16502_v25  ;;  %v16574_v25 = vld [vmem:[#allocation7 + $0x1460] ss:$16 sps:$4 sm:$0xff]  }
 0x4cf   : > { %8014 = vmatpush1.bf16.msra.mxu1 %v16505_v24  ;;  %7499 = vmatprep.subr.bf16.mxu0 %v16510_v33  ;;  %v16577_v24 = vld [vmem:[#allocation7 + $0x1468] ss:$16 sps:$4 sm:$0xff]   ;;  %v16582_v33 = vld [vmem:[#allocation7 + $0x1484] ss:$16 sps:$4 sm:$0xff]  }
 0x4d0   : > { %8015 = vmatprep.subr.bf16.mxu1 %v16513_v30  ;;  %v16585_v30 = vld [vmem:[#allocation7 + $0x148c] ss:$16 sps:$4 sm:$0xff]  }
 0x4d2   : > { %7500 = vmatpush1.bf16.msra.mxu0 %v16508_v23  ;;  %v16580_v23 = vld [vmem:[#allocation7 + $0x1480] ss:$16 sps:$4 sm:$0xff]  }
 0x4d3   : > { %8016 = vmatpush1.bf16.msra.mxu1 %v16511_v56  ;;  %7501 = vmatprep.subr.bf16.mxu0 %v16516_v31  ;;  %v16583_v56 = vld [vmem:[#allocation7 + $0x1488] ss:$16 sps:$4 sm:$0xff]   ;;  %v16588_v31 = vld [vmem:[#allocation7 + $0x14a4] ss:$16 sps:$4 sm:$0xff]  }
 0x4d4   : > { %8017 = vmatprep.subr.bf16.mxu1 %v16519_v48  ;;  %v16591_v48 = vld [vmem:[#allocation7 + $0x14ac] ss:$16 sps:$4 sm:$0xff]  }
 0x4d6   : > { %7502 = vmatpush1.bf16.msra.mxu0 %v16514_v40  ;;  %v16586_v40 = vld [vmem:[#allocation7 + $0x14a0] ss:$16 sps:$4 sm:$0xff]  }
 0x4d7   : > { %8018 = vmatpush1.bf16.msra.mxu1 %v16517_v39  ;;  %7503 = vmatprep.subr.bf16.mxu0 %v16522_v57  ;;  %v16589_v39 = vld [vmem:[#allocation7 + $0x14a8] ss:$16 sps:$4 sm:$0xff]   ;;  %v16594_v57 = vld [vmem:[#allocation7 + $0x14c4] ss:$16 sps:$4 sm:$0xff]  }
 0x4d8   : > { %8019 = vmatprep.subr.bf16.mxu1 %v16525_v12  ;;  %v16597_v12 = vld [vmem:[#allocation7 + $0x14cc] ss:$16 sps:$4 sm:$0xff]  }
 0x4da   : > { %7504 = vmatpush1.bf16.msra.mxu0 %v16520_v54  ;;  %v16592_v54 = vld [vmem:[#allocation7 + $0x14c0] ss:$16 sps:$4 sm:$0xff]  }
 0x4db   : > { %8020 = vmatpush1.bf16.msra.mxu1 %v16523_v34  ;;  %7505 = vmatprep.subr.bf16.mxu0 %v16528_v17  ;;  %v16595_v34 = vld [vmem:[#allocation7 + $0x14c8] ss:$16 sps:$4 sm:$0xff]   ;;  %v16600_v17 = vld [vmem:[#allocation7 + $0x14e4] ss:$16 sps:$4 sm:$0xff]  }
 0x4dc   : > { %8021 = vmatprep.subr.bf16.mxu1 %v16531_v36  ;;  %v16603_v36 = vld [vmem:[#allocation7 + $0x14ec] ss:$16 sps:$4 sm:$0xff]  }
 0x4de   : > { %7506 = vmatpush1.bf16.msra.mxu0 %v16526_v32  ;;  %v16598_v32 = vld [vmem:[#allocation7 + $0x14e0] ss:$16 sps:$4 sm:$0xff]  }
 0x4df   : > { %8022 = vmatpush1.bf16.msra.mxu1 %v16529_v37  ;;  %7507 = vmatprep.subr.bf16.mxu0 %v16534_v18  ;;  %v16601_v37 = vld [vmem:[#allocation7 + $0x14e8] ss:$16 sps:$4 sm:$0xff]   ;;  %v16606_v18 = vld [vmem:[#allocation7 + $0x1504] ss:$16 sps:$4 sm:$0xff]  }
 0x4e0   : > { %8023 = vmatprep.subr.bf16.mxu1 %v16537_v29  ;;  %v16609_v29 = vld [vmem:[#allocation7 + $0x150c] ss:$16 sps:$4 sm:$0xff]  }
 0x4e2   : > { %7508 = vmatpush1.bf16.msra.mxu0 %v16532_v42  ;;  %v16604_v42 = vld [vmem:[#allocation7 + $0x1500] ss:$16 sps:$4 sm:$0xff]  }
 0x4e3   : > { %8024 = vmatpush1.bf16.msra.mxu1 %v16535_v43  ;;  %7509 = vmatprep.subr.bf16.mxu0 %v16540_v46  ;;  %v16607_v43 = vld [vmem:[#allocation7 + $0x1508] ss:$16 sps:$4 sm:$0xff]   ;;  %v16612_v46 = vld [vmem:[#allocation7 + $0x1524] ss:$16 sps:$4 sm:$0xff]  }
 0x4e4   : > { %8025 = vmatprep.subr.bf16.mxu1 %v16543_v44  ;;  %v16615_v44 = vld [vmem:[#allocation7 + $0x152c] ss:$16 sps:$4 sm:$0xff]  }
 0x4e6   : > { %7510 = vmatpush1.bf16.msra.mxu0 %v16538_v50  ;;  %v16610_v50 = vld [vmem:[#allocation7 + $0x1520] ss:$16 sps:$4 sm:$0xff]  }
 0x4e7   : > { %8026 = vmatpush1.bf16.msra.mxu1 %v16541_v51  ;;  %7511 = vmatprep.subr.bf16.mxu0 %v16546_v41  ;;  %v16613_v51 = vld [vmem:[#allocation7 + $0x1528] ss:$16 sps:$4 sm:$0xff]   ;;  %v16618_v41 = vld [vmem:[#allocation7 + $0x1544] ss:$16 sps:$4 sm:$0xff]  }
 0x4e8   : > { %8027 = vmatprep.subr.bf16.mxu1 %v16549_v15  ;;  %v16621_v15 = vld [vmem:[#allocation7 + $0x154c] ss:$16 sps:$4 sm:$0xff]  }
 0x4ea   : > { %7512 = vmatpush1.bf16.msra.mxu0 %v16544_v16  ;;  %v16616_v16 = vld [vmem:[#allocation7 + $0x1540] ss:$16 sps:$4 sm:$0xff]  }
 0x4eb   : > { %8028 = vmatpush1.bf16.msra.mxu1 %v16547_v63  ;;  %7513 = vmatprep.subr.bf16.mxu0 %v16552_v2  ;;  %v16619_v63 = vld [vmem:[#allocation7 + $0x1548] ss:$16 sps:$4 sm:$0xff]   ;;  %v16624_v2 = vld [vmem:[#allocation7 + $0x1564] ss:$16 sps:$4 sm:$0xff]  }
 0x4ec   : > { %8029 = vmatprep.subr.bf16.mxu1 %v16555_v58  ;;  %v16622_v58 = vld [vmem:[#allocation7 + $0x1560] ss:$16 sps:$4 sm:$0xff]  }
 0x4ee   : > { %7514 = vmatpush1.bf16.msra.mxu0 %v16550_v5  ;;  %v16630_v5 = vld [vmem:[#allocation7 + $0x1584] ss:$16 sps:$4 sm:$0xff]  }
 0x4ef   : > { %8030 = vmatpush1.bf16.msra.mxu1 %v16553_v38  ;;  %7526 = vmatprep.subr.bf16.mxu0 %v16558_v53  ;;  %v16633_v38 = vld [vmem:[#allocation7 + $0x158c] ss:$16 sps:$4 sm:$0xff]   ;;  %v16631_v53 = vld [vmem:[#allocation7 + $0x1588] ss:$16 sps:$4 sm:$0xff]  }
 0x4f0   : > { %8042 = vmatprep.subr.bf16.mxu1 %v16561_v9  ;;  %v16636_v9 = vld [vmem:[#allocation7 + $0x15a4] ss:$16 sps:$4 sm:$0xff]  }
 0x4f1   : > { %7516 = vmatmul.mubr.bf16.vlgmr.msra.gmra.mrb[16].mxu0 %v3191_v19 }
 0x4f2   : > { %8032 = vmatmul.mubr.bf16.vlgmr.msra.gmra.mrb[16].mxu1 %v3191_v19  ;;  %7527 = vmatpush1.bf16.msra.mxu0 %v16556_v59  ;;  %v16637_v59 = vld [vmem:[#allocation7 + $0x15a8] ss:$16 sps:$4 sm:$0xff]   ;;  %v16642_v19 = vld [vmem:[#allocation7 + $0x15c4] ss:$16 sps:$4 sm:$0xff]  }
 0x4f3   : > { %7558 = vmatprep.mubr.bf16.mxu0 %v3212_v20  ;;  %8043 = vmatpush1.bf16.msra.mxu1 %v16559_v14  ;;  %v16645_v14 = vld [vmem:[#allocation7 + $0x15cc] ss:$16 sps:$4 sm:$0xff]  }
 0x4f4   : > { %8074 = vmatprep.mubr.bf16.mxu1 %v3212_v20  ;;  %7528 = vmatprep.subr.bf16.mxu0 %v16564_v6  ;;  %v16643_v6 = vld [vmem:[#allocation7 + $0x15c8] ss:$16 sps:$4 sm:$0xff]   ;;  %v16648_v20 = vld [vmem:[#allocation7 + $0x15e4] ss:$16 sps:$4 sm:$0xff]  }
 0x4f5   : > { %8044 = vmatprep.subr.bf16.mxu1 %v16567_v55  ;;  %v3202_v55 = vshll.u32 %v18731_v0, 16 }
 0x4f6   : > { %7529 = vmatpush1.bf16.msra.mxu0 %v16562_v22  ;;  %v16651_v22 = vld [vmem:[#allocation7 + $0x15ec] ss:$16 sps:$4 sm:$0xff]  }
 0x4f7   : > { %8045 = vmatpush1.bf16.msra.mxu1 %v16565_v7  ;;  %7530 = vmatprep.subr.bf16.mxu0 %v16570_v21  ;;  %v3223_v7 = vshll.u32 %v18737_v35, 16  ;;  %v16646_v21 = vld [vmem:[#allocation7 + $0x15e0] ss:$16 sps:$4 sm:$0xff]  }
 0x4f8   : > { %8046 = vmatprep.subr.bf16.mxu1 %v16573_v27  ;;  %v16649_v27 = vld [vmem:[#allocation7 + $0x15e8] ss:$16 sps:$4 sm:$0xff]  }
 0x4fa   : > { %7531 = vmatpush1.bf16.msra.mxu0 %v16568_v28  ;;  %v3204_v28 = vrot.slane %v3202_v55, 1  ;;  %v16721_v55 = vld [vmem:[#allocation7 + $0x1768] ss:$16 sps:$4 sm:$0xff]  }
 0x4fb   : > { %8047 = vmatpush1.bf16.msra.mxu1 %v16571_v13  ;;  %7532 = vmatprep.subr.bf16.mxu0 %v16576_v1  ;;  %v16654_v13 = vld [vmem:[#allocation7 + $0x1604] ss:$16 sps:$4 sm:$0xff]   ;;  %v16657_v1 = vld [vmem:[#allocation7 + $0x160c] ss:$16 sps:$4 sm:$0xff]  }
 0x4fc   : > { %8048 = vmatprep.subr.bf16.mxu1 %v16579_v60  ;;  %v3200_v60 = vshrl.u32 %v18731_v0, 16  ;;  %v16661_v0 = vld [vmem:[#allocation7 + $0x1628] ss:$16 sps:$4 sm:$0xff]  }
 0x4fe   : > { %7533 = vmatpush1.bf16.msra.mxu0 %v16574_v25  ;;  %v3225_v25 = vrot.slane %v3223_v7, 1  ;;  %v16729_v7 = vld [vmem:[#allocation7 + $0x178c] ss:$16 sps:$4 sm:$0xff]  }
 0x4ff   : > { %8049 = vmatpush1.bf16.msra.mxu1 %v16577_v24  ;;  %7534 = vmatprep.subr.bf16.mxu0 %v16582_v33  ;;  %v16652_v24 = vld [vmem:[#allocation7 + $0x1600] ss:$16 sps:$4 sm:$0xff]   ;;  %v3205_v33 = vor.u32 %v3204_v28, %v3200_v60  ;;  %v16732_v28 = vld [vmem:[#allocation7 + $0x17a4] ss:$16 sps:$4 sm:$0xff]   ;;  %v16733_v60 = vld [vmem:[#allocation7 + $0x17a8] ss:$16 sps:$4 sm:$0xff]  }
 0x500   : > { %8050 = vmatprep.subr.bf16.mxu1 %v16585_v30  ;;  %v16655_v30 = vld [vmem:[#allocation7 + $0x1608] ss:$16 sps:$4 sm:$0xff]  }
 0x502   : > { %7535 = vmatpush1.bf16.msra.mxu0 %v16580_v23  ;;  %v3221_v23 = vshrl.u32 %v18737_v35, 16  ;;  %v16667_v35 = vld [vmem:[#allocation7 + $0x1648] ss:$16 sps:$4 sm:$0xff]  }
 0x503   : > { %8051 = vmatpush1.bf16.msra.mxu1 %v16583_v56  ;;  %7536 = vmatprep.subr.bf16.mxu0 %v16588_v31  ;;  %v16660_v56 = vld [vmem:[#allocation7 + $0x1624] ss:$16 sps:$4 sm:$0xff]  }
 0x504   : > { %8052 = vmatprep.subr.bf16.mxu1 %v16591_v48  ;;  %v3226_v31 = vor.u32 %v3225_v25, %v3221_v23  ;;  %v16663_v48 = vld [vmem:[#allocation7 + $0x162c] ss:$16 sps:$4 sm:$0xff]   ;;  %v16738_v25 = vld [vmem:[#allocation7 + $0x17c4] ss:$16 sps:$4 sm:$0xff]  }
 0x505   : > { %v16744_v23 = vld [vmem:[#allocation7 + $0x17e4] ss:$16 sps:$4 sm:$0xff]  }
 0x506   : > { %7537 = vmatpush1.bf16.msra.mxu0 %v16586_v40  ;;  %v16658_v40 = vld [vmem:[#allocation7 + $0x1620] ss:$16 sps:$4 sm:$0xff]  }
 0x507   : > { %8053 = vmatpush1.bf16.msra.mxu1 %v16589_v39  ;;  %7538 = vmatprep.subr.bf16.mxu0 %v16594_v57  ;;  %v16666_v39 = vld [vmem:[#allocation7 + $0x1644] ss:$16 sps:$4 sm:$0xff]   ;;  %v16669_v57 = vld [vmem:[#allocation7 + $0x164c] ss:$16 sps:$4 sm:$0xff]  }
 0x508   : > { %8054 = vmatprep.subr.bf16.mxu1 %v16597_v12  ;;  %v16664_v12 = vld [vmem:[#allocation7 + $0x1640] ss:$16 sps:$4 sm:$0xff]  }
 0x50a   : > { %7539 = vmatpush1.bf16.msra.mxu0 %v16592_v54  ;;  %v16672_v54 = vld [vmem:[#allocation7 + $0x1664] ss:$16 sps:$4 sm:$0xff]  }
 0x50b   : > { %8055 = vmatpush1.bf16.msra.mxu1 %v16595_v34  ;;  %7540 = vmatprep.subr.bf16.mxu0 %v16600_v17  ;;  %v16675_v34 = vld [vmem:[#allocation7 + $0x166c] ss:$16 sps:$4 sm:$0xff]   ;;  %v16670_v17 = vld [vmem:[#allocation7 + $0x1660] ss:$16 sps:$4 sm:$0xff]  }
 0x50c   : > { %8056 = vmatprep.subr.bf16.mxu1 %v16603_v36  ;;  %v16673_v36 = vld [vmem:[#allocation7 + $0x1668] ss:$16 sps:$4 sm:$0xff]  }
 0x50e   : > { %7541 = vmatpush1.bf16.msra.mxu0 %v16598_v32  ;;  %v16678_v32 = vld [vmem:[#allocation7 + $0x1684] ss:$16 sps:$4 sm:$0xff]  }
 0x50f   : > { %8057 = vmatpush1.bf16.msra.mxu1 %v16601_v37  ;;  %7542 = vmatprep.subr.bf16.mxu0 %v16606_v18  ;;  %v16681_v37 = vld [vmem:[#allocation7 + $0x168c] ss:$16 sps:$4 sm:$0xff]   ;;  %v16676_v18 = vld [vmem:[#allocation7 + $0x1680] ss:$16 sps:$4 sm:$0xff]  }
 0x510   : > { %8058 = vmatprep.subr.bf16.mxu1 %v16609_v29  ;;  %v16679_v29 = vld [vmem:[#allocation7 + $0x1688] ss:$16 sps:$4 sm:$0xff]  }
 0x512   : > { %7543 = vmatpush1.bf16.msra.mxu0 %v16604_v42  ;;  %v16684_v42 = vld [vmem:[#allocation7 + $0x16a4] ss:$16 sps:$4 sm:$0xff]  }
 0x513   : > { %8059 = vmatpush1.bf16.msra.mxu1 %v16607_v43  ;;  %7544 = vmatprep.subr.bf16.mxu0 %v16612_v46  ;;  %v16687_v43 = vld [vmem:[#allocation7 + $0x16ac] ss:$16 sps:$4 sm:$0xff]   ;;  %v16682_v46 = vld [vmem:[#allocation7 + $0x16a0] ss:$16 sps:$4 sm:$0xff]  }
 0x514   : > { %8060 = vmatprep.subr.bf16.mxu1 %v16615_v44  ;;  %v16685_v44 = vld [vmem:[#allocation7 + $0x16a8] ss:$16 sps:$4 sm:$0xff]  }
 0x516   : > { %7545 = vmatpush1.bf16.msra.mxu0 %v16610_v50  ;;  %v16690_v50 = vld [vmem:[#allocation7 + $0x16c4] ss:$16 sps:$4 sm:$0xff]  }
 0x517   : > { %8061 = vmatpush1.bf16.msra.mxu1 %v16613_v51  ;;  %7546 = vmatprep.subr.bf16.mxu0 %v16618_v41  ;;  %v16693_v51 = vld [vmem:[#allocation7 + $0x16cc] ss:$16 sps:$4 sm:$0xff]   ;;  %v16688_v41 = vld [vmem:[#allocation7 + $0x16c0] ss:$16 sps:$4 sm:$0xff]  }
 0x518   : > { %8062 = vmatprep.subr.bf16.mxu1 %v16621_v15  ;;  %v16691_v15 = vld [vmem:[#allocation7 + $0x16c8] ss:$16 sps:$4 sm:$0xff]  }
 0x51a   : > { %7547 = vmatpush1.bf16.msra.mxu0 %v16616_v16  ;;  %v16696_v16 = vld [vmem:[#allocation7 + $0x16e4] ss:$16 sps:$4 sm:$0xff]  }
 0x51b   : > { %8063 = vmatpush1.bf16.msra.mxu1 %v16619_v63  ;;  %7548 = vmatprep.subr.bf16.mxu0 %v16624_v2  ;;  %v16699_v63 = vld [vmem:[#allocation7 + $0x16ec] ss:$16 sps:$4 sm:$0xff]   ;;  %v16694_v2 = vld [vmem:[#allocation7 + $0x16e0] ss:$16 sps:$4 sm:$0xff]  }
 0x51c   : > { %8064 = vmatprep.subr.bf16.mxu1 %v16627_v52  ;;  %v16697_v52 = vld [vmem:[#allocation7 + $0x16e8] ss:$16 sps:$4 sm:$0xff]  }
 0x51e   : > { %7549 = vmatpush1.bf16.msra.mxu0 %v16622_v58  ;;  %v16702_v58 = vld [vmem:[#allocation7 + $0x1704] ss:$16 sps:$4 sm:$0xff]  }
 0x51f   : > { %8065 = vmatpush1.bf16.msra.mxu1 %v16625_v3  ;;  %7550 = vmatprep.subr.bf16.mxu0 %v16630_v5  ;;  %v16705_v3 = vld [vmem:[#allocation7 + $0x170c] ss:$16 sps:$4 sm:$0xff]   ;;  %v16700_v5 = vld [vmem:[#allocation7 + $0x1700] ss:$16 sps:$4 sm:$0xff]  }
 0x520   : > { %8066 = vmatprep.subr.bf16.mxu1 %v16633_v38  ;;  %v16703_v38 = vld [vmem:[#allocation7 + $0x1708] ss:$16 sps:$4 sm:$0xff]  }
 0x522   : > { %7551 = vmatpush1.bf16.msra.mxu0 %v16628_v8  ;;  %v16708_v8 = vld [vmem:[#allocation7 + $0x1724] ss:$16 sps:$4 sm:$0xff]  }
 0x523   : > { %8067 = vmatpush1.bf16.msra.mxu1 %v16631_v53  ;;  %7552 = vmatprep.subr.bf16.mxu0 %v16636_v9  ;;  %v16711_v53 = vld [vmem:[#allocation7 + $0x172c] ss:$16 sps:$4 sm:$0xff]   ;;  %v16706_v9 = vld [vmem:[#allocation7 + $0x1720] ss:$16 sps:$4 sm:$0xff]  }
 0x524   : > { %8068 = vmatprep.subr.bf16.mxu1 %v16639_v49  ;;  %v16709_v49 = vld [vmem:[#allocation7 + $0x1728] ss:$16 sps:$4 sm:$0xff]  }
 0x526   : > { %7553 = vmatpush1.bf16.msra.mxu0 %v16634_v10  ;;  %v16714_v10 = vld [vmem:[#allocation7 + $0x1744] ss:$16 sps:$4 sm:$0xff]  }
 0x527   : > { %8069 = vmatpush1.bf16.msra.mxu1 %v16637_v59  ;;  %7554 = vmatprep.subr.bf16.mxu0 %v16642_v19  ;;  %v16717_v59 = vld [vmem:[#allocation7 + $0x174c] ss:$16 sps:$4 sm:$0xff]   ;;  %v16712_v19 = vld [vmem:[#allocation7 + $0x1740] ss:$16 sps:$4 sm:$0xff]  }
 0x528   : > { %8070 = vmatprep.subr.bf16.mxu1 %v16645_v14  ;;  %v16715_v14 = vld [vmem:[#allocation7 + $0x1748] ss:$16 sps:$4 sm:$0xff]  }
 0x52a   : > { %7555 = vmatpush1.bf16.msra.mxu0 %v16640_v61  ;;  %v16720_v61 = vld [vmem:[#allocation7 + $0x1764] ss:$16 sps:$4 sm:$0xff]  }
 0x52b   : > { %8071 = vmatpush1.bf16.msra.mxu1 %v16643_v6  ;;  %7556 = vmatprep.subr.bf16.mxu0 %v16648_v20  ;;  %v16723_v6 = vld [vmem:[#allocation7 + $0x176c] ss:$16 sps:$4 sm:$0xff]   ;;  %v16718_v20 = vld [vmem:[#allocation7 + $0x1760] ss:$16 sps:$4 sm:$0xff]  }
 0x52c   : > { %8072 = vmatprep.subr.bf16.mxu1 %v16651_v22  ;;  %v16726_v22 = vld [vmem:[#allocation7 + $0x1784] ss:$16 sps:$4 sm:$0xff]  }
 0x52e   : > { %7557 = vmatpush1.bf16.msra.mxu0 %v16646_v21  ;;  %v16724_v21 = vld [vmem:[#allocation7 + $0x1780] ss:$16 sps:$4 sm:$0xff]  }
 0x52f   : > { %8073 = vmatpush1.bf16.msra.mxu1 %v16649_v27  ;;  %7569 = vmatprep.subr.bf16.mxu0 %v16654_v13  ;;  %v16727_v27 = vld [vmem:[#allocation7 + $0x1788] ss:$16 sps:$4 sm:$0xff]   ;;  %v16735_v13 = vld [vmem:[#allocation7 + $0x17ac] ss:$16 sps:$4 sm:$0xff]  }
 0x530   : > { %8085 = vmatprep.subr.bf16.mxu1 %v16657_v1  ;;  %v16730_v1 = vld [vmem:[#allocation7 + $0x17a0] ss:$16 sps:$4 sm:$0xff]  }
 0x531   : > { %7559 = vmatmul.mubr.bf16.vlgmr.msra.gmra.mrb[16].mxu0 %v3205_v33 }
 0x532   : > { %8075 = vmatmul.mubr.bf16.vlgmr.msra.gmra.mrb[16].mxu1 %v3205_v33  ;;  %7570 = vmatpush1.bf16.msra.mxu0 %v16652_v24  ;;  %v16741_v24 = vld [vmem:[#allocation7 + $0x17cc] ss:$16 sps:$4 sm:$0xff]   ;;  %v16736_v33 = vld [vmem:[#allocation7 + $0x17c0] ss:$16 sps:$4 sm:$0xff]  }
 0x533   : > { %7601 = vmatprep.mubr.bf16.mxu0 %v3226_v31  ;;  %8086 = vmatpush1.bf16.msra.mxu1 %v16655_v30  ;;  %v16739_v30 = vld [vmem:[#allocation7 + $0x17c8] ss:$16 sps:$4 sm:$0xff]  }
 0x534   : > { %8117 = vmatprep.mubr.bf16.mxu1 %v3226_v31  ;;  %7571 = vmatprep.subr.bf16.mxu0 %v16660_v56  ;;  %v3216_v56 = vshll.u32 %v18733_v26, 16  ;;  %v16747_v31 = vld [vmem:[#allocation7 + $0x17ec] ss:$16 sps:$4 sm:$0xff]  }
 0x535   : > { %8087 = vmatprep.subr.bf16.mxu1 %v16663_v48  ;;  %v16742_v48 = vld [vmem:[#allocation7 + $0x17e0] ss:$16 sps:$4 sm:$0xff]  }
 0x536   : > { %7572 = vmatpush1.bf16.msra.mxu0 %v16658_v40  ;;  %v16745_v40 = vld [vmem:[#allocation7 + $0x17e8] ss:$16 sps:$4 sm:$0xff]  }
 0x537   : > { %8088 = vmatpush1.bf16.msra.mxu1 %v16661_v0  ;;  %7573 = vmatprep.subr.bf16.mxu0 %v16666_v39  ;;  %v3218_v0 = vrot.slane %v3216_v56, 1  ;;  %v16748_v39 = vld [vmem:[#allocation10 + $0x40] sm:$0xff]  }
 0x538   : > { %8089 = vmatprep.subr.bf16.mxu1 %v16669_v57  ;;  %v16749_v57 = vld [vmem:[#allocation10 + $0xc0] sm:$0xff]  }
 0x53a   : > { %7574 = vmatpush1.bf16.msra.mxu0 %v16664_v12  ;;  %v3214_v12 = vshrl.u32 %v18733_v26, 16  ;;  %v16758_v26 = vld [vmem:[#allocation10 + $0x10] sm:$0xff]  }
 0x53b   : > { %8090 = vmatpush1.bf16.msra.mxu1 %v16667_v35  ;;  %7575 = vmatprep.subr.bf16.mxu0 %v16672_v54  ;;  %v16750_v35 = vld [vmem:[#allocation10] sm:$0xff]  }
 0x53c   : > { %8091 = vmatprep.subr.bf16.mxu1 %v16675_v34  ;;  %v3219_v54 = vor.u32 %v3218_v0, %v3214_v12  ;;  %v16751_v34 = vld [vmem:[#allocation10 + $0x80] sm:$0xff]  }
 0x53e   : > { %7576 = vmatpush1.bf16.msra.mxu0 %v16670_v17  ;;  %v16752_v17 = vld [vmem:[#allocation10 + $0x48] sm:$0xff]  }
 0x53f   : > { %8092 = vmatpush1.bf16.msra.mxu1 %v16673_v36  ;;  %7577 = vmatprep.subr.bf16.mxu0 %v16678_v32  ;;  %v16753_v36 = vld [vmem:[#allocation10 + $0xc8] sm:$0xff]  }
 0x540   : > { %8093 = vmatprep.subr.bf16.mxu1 %v16681_v37  ;;  %v16754_v32 = vld [vmem:[#allocation10 + $0x8] sm:$0xff]  }
 0x541   : > { %v16755_v37 = vld [vmem:[#allocation10 + $0x88] sm:$0xff]  }
 0x542   : > { %7578 = vmatpush1.bf16.msra.mxu0 %v16676_v18  ;;  %v16756_v18 = vld [vmem:[#allocation10 + $0x50] sm:$0xff]  }
 0x543   : > { %8094 = vmatpush1.bf16.msra.mxu1 %v16679_v29  ;;  %7579 = vmatprep.subr.bf16.mxu0 %v16684_v42  ;;  %v16757_v29 = vld [vmem:[#allocation10 + $0xd0] sm:$0xff]  }
 0x544   : > { %8095 = vmatprep.subr.bf16.mxu1 %v16687_v43  ;;  %v16759_v42 = vld [vmem:[#allocation10 + $0x90] sm:$0xff]   ;;  %v16760_v43 = vld [vmem:[#allocation10 + $0x58] sm:$0xff]  }
 0x546   : > { %7580 = vmatpush1.bf16.msra.mxu0 %v16682_v46  ;;  %v16761_v46 = vld [vmem:[#allocation10 + $0xd8] sm:$0xff]  }
 0x547   : > { %8096 = vmatpush1.bf16.msra.mxu1 %v16685_v44  ;;  %7581 = vmatprep.subr.bf16.mxu0 %v16690_v50  ;;  %v16762_v44 = vld [vmem:[#allocation10 + $0x18] sm:$0xff]  }
 0x548   : > { %8097 = vmatprep.subr.bf16.mxu1 %v16693_v51  ;;  %v16763_v50 = vld [vmem:[#allocation10 + $0x98] sm:$0xff]   ;;  %v16764_v51 = vld [vmem:[#allocation10 + $0x60] sm:$0xff]  }
 0x54a   : > { %7582 = vmatpush1.bf16.msra.mxu0 %v16688_v41  ;;  %v16765_v41 = vld [vmem:[#allocation10 + $0xe0] sm:$0xff]  }
 0x54b   : > { %8098 = vmatpush1.bf16.msra.mxu1 %v16691_v15  ;;  %7583 = vmatprep.subr.bf16.mxu0 %v16696_v16  ;;  %v16766_v15 = vld [vmem:[#allocation10 + $0x20] sm:$0xff]  }
 0x54c   : > { %8099 = vmatprep.subr.bf16.mxu1 %v16699_v63  ;;  %v16767_v16 = vld [vmem:[#allocation10 + $0xa0] sm:$0xff]   ;;  %v16768_v63 = vld [vmem:[#allocation10 + $0x68] sm:$0xff]  }
 0x54e   : > { %7584 = vmatpush1.bf16.msra.mxu0 %v16694_v2  ;;  %v16769_v2 = vld [vmem:[#allocation10 + $0xe8] sm:$0xff]  }
 0x54f   : > { %8100 = vmatpush1.bf16.msra.mxu1 %v16697_v52  ;;  %7585 = vmatprep.subr.bf16.mxu0 %v16702_v58  ;;  %v16770_v52 = vld [vmem:[#allocation10 + $0x28] sm:$0xff]  }
 0x550   : > { %8101 = vmatprep.subr.bf16.mxu1 %v16705_v3  ;;  %v16771_v58 = vld [vmem:[#allocation10 + $0xa8] sm:$0xff]   ;;  %v16772_v3 = vld [vmem:[#allocation10 + $0x70] sm:$0xff]  }
 0x552   : > { %7586 = vmatpush1.bf16.msra.mxu0 %v16700_v5  ;;  %v16773_v5 = vld [vmem:[#allocation10 + $0xf0] sm:$0xff]  }
 0x553   : > { %8102 = vmatpush1.bf16.msra.mxu1 %v16703_v38  ;;  %7587 = vmatprep.subr.bf16.mxu0 %v16708_v8  ;;  %v16774_v38 = vld [vmem:[#allocation10 + $0x30] sm:$0xff]  }
 0x554   : > { %8103 = vmatprep.subr.bf16.mxu1 %v16711_v53  ;;  %v16775_v8 = vld [vmem:[#allocation10 + $0xb0] sm:$0xff]   ;;  %v16776_v53 = vld [vmem:[#allocation10 + $0x78] sm:$0xff]  }
 0x556   : > { %7588 = vmatpush1.bf16.msra.mxu0 %v16706_v9  ;;  %v16777_v9 = vld [vmem:[#allocation10 + $0xf8] sm:$0xff]  }
 0x557   : > { %8104 = vmatpush1.bf16.msra.mxu1 %v16709_v49  ;;  %7589 = vmatprep.subr.bf16.mxu0 %v16714_v10  ;;  %v16778_v49 = vld [vmem:[#allocation10 + $0x38] sm:$0xff]  }
 0x558   : > { %8105 = vmatprep.subr.bf16.mxu1 %v16717_v59  ;;  %v16779_v10 = vld [vmem:[#allocation10 + $0xb8] sm:$0xff]   ;;  %v16780_v59 = vld [vmem:[#allocation10 + $0x140] sm:$0xff]  }
 0x55a   : > { %7590 = vmatpush1.bf16.msra.mxu0 %v16712_v19  ;;  %v16781_v19 = vld [vmem:[#allocation10 + $0x1c0] sm:$0xff]  }
 0x55b   : > { %8106 = vmatpush1.bf16.msra.mxu1 %v16715_v14  ;;  %7591 = vmatprep.subr.bf16.mxu0 %v16720_v61  ;;  %v1401_v14 = vld [vmem:[#allocation8] sm:$0xf] }
 0x55c   : > { %8107 = vmatprep.subr.bf16.mxu1 %v16723_v6  ;;  %v3239_v61 = vrot.slane %v1401_v14, %v1437_v47  ;;  %v3247_v6 = vrot.slane %v1401_v14, %v1445_v62 }
 0x55e   : > { %7592 = vmatpush1.bf16.msra.mxu0 %v16718_v20  ;;  %v3243_v20 = vrot.slane %v1401_v14, %v1441_v4 }
 0x55f   : > { %8108 = vmatpush1.bf16.msra.mxu1 %v16721_v55  ;;  %7593 = vmatprep.subr.bf16.mxu0 %v16726_v22  ;;  %v3251_v55 = vrot.slane %v1401_v14, %v1449_v11  ;;  %v16811_v14 = vld [vmem:[#allocation10 + $0x1b8] sm:$0xff]  }
 0x560   : > { %8109 = vmatprep.subr.bf16.mxu1 %v16729_v7 }
 0x562   : > { %7594 = vmatpush1.bf16.msra.mxu0 %v16724_v21 }
 0x563   : > { %8110 = vmatpush1.bf16.msra.mxu1 %v16727_v27  ;;  %7595 = vmatprep.subr.bf16.mxu0 %v16732_v28 }
 0x564   : > { %8111 = vmatprep.subr.bf16.mxu1 %v16735_v13 }
 0x566   : > { %7596 = vmatpush1.bf16.msra.mxu0 %v16730_v1 }
 0x567   : > { %8112 = vmatpush1.bf16.msra.mxu1 %v16733_v60  ;;  %7597 = vmatprep.subr.bf16.mxu0 %v16738_v25 }
 0x568   : > { %8113 = vmatprep.subr.bf16.mxu1 %v16741_v24 }
 0x56a   : > { %7598 = vmatpush1.bf16.msra.mxu0 %v16736_v33 }
 0x56b   : > { %8114 = vmatpush1.bf16.msra.mxu1 %v16739_v30  ;;  %7599 = vmatprep.subr.bf16.mxu0 %v16744_v23 }
 0x56c   : > { %8115 = vmatprep.subr.bf16.mxu1 %v16747_v31 }
 0x56e   : > { %7600 = vmatpush1.bf16.msra.mxu0 %v16742_v48 }
 0x56f   : > { %8116 = vmatpush1.bf16.msra.mxu1 %v16745_v40  ;;  %14660 = vmatprep.subr.bf16.mxu0 %v16748_v39 }
 0x570   : > { %14682 = vmatprep.subr.bf16.mxu1 %v16749_v57 }
 0x571   : > { %7602 = vmatmul.mubr.bf16.vlgmr.msra.gmra.mrb[16].mxu0 %v3219_v54 }
 0x572   : > { %8118 = vmatmul.mubr.bf16.vlgmr.msra.gmra.mrb[16].mxu1 %v3219_v54  ;;  %14661 = vmatpush3.bf16.msra.mxu0 %v16750_v35  ;;  %v16782_v54 = vld [vmem:[#allocation10 + $0x100] sm:$0xff]  }
 0x573   : > { %14683 = vmatpush3.bf16.msra.mxu1 %v16751_v34  ;;  %14662 = vmatprep.subr.bf16.mxu0 %v16752_v17  ;;  %v16783_v17 = vld [vmem:[#allocation10 + $0x180] sm:$0xff]  }
 0x574   : > { %14684 = vmatprep.subr.bf16.mxu1 %v16753_v36 }
 0x576   : > { %14663 = vmatpush3.bf16.msra.mxu0 %v16754_v32  ;;  %v16784_v32 = vld [vmem:[#allocation10 + $0x148] sm:$0xff]  }
 0x577   : > { %14685 = vmatpush3.bf16.msra.mxu1 %v16755_v37  ;;  %14664 = vmatprep.subr.bf16.mxu0 %v16756_v18  ;;  %v16785_v18 = vld [vmem:[#allocation10 + $0x1c8] sm:$0xff]  }
 0x578   : > { %14686 = vmatprep.subr.bf16.mxu1 %v16757_v29  ;;  %v16786_v29 = vld [vmem:[#allocation10 + $0x108] sm:$0xff]  }
 0x57a   : > { %14665 = vmatpush3.bf16.msra.mxu0 %v16758_v26  ;;  %v16787_v26 = vld [vmem:[#allocation10 + $0x188] sm:$0xff]  }
 0x57b   : > { %14687 = vmatpush3.bf16.msra.mxu1 %v16759_v42  ;;  %14666 = vmatprep.subr.bf16.mxu0 %v16760_v43  ;;  %v16788_v42 = vld [vmem:[#allocation10 + $0x150] sm:$0xff]  }
 0x57c   : > { %14688 = vmatprep.subr.bf16.mxu1 %v16761_v46  ;;  %v16789_v43 = vld [vmem:[#allocation10 + $0x1d0] sm:$0xff]  }
 0x57d   : > { %v16790_v46 = vld [vmem:[#allocation10 + $0x110] sm:$0xff]  }
 0x57e   : > { %14667 = vmatpush3.bf16.msra.mxu0 %v16762_v44  ;;  %v16791_v44 = vld [vmem:[#allocation10 + $0x190] sm:$0xff]  }
 0x57f   : > { %14689 = vmatpush3.bf16.msra.mxu1 %v16763_v50  ;;  %14668 = vmatprep.subr.bf16.mxu0 %v16764_v51  ;;  %v16792_v50 = vld [vmem:[#allocation10 + $0x158] sm:$0xff]  }
 0x580   : > { %14690 = vmatprep.subr.bf16.mxu1 %v16765_v41  ;;  %v16793_v51 = vld [vmem:[#allocation10 + $0x1d8] sm:$0xff]  }
 0x581   : > { %v16794_v41 = vld [vmem:[#allocation10 + $0x118] sm:$0xff]  }
 0x582   : > { %14669 = vmatpush3.bf16.msra.mxu0 %v16766_v15  ;;  %v16795_v15 = vld [vmem:[#allocation10 + $0x198] sm:$0xff]  }
 0x583   : > { %14691 = vmatpush3.bf16.msra.mxu1 %v16767_v16  ;;  %14670 = vmatprep.subr.bf16.mxu0 %v16768_v63  ;;  %v16796_v16 = vld [vmem:[#allocation10 + $0x160] sm:$0xff]  }
 0x584   : > { %14692 = vmatprep.subr.bf16.mxu1 %v16769_v2  ;;  %v16797_v63 = vld [vmem:[#allocation10 + $0x1e0] sm:$0xff]  }
 0x585   : > { %v16798_v2 = vld [vmem:[#allocation10 + $0x120] sm:$0xff]  }
 0x586   : > { %14671 = vmatpush3.bf16.msra.mxu0 %v16770_v52  ;;  %v16799_v52 = vld [vmem:[#allocation10 + $0x1a0] sm:$0xff]  }
 0x587   : > { %14693 = vmatpush3.bf16.msra.mxu1 %v16771_v58  ;;  %14672 = vmatprep.subr.bf16.mxu0 %v16772_v3  ;;  %v16800_v58 = vld [vmem:[#allocation10 + $0x168] sm:$0xff]  }
 0x588   : > { %14694 = vmatprep.subr.bf16.mxu1 %v16773_v5  ;;  %v16801_v3 = vld [vmem:[#allocation10 + $0x1e8] sm:$0xff]  }
 0x589   : > { %v16802_v5 = vld [vmem:[#allocation10 + $0x128] sm:$0xff]  }
 0x58a   : > { %14673 = vmatpush3.bf16.msra.mxu0 %v16774_v38  ;;  %v16803_v38 = vld [vmem:[#allocation10 + $0x1a8] sm:$0xff]  }
 0x58b   : > { %14695 = vmatpush3.bf16.msra.mxu1 %v16775_v8  ;;  %14674 = vmatprep.subr.bf16.mxu0 %v16776_v53  ;;  %v16804_v8 = vld [vmem:[#allocation10 + $0x170] sm:$0xff]  }
 0x58c   : > { %14696 = vmatprep.subr.bf16.mxu1 %v16777_v9  ;;  %v16805_v53 = vld [vmem:[#allocation10 + $0x1f0] sm:$0xff]  }
 0x58d   : > { %v16806_v9 = vld [vmem:[#allocation10 + $0x130] sm:$0xff]  }
 0x58e   : > { %14675 = vmatpush3.bf16.msra.mxu0 %v16778_v49  ;;  %v16807_v49 = vld [vmem:[#allocation10 + $0x1b0] sm:$0xff]  }
 0x58f   : > { %14697 = vmatpush3.bf16.msra.mxu1 %v16779_v10  ;;  %14704 = vmatprep.subr.bf16.mxu0 %v16780_v59  ;;  %v16808_v10 = vld [vmem:[#allocation10 + $0x178] sm:$0xff]  }
 0x590   : > { %14726 = vmatprep.subr.bf16.mxu1 %v16781_v19  ;;  %v16809_v59 = vld [vmem:[#allocation10 + $0x1f8] sm:$0xff]  }
 0x591   : > { %v16810_v19 = vld [vmem:[#allocation10 + $0x138] sm:$0xff]  }
 0x644   : > { %v7603_v22 = vpop.f32.mrb[16].mxu0 }
 0x645   : > { %v15337_v7 = vadd.f32 %v7603_v22, %v3239_v61  ;;  %v8119_v21 = vpop.f32.mrb[16].mxu1  ;;  %v7605_v27 = vpop.f32.mrb[17].mxu0  ;;  %v16815_v22 = vld [vmem:[#allocation10 + $0x280] sm:$0xff]  }
 0x646   : > { %v15341_v28 = vadd.f32 %v8119_v21, %v3247_v6  ;;  %v15338_v13 = vadd.f32 %v7605_v27, %v3243_v20  ;;  %v8121_v1 = vpop.f32.mrb[17].mxu1  ;;  %v7607_v60 = vpop.f32.mrb[18].mxu0  ;;  %v16816_v21 = vld [vmem:[#allocation10 + $0x248] sm:$0xff]  }
 0x647   : > { %v15342_v25 = vadd.f32 %v8121_v1, %v3251_v55  ;;  %v15339_v24 = vadd.f32 %v7607_v60, %v3239_v61  ;;  %v8123_v47 = vpop.f32.mrb[18].mxu1  ;;  %v7609_v33 = vpop.f32.mrb[19].mxu0  ;;  %v8128_v56 = vmax.f32 %v15337_v7, 0.0  ;;  %v16812_v61 = vld [vmem:[#allocation10 + $0x240] sm:$0xff]   ;;  %v16818_v1 = vld [vmem:[#allocation10 + $0x208] sm:$0xff]  }
 0x648   : > { %v15343_v30 = vadd.f32 %v8123_v47, %v3247_v6  ;;  %v15340_v62 = vadd.f32 %v7609_v33, %v3243_v20  ;;  %v8125_v23 = vpop.f32.mrb[19].mxu1  ;;  %v8130_v45 = vmax.f32 %v15341_v28, 0.0  ;;  %v8129_v11 = vmax.f32 %v15338_v13, 0.0  ;;  %v16813_v6 = vld [vmem:[#allocation10 + $0x2c0] sm:$0xff]   ;;  %v16817_v28 = vld [vmem:[#allocation10 + $0x2c8] sm:$0xff]   ;;  %v16822_v47 = vld [vmem:[#allocation10 + $0x210] sm:$0xff]  }
 0x649   : > { %v8132_v4 = vmax.f32 %v15339_v24, 0.0  ;;  %v15344_v31 = vadd.f32 %v8125_v23, %v3251_v55  ;;  %v8131_v0 = vmax.f32 %v15342_v25, 0.0  ;;  %v16814_v20 = vld [vmem:[#allocation10 + $0x200] sm:$0xff]   ;;  %v16819_v60 = vld [vmem:[#allocation10 + $0x288] sm:$0xff]   ;;  %v16820_v25 = vld [vmem:[#allocation10 + $0x250] sm:$0xff]  }
 0x64a   : > { %v8134_v48 = vmax.f32 %v15343_v30, 0.0  ;;  %v8133_v40 = vmax.f32 %v15340_v62, 0.0  ;;  %v16821_v24 = vld [vmem:[#allocation10 + $0x2d0] sm:$0xff]   ;;  %v16824_v30 = vld [vmem:[#allocation10 + $0x258] sm:$0xff]  }
 0x64b   : > { %v18825_v39 = vpack.c.bf16 %v8132_v4, %v8128_v56  ;;  %v8135_v57 = vmax.f32 %v15344_v31, 0.0  ;;  %v16823_v33 = vld [vmem:[#allocation10 + $0x290] sm:$0xff]   ;;  %v16825_v62 = vld [vmem:[#allocation10 + $0x2d8] sm:$0xff]   ;;  %v16828_v4 = vld [vmem:[#allocation10 + $0x260] sm:$0xff]  }
 0x64c   : > { %v18827_v12 = vpack.c.bf16 %v8134_v48, %v8130_v45  ;;  %v18829_v35 = vpack.c.bf16 %v8133_v40, %v8129_v11  ;;  %v16826_v23 = vld [vmem:[#allocation10 + $0x218] sm:$0xff]   ;;  %v16829_v31 = vld [vmem:[#allocation10 + $0x2e0] sm:$0xff]   ;;  %v16832_v48 = vld [vmem:[#allocation10 + $0x268] sm:$0xff]  }
 0x64d   : > { %v18831_v34 = vpack.c.bf16 %v8135_v57, %v8131_v0  ;;  %v18846_v55 = vshrl.u32 %v18825_v39, 16  ;;  %v16827_v56 = vld [vmem:[#allocation10 + $0x298] sm:$0xff]   ;;  %v16830_v45 = vld [vmem:[#allocation10 + $0x220] sm:$0xff]   ;;  %v16833_v40 = vld [vmem:[#allocation10 + $0x2e8] sm:$0xff]  }
 0x64e   : > { %11873 = vmatprep.mubr.bf16.mxu0 %v18829_v35  ;;  %v18835_v36 = vshrl.u32 %v18829_v35, 16  ;;  %v18849_v7 = vshrl.u32 %v18827_v12, 16  ;;  %v8161_v27 = vrot.slane %v18829_v35, 1  ;;  %v16831_v11 = vld [vmem:[#allocation10 + $0x2a0] sm:$0xff]   ;;  %v16834_v0 = vld [vmem:[#allocation10 + $0x228] sm:$0xff]  }
 0x64f   : > { %11913 = vmatprep.mubr.bf16.mxu1 %v18831_v34  ;;  %11874 = vmatmul.mubr.bf16.vlgmr.msra.gmra.mrb[20].mxu0 %v18825_v39  ;;  %v18840_v37 = vshrl.u32 %v18831_v34, 16  ;;  %v8163_v13 = vrot.slane %v18831_v34, 1  ;;  %v16835_v57 = vld [vmem:[#allocation10 + $0x2a8] sm:$0xff]  }
 0x650   : > { %11914 = vmatmul.mubr.bf16.vlgmr.msra.gmra.mrb[20].mxu1 %v18827_v12  ;;  %14705 = vmatpush3.bf16.msra.mxu0 %v16782_v54  ;;  %v16836_v54 = vld [vmem:[#allocation10 + $0x270] sm:$0xff]  }
 0x651   : > { %14727 = vmatpush3.bf16.msra.mxu1 %v16783_v17  ;;  %11953 = vmatprep.mubr.bf16.mxu0 %v18835_v36  ;;  %v16837_v17 = vld [vmem:[#allocation10 + $0x2f0] sm:$0xff]  }
 0x652   : > { %11993 = vmatprep.mubr.bf16.mxu1 %v18840_v37  ;;  %14706 = vmatprep.subr.bf16.mxu0 %v16784_v32  ;;  %v16838_v32 = vld [vmem:[#allocation10 + $0x230] sm:$0xff]  }
 0x653   : > { %14728 = vmatprep.subr.bf16.mxu1 %v16785_v18  ;;  %v16839_v18 = vld [vmem:[#allocation10 + $0x2b0] sm:$0xff]  }
 0x654   : > { %14707 = vmatpush3.bf16.msra.mxu0 %v16786_v29  ;;  %v16840_v29 = vld [vmem:[#allocation10 + $0x278] sm:$0xff]  }
 0x655   : > { %14729 = vmatpush3.bf16.msra.mxu1 %v16787_v26  ;;  %14708 = vmatprep.subr.bf16.mxu0 %v16788_v42  ;;  %v16841_v26 = vld [vmem:[#allocation10 + $0x2f8] sm:$0xff]  }
 0x656   : > { %14730 = vmatprep.subr.bf16.mxu1 %v16789_v43  ;;  %v16842_v42 = vld [vmem:[#allocation10 + $0x238] sm:$0xff]  }
 0x657   : > { %v16843_v43 = vld [vmem:[#allocation10 + $0x2b8] sm:$0xff]  }
 0x658   : > { %14709 = vmatpush3.bf16.msra.mxu0 %v16790_v46  ;;  %v16844_v46 = vld [vmem:[#allocation10 + $0x340] sm:$0xff]  }
 0x659   : > { %14731 = vmatpush3.bf16.msra.mxu1 %v16791_v44  ;;  %14710 = vmatprep.subr.bf16.mxu0 %v16792_v50  ;;  %v16845_v44 = vld [vmem:[#allocation10 + $0x3c0] sm:$0xff]  }
 0x65a   : > { %14732 = vmatprep.subr.bf16.mxu1 %v16793_v51  ;;  %v16846_v50 = vld [vmem:[#allocation10 + $0x300] sm:$0xff]   ;;  %v8160_v51 = vrot.slane %v18825_v39, 1 }
 0x65c   : > { %14711 = vmatpush3.bf16.msra.mxu0 %v16794_v41  ;;  %v16847_v41 = vld [vmem:[#allocation10 + $0x380] sm:$0xff]  }
 0x65d   : > { %14733 = vmatpush3.bf16.msra.mxu1 %v16795_v15  ;;  %14712 = vmatprep.subr.bf16.mxu0 %v16796_v16  ;;  %v8162_v15 = vrot.slane %v18827_v12, 1  ;;  %v16848_v16 = vld [vmem:[#allocation10 + $0x348] sm:$0xff]  }
 0x65e   : > { %14734 = vmatprep.subr.bf16.mxu1 %v16797_v63  ;;  %v8169_v63 = vrot.slane %v18835_v36, 1 }
 0x660   : > { %14713 = vmatpush3.bf16.msra.mxu0 %v16798_v2  ;;  %v16849_v2 = vld [vmem:[#allocation10 + $0x3c8] sm:$0xff]  }
 0x661   : > { %14735 = vmatpush3.bf16.msra.mxu1 %v16799_v52  ;;  %14714 = vmatprep.subr.bf16.mxu0 %v16800_v58  ;;  %v8171_v52 = vrot.slane %v18840_v37, 1  ;;  %v16850_v58 = vld [vmem:[#allocation10 + $0x308] sm:$0xff]  }
 0x662   : > { %14736 = vmatprep.subr.bf16.mxu1 %v16801_v3  ;;  %v16851_v3 = vld [vmem:[#allocation10 + $0x388] sm:$0xff]  }
 0x664   : > { %14715 = vmatpush3.bf16.msra.mxu0 %v16802_v5  ;;  %v16852_v5 = vld [vmem:[#allocation10 + $0x350] sm:$0xff]  }
 0x665   : > { %14737 = vmatpush3.bf16.msra.mxu1 %v16803_v38  ;;  %14716 = vmatprep.subr.bf16.mxu0 %v16804_v8  ;;  %v16853_v38 = vld [vmem:[#allocation10 + $0x3d0] sm:$0xff]  }
 0x666   : > { %14738 = vmatprep.subr.bf16.mxu1 %v16805_v53  ;;  %v16854_v8 = vld [vmem:[#allocation10 + $0x310] sm:$0xff]  }
 0x667   : > { %v16855_v53 = vld [vmem:[#allocation10 + $0x390] sm:$0xff]  }
 0x668   : > { %14717 = vmatpush3.bf16.msra.mxu0 %v16806_v9  ;;  %v16856_v9 = vld [vmem:[#allocation10 + $0x358] sm:$0xff]  }
 0x669   : > { %14739 = vmatpush3.bf16.msra.mxu1 %v16807_v49  ;;  %14718 = vmatprep.subr.bf16.mxu0 %v16808_v10  ;;  %v16857_v49 = vld [vmem:[#allocation10 + $0x3d8] sm:$0xff]  }
 0x66a   : > { %14740 = vmatprep.subr.bf16.mxu1 %v16809_v59  ;;  %v16858_v10 = vld [vmem:[#allocation10 + $0x318] sm:$0xff]  }
 0x66b   : > { %v16859_v59 = vld [vmem:[#allocation10 + $0x398] sm:$0xff]  }
 0x66c   : > { %14719 = vmatpush3.bf16.msra.mxu0 %v16810_v19  ;;  %v16860_v19 = vld [vmem:[#allocation10 + $0x360] sm:$0xff]  }
 0x66d   : > { %14741 = vmatpush3.bf16.msra.mxu1 %v16811_v14  ;;  %14748 = vmatprep.subr.bf16.mxu0 %v16812_v61  ;;  %v16861_v14 = vld [vmem:[#allocation10 + $0x3e0] sm:$0xff]  }
 0x66e   : > { %14770 = vmatprep.subr.bf16.mxu1 %v16813_v6  ;;  %v16862_v61 = vld [vmem:[#allocation10 + $0x320] sm:$0xff]  }
 0x66f   : > { %11954 = vmatmul.mubr.bf16.vlgmr.msra.gmra.mrb[24].mxu0 %v18846_v55  ;;  %v16863_v6 = vld [vmem:[#allocation10 + $0x3a0] sm:$0xff]  }
 0x670   : > { %11994 = vmatmul.mubr.bf16.vlgmr.msra.gmra.mrb[24].mxu1 %v18849_v7  ;;  %14749 = vmatpush3.bf16.msra.mxu0 %v16814_v20  ;;  %v16864_v20 = vld [vmem:[#allocation10 + $0x368] sm:$0xff]  }
 0x671   : > { %12033 = vmatprep.mubr.bf16.mxu0 %v8161_v27  ;;  %14771 = vmatpush3.bf16.msra.mxu1 %v16815_v22  ;;  %v16865_v22 = vld [vmem:[#allocation10 + $0x3e8] sm:$0xff]  }
 0x672   : > { %12073 = vmatprep.mubr.bf16.mxu1 %v8163_v13  ;;  %14750 = vmatprep.subr.bf16.mxu0 %v16816_v21  ;;  %v16866_v21 = vld [vmem:[#allocation10 + $0x328] sm:$0xff]   ;;  %v16869_v13 = vld [vmem:[#allocation10 + $0x3f0] sm:$0xff]  }
 0x673   : > { %14772 = vmatprep.subr.bf16.mxu1 %v16817_v28  ;;  %v16867_v27 = vld [vmem:[#allocation10 + $0x3a8] sm:$0xff]   ;;  %v16868_v28 = vld [vmem:[#allocation10 + $0x370] sm:$0xff]  }
 0x674   : > { %14751 = vmatpush3.bf16.msra.mxu0 %v16818_v1  ;;  %v16870_v1 = vld [vmem:[#allocation10 + $0x330] sm:$0xff]  }
 0x675   : > { %14773 = vmatpush3.bf16.msra.mxu1 %v16819_v60  ;;  %14752 = vmatprep.subr.bf16.mxu0 %v16820_v25  ;;  %v16871_v60 = vld [vmem:[#allocation10 + $0x3b0] sm:$0xff]   ;;  %v16872_v25 = vld [vmem:[#allocation10 + $0x378] sm:$0xff]  }
 0x676   : > { %14774 = vmatprep.subr.bf16.mxu1 %v16821_v24  ;;  %v16873_v24 = vld [vmem:[#allocation10 + $0x3f8] sm:$0xff]  }
 0x678   : > { %14753 = vmatpush3.bf16.msra.mxu0 %v16822_v47  ;;  %v16874_v47 = vld [vmem:[#allocation10 + $0x338] sm:$0xff]  }
 0x679   : > { %14775 = vmatpush3.bf16.msra.mxu1 %v16823_v33  ;;  %14754 = vmatprep.subr.bf16.mxu0 %v16824_v30  ;;  %v16875_v33 = vld [vmem:[#allocation10 + $0x3b8] sm:$0xff]   ;;  %v16876_v30 = vld [vmem:[#allocation10 + $0x440] sm:$0xff]  }
 0x67a   : > { %14776 = vmatprep.subr.bf16.mxu1 %v16825_v62  ;;  %v16877_v62 = vld [vmem:[#allocation10 + $0x4c0] sm:$0xff]  }
 0x67c   : > { %14755 = vmatpush3.bf16.msra.mxu0 %v16826_v23  ;;  %v16878_v23 = vld [vmem:[#allocation10 + $0x400] sm:$0xff]  }
 0x67d   : > { %14777 = vmatpush3.bf16.msra.mxu1 %v16827_v56  ;;  %14756 = vmatprep.subr.bf16.mxu0 %v16828_v4  ;;  %v8168_v56 = vrot.slane %v18846_v55, 1  ;;  %v16879_v4 = vld [vmem:[#allocation10 + $0x480] sm:$0xff]  }
 0x67e   : > { %14778 = vmatprep.subr.bf16.mxu1 %v16829_v31  ;;  %v8170_v31 = vrot.slane %v18849_v7, 1 }
 0x680   : > { %14757 = vmatpush3.bf16.msra.mxu0 %v16830_v45  ;;  %v16880_v45 = vld [vmem:[#allocation10 + $0x448] sm:$0xff]  }
 0x681   : > { %14779 = vmatpush3.bf16.msra.mxu1 %v16831_v11  ;;  %14758 = vmatprep.subr.bf16.mxu0 %v16832_v48  ;;  %v8177_v11 = vrot.slane %v18829_v35, 2  ;;  %v16881_v48 = vld [vmem:[#allocation10 + $0x4c8] sm:$0xff]  }
 0x682   : > { %14780 = vmatprep.subr.bf16.mxu1 %v16833_v40  ;;  %v8179_v40 = vrot.slane %v18831_v34, 2 }
 0x684   : > { %14759 = vmatpush3.bf16.msra.mxu0 %v16834_v0  ;;  %v16882_v0 = vld [vmem:[#allocation10 + $0x408] sm:$0xff]  }
 0x685   : > { %14781 = vmatpush3.bf16.msra.mxu1 %v16835_v57  ;;  %14760 = vmatprep.subr.bf16.mxu0 %v16836_v54  ;;  %v16883_v57 = vld [vmem:[#allocation10 + $0x488] sm:$0xff]   ;;  %v16884_v54 = vld [vmem:[#allocation10 + $0x450] sm:$0xff]  }
 0x686   : > { %14782 = vmatprep.subr.bf16.mxu1 %v16837_v17  ;;  %v16885_v17 = vld [vmem:[#allocation10 + $0x4d0] sm:$0xff]  }
 0x688   : > { %14761 = vmatpush3.bf16.msra.mxu0 %v16838_v32  ;;  %v16886_v32 = vld [vmem:[#allocation10 + $0x410] sm:$0xff]  }
 0x689   : > { %14783 = vmatpush3.bf16.msra.mxu1 %v16839_v18  ;;  %14762 = vmatprep.subr.bf16.mxu0 %v16840_v29  ;;  %v16887_v18 = vld [vmem:[#allocation10 + $0x490] sm:$0xff]   ;;  %v16888_v29 = vld [vmem:[#allocation10 + $0x458] sm:$0xff]  }
 0x68a   : > { %14784 = vmatprep.subr.bf16.mxu1 %v16841_v26  ;;  %v16889_v26 = vld [vmem:[#allocation10 + $0x4d8] sm:$0xff]  }
 0x68c   : > { %14763 = vmatpush3.bf16.msra.mxu0 %v16842_v42  ;;  %v16890_v42 = vld [vmem:[#allocation10 + $0x418] sm:$0xff]  }
 0x68d   : > { %14785 = vmatpush3.bf16.msra.mxu1 %v16843_v43  ;;  %14792 = vmatprep.subr.bf16.mxu0 %v16844_v46  ;;  %v16891_v43 = vld [vmem:[#allocation10 + $0x498] sm:$0xff]   ;;  %v16892_v46 = vld [vmem:[#allocation10 + $0x460] sm:$0xff]  }
 0x68e   : > { %14814 = vmatprep.subr.bf16.mxu1 %v16845_v44  ;;  %v16893_v44 = vld [vmem:[#allocation10 + $0x4e0] sm:$0xff]  }
 0x68f   : > { %12034 = vmatmul.mubr.bf16.vlgmr.msra.gmra.mrb[28].mxu0 %v8160_v51  ;;  %v16895_v51 = vld [vmem:[#allocation10 + $0x4a0] sm:$0xff]  }
 0x690   : > { %12074 = vmatmul.mubr.bf16.vlgmr.msra.gmra.mrb[28].mxu1 %v8162_v15  ;;  %14793 = vmatpush3.bf16.msra.mxu0 %v16846_v50  ;;  %v16894_v50 = vld [vmem:[#allocation10 + $0x420] sm:$0xff]   ;;  %v16897_v15 = vld [vmem:[#allocation10 + $0x4e8] sm:$0xff]  }
 0x691   : > { %12113 = vmatprep.mubr.bf16.mxu0 %v8169_v63  ;;  %14815 = vmatpush3.bf16.msra.mxu1 %v16847_v41  ;;  %v16896_v41 = vld [vmem:[#allocation10 + $0x468] sm:$0xff]  }
 0x692   : > { %12153 = vmatprep.mubr.bf16.mxu1 %v8171_v52  ;;  %14794 = vmatprep.subr.bf16.mxu0 %v16848_v16  ;;  %v16898_v16 = vld [vmem:[#allocation10 + $0x428] sm:$0xff]   ;;  %v16901_v52 = vld [vmem:[#allocation10 + $0x4f0] sm:$0xff]  }
 0x693   : > { %14816 = vmatprep.subr.bf16.mxu1 %v16849_v2  ;;  %v16899_v63 = vld [vmem:[#allocation10 + $0x4a8] sm:$0xff]   ;;  %v16900_v2 = vld [vmem:[#allocation10 + $0x470] sm:$0xff]  }
 0x694   : > { %14795 = vmatpush3.bf16.msra.mxu0 %v16850_v58  ;;  %v16902_v58 = vld [vmem:[#allocation10 + $0x430] sm:$0xff]  }
 0x695   : > { %14817 = vmatpush3.bf16.msra.mxu1 %v16851_v3  ;;  %14796 = vmatprep.subr.bf16.mxu0 %v16852_v5  ;;  %v16903_v3 = vld [vmem:[#allocation10 + $0x4b0] sm:$0xff]   ;;  %v16904_v5 = vld [vmem:[#allocation10 + $0x478] sm:$0xff]  }
 0x696   : > { %14818 = vmatprep.subr.bf16.mxu1 %v16853_v38  ;;  %v16905_v38 = vld [vmem:[#allocation10 + $0x4f8] sm:$0xff]  }
 0x698   : > { %14797 = vmatpush3.bf16.msra.mxu0 %v16854_v8  ;;  %v16906_v8 = vld [vmem:[#allocation10 + $0x438] sm:$0xff]  }
 0x699   : > { %14819 = vmatpush3.bf16.msra.mxu1 %v16855_v53  ;;  %14798 = vmatprep.subr.bf16.mxu0 %v16856_v9  ;;  %v16907_v53 = vld [vmem:[#allocation10 + $0x4b8] sm:$0xff]   ;;  %v16908_v9 = vld [vmem:[#allocation10 + $0x540] sm:$0xff]  }
 0x69a   : > { %14820 = vmatprep.subr.bf16.mxu1 %v16857_v49  ;;  %v16909_v49 = vld [vmem:[#allocation10 + $0x5c0] sm:$0xff]  }
 0x69c   : > { %14799 = vmatpush3.bf16.msra.mxu0 %v16858_v10  ;;  %v16910_v10 = vld [vmem:[#allocation10 + $0x500] sm:$0xff]  }
 0x69d   : > { %14821 = vmatpush3.bf16.msra.mxu1 %v16859_v59  ;;  %14800 = vmatprep.subr.bf16.mxu0 %v16860_v19  ;;  %v8176_v59 = vrot.slane %v18825_v39, 2  ;;  %v16911_v19 = vld [vmem:[#allocation10 + $0x580] sm:$0xff]  }
 0x69e   : > { %14822 = vmatprep.subr.bf16.mxu1 %v16861_v14  ;;  %v8178_v14 = vrot.slane %v18827_v12, 2 }
 0x6a0   : > { %14801 = vmatpush3.bf16.msra.mxu0 %v16862_v61  ;;  %v16912_v61 = vld [vmem:[#allocation10 + $0x548] sm:$0xff]  }
 0x6a1   : > { %14823 = vmatpush3.bf16.msra.mxu1 %v16863_v6  ;;  %14802 = vmatprep.subr.bf16.mxu0 %v16864_v20  ;;  %v8185_v6 = vrot.slane %v18835_v36, 2  ;;  %v16913_v20 = vld [vmem:[#allocation10 + $0x5c8] sm:$0xff]  }
 0x6a2   : > { %14824 = vmatprep.subr.bf16.mxu1 %v16865_v22  ;;  %v8187_v22 = vrot.slane %v18840_v37, 2 }
 0x6a4   : > { %14803 = vmatpush3.bf16.msra.mxu0 %v16866_v21  ;;  %v16914_v21 = vld [vmem:[#allocation10 + $0x508] sm:$0xff]  }
 0x6a5   : > { %14825 = vmatpush3.bf16.msra.mxu1 %v16867_v27  ;;  %14804 = vmatprep.subr.bf16.mxu0 %v16868_v28  ;;  %v16915_v27 = vld [vmem:[#allocation10 + $0x588] sm:$0xff]   ;;  %v16916_v28 = vld [vmem:[#allocation10 + $0x550] sm:$0xff]  }
 0x6a6   : > { %14826 = vmatprep.subr.bf16.mxu1 %v16869_v13  ;;  %v16917_v13 = vld [vmem:[#allocation10 + $0x5d0] sm:$0xff]  }
 0x6a8   : > { %14805 = vmatpush3.bf16.msra.mxu0 %v16870_v1  ;;  %v16918_v1 = vld [vmem:[#allocation10 + $0x510] sm:$0xff]  }
 0x6a9   : > { %14827 = vmatpush3.bf16.msra.mxu1 %v16871_v60  ;;  %14806 = vmatprep.subr.bf16.mxu0 %v16872_v25  ;;  %v16919_v60 = vld [vmem:[#allocation10 + $0x590] sm:$0xff]   ;;  %v16920_v25 = vld [vmem:[#allocation10 + $0x558] sm:$0xff]  }
 0x6aa   : > { %14828 = vmatprep.subr.bf16.mxu1 %v16873_v24  ;;  %v16921_v24 = vld [vmem:[#allocation10 + $0x5d8] sm:$0xff]  }
 0x6ac   : > { %14807 = vmatpush3.bf16.msra.mxu0 %v16874_v47  ;;  %v16922_v47 = vld [vmem:[#allocation10 + $0x518] sm:$0xff]  }
 0x6ad   : > { %14829 = vmatpush3.bf16.msra.mxu1 %v16875_v33  ;;  %14836 = vmatprep.subr.bf16.mxu0 %v16876_v30  ;;  %v16923_v33 = vld [vmem:[#allocation10 + $0x598] sm:$0xff]   ;;  %v16924_v30 = vld [vmem:[#allocation10 + $0x560] sm:$0xff]  }
 0x6ae   : > { %14858 = vmatprep.subr.bf16.mxu1 %v16877_v62  ;;  %v16925_v62 = vld [vmem:[#allocation10 + $0x5e0] sm:$0xff]  }
 0x6af   : > { %12114 = vmatmul.mubr.bf16.vlgmr.msra.gmra.mrb[32].mxu0 %v8168_v56  ;;  %v16927_v56 = vld [vmem:[#allocation10 + $0x5a0] sm:$0xff]  }
 0x6b0   : > { %12154 = vmatmul.mubr.bf16.vlgmr.msra.gmra.mrb[32].mxu1 %v8170_v31  ;;  %14837 = vmatpush3.bf16.msra.mxu0 %v16878_v23  ;;  %v16926_v23 = vld [vmem:[#allocation10 + $0x520] sm:$0xff]   ;;  %v16929_v31 = vld [vmem:[#allocation10 + $0x5e8] sm:$0xff]  }
 0x6b1   : > { %12193 = vmatprep.mubr.bf16.mxu0 %v8177_v11  ;;  %14859 = vmatpush3.bf16.msra.mxu1 %v16879_v4  ;;  %v16928_v4 = vld [vmem:[#allocation10 + $0x568] sm:$0xff]  }
 0x6b2   : > { %12233 = vmatprep.mubr.bf16.mxu1 %v8179_v40  ;;  %14838 = vmatprep.subr.bf16.mxu0 %v16880_v45  ;;  %v16930_v45 = vld [vmem:[#allocation10 + $0x528] sm:$0xff]   ;;  %v16933_v40 = vld [vmem:[#allocation10 + $0x5f0] sm:$0xff]  }
 0x6b3   : > { %14860 = vmatprep.subr.bf16.mxu1 %v16881_v48  ;;  %v16931_v11 = vld [vmem:[#allocation10 + $0x5a8] sm:$0xff]   ;;  %v16932_v48 = vld [vmem:[#allocation10 + $0x570] sm:$0xff]  }
 0x6b4   : > { %14839 = vmatpush3.bf16.msra.mxu0 %v16882_v0  ;;  %v16934_v0 = vld [vmem:[#allocation10 + $0x530] sm:$0xff]  }
 0x6b5   : > { %14861 = vmatpush3.bf16.msra.mxu1 %v16883_v57  ;;  %14840 = vmatprep.subr.bf16.mxu0 %v16884_v54  ;;  %v16935_v57 = vld [vmem:[#allocation10 + $0x5b0] sm:$0xff]   ;;  %v16936_v54 = vld [vmem:[#allocation10 + $0x578] sm:$0xff]  }
 0x6b6   : > { %14862 = vmatprep.subr.bf16.mxu1 %v16885_v17  ;;  %v16937_v17 = vld [vmem:[#allocation10 + $0x5f8] sm:$0xff]  }
 0x6b8   : > { %14841 = vmatpush3.bf16.msra.mxu0 %v16886_v32  ;;  %v16938_v32 = vld [vmem:[#allocation10 + $0x538] sm:$0xff]  }
 0x6b9   : > { %14863 = vmatpush3.bf16.msra.mxu1 %v16887_v18  ;;  %14842 = vmatprep.subr.bf16.mxu0 %v16888_v29  ;;  %v16939_v18 = vld [vmem:[#allocation10 + $0x5b8] sm:$0xff]   ;;  %v16940_v29 = vld [vmem:[#allocation10 + $0x640] sm:$0xff]  }
 0x6ba   : > { %14864 = vmatprep.subr.bf16.mxu1 %v16889_v26  ;;  %v16941_v26 = vld [vmem:[#allocation10 + $0x6c0] sm:$0xff]  }
 0x6bc   : > { %14843 = vmatpush3.bf16.msra.mxu0 %v16890_v42  ;;  %v16942_v42 = vld [vmem:[#allocation10 + $0x600] sm:$0xff]  }
 0x6bd   : > { %14865 = vmatpush3.bf16.msra.mxu1 %v16891_v43  ;;  %14844 = vmatprep.subr.bf16.mxu0 %v16892_v46  ;;  %v8184_v43 = vrot.slane %v18846_v55, 2  ;;  %v16943_v46 = vld [vmem:[#allocation10 + $0x680] sm:$0xff]  }
 0x6be   : > { %14866 = vmatprep.subr.bf16.mxu1 %v16893_v44  ;;  %v8186_v44 = vrot.slane %v18849_v7, 2 }
 0x6c0   : > { %14845 = vmatpush3.bf16.msra.mxu0 %v16894_v50  ;;  %v16944_v50 = vld [vmem:[#allocation10 + $0x648] sm:$0xff]  }
 0x6c1   : > { %14867 = vmatpush3.bf16.msra.mxu1 %v16895_v51  ;;  %14846 = vmatprep.subr.bf16.mxu0 %v16896_v41  ;;  %v8193_v51 = vrot.slane %v18829_v35, 3  ;;  %v16945_v41 = vld [vmem:[#allocation10 + $0x6c8] sm:$0xff]  }
 0x6c2   : > { %14868 = vmatprep.subr.bf16.mxu1 %v16897_v15  ;;  %v8195_v15 = vrot.slane %v18831_v34, 3 }
 0x6c4   : > { %14847 = vmatpush3.bf16.msra.mxu0 %v16898_v16  ;;  %v16946_v16 = vld [vmem:[#allocation10 + $0x608] sm:$0xff]  }
 0x6c5   : > { %14869 = vmatpush3.bf16.msra.mxu1 %v16899_v63  ;;  %14848 = vmatprep.subr.bf16.mxu0 %v16900_v2  ;;  %v16947_v63 = vld [vmem:[#allocation10 + $0x688] sm:$0xff]   ;;  %v16948_v2 = vld [vmem:[#allocation10 + $0x650] sm:$0xff]  }
 0x6c6   : > { %14870 = vmatprep.subr.bf16.mxu1 %v16901_v52  ;;  %v16949_v52 = vld [vmem:[#allocation10 + $0x6d0] sm:$0xff]  }
 0x6c8   : > { %14849 = vmatpush3.bf16.msra.mxu0 %v16902_v58  ;;  %v16950_v58 = vld [vmem:[#allocation10 + $0x610] sm:$0xff]  }
 0x6c9   : > { %14871 = vmatpush3.bf16.msra.mxu1 %v16903_v3  ;;  %14850 = vmatprep.subr.bf16.mxu0 %v16904_v5  ;;  %v16951_v3 = vld [vmem:[#allocation10 + $0x690] sm:$0xff]   ;;  %v16952_v5 = vld [vmem:[#allocation10 + $0x658] sm:$0xff]  }
 0x6ca   : > { %14872 = vmatprep.subr.bf16.mxu1 %v16905_v38  ;;  %v16953_v38 = vld [vmem:[#allocation10 + $0x6d8] sm:$0xff]  }
 0x6cc   : > { %14851 = vmatpush3.bf16.msra.mxu0 %v16906_v8  ;;  %v16954_v8 = vld [vmem:[#allocation10 + $0x618] sm:$0xff]  }
 0x6cd   : > { %14873 = vmatpush3.bf16.msra.mxu1 %v16907_v53  ;;  %14880 = vmatprep.subr.bf16.mxu0 %v16908_v9  ;;  %v16955_v53 = vld [vmem:[#allocation10 + $0x698] sm:$0xff]   ;;  %v16956_v9 = vld [vmem:[#allocation10 + $0x660] sm:$0xff]  }
 0x6ce   : > { %14902 = vmatprep.subr.bf16.mxu1 %v16909_v49  ;;  %v16957_v49 = vld [vmem:[#allocation10 + $0x6e0] sm:$0xff]  }
 0x6cf   : > { %12194 = vmatmul.mubr.bf16.vlgmr.msra.gmra.mrb[36].mxu0 %v8176_v59  ;;  %v16959_v59 = vld [vmem:[#allocation10 + $0x6a0] sm:$0xff]  }
 0x6d0   : > { %12234 = vmatmul.mubr.bf16.vlgmr.msra.gmra.mrb[36].mxu1 %v8178_v14  ;;  %14881 = vmatpush3.bf16.msra.mxu0 %v16910_v10  ;;  %v16958_v10 = vld [vmem:[#allocation10 + $0x620] sm:$0xff]   ;;  %v16961_v14 = vld [vmem:[#allocation10 + $0x6e8] sm:$0xff]  }
 0x6d1   : > { %12273 = vmatprep.mubr.bf16.mxu0 %v8185_v6  ;;  %14903 = vmatpush3.bf16.msra.mxu1 %v16911_v19  ;;  %v16960_v19 = vld [vmem:[#allocation10 + $0x668] sm:$0xff]  }
 0x6d2   : > { %12313 = vmatprep.mubr.bf16.mxu1 %v8187_v22  ;;  %14882 = vmatprep.subr.bf16.mxu0 %v16912_v61  ;;  %v16962_v61 = vld [vmem:[#allocation10 + $0x628] sm:$0xff]   ;;  %v16965_v22 = vld [vmem:[#allocation10 + $0x6f0] sm:$0xff]  }
 0x6d3   : > { %14904 = vmatprep.subr.bf16.mxu1 %v16913_v20  ;;  %v16963_v6 = vld [vmem:[#allocation10 + $0x6a8] sm:$0xff]   ;;  %v16964_v20 = vld [vmem:[#allocation10 + $0x670] sm:$0xff]  }
 0x6d4   : > { %14883 = vmatpush3.bf16.msra.mxu0 %v16914_v21  ;;  %v16966_v21 = vld [vmem:[#allocation10 + $0x630] sm:$0xff]  }
 0x6d5   : > { %14905 = vmatpush3.bf16.msra.mxu1 %v16915_v27  ;;  %14884 = vmatprep.subr.bf16.mxu0 %v16916_v28  ;;  %v16967_v27 = vld [vmem:[#allocation10 + $0x6b0] sm:$0xff]   ;;  %v16968_v28 = vld [vmem:[#allocation10 + $0x678] sm:$0xff]  }
 0x6d6   : > { %14906 = vmatprep.subr.bf16.mxu1 %v16917_v13  ;;  %v16969_v13 = vld [vmem:[#allocation10 + $0x6f8] sm:$0xff]  }
 0x6d8   : > { %14885 = vmatpush3.bf16.msra.mxu0 %v16918_v1  ;;  %v16970_v1 = vld [vmem:[#allocation10 + $0x638] sm:$0xff]  }
 0x6d9   : > { %14907 = vmatpush3.bf16.msra.mxu1 %v16919_v60  ;;  %14886 = vmatprep.subr.bf16.mxu0 %v16920_v25  ;;  %v16971_v60 = vld [vmem:[#allocation10 + $0x6b8] sm:$0xff]   ;;  %v16972_v25 = vld [vmem:[#allocation10 + $0x740] sm:$0xff]  }
 0x6da   : > { %14908 = vmatprep.subr.bf16.mxu1 %v16921_v24  ;;  %v16973_v24 = vld [vmem:[#allocation10 + $0x7c0] sm:$0xff]  }
 0x6dc   : > { %14887 = vmatpush3.bf16.msra.mxu0 %v16922_v47  ;;  %v16974_v47 = vld [vmem:[#allocation10 + $0x700] sm:$0xff]  }
 0x6dd   : > { %14909 = vmatpush3.bf16.msra.mxu1 %v16923_v33  ;;  %14888 = vmatprep.subr.bf16.mxu0 %v16924_v30  ;;  %v8192_v33 = vrot.slane %v18825_v39, 3  ;;  %v16975_v30 = vld [vmem:[#allocation10 + $0x780] sm:$0xff]  }
 0x6de   : > { %14910 = vmatprep.subr.bf16.mxu1 %v16925_v62  ;;  %v8194_v62 = vrot.slane %v18827_v12, 3 }
 0x6e0   : > { %14889 = vmatpush3.bf16.msra.mxu0 %v16926_v23  ;;  %v16976_v23 = vld [vmem:[#allocation10 + $0x748] sm:$0xff]  }
 0x6e1   : > { %14911 = vmatpush3.bf16.msra.mxu1 %v16927_v56  ;;  %14890 = vmatprep.subr.bf16.mxu0 %v16928_v4  ;;  %v8201_v56 = vrot.slane %v18835_v36, 3  ;;  %v16977_v4 = vld [vmem:[#allocation10 + $0x7c8] sm:$0xff]  }
 0x6e2   : > { %14912 = vmatprep.subr.bf16.mxu1 %v16929_v31  ;;  %v8203_v31 = vrot.slane %v18840_v37, 3 }
 0x6e4   : > { %14891 = vmatpush3.bf16.msra.mxu0 %v16930_v45  ;;  %v16978_v45 = vld [vmem:[#allocation10 + $0x708] sm:$0xff]  }
 0x6e5   : > { %14913 = vmatpush3.bf16.msra.mxu1 %v16931_v11  ;;  %14892 = vmatprep.subr.bf16.mxu0 %v16932_v48  ;;  %v16979_v11 = vld [vmem:[#allocation10 + $0x788] sm:$0xff]   ;;  %v16980_v48 = vld [vmem:[#allocation10 + $0x750] sm:$0xff]  }
 0x6e6   : > { %14914 = vmatprep.subr.bf16.mxu1 %v16933_v40  ;;  %v16981_v40 = vld [vmem:[#allocation10 + $0x7d0] sm:$0xff]  }
 0x6e8   : > { %14893 = vmatpush3.bf16.msra.mxu0 %v16934_v0  ;;  %v16982_v0 = vld [vmem:[#allocation10 + $0x710] sm:$0xff]  }
 0x6e9   : > { %14915 = vmatpush3.bf16.msra.mxu1 %v16935_v57  ;;  %14894 = vmatprep.subr.bf16.mxu0 %v16936_v54  ;;  %v16983_v57 = vld [vmem:[#allocation10 + $0x790] sm:$0xff]   ;;  %v16984_v54 = vld [vmem:[#allocation10 + $0x758] sm:$0xff]  }
 0x6ea   : > { %14916 = vmatprep.subr.bf16.mxu1 %v16937_v17  ;;  %v16985_v17 = vld [vmem:[#allocation10 + $0x7d8] sm:$0xff]  }
 0x6ec   : > { %14895 = vmatpush3.bf16.msra.mxu0 %v16938_v32  ;;  %v16986_v32 = vld [vmem:[#allocation10 + $0x718] sm:$0xff]  }
 0x6ed   : > { %14917 = vmatpush3.bf16.msra.mxu1 %v16939_v18  ;;  %14924 = vmatprep.subr.bf16.mxu0 %v16940_v29  ;;  %v16987_v18 = vld [vmem:[#allocation10 + $0x798] sm:$0xff]   ;;  %v16988_v29 = vld [vmem:[#allocation10 + $0x760] sm:$0xff]  }
 0x6ee   : > { %14946 = vmatprep.subr.bf16.mxu1 %v16941_v26  ;;  %v16989_v26 = vld [vmem:[#allocation10 + $0x7e0] sm:$0xff]  }
 0x6ef   : > { %12274 = vmatmul.mubr.bf16.vlgmr.msra.gmra.mrb[40].mxu0 %v8184_v43  ;;  %v16991_v43 = vld [vmem:[#allocation10 + $0x7a0] sm:$0xff]  }
 0x6f0   : > { %12314 = vmatmul.mubr.bf16.vlgmr.msra.gmra.mrb[40].mxu1 %v8186_v44  ;;  %14925 = vmatpush3.bf16.msra.mxu0 %v16942_v42  ;;  %v16990_v42 = vld [vmem:[#allocation10 + $0x720] sm:$0xff]   ;;  %v16993_v44 = vld [vmem:[#allocation10 + $0x7e8] sm:$0xff]  }
 0x6f1   : > { %12353 = vmatprep.mubr.bf16.mxu0 %v8193_v51  ;;  %14947 = vmatpush3.bf16.msra.mxu1 %v16943_v46  ;;  %v16992_v46 = vld [vmem:[#allocation10 + $0x768] sm:$0xff]  }
 0x6f2   : > { %12393 = vmatprep.mubr.bf16.mxu1 %v8195_v15  ;;  %14926 = vmatprep.subr.bf16.mxu0 %v16944_v50  ;;  %v16994_v50 = vld [vmem:[#allocation10 + $0x728] sm:$0xff]  }
 0x6f3   : > { %14948 = vmatprep.subr.bf16.mxu1 %v16945_v41  ;;  %v16995_v51 = vld [vmem:[#allocation10 + $0x7a8] sm:$0xff]   ;;  %v16996_v41 = vld [vmem:[#allocation10 + $0x770] sm:$0xff]  }
 0x6f4   : > { %14927 = vmatpush3.bf16.msra.mxu0 %v16946_v16  ;;  %v16997_v16 = vld [vmem:[#allocation10 + $0x7f0] sm:$0xff]  }
 0x6f5   : > { %14949 = vmatpush3.bf16.msra.mxu1 %v16947_v63  ;;  %14928 = vmatprep.subr.bf16.mxu0 %v16948_v2  ;;  %v9152_v2 = vld [vmem:[#allocation11] sm:$0x1] }
 0x6f6   : > { %14950 = vmatprep.subr.bf16.mxu1 %v16949_v52 }
 0x6f8   : > { %14929 = vmatpush3.bf16.msra.mxu0 %v16950_v58 }
 0x6f9   : > { %14951 = vmatpush3.bf16.msra.mxu1 %v16951_v3  ;;  %14930 = vmatprep.subr.bf16.mxu0 %v16952_v5 }
 0x6fa   : > { %14952 = vmatprep.subr.bf16.mxu1 %v16953_v38  ;;  %v16998_v38 = vld [vmem:[#allocation10 + $0x730] sm:$0xff]  }
 0x6fc   : > { %14931 = vmatpush3.bf16.msra.mxu0 %v16954_v8 }
 0x6fd   : > { %14953 = vmatpush3.bf16.msra.mxu1 %v16955_v53  ;;  %14932 = vmatprep.subr.bf16.mxu0 %v16956_v9 }
 0x6fe   : > { %14954 = vmatprep.subr.bf16.mxu1 %v16957_v49  ;;  %v16999_v49 = vld [vmem:[#allocation10 + $0x7b0] sm:$0xff]  }
 0x700   : > { %14933 = vmatpush3.bf16.msra.mxu0 %v16958_v10  ;;  %v17000_v10 = vld [vmem:[#allocation10 + $0x778] sm:$0xff]  }
 0x701   : > { %14955 = vmatpush3.bf16.msra.mxu1 %v16959_v59  ;;  %14934 = vmatprep.subr.bf16.mxu0 %v16960_v19 }
 0x702   : > { %14956 = vmatprep.subr.bf16.mxu1 %v16961_v14  ;;  %v17001_v14 = vld [vmem:[#allocation10 + $0x7f8] sm:$0xff]  }
 0x704   : > { %14935 = vmatpush3.bf16.msra.mxu0 %v16962_v61 }
 0x705   : > { %14957 = vmatpush3.bf16.msra.mxu1 %v16963_v6  ;;  %14936 = vmatprep.subr.bf16.mxu0 %v16964_v20  ;;  %v17002_v6 = vld [vmem:[#allocation10 + $0x738] sm:$0xff]  }
 0x706   : > { %14958 = vmatprep.subr.bf16.mxu1 %v16965_v22  ;;  %v17003_v20 = vld [vmem:[#allocation10 + $0x7b8] sm:$0xff]   ;;  %v17004_v22 = vld [vmem:[#allocation10 + $0x840] sm:$0xff]  }
 0x708   : > { %14937 = vmatpush3.bf16.msra.mxu0 %v16966_v21  ;;  %v17005_v21 = vld [vmem:[#allocation10 + $0x8c0] sm:$0xff]  }
 0x709   : > { %14959 = vmatpush3.bf16.msra.mxu1 %v16967_v27  ;;  %14938 = vmatprep.subr.bf16.mxu0 %v16968_v28  ;;  %v17006_v27 = vld [vmem:[#allocation10 + $0x800] sm:$0xff]   ;;  %v8200_v28 = vrot.slane %v18846_v55, 3 }
 0x70a   : > { %14960 = vmatprep.subr.bf16.mxu1 %v16969_v13  ;;  %v17007_v13 = vld [vmem:[#allocation10 + $0x880] sm:$0xff]  }
 0x70c   : > { %14939 = vmatpush3.bf16.msra.mxu0 %v16970_v1  ;;  %v8202_v1 = vrot.slane %v18849_v7, 3 }
 0x70d   : > { %14961 = vmatpush3.bf16.msra.mxu1 %v16971_v60  ;;  %14968 = vmatprep.subr.bf16.mxu0 %v16972_v25  ;;  %v17008_v60 = vld [vmem:[#allocation10 + $0x848] sm:$0xff]   ;;  %v8209_v25 = vrot.slane %v18829_v35, 4 }
 0x70e   : > { %14990 = vmatprep.subr.bf16.mxu1 %v16973_v24  ;;  %v17009_v24 = vld [vmem:[#allocation10 + $0x8c8] sm:$0xff]  }
 0x70f   : > { %12354 = vmatmul.mubr.bf16.vlgmr.msra.gmra.mrb[44].mxu0 %v8192_v33  ;;  %v17010_v33 = vld [vmem:[#allocation10 + $0x808] sm:$0xff]  }
 0x710   : > { %12394 = vmatmul.mubr.bf16.vlgmr.msra.gmra.mrb[44].mxu1 %v8194_v62  ;;  %14969 = vmatpush3.bf16.msra.mxu0 %v16974_v47  ;;  %v8211_v47 = vrot.slane %v18831_v34, 4  ;;  %v17012_v62 = vld [vmem:[#allocation10 + $0x850] sm:$0xff]  }
 0x711   : > { %12433 = vmatprep.mubr.bf16.mxu0 %v8201_v56  ;;  %14991 = vmatpush3.bf16.msra.mxu1 %v16975_v30  ;;  %v17011_v30 = vld [vmem:[#allocation10 + $0x888] sm:$0xff]   ;;  %v17014_v56 = vld [vmem:[#allocation10 + $0x810] sm:$0xff]  }
 0x712   : > { %12473 = vmatprep.mubr.bf16.mxu1 %v8203_v31  ;;  %14970 = vmatprep.subr.bf16.mxu0 %v16976_v23  ;;  %v17013_v23 = vld [vmem:[#allocation10 + $0x8d0] sm:$0xff]   ;;  %v17016_v31 = vld [vmem:[#allocation10 + $0x858] sm:$0xff]  }
 0x713   : > { %14992 = vmatprep.subr.bf16.mxu1 %v16977_v4  ;;  %v17015_v4 = vld [vmem:[#allocation10 + $0x890] sm:$0xff]  }
 0x714   : > { %14971 = vmatpush3.bf16.msra.mxu0 %v16978_v45  ;;  %v17017_v45 = vld [vmem:[#allocation10 + $0x8d8] sm:$0xff]  }
 0x715   : > { %14993 = vmatpush3.bf16.msra.mxu1 %v16979_v11  ;;  %14972 = vmatprep.subr.bf16.mxu0 %v16980_v48  ;;  %v17018_v11 = vld [vmem:[#allocation10 + $0x818] sm:$0xff]  }
 0x716   : > { %14994 = vmatprep.subr.bf16.mxu1 %v16981_v40  ;;  %v17019_v48 = vld [vmem:[#allocation10 + $0x898] sm:$0xff]   ;;  %v17020_v40 = vld [vmem:[#allocation10 + $0x860] sm:$0xff]  }
 0x718   : > { %14973 = vmatpush3.bf16.msra.mxu0 %v16982_v0  ;;  %v17021_v0 = vld [vmem:[#allocation10 + $0x8e0] sm:$0xff]  }
 0x719   : > { %14995 = vmatpush3.bf16.msra.mxu1 %v16983_v57  ;;  %14974 = vmatprep.subr.bf16.mxu0 %v16984_v54  ;;  %v17022_v57 = vld [vmem:[#allocation10 + $0x820] sm:$0xff]  }
 0x71a   : > { %14996 = vmatprep.subr.bf16.mxu1 %v16985_v17  ;;  %v17023_v54 = vld [vmem:[#allocation10 + $0x8a0] sm:$0xff]   ;;  %v17024_v17 = vld [vmem:[#allocation10 + $0x868] sm:$0xff]  }
 0x71c   : > { %14975 = vmatpush3.bf16.msra.mxu0 %v16986_v32  ;;  %v17025_v32 = vld [vmem:[#allocation10 + $0x8e8] sm:$0xff]  }
 0x71d   : > { %14997 = vmatpush3.bf16.msra.mxu1 %v16987_v18  ;;  %14976 = vmatprep.subr.bf16.mxu0 %v16988_v29  ;;  %v17026_v18 = vld [vmem:[#allocation10 + $0x828] sm:$0xff]  }
 0x71e   : > { %14998 = vmatprep.subr.bf16.mxu1 %v16989_v26  ;;  %v17027_v29 = vld [vmem:[#allocation10 + $0x8a8] sm:$0xff]   ;;  %v17028_v26 = vld [vmem:[#allocation10 + $0x870] sm:$0xff]  }
 0x720   : > { %14977 = vmatpush3.bf16.msra.mxu0 %v16990_v42 }
 0x721   : > { %14999 = vmatpush3.bf16.msra.mxu1 %v16991_v43  ;;  %14978 = vmatprep.subr.bf16.mxu0 %v16992_v46  ;;  %v17029_v43 = vld [vmem:[#allocation10 + $0x8f0] sm:$0xff]  }
 0x722   : > { %v14676_v15 = vpop.f32.mrb[20].mxu0  ;;  %15000 = vmatprep.subr.bf16.mxu1 %v16993_v44 }
 0x723   : > { %v14698_v63 = vpop.f32.mrb[20].mxu1  ;;  %v14677_v52 = vpop.f32.mrb[21].mxu0 }
 0x724   : > { %v14678_v58 = vadd.f32 %v14677_v52, %v14676_v15  ;;  %v14699_v3 = vpop.f32.mrb[21].mxu1  ;;  %14979 = vmatpush3.bf16.msra.mxu0 %v16994_v50  ;;  %v14679_v5 = vpop.f32.mrb[22].mxu0  ;;  %v17030_v15 = vld [vmem:[#allocation10 + $0x830] sm:$0xff]  }
 0x725   : > { %v14700_v8 = vadd.f32 %v14699_v3, %v14698_v63  ;;  %15001 = vmatpush3.bf16.msra.mxu1 %v16995_v51  ;;  %v14701_v53 = vpop.f32.mrb[22].mxu1  ;;  %v14680_v9 = vpop.f32.mrb[23].mxu0  ;;  %14980 = vmatprep.subr.bf16.mxu0 %v16996_v41  ;;  %v17031_v52 = vld [vmem:[#allocation10 + $0x8b0] sm:$0xff]  }
 0x726   : > { %v11876_v59 = vadd.f32 %v14678_v58, %v9152_v2  ;;  %v14702_v19 = vpop.f32.mrb[23].mxu1  ;;  %15002 = vmatprep.subr.bf16.mxu1 %v16997_v16  ;;  %v17032_v58 = vld [vmem:[#allocation10 + $0x878] sm:$0xff]  }
 0x727   : > { %v17034_v53 = vld [vmem:[#allocation10 + $0x838] sm:$0xff]   ;;  %v8208_v19 = vrot.slane %v18825_v39, 4 }
 0x728   : > { %v18875_v61 = vadd.f32 %v14700_v8, %v11876_v59  ;;  %14981 = vmatpush3.bf16.msra.mxu0 %v16998_v38  ;;  %v17033_v38 = vld [vmem:[#allocation10 + $0x8f8] sm:$0xff]   ;;  %v17038_v59 = vld [vmem:[#allocation10 + $0x900] sm:$0xff]  }
 0x729   : > { %15003 = vmatpush3.bf16.msra.mxu1 %v16999_v49  ;;  %14982 = vmatprep.subr.bf16.mxu0 %v17000_v10  ;;  %v17035_v9 = vld [vmem:[#allocation10 + $0x8b8] sm:$0xff]   ;;  %v17036_v49 = vld [vmem:[#allocation10 + $0x940] sm:$0xff]  }
 0x72a   : > { %15004 = vmatprep.subr.bf16.mxu1 %v17001_v14  ;;  %v17037_v10 = vld [vmem:[#allocation10 + $0x9c0] sm:$0xff]  }
 0x72b   : > { %v17039_v14 = vld [vmem:[#allocation10 + $0x980] sm:$0xff]  }
 0x72c   : > { %14983 = vmatpush3.bf16.msra.mxu0 %v17002_v6  ;;  %v17040_v6 = vld [vmem:[#allocation10 + $0x948] sm:$0xff]  }
 0x72d   : > { %15005 = vmatpush3.bf16.msra.mxu1 %v17003_v20  ;;  %15012 = vmatprep.subr.bf16.mxu0 %v17004_v22  ;;  %v8217_v20 = vrot.slane %v18835_v36, 4  ;;  %v17041_v22 = vld [vmem:[#allocation10 + $0x9c8] sm:$0xff]  }
 0x72e   : > { %15034 = vmatprep.subr.bf16.mxu1 %v17005_v21  ;;  %v8219_v21 = vrot.slane %v18840_v37, 4 }
 0x72f   : > { %12434 = vmatmul.mubr.bf16.vlgmr.msra.gmra.mrb[48].mxu0 %v8200_v28  ;;  %v17043_v28 = vld [vmem:[#allocation10 + $0x988] sm:$0xff]  }
 0x730   : > { %12474 = vmatmul.mubr.bf16.vlgmr.msra.gmra.mrb[48].mxu1 %v8202_v1  ;;  %15013 = vmatpush3.bf16.msra.mxu0 %v17006_v27  ;;  %v17042_v27 = vld [vmem:[#allocation10 + $0x908] sm:$0xff]   ;;  %v17045_v1 = vld [vmem:[#allocation10 + $0x9d0] sm:$0xff]  }
 0x731   : > { %12513 = vmatprep.mubr.bf16.mxu0 %v8209_v25  ;;  %15035 = vmatpush3.bf16.msra.mxu1 %v17007_v13  ;;  %v17044_v13 = vld [vmem:[#allocation10 + $0x950] sm:$0xff]  }
 0x732   : > { %12553 = vmatprep.mubr.bf16.mxu1 %v8211_v47  ;;  %15014 = vmatprep.subr.bf16.mxu0 %v17008_v60  ;;  %v17046_v60 = vld [vmem:[#allocation10 + $0x910] sm:$0xff]   ;;  %v17049_v47 = vld [vmem:[#allocation10 + $0x9d8] sm:$0xff]  }
 0x733   : > { %15036 = vmatprep.subr.bf16.mxu1 %v17009_v24  ;;  %v17047_v25 = vld [vmem:[#allocation10 + $0x990] sm:$0xff]   ;;  %v17048_v24 = vld [vmem:[#allocation10 + $0x958] sm:$0xff]  }
 0x734   : > { %15015 = vmatpush3.bf16.msra.mxu0 %v17010_v33  ;;  %v17050_v33 = vld [vmem:[#allocation10 + $0x918] sm:$0xff]  }
 0x735   : > { %15037 = vmatpush3.bf16.msra.mxu1 %v17011_v30  ;;  %15016 = vmatprep.subr.bf16.mxu0 %v17012_v62  ;;  %v17051_v30 = vld [vmem:[#allocation10 + $0x998] sm:$0xff]   ;;  %v17052_v62 = vld [vmem:[#allocation10 + $0x960] sm:$0xff]  }
 0x736   : > { %15038 = vmatprep.subr.bf16.mxu1 %v17013_v23  ;;  %v17053_v23 = vld [vmem:[#allocation10 + $0x9e0] sm:$0xff]  }
 0x738   : > { %15017 = vmatpush3.bf16.msra.mxu0 %v17014_v56  ;;  %v17054_v56 = vld [vmem:[#allocation10 + $0x920] sm:$0xff]  }
 0x739   : > { %15039 = vmatpush3.bf16.msra.mxu1 %v17015_v4  ;;  %15018 = vmatprep.subr.bf16.mxu0 %v17016_v31  ;;  %v17055_v4 = vld [vmem:[#allocation10 + $0x9a0] sm:$0xff]   ;;  %v17056_v31 = vld [vmem:[#allocation10 + $0x968] sm:$0xff]  }
 0x73a   : > { %15040 = vmatprep.subr.bf16.mxu1 %v17017_v45  ;;  %v17057_v45 = vld [vmem:[#allocation10 + $0x9e8] sm:$0xff]  }
 0x73c   : > { %15019 = vmatpush3.bf16.msra.mxu0 %v17018_v11  ;;  %v17058_v11 = vld [vmem:[#allocation10 + $0x928] sm:$0xff]  }
 0x73d   : > { %15041 = vmatpush3.bf16.msra.mxu1 %v17019_v48  ;;  %15020 = vmatprep.subr.bf16.mxu0 %v17020_v40  ;;  %v17059_v48 = vld [vmem:[#allocation10 + $0x9a8] sm:$0xff]   ;;  %v17060_v40 = vld [vmem:[#allocation10 + $0x970] sm:$0xff]  }
 0x73e   : > { %15042 = vmatprep.subr.bf16.mxu1 %v17021_v0 }
 0x740   : > { %15021 = vmatpush3.bf16.msra.mxu0 %v17022_v57  ;;  %v17061_v57 = vld [vmem:[#allocation10 + $0x9f0] sm:$0xff]  }
 0x741   : > { %15043 = vmatpush3.bf16.msra.mxu1 %v17023_v54  ;;  %15022 = vmatprep.subr.bf16.mxu0 %v17024_v17 }
 0x742   : > { %v14720_v42 = vpop.f32.mrb[24].mxu0  ;;  %15044 = vmatprep.subr.bf16.mxu1 %v17025_v32 }
 0x743   : > { %v14742_v46 = vpop.f32.mrb[24].mxu1  ;;  %v14721_v44 = vpop.f32.mrb[25].mxu0 }
 0x744   : > { %v14722_v50 = vadd.f32 %v14721_v44, %v14720_v42  ;;  %v14743_v51 = vpop.f32.mrb[25].mxu1  ;;  %v14723_v41 = vpop.f32.mrb[26].mxu0  ;;  %15023 = vmatpush3.bf16.msra.mxu0 %v17026_v18  ;;  %v17063_v44 = vld [vmem:[#allocation10 + $0x9b0] sm:$0xff]  }
 0x745   : > { %v14744_v16 = vadd.f32 %v14743_v51, %v14742_v46  ;;  %v14745_v63 = vpop.f32.mrb[26].mxu1  ;;  %15045 = vmatpush3.bf16.msra.mxu1 %v17027_v29  ;;  %v14724_v2 = vpop.f32.mrb[27].mxu0  ;;  %15024 = vmatprep.subr.bf16.mxu0 %v17028_v26  ;;  %v17062_v26 = vld [vmem:[#allocation10 + $0x930] sm:$0xff]  }
 0x746   : > { %v11956_v3 = vadd.f32 %v14722_v50, %v18875_v61  ;;  %v14746_v5 = vpop.f32.mrb[27].mxu1  ;;  %15046 = vmatprep.subr.bf16.mxu1 %v17029_v43  ;;  %v8210_v61 = vrot.slane %v18827_v12, 4  ;;  %v17064_v50 = vld [vmem:[#allocation10 + $0x978] sm:$0xff]  }
 0x747   : > { %v17066_v63 = vld [vmem:[#allocation10 + $0x938] sm:$0xff]   ;;  %v8216_v5 = vrot.slane %v18846_v55, 4 }
 0x748   : > { %v18882_v8 = vadd.f32 %v14744_v16, %v11956_v3  ;;  %15025 = vmatpush3.bf16.msra.mxu0 %v17030_v15  ;;  %v17065_v15 = vld [vmem:[#allocation10 + $0x9f8] sm:$0xff]   ;;  %v17070_v3 = vld [vmem:[#allocation10 + $0xa00] sm:$0xff]  }
 0x749   : > { %15047 = vmatpush3.bf16.msra.mxu1 %v17031_v52  ;;  %15026 = vmatprep.subr.bf16.mxu0 %v17032_v58  ;;  %v17067_v2 = vld [vmem:[#allocation10 + $0x9b8] sm:$0xff]   ;;  %v17068_v52 = vld [vmem:[#allocation10 + $0xa40] sm:$0xff]  }
 0x74a   : > { %15048 = vmatprep.subr.bf16.mxu1 %v17033_v38  ;;  %v17069_v58 = vld [vmem:[#allocation10 + $0xac0] sm:$0xff]  }
 0x74b   : > { %v17071_v38 = vld [vmem:[#allocation10 + $0xa80] sm:$0xff]  }
 0x74c   : > { %15027 = vmatpush3.bf16.msra.mxu0 %v17034_v53  ;;  %v17072_v53 = vld [vmem:[#allocation10 + $0xa48] sm:$0xff]  }
 0x74d   : > { %15049 = vmatpush3.bf16.msra.mxu1 %v17035_v9  ;;  %15056 = vmatprep.subr.bf16.mxu0 %v17036_v49  ;;  %v8225_v9 = vrot.slane %v18829_v35, 5  ;;  %v17073_v49 = vld [vmem:[#allocation10 + $0xac8] sm:$0xff]  }
 0x74e   : > { %15078 = vmatprep.subr.bf16.mxu1 %v17037_v10  ;;  %v8227_v10 = vrot.slane %v18831_v34, 5 }
 0x74f   : > { %12514 = vmatmul.mubr.bf16.vlgmr.msra.gmra.mrb[52].mxu0 %v8208_v19  ;;  %v17075_v19 = vld [vmem:[#allocation10 + $0xa88] sm:$0xff]  }
 0x750   : > { %12554 = vmatmul.mubr.bf16.vlgmr.msra.gmra.mrb[52].mxu1 %v8210_v61  ;;  %15057 = vmatpush3.bf16.msra.mxu0 %v17038_v59  ;;  %v17074_v59 = vld [vmem:[#allocation10 + $0xa08] sm:$0xff]   ;;  %v17077_v61 = vld [vmem:[#allocation10 + $0xad0] sm:$0xff]  }
 0x751   : > { %12593 = vmatprep.mubr.bf16.mxu0 %v8217_v20  ;;  %15079 = vmatpush3.bf16.msra.mxu1 %v17039_v14  ;;  %v17076_v14 = vld [vmem:[#allocation10 + $0xa50] sm:$0xff]  }
 0x752   : > { %12633 = vmatprep.mubr.bf16.mxu1 %v8219_v21  ;;  %15058 = vmatprep.subr.bf16.mxu0 %v17040_v6  ;;  %v17078_v6 = vld [vmem:[#allocation10 + $0xa10] sm:$0xff]   ;;  %v17081_v21 = vld [vmem:[#allocation10 + $0xad8] sm:$0xff]  }
 0x753   : > { %15080 = vmatprep.subr.bf16.mxu1 %v17041_v22  ;;  %v17079_v20 = vld [vmem:[#allocation10 + $0xa90] sm:$0xff]   ;;  %v17080_v22 = vld [vmem:[#allocation10 + $0xa58] sm:$0xff]  }
 0x754   : > { %15059 = vmatpush3.bf16.msra.mxu0 %v17042_v27  ;;  %v17082_v27 = vld [vmem:[#allocation10 + $0xa18] sm:$0xff]  }
 0x755   : > { %15081 = vmatpush3.bf16.msra.mxu1 %v17043_v28  ;;  %15060 = vmatprep.subr.bf16.mxu0 %v17044_v13  ;;  %v17083_v28 = vld [vmem:[#allocation10 + $0xa98] sm:$0xff]   ;;  %v17084_v13 = vld [vmem:[#allocation10 + $0xa60] sm:$0xff]  }
 0x756   : > { %15082 = vmatprep.subr.bf16.mxu1 %v17045_v1  ;;  %v17085_v1 = vld [vmem:[#allocation10 + $0xae0] sm:$0xff]  }
 0x758   : > { %15061 = vmatpush3.bf16.msra.mxu0 %v17046_v60  ;;  %v17086_v60 = vld [vmem:[#allocation10 + $0xa20] sm:$0xff]  }
 0x759   : > { %15083 = vmatpush3.bf16.msra.mxu1 %v17047_v25  ;;  %15062 = vmatprep.subr.bf16.mxu0 %v17048_v24  ;;  %v17087_v25 = vld [vmem:[#allocation10 + $0xaa0] sm:$0xff]   ;;  %v17088_v24 = vld [vmem:[#allocation10 + $0xa68] sm:$0xff]  }
 0x75a   : > { %15084 = vmatprep.subr.bf16.mxu1 %v17049_v47  ;;  %v17089_v47 = vld [vmem:[#allocation10 + $0xae8] sm:$0xff]  }
 0x75c   : > { %15063 = vmatpush3.bf16.msra.mxu0 %v17050_v33  ;;  %v17090_v33 = vld [vmem:[#allocation10 + $0xa28] sm:$0xff]  }
 0x75d   : > { %15085 = vmatpush3.bf16.msra.mxu1 %v17051_v30  ;;  %15064 = vmatprep.subr.bf16.mxu0 %v17052_v62  ;;  %v17091_v30 = vld [vmem:[#allocation10 + $0xaa8] sm:$0xff]   ;;  %v17092_v62 = vld [vmem:[#allocation10 + $0xa70] sm:$0xff]  }
 0x75e   : > { %15086 = vmatprep.subr.bf16.mxu1 %v17053_v23 }
 0x760   : > { %15065 = vmatpush3.bf16.msra.mxu0 %v17054_v56  ;;  %v17093_v56 = vld [vmem:[#allocation10 + $0xaf0] sm:$0xff]  }
 0x761   : > { %15087 = vmatpush3.bf16.msra.mxu1 %v17055_v4  ;;  %15066 = vmatprep.subr.bf16.mxu0 %v17056_v31 }
 0x762   : > { %v14764_v0 = vpop.f32.mrb[28].mxu0  ;;  %15088 = vmatprep.subr.bf16.mxu1 %v17057_v45 }
 0x763   : > { %v14786_v54 = vpop.f32.mrb[28].mxu1  ;;  %v14765_v17 = vpop.f32.mrb[29].mxu0 }
 0x764   : > { %v14766_v32 = vadd.f32 %v14765_v17, %v14764_v0  ;;  %v14787_v18 = vpop.f32.mrb[29].mxu1  ;;  %v14767_v29 = vpop.f32.mrb[30].mxu0  ;;  %15067 = vmatpush3.bf16.msra.mxu0 %v17058_v11  ;;  %v17095_v17 = vld [vmem:[#allocation10 + $0xab0] sm:$0xff]  }
 0x765   : > { %v14788_v42 = vadd.f32 %v14787_v18, %v14786_v54  ;;  %v14789_v43 = vpop.f32.mrb[30].mxu1  ;;  %15089 = vmatpush3.bf16.msra.mxu1 %v17059_v48  ;;  %v14768_v46 = vpop.f32.mrb[31].mxu0  ;;  %15068 = vmatprep.subr.bf16.mxu0 %v17060_v40  ;;  %v17094_v40 = vld [vmem:[#allocation10 + $0xa30] sm:$0xff]  }
 0x766   : > { %v12036_v51 = vadd.f32 %v14766_v32, %v18882_v8  ;;  %v14790_v41 = vpop.f32.mrb[31].mxu1  ;;  %15090 = vmatprep.subr.bf16.mxu1 %v17061_v57  ;;  %v8218_v8 = vrot.slane %v18849_v7, 4  ;;  %v17096_v32 = vld [vmem:[#allocation10 + $0xa78] sm:$0xff]  }
 0x767   : > { %v17098_v43 = vld [vmem:[#allocation10 + $0xa38] sm:$0xff]   ;;  %v8224_v41 = vrot.slane %v18825_v39, 5 }
 0x768   : > { %v18889_v16 = vadd.f32 %v14788_v42, %v12036_v51  ;;  %15069 = vmatpush3.bf16.msra.mxu0 %v17062_v26  ;;  %v17097_v26 = vld [vmem:[#allocation10 + $0xaf8] sm:$0xff]   ;;  %v17102_v51 = vld [vmem:[#allocation10 + $0xb00] sm:$0xff]  }
 0x769   : > { %15091 = vmatpush3.bf16.msra.mxu1 %v17063_v44  ;;  %15070 = vmatprep.subr.bf16.mxu0 %v17064_v50  ;;  %v17099_v46 = vld [vmem:[#allocation10 + $0xab8] sm:$0xff]   ;;  %v17100_v44 = vld [vmem:[#allocation10 + $0xb40] sm:$0xff]  }
 0x76a   : > { %15092 = vmatprep.subr.bf16.mxu1 %v17065_v15  ;;  %v17101_v50 = vld [vmem:[#allocation10 + $0xbc0] sm:$0xff]  }
 0x76b   : > { %v17103_v15 = vld [vmem:[#allocation10 + $0xb80] sm:$0xff]  }
 0x76c   : > { %15071 = vmatpush3.bf16.msra.mxu0 %v17066_v63  ;;  %v17104_v63 = vld [vmem:[#allocation10 + $0xb48] sm:$0xff]  }
 0x76d   : > { %15093 = vmatpush3.bf16.msra.mxu1 %v17067_v2  ;;  %15100 = vmatprep.subr.bf16.mxu0 %v17068_v52  ;;  %v8233_v2 = vrot.slane %v18835_v36, 5  ;;  %v17105_v52 = vld [vmem:[#allocation10 + $0xbc8] sm:$0xff]  }
 0x76e   : > { %15122 = vmatprep.subr.bf16.mxu1 %v17069_v58  ;;  %v8235_v58 = vrot.slane %v18840_v37, 5 }
 0x76f   : > { %12594 = vmatmul.mubr.bf16.vlgmr.msra.gmra.mrb[56].mxu0 %v8216_v5  ;;  %v17107_v5 = vld [vmem:[#allocation10 + $0xb88] sm:$0xff]  }
 0x770   : > { %12634 = vmatmul.mubr.bf16.vlgmr.msra.gmra.mrb[56].mxu1 %v8218_v8  ;;  %15101 = vmatpush3.bf16.msra.mxu0 %v17070_v3  ;;  %v17106_v3 = vld [vmem:[#allocation10 + $0xb08] sm:$0xff]   ;;  %v17109_v8 = vld [vmem:[#allocation10 + $0xbd0] sm:$0xff]  }
 0x771   : > { %12673 = vmatprep.mubr.bf16.mxu0 %v8225_v9  ;;  %15123 = vmatpush3.bf16.msra.mxu1 %v17071_v38  ;;  %v17108_v38 = vld [vmem:[#allocation10 + $0xb50] sm:$0xff]  }
 0x772   : > { %12713 = vmatprep.mubr.bf16.mxu1 %v8227_v10  ;;  %15102 = vmatprep.subr.bf16.mxu0 %v17072_v53  ;;  %v17110_v53 = vld [vmem:[#allocation10 + $0xb10] sm:$0xff]   ;;  %v17113_v10 = vld [vmem:[#allocation10 + $0xbd8] sm:$0xff]  }
 0x773   : > { %15124 = vmatprep.subr.bf16.mxu1 %v17073_v49  ;;  %v17111_v9 = vld [vmem:[#allocation10 + $0xb90] sm:$0xff]   ;;  %v17112_v49 = vld [vmem:[#allocation10 + $0xb58] sm:$0xff]  }
 0x774   : > { %15103 = vmatpush3.bf16.msra.mxu0 %v17074_v59  ;;  %v17114_v59 = vld [vmem:[#allocation10 + $0xb18] sm:$0xff]  }
 0x775   : > { %15125 = vmatpush3.bf16.msra.mxu1 %v17075_v19  ;;  %15104 = vmatprep.subr.bf16.mxu0 %v17076_v14  ;;  %v17115_v19 = vld [vmem:[#allocation10 + $0xb98] sm:$0xff]   ;;  %v17116_v14 = vld [vmem:[#allocation10 + $0xb60] sm:$0xff]  }
 0x776   : > { %15126 = vmatprep.subr.bf16.mxu1 %v17077_v61  ;;  %v17117_v61 = vld [vmem:[#allocation10 + $0xbe0] sm:$0xff]  }
 0x778   : > { %15105 = vmatpush3.bf16.msra.mxu0 %v17078_v6  ;;  %v17118_v6 = vld [vmem:[#allocation10 + $0xb20] sm:$0xff]  }
 0x779   : > { %15127 = vmatpush3.bf16.msra.mxu1 %v17079_v20  ;;  %15106 = vmatprep.subr.bf16.mxu0 %v17080_v22  ;;  %v17119_v20 = vld [vmem:[#allocation10 + $0xba0] sm:$0xff]   ;;  %v17120_v22 = vld [vmem:[#allocation10 + $0xb68] sm:$0xff]  }
 0x77a   : > { %15128 = vmatprep.subr.bf16.mxu1 %v17081_v21  ;;  %v17121_v21 = vld [vmem:[#allocation10 + $0xbe8] sm:$0xff]  }
 0x77c   : > { %15107 = vmatpush3.bf16.msra.mxu0 %v17082_v27  ;;  %v17122_v27 = vld [vmem:[#allocation10 + $0xb28] sm:$0xff]  }
 0x77d   : > { %15129 = vmatpush3.bf16.msra.mxu1 %v17083_v28  ;;  %15108 = vmatprep.subr.bf16.mxu0 %v17084_v13  ;;  %v17123_v28 = vld [vmem:[#allocation10 + $0xba8] sm:$0xff]   ;;  %v17124_v13 = vld [vmem:[#allocation10 + $0xb70] sm:$0xff]  }
 0x77e   : > { %15130 = vmatprep.subr.bf16.mxu1 %v17085_v1 }
 0x780   : > { %15109 = vmatpush3.bf16.msra.mxu0 %v17086_v60  ;;  %v17125_v60 = vld [vmem:[#allocation10 + $0xbf0] sm:$0xff]  }
 0x781   : > { %15131 = vmatpush3.bf16.msra.mxu1 %v17087_v25  ;;  %15110 = vmatprep.subr.bf16.mxu0 %v17088_v24 }
 0x782   : > { %v14808_v23 = vpop.f32.mrb[32].mxu0  ;;  %15132 = vmatprep.subr.bf16.mxu1 %v17089_v47 }
 0x783   : > { %v14830_v4 = vpop.f32.mrb[32].mxu1  ;;  %v14809_v31 = vpop.f32.mrb[33].mxu0 }
 0x784   : > { %v14810_v45 = vadd.f32 %v14809_v31, %v14808_v23  ;;  %v14831_v11 = vpop.f32.mrb[33].mxu1  ;;  %v14811_v48 = vpop.f32.mrb[34].mxu0  ;;  %15111 = vmatpush3.bf16.msra.mxu0 %v17090_v33  ;;  %v17127_v31 = vld [vmem:[#allocation10 + $0xbb0] sm:$0xff]  }
 0x785   : > { %v14832_v0 = vadd.f32 %v14831_v11, %v14830_v4  ;;  %v14833_v57 = vpop.f32.mrb[34].mxu1  ;;  %15133 = vmatpush3.bf16.msra.mxu1 %v17091_v30  ;;  %v14812_v54 = vpop.f32.mrb[35].mxu0  ;;  %15112 = vmatprep.subr.bf16.mxu0 %v17092_v62  ;;  %v17126_v62 = vld [vmem:[#allocation10 + $0xb30] sm:$0xff]  }
 0x786   : > { %v12116_v18 = vadd.f32 %v14810_v45, %v18889_v16  ;;  %v14834_v29 = vpop.f32.mrb[35].mxu1  ;;  %15134 = vmatprep.subr.bf16.mxu1 %v17093_v56  ;;  %v8226_v16 = vrot.slane %v18827_v12, 5  ;;  %v17128_v45 = vld [vmem:[#allocation10 + $0xb78] sm:$0xff]  }
 0x787   : > { %v17130_v57 = vld [vmem:[#allocation10 + $0xb38] sm:$0xff]   ;;  %v8232_v29 = vrot.slane %v18846_v55, 5 }
 0x788   : > { %v18896_v42 = vadd.f32 %v14832_v0, %v12116_v18  ;;  %15113 = vmatpush3.bf16.msra.mxu0 %v17094_v40  ;;  %v17129_v40 = vld [vmem:[#allocation10 + $0xbf8] sm:$0xff]   ;;  %v17134_v18 = vld [vmem:[#allocation10 + $0xc00] sm:$0xff]  }
 0x789   : > { %15135 = vmatpush3.bf16.msra.mxu1 %v17095_v17  ;;  %15114 = vmatprep.subr.bf16.mxu0 %v17096_v32  ;;  %v17131_v54 = vld [vmem:[#allocation10 + $0xbb8] sm:$0xff]   ;;  %v17132_v17 = vld [vmem:[#allocation10 + $0xc40] sm:$0xff]  }
 0x78a   : > { %15136 = vmatprep.subr.bf16.mxu1 %v17097_v26  ;;  %v17133_v32 = vld [vmem:[#allocation10 + $0xcc0] sm:$0xff]  }
 0x78b   : > { %v17135_v26 = vld [vmem:[#allocation10 + $0xc80] sm:$0xff]  }
 0x78c   : > { %15115 = vmatpush3.bf16.msra.mxu0 %v17098_v43  ;;  %v17136_v43 = vld [vmem:[#allocation10 + $0xc48] sm:$0xff]  }
 0x78d   : > { %15137 = vmatpush3.bf16.msra.mxu1 %v17099_v46  ;;  %15144 = vmatprep.subr.bf16.mxu0 %v17100_v44  ;;  %v8241_v46 = vrot.slane %v18829_v35, 6  ;;  %v17137_v44 = vld [vmem:[#allocation10 + $0xcc8] sm:$0xff]   ;;  %v17144_v35 = vld [vmem:[#allocation10 + $0xc58] sm:$0xff]  }
 0x78e   : > { %15166 = vmatprep.subr.bf16.mxu1 %v17101_v50  ;;  %v8243_v50 = vrot.slane %v18831_v34, 6  ;;  %v17147_v34 = vld [vmem:[#allocation10 + $0xc98] sm:$0xff]  }
 0x78f   : > { %12674 = vmatmul.mubr.bf16.vlgmr.msra.gmra.mrb[60].mxu0 %v8224_v41  ;;  %v17139_v41 = vld [vmem:[#allocation10 + $0xc88] sm:$0xff]  }
 0x790   : > { %12714 = vmatmul.mubr.bf16.vlgmr.msra.gmra.mrb[60].mxu1 %v8226_v16  ;;  %15145 = vmatpush3.bf16.msra.mxu0 %v17102_v51  ;;  %v17138_v51 = vld [vmem:[#allocation10 + $0xc08] sm:$0xff]   ;;  %v17141_v16 = vld [vmem:[#allocation10 + $0xcd0] sm:$0xff]  }
 0x791   : > { %12753 = vmatprep.mubr.bf16.mxu0 %v8233_v2  ;;  %15167 = vmatpush3.bf16.msra.mxu1 %v17103_v15  ;;  %v17140_v15 = vld [vmem:[#allocation10 + $0xc50] sm:$0xff]  }
 0x792   : > { %12793 = vmatprep.mubr.bf16.mxu1 %v8235_v58  ;;  %15146 = vmatprep.subr.bf16.mxu0 %v17104_v63  ;;  %v17142_v63 = vld [vmem:[#allocation10 + $0xc10] sm:$0xff]   ;;  %v17146_v58 = vld [vmem:[#allocation10 + $0xc18] sm:$0xff]  }
 0x793   : > { %15168 = vmatprep.subr.bf16.mxu1 %v17105_v52  ;;  %v17143_v2 = vld [vmem:[#allocation10 + $0xc90] sm:$0xff]   ;;  %v17145_v52 = vld [vmem:[#allocation10 + $0xcd8] sm:$0xff]  }
 0x794   : > { %15147 = vmatpush3.bf16.msra.mxu0 %v17106_v3  ;;  %v17148_v3 = vld [vmem:[#allocation10 + $0xc60] sm:$0xff]  }
 0x795   : > { %15169 = vmatpush3.bf16.msra.mxu1 %v17107_v5  ;;  %15148 = vmatprep.subr.bf16.mxu0 %v17108_v38  ;;  %v17149_v5 = vld [vmem:[#allocation10 + $0xce0] sm:$0xff]  }
 0x796   : > { %15170 = vmatprep.subr.bf16.mxu1 %v17109_v8  ;;  %v17150_v38 = vld [vmem:[#allocation10 + $0xc20] sm:$0xff]  }
 0x797   : > { %v17151_v8 = vld [vmem:[#allocation10 + $0xca0] sm:$0xff]  }
 0x798   : > { %15149 = vmatpush3.bf16.msra.mxu0 %v17110_v53  ;;  %v17152_v53 = vld [vmem:[#allocation10 + $0xc68] sm:$0xff]  }
 0x799   : > { %15171 = vmatpush3.bf16.msra.mxu1 %v17111_v9  ;;  %15150 = vmatprep.subr.bf16.mxu0 %v17112_v49  ;;  %v17153_v9 = vld [vmem:[#allocation10 + $0xce8] sm:$0xff]  }
 0x79a   : > { %15172 = vmatprep.subr.bf16.mxu1 %v17113_v10  ;;  %v17154_v49 = vld [vmem:[#allocation10 + $0xc28] sm:$0xff]  }
 0x79b   : > { %v17155_v10 = vld [vmem:[#allocation10 + $0xca8] sm:$0xff]  }
 0x79c   : > { %15151 = vmatpush3.bf16.msra.mxu0 %v17114_v59  ;;  %v17156_v59 = vld [vmem:[#allocation10 + $0xc70] sm:$0xff]  }
 0x79d   : > { %15173 = vmatpush3.bf16.msra.mxu1 %v17115_v19  ;;  %15152 = vmatprep.subr.bf16.mxu0 %v17116_v14  ;;  %v17157_v14 = vld [vmem:[#allocation10 + $0xcf0] sm:$0xff]  }
 0x79e   : > { %15174 = vmatprep.subr.bf16.mxu1 %v17117_v61 }
 0x7a0   : > { %15153 = vmatpush3.bf16.msra.mxu0 %v17118_v6 }
 0x7a1   : > { %15175 = vmatpush3.bf16.msra.mxu1 %v17119_v20  ;;  %15154 = vmatprep.subr.bf16.mxu0 %v17120_v22 }
 0x7a2   : > { %v14852_v1 = vpop.f32.mrb[36].mxu0  ;;  %15176 = vmatprep.subr.bf16.mxu1 %v17121_v21 }
 0x7a3   : > { %v14874_v25 = vpop.f32.mrb[36].mxu1  ;;  %v14853_v24 = vpop.f32.mrb[37].mxu0 }
 0x7a4   : > { %v14854_v47 = vadd.f32 %v14853_v24, %v14852_v1  ;;  %v14875_v33 = vpop.f32.mrb[37].mxu1  ;;  %v14855_v30 = vpop.f32.mrb[38].mxu0  ;;  %15155 = vmatpush3.bf16.msra.mxu0 %v17122_v27  ;;  %v17158_v27 = vld [vmem:[#allocation10 + $0xc30] sm:$0xff]  }
 0x7a5   : > { %v14876_v23 = vadd.f32 %v14875_v33, %v14874_v25  ;;  %v14877_v56 = vpop.f32.mrb[38].mxu1  ;;  %15177 = vmatpush3.bf16.msra.mxu1 %v17123_v28  ;;  %v14856_v4 = vpop.f32.mrb[39].mxu0  ;;  %15156 = vmatprep.subr.bf16.mxu0 %v17124_v13  ;;  %v17160_v25 = vld [vmem:[#allocation10 + $0xc78] sm:$0xff]  }
 0x7a6   : > { %v12196_v11 = vadd.f32 %v14854_v47, %v18896_v42  ;;  %v14878_v48 = vpop.f32.mrb[39].mxu1  ;;  %15178 = vmatprep.subr.bf16.mxu1 %v17125_v60  ;;  %v8234_v42 = vrot.slane %v18849_v7, 5  ;;  %v17159_v60 = vld [vmem:[#allocation10 + $0xcb0] sm:$0xff]   ;;  %v17161_v33 = vld [vmem:[#allocation10 + $0xcf8] sm:$0xff]   ;;  %v17164_v56 = vld [vmem:[#allocation10 + $0xd40] sm:$0xff]  }
 0x7a7   : > { %v17165_v4 = vld [vmem:[#allocation10 + $0xdc0] sm:$0xff]   ;;  %v8242_v48 = vrot.slane %v18827_v12, 6  ;;  %v17174_v12 = vld [vmem:[#allocation10 + $0xd10] sm:$0xff]  }
 0x7a8   : > { %v18903_v0 = vadd.f32 %v14876_v23, %v12196_v11  ;;  %15157 = vmatpush3.bf16.msra.mxu0 %v17126_v62  ;;  %v17162_v62 = vld [vmem:[#allocation10 + $0xc38] sm:$0xff]   ;;  %v17167_v11 = vld [vmem:[#allocation10 + $0xd80] sm:$0xff]  }
 0x7a9   : > { %15179 = vmatpush3.bf16.msra.mxu1 %v17127_v31  ;;  %15158 = vmatprep.subr.bf16.mxu0 %v17128_v45  ;;  %v17163_v23 = vld [vmem:[#allocation10 + $0xcb8] sm:$0xff]   ;;  %v17166_v31 = vld [vmem:[#allocation10 + $0xd00] sm:$0xff]   ;;  %v8240_v45 = vrot.slane %v18825_v39, 6  ;;  %v17173_v39 = vld [vmem:[#allocation10 + $0xdd0] sm:$0xff]  }
 0x7aa   : > { %15180 = vmatprep.subr.bf16.mxu1 %v17129_v40  ;;  %v17168_v40 = vld [vmem:[#allocation10 + $0xd48] sm:$0xff]  }
 0x7ac   : > { %15159 = vmatpush3.bf16.msra.mxu0 %v17130_v57  ;;  %v17169_v57 = vld [vmem:[#allocation10 + $0xdc8] sm:$0xff]  }
 0x7ad   : > { %15181 = vmatpush3.bf16.msra.mxu1 %v17131_v54  ;;  %15188 = vmatprep.subr.bf16.mxu0 %v17132_v17  ;;  %v8251_v54 = vrot.slane %v18840_v37, 6  ;;  %v17170_v17 = vld [vmem:[#allocation10 + $0xd08] sm:$0xff]   ;;  %v17179_v37 = vld [vmem:[#allocation10 + $0xd98] sm:$0xff]  }
 0x7ae   : > { %15210 = vmatprep.subr.bf16.mxu1 %v17133_v32  ;;  %v17171_v32 = vld [vmem:[#allocation10 + $0xd88] sm:$0xff]  }
 0x7af   : > { %12754 = vmatmul.mubr.bf16.vlgmr.msra.gmra.mrb[64].mxu0 %v8232_v29  ;;  %v17175_v29 = vld [vmem:[#allocation10 + $0xd90] sm:$0xff]  }
 0x7b0   : > { %12794 = vmatmul.mubr.bf16.vlgmr.msra.gmra.mrb[64].mxu1 %v8234_v42  ;;  %15189 = vmatpush3.bf16.msra.mxu0 %v17134_v18  ;;  %v17172_v18 = vld [vmem:[#allocation10 + $0xd50] sm:$0xff]   ;;  %v17178_v42 = vld [vmem:[#allocation10 + $0xd18] sm:$0xff]  }
 0x7b1   : > { %12833 = vmatprep.mubr.bf16.mxu0 %v8241_v46  ;;  %15211 = vmatpush3.bf16.msra.mxu1 %v17135_v26  ;;  %v17177_v26 = vld [vmem:[#allocation10 + $0xdd8] sm:$0xff]   ;;  %v17181_v46 = vld [vmem:[#allocation10 + $0xde0] sm:$0xff]  }
 0x7b2   : > { %12873 = vmatprep.mubr.bf16.mxu1 %v8243_v50  ;;  %15190 = vmatprep.subr.bf16.mxu0 %v17136_v43  ;;  %v17180_v43 = vld [vmem:[#allocation10 + $0xd60] sm:$0xff]  }
 0x7b3   : > { %15212 = vmatprep.subr.bf16.mxu1 %v17137_v44  ;;  %v17182_v44 = vld [vmem:[#allocation10 + $0xd20] sm:$0xff]  }
 0x7b4   : > { %15191 = vmatpush3.bf16.msra.mxu0 %v17138_v51  ;;  %v17183_v50 = vld [vmem:[#allocation10 + $0xda0] sm:$0xff]   ;;  %v17184_v51 = vld [vmem:[#allocation10 + $0xd68] sm:$0xff]  }
 0x7b5   : > { %15213 = vmatpush3.bf16.msra.mxu1 %v17139_v41  ;;  %15192 = vmatprep.subr.bf16.mxu0 %v17140_v15  ;;  %v17185_v41 = vld [vmem:[#allocation10 + $0xde8] sm:$0xff]  }
 0x7b6   : > { %15214 = vmatprep.subr.bf16.mxu1 %v17141_v16  ;;  %v17186_v15 = vld [vmem:[#allocation10 + $0xd28] sm:$0xff]  }
 0x7b7   : > { %v17187_v16 = vld [vmem:[#allocation10 + $0xda8] sm:$0xff]  }
 0x7b8   : > { %15193 = vmatpush3.bf16.msra.mxu0 %v17142_v63  ;;  %v17188_v63 = vld [vmem:[#allocation10 + $0xd70] sm:$0xff]  }
 0x7b9   : > { %15215 = vmatpush3.bf16.msra.mxu1 %v17143_v2  ;;  %15194 = vmatprep.subr.bf16.mxu0 %v17144_v35  ;;  %v17189_v35 = vld [vmem:[#allocation10 + $0xdf0] sm:$0xff]  }
 0x7ba   : > { %15216 = vmatprep.subr.bf16.mxu1 %v17145_v52 }
 0x7bc   : > { %15195 = vmatpush3.bf16.msra.mxu0 %v17146_v58 }
 0x7bd   : > { %15217 = vmatpush3.bf16.msra.mxu1 %v17147_v34  ;;  %15196 = vmatprep.subr.bf16.mxu0 %v17148_v3 }
 0x7be   : > { %15218 = vmatprep.subr.bf16.mxu1 %v17149_v5 }
 0x7c0   : > { %15197 = vmatpush3.bf16.msra.mxu0 %v17150_v38  ;;  %v17190_v38 = vld [vmem:[#allocation10 + $0xd30] sm:$0xff]  }
 0x7c1   : > { %15219 = vmatpush3.bf16.msra.mxu1 %v17151_v8  ;;  %15198 = vmatprep.subr.bf16.mxu0 %v17152_v53 }
 0x7c2   : > { %v14896_v19 = vpop.f32.mrb[40].mxu0  ;;  %15220 = vmatprep.subr.bf16.mxu1 %v17153_v9 }
 0x7c3   : > { %v14918_v61 = vpop.f32.mrb[40].mxu1  ;;  %v14897_v6 = vpop.f32.mrb[41].mxu0 }
 0x7c4   : > { %v14898_v20 = vadd.f32 %v14897_v6, %v14896_v19  ;;  %v14919_v22 = vpop.f32.mrb[41].mxu1  ;;  %v14899_v21 = vpop.f32.mrb[42].mxu0  ;;  %15199 = vmatpush3.bf16.msra.mxu0 %v17154_v49  ;;  %v17191_v49 = vld [vmem:[#allocation10 + $0xdb0] sm:$0xff]   ;;  %v17194_v6 = vld [vmem:[#allocation10 + $0xd38] sm:$0xff]  }
 0x7c5   : > { %v14920_v28 = vadd.f32 %v14919_v22, %v14918_v61  ;;  %v14921_v13 = vpop.f32.mrb[42].mxu1  ;;  %15221 = vmatpush3.bf16.msra.mxu1 %v17155_v10  ;;  %v14900_v1 = vpop.f32.mrb[43].mxu0  ;;  %15200 = vmatprep.subr.bf16.mxu0 %v17156_v59  ;;  %v17192_v10 = vld [vmem:[#allocation10 + $0xd78] sm:$0xff]   ;;  %v8248_v22 = vrot.slane %v18846_v55, 6  ;;  %v8250_v21 = vrot.slane %v18849_v7, 6 }
 0x7c6   : > { %v12276_v24 = vadd.f32 %v14898_v20, %v18903_v0  ;;  %v14922_v47 = vpop.f32.mrb[43].mxu1  ;;  %15222 = vmatprep.subr.bf16.mxu1 %v17157_v14  ;;  %v8249_v0 = vrot.slane %v18835_v36, 6  ;;  %v17176_v36 = vld [vmem:[#allocation10 + $0xd58] sm:$0xff]  }
 0x7c7   : > { %v17193_v14 = vld [vmem:[#allocation10 + $0xdf8] sm:$0xff]  }
 0x7c8   : > { %v18910_v30 = vadd.f32 %v14920_v28, %v12276_v24  ;;  %15201 = vmatpush3.bf16.msra.mxu0 %v17158_v27  ;;  %v17195_v20 = vld [vmem:[#allocation10 + $0xdb8] sm:$0xff]  }
 0x7c9   : > { %15223 = vmatpush3.bf16.msra.mxu1 %v17159_v60  ;;  %15202 = vmatprep.subr.bf16.mxu0 %v17160_v25 }
 0x7ca   : > { %15224 = vmatprep.subr.bf16.mxu1 %v17161_v33 }
 0x7cc   : > { %15203 = vmatpush3.bf16.msra.mxu0 %v17162_v62 }
 0x7cd   : > { %15225 = vmatpush3.bf16.msra.mxu1 %v17163_v23  ;;  %15232 = vmatprep.subr.bf16.mxu0 %v17164_v56 }
 0x7ce   : > { %15254 = vmatprep.subr.bf16.mxu1 %v17165_v4 }
 0x7cf   : > { %12834 = vmatmul.mubr.bf16.vlgmr.msra.gmra.mrb[68].mxu0 %v8240_v45 }
 0x7d0   : > { %12874 = vmatmul.mubr.bf16.vlgmr.msra.gmra.mrb[68].mxu1 %v8242_v48  ;;  %15233 = vmatpush3.bf16.msra.mxu0 %v17166_v31 }
 0x7d1   : > { %12913 = vmatprep.mubr.bf16.mxu0 %v8249_v0  ;;  %15255 = vmatpush3.bf16.msra.mxu1 %v17167_v11 }
 0x7d2   : > { %12953 = vmatprep.mubr.bf16.mxu1 %v8251_v54  ;;  %15234 = vmatprep.subr.bf16.mxu0 %v17168_v40 }
 0x7d3   : > { %15256 = vmatprep.subr.bf16.mxu1 %v17169_v57 }
 0x7d4   : > { %15235 = vmatpush3.bf16.msra.mxu0 %v17170_v17  ;;  %v17196_v17 = vld [vmem:[#allocation13] sm:$0xff]  }
 0x7d5   : > { %15257 = vmatpush3.bf16.msra.mxu1 %v17171_v32  ;;  %15236 = vmatprep.subr.bf16.mxu0 %v17172_v18  ;;  %v17529_v32 = vmov 0.0   ;;  %v17197_v18 = vld [vmem:[#allocation13 + $0x8] sm:$0xff]  }
 0x7d6   : > { %15258 = vmatprep.subr.bf16.mxu1 %v17173_v39  ;;  %v17198_v39 = vld [vmem:[#allocation13 + $0x10] sm:$0xff]  }
 0x7d8   : > { %15237 = vmatpush3.bf16.msra.mxu0 %v17174_v12  ;;  %v17199_v12 = vld [vmem:[#allocation13 + $0x18] sm:$0xff]  }
 0x7d9   : > { %15259 = vmatpush3.bf16.msra.mxu1 %v17175_v29  ;;  %15238 = vmatprep.subr.bf16.mxu0 %v17176_v36  ;;  %v17200_v29 = vld [vmem:[#allocation13 + $0x20] sm:$0xff]  }
 0x7da   : > { %15260 = vmatprep.subr.bf16.mxu1 %v17177_v26 }
 0x7dc   : > { %15239 = vmatpush3.bf16.msra.mxu0 %v17178_v42 }
 0x7dd   : > { %15261 = vmatpush3.bf16.msra.mxu1 %v17179_v37  ;;  %15240 = vmatprep.subr.bf16.mxu0 %v17180_v43 }
 0x7de   : > { %15262 = vmatprep.subr.bf16.mxu1 %v17181_v46 }
 0x7e0   : > { %15241 = vmatpush3.bf16.msra.mxu0 %v17182_v44 }
 0x7e1   : > { %15263 = vmatpush3.bf16.msra.mxu1 %v17183_v50  ;;  %15242 = vmatprep.subr.bf16.mxu0 %v17184_v51 }
 0x7e2   : > { %v14940_v2 = vpop.f32.mrb[44].mxu0  ;;  %15264 = vmatprep.subr.bf16.mxu1 %v17185_v41 }
 0x7e3   : > { %v14962_v52 = vpop.f32.mrb[44].mxu1  ;;  %v14941_v58 = vpop.f32.mrb[45].mxu0 }
 0x7e4   : > { %v14942_v34 = vadd.f32 %v14941_v58, %v14940_v2  ;;  %v14963_v3 = vpop.f32.mrb[45].mxu1  ;;  %v14943_v5 = vpop.f32.mrb[46].mxu0  ;;  %15243 = vmatpush3.bf16.msra.mxu0 %v17186_v15  ;;  %v17202_v2 = vld [vmem:[#allocation13 + $0x30] sm:$0xff]  }
 0x7e5   : > { %v14964_v8 = vadd.f32 %v14963_v3, %v14962_v52  ;;  %v14965_v53 = vpop.f32.mrb[46].mxu1  ;;  %15265 = vmatpush3.bf16.msra.mxu1 %v17187_v16  ;;  %v14944_v9 = vpop.f32.mrb[47].mxu0  ;;  %15244 = vmatprep.subr.bf16.mxu0 %v17188_v63  ;;  %v17201_v63 = vld [vmem:[#allocation13 + $0x28] sm:$0xff]  }
 0x7e6   : > { %v12356_v59 = vadd.f32 %v14942_v34, %v18910_v30  ;;  %v14966_v19 = vpop.f32.mrb[47].mxu1  ;;  %15266 = vmatprep.subr.bf16.mxu1 %v17189_v35  ;;  %v17203_v35 = vld [vmem:[#allocation13 + $0x38] sm:$0xff]  }
 0x7e8   : > { %v12396_v61 = vadd.f32 %v14964_v8, %v12356_v59  ;;  %15245 = vmatpush3.bf16.msra.mxu0 %v17190_v38 }
 0x7e9   : > { %15267 = vmatpush3.bf16.msra.mxu1 %v17191_v49  ;;  %15246 = vmatprep.subr.bf16.mxu0 %v17192_v10 }
 0x7ea   : > { %15268 = vmatprep.subr.bf16.mxu1 %v17193_v14 }
 0x7ec   : > { %15247 = vmatpush3.bf16.msra.mxu0 %v17194_v6 }
 0x7ed   : > { %15269 = vmatpush3.bf16.msra.mxu1 %v17195_v20  ;;  %15285 = vmatprep.subr.bf16.mxu0 %v17529_v32 }
 0x7ef   : > { %12914 = vmatmul.mubr.bf16.vlgmr.msra.gmra.mrb[72].mxu0 %v8248_v22 }
 0x7f0   : > { %12954 = vmatmul.mubr.bf16.vlgmr.msra.gmra.mrb[72].mxu1 %v8250_v21  ;;  %15286 = vmatpush3.bf16.msra.mxu0 %v17196_v17 }
 0x7f1   : > { %15287 = vmatprep.subr.bf16.mxu0 %v17529_v32  ;;  %15301 = vmatprep.mubr.msk.bf16.mxu0 %vm17530_vm0, %v17529_v32 }
 0x7f4   : > { %15288 = vmatpush3.bf16.msra.mxu0 %v17197_v18 }
 0x7f5   : > { %15289 = vmatprep.subr.bf16.mxu0 %v17529_v32 }
 0x7f8   : > { %15290 = vmatpush3.bf16.msra.mxu0 %v17198_v39 }
 0x7f9   : > { %15291 = vmatprep.subr.bf16.mxu0 %v17529_v32 }
 0x7fc   : > { %15292 = vmatpush3.bf16.msra.mxu0 %v17199_v12 }
 0x7fd   : > { %15293 = vmatprep.subr.bf16.mxu0 %v17529_v32 }
 0x800   : > { %15294 = vmatpush3.bf16.msra.mxu0 %v17200_v29 }
 0x801   : > { %15295 = vmatprep.subr.bf16.mxu0 %v17529_v32 }
 0x802   : > { %v14984_v27 = vpop.f32.mrb[48].mxu0 }
 0x803   : > { %v15006_v28 = vpop.f32.mrb[48].mxu1  ;;  %v14985_v13 = vpop.f32.mrb[49].mxu0 }
 0x804   : > { %v14986_v1 = vadd.f32 %v14985_v13, %v14984_v27  ;;  %v15007_v60 = vpop.f32.mrb[49].mxu1  ;;  %v14987_v25 = vpop.f32.mrb[50].mxu0  ;;  %15296 = vmatpush3.bf16.msra.mxu0 %v17201_v63 }
 0x805   : > { %v15008_v24 = vadd.f32 %v15007_v60, %v15006_v28  ;;  %v15009_v47 = vpop.f32.mrb[50].mxu1  ;;  %v14988_v33 = vpop.f32.mrb[51].mxu0  ;;  %15297 = vmatprep.subr.bf16.mxu0 %v17529_v32 }
 0x806   : > { %v12436_v30 = vadd.f32 %v14986_v1, %v12396_v61  ;;  %v15010_v62 = vpop.f32.mrb[51].mxu1 }
 0x808   : > { %v12476_v23 = vadd.f32 %v15008_v24, %v12436_v30  ;;  %15298 = vmatpush3.bf16.msra.mxu0 %v17202_v2 }
 0x809   : > { %15299 = vmatprep.subr.bf16.mxu0 %v17529_v32 }
 0x80c   : > { %15300 = vmatpush3.bf16.msra.mxu0 %v17203_v35 }
 0x822   : > { %v15028_v56 = vpop.f32.mrb[52].mxu0 }
 0x823   : > { %v15050_v4 = vpop.f32.mrb[52].mxu1  ;;  %v15029_v31 = vpop.f32.mrb[53].mxu0 }
 0x824   : > { %v15030_v55 = vadd.f32 %v15029_v31, %v15028_v56  ;;  %v15051_v45 = vpop.f32.mrb[53].mxu1  ;;  %v15031_v7 = vpop.f32.mrb[54].mxu0 }
 0x825   : > { %v15052_v11 = vadd.f32 %v15051_v45, %v15050_v4  ;;  %v15053_v48 = vpop.f32.mrb[54].mxu1  ;;  %v15032_v40 = vpop.f32.mrb[55].mxu0 }
 0x826   : > { %v12516_v0 = vadd.f32 %v15030_v55, %v12476_v23  ;;  %v15054_v57 = vpop.f32.mrb[55].mxu1 }
 0x828   : > { %v12556_v54 = vadd.f32 %v15052_v11, %v12516_v0 }
 0x842   : > { %v15072_v36 = vpop.f32.mrb[56].mxu0 }
 0x843   : > { %v15094_v26 = vpop.f32.mrb[56].mxu1  ;;  %v15073_v42 = vpop.f32.mrb[57].mxu0 }
 0x844   : > { %v15074_v37 = vadd.f32 %v15073_v42, %v15072_v36  ;;  %v15095_v43 = vpop.f32.mrb[57].mxu1  ;;  %v15075_v46 = vpop.f32.mrb[58].mxu0 }
 0x845   : > { %v15096_v44 = vadd.f32 %v15095_v43, %v15094_v26  ;;  %v15097_v50 = vpop.f32.mrb[58].mxu1  ;;  %v15076_v51 = vpop.f32.mrb[59].mxu0  ;;  %v12979_v26 = vld [vmem:[#allocation14] sm:$0x1] }
 0x846   : > { %v12596_v41 = vadd.f32 %v15074_v37, %v12556_v54  ;;  %v15098_v15 = vpop.f32.mrb[59].mxu1 }
 0x848   : > { %v12636_v16 = vadd.f32 %v15096_v44, %v12596_v41 }
 0x862   : > { %v15116_v52 = vpop.f32.mrb[60].mxu0 }
 0x863   : > { %v15138_v58 = vpop.f32.mrb[60].mxu1  ;;  %v15117_v34 = vpop.f32.mrb[61].mxu0 }
 0x864   : > { %v15118_v3 = vadd.f32 %v15117_v34, %v15116_v52  ;;  %v15139_v5 = vpop.f32.mrb[61].mxu1  ;;  %v15119_v38 = vpop.f32.mrb[62].mxu0 }
 0x865   : > { %v15140_v8 = vadd.f32 %v15139_v5, %v15138_v58  ;;  %v15141_v53 = vpop.f32.mrb[62].mxu1  ;;  %v15120_v9 = vpop.f32.mrb[63].mxu0 }
 0x866   : > { %v12676_v49 = vadd.f32 %v15118_v3, %v12636_v16  ;;  %v15142_v10 = vpop.f32.mrb[63].mxu1 }
 0x868   : > { %v12716_v59 = vadd.f32 %v15140_v8, %v12676_v49 }
 0x882   : > { %v15160_v19 = vpop.f32.mrb[64].mxu0 }
 0x883   : > { %v15182_v14 = vpop.f32.mrb[64].mxu1  ;;  %v15161_v61 = vpop.f32.mrb[65].mxu0 }
 0x884   : > { %v15162_v6 = vadd.f32 %v15161_v61, %v15160_v19  ;;  %v15183_v20 = vpop.f32.mrb[65].mxu1  ;;  %v15163_v22 = vpop.f32.mrb[66].mxu0 }
 0x885   : > { %v15184_v21 = vadd.f32 %v15183_v20, %v15182_v14  ;;  %v15185_v27 = vpop.f32.mrb[66].mxu1  ;;  %v15164_v28 = vpop.f32.mrb[67].mxu0 }
 0x886   : > { %v12756_v13 = vadd.f32 %v15162_v6, %v12716_v59  ;;  %v15186_v1 = vpop.f32.mrb[67].mxu1 }
 0x888   : > { %v12796_v60 = vadd.f32 %v15184_v21, %v12756_v13 }
 0x8a2   : > { %v15204_v25 = vpop.f32.mrb[68].mxu0 }
 0x8a3   : > { %v15226_v24 = vpop.f32.mrb[68].mxu1  ;;  %v15205_v47 = vpop.f32.mrb[69].mxu0 }
 0x8a4   : > { %v15206_v33 = vadd.f32 %v15205_v47, %v15204_v25  ;;  %v15227_v30 = vpop.f32.mrb[69].mxu1  ;;  %v15207_v62 = vpop.f32.mrb[70].mxu0 }
 0x8a5   : > { %v15228_v23 = vadd.f32 %v15227_v30, %v15226_v24  ;;  %v15229_v56 = vpop.f32.mrb[70].mxu1  ;;  %v15208_v4 = vpop.f32.mrb[71].mxu0 }
 0x8a6   : > { %v12836_v31 = vadd.f32 %v15206_v33, %v12796_v60  ;;  %v15230_v55 = vpop.f32.mrb[71].mxu1 }
 0x8a8   : > { %v12876_v45 = vadd.f32 %v15228_v23, %v12836_v31 }
 0x8c2   : > { %v15248_v7 = vpop.f32.mrb[72].mxu0 }
 0x8c3   : > { %v15270_v11 = vpop.f32.mrb[72].mxu1  ;;  %v15249_v48 = vpop.f32.mrb[73].mxu0 }
 0x8c4   : > { %v15250_v40 = vadd.f32 %v15249_v48, %v15248_v7  ;;  %v15271_v0 = vpop.f32.mrb[73].mxu1  ;;  %v15251_v57 = vpop.f32.mrb[74].mxu0 }
 0x8c5   : > { %v15272_v54 = vadd.f32 %v15271_v0, %v15270_v11  ;;  %v15273_v17 = vpop.f32.mrb[74].mxu1  ;;  %v15252_v32 = vpop.f32.mrb[75].mxu0 }
 0x8c6   : > { %v12916_v18 = vadd.f32 %v15250_v40, %v12876_v45  ;;  %v15274_v39 = vpop.f32.mrb[75].mxu1 }
 0x8c8   : > { %v12956_v12 = vadd.f32 %v15272_v54, %v12916_v18 }
 0x8ca   : > { %v12961_v29 = vmax.f32 %v12956_v12, 0.0 }
 0x8cc   : > { %v12962_v36 = vpack.c.bf16 %v12961_v29, %v12961_v29 }
 0x8ce   : > { %15302 = vmatmul.mubr.bf16.vlgmr.msra.gmra.mrb[76].mxu0 %v12962_v36 }
 0x9a1   : > { %v13062_v42 = vpop.f32.mrb[76].mxu0 }
 0x9a2   : > { %v13063_v37 = vadd.f32 %v13062_v42, %v12979_v26  ;;  %v15303_v43 = vpop.f32.mrb[77].mxu0 }
 0x9a3   : > { %v13065_v46 = vpop.f32.mrb[78].mxu0 }
 0x9a4   : > { %13068 = vst [vmem:[%s433_s23] sm:$0x1] %v13063_v37  ;;  %v15304_v44 = vpop.f32.mrb[79].mxu0 }
 0x9a5   : > { %17443 = shalt.err (!%p17440_p9)
}
 0x9a6   : > { %s17444_s4 = scalar_lea.hbm %s18924_s2, 16  ;;  %s17448_s24 = scalar_lea.hbm %s18975_s9, 32 }
 0x9a7   : > { %p17445_p12 = scmp.ne.s32.totalorder %s18924_s2, %s17444_s4  ;;  %p17449_p3 = scmp.lt.u32.totalorder %s18924_s2, %s18975_s9 }
 0x9a8   : > { %p17450_p4 = scmp.lt.u32.totalorder %s17448_s24, %s17444_s4  ;;  %p17452_p8 = scmp.lt.u32.totalorder %s17444_s4, %s18924_s2 }
 0x9a9   : > { %p17446_p10 = pnand %p17445_p12, %p19419_p11 }
 0x9aa   : > { %p17451_p7 = por %p17450_p4, %p17449_p3 }
 0x9ab   : > { %p17447_p2 = pneg %p17446_p10 }
 0x9ac   : > { %p17453_p13 = por %p17452_p8, %p17451_p7 }
 0x9ae   : > { %p17454_p0 = pnand %p17453_p13, %p17447_p2 }
 0x9b0   : > { %17457 = shalt.err (!%p17454_p0)
}
 0x9b1   : > { %15497 = dma.vmem_to_hbm [thread:$0]  (%p19419_p11), %s18926_s28, 16, %s18924_s2, %s13070_s18  }
 0x9b2 PF: > { %p15544_p1 = scmp.ge.s32.totalorder %s17512_s12, 2  ;;  %s13094_s27 = sand.u32 1, %s17500_s30  }
 0x9b3   : > { %p19420_p6 = scmp.ne.s32.totalorder %s19127_s20, 0  ;;  %s13095_s25 = scalar_lea.sflag [#allocation4], %s13094_s27 }
 0x9b5   : > { %p15525_p5 = pnand %p15544_p1, %p19420_p6 }
 0x9b7   : > { %17495 = dma.done.wait (!%p15525_p5), %s13095_s25, 16  }
 0x9b8   : > { %17497 = vsyncadd (!%p15525_p5), %s13095_s25, 4294967280  ;;  %s19421_s12 = sld [smem:[#allocation24_spill]]  ;;  %s19422_s23 = sld [smem:[#allocation23_spill]] }
 0x9b9   : > { %s19423_s11 = sld [smem:[#allocation25_spill]]  ;;  %s19424_s30 = smov %s17504_s10 }
 0x9be   : > { %p24_p9 = scmp.ge.s32.totalorder %s19421_s12, 4   ;;  %s19425_s10 = smov %s19422_s23 }
 0x9c0   :  { %26 = sbr.rel (!%p24_p9) target bundleno = 11 (0xb), region = 124 }
 0x9c7   :  { %13099 = vsyncpa [#allocation3], 1 }
 0x9c8   :  { %13101 = vsyncpa [#allocation3 + $0x1], 1 }
 0x9c9   :  { %13102 = vsyncpa [#allocation6], 1 }
 0x9ca   :  { %13103 = vsyncpa [#allocation9], 1 }
 0x9cb   :  { %13104 = vsyncpa [#allocation12], 1 }
 0x9cc   :  { %13105 = vsyncpa [#allocation15], 1 }
 0x9cd   :  { %13106 = vsyncpa [#allocation4], 1 }
 0x9ce   :  { %13108 = vsyncpa [#allocation4 + $0x1], 1 }

</bundles_post_ra>
